<compile_context>
chip_gen: v7x
topology: tpu7x:2x2x1
jax: 0.10.0
libtpu: 0.0.40
codegen_flags: <defaults>
</compile_context>

<pallas_src>
import functools

import jax
import jax.numpy as jnp
from jax import lax
from jax.experimental import pallas as pl
from jax.experimental.pallas import tpu as pltpu


# ----------------------------------------------------------------------------
# Helpers
# ----------------------------------------------------------------------------
def _round_up(v, m):
    return (v + m - 1) // m * m


def _vmem_limit_bytes():
    """Per-generation scoped-VMEM budget (v5e/v6e: up to 100 MiB, v7x: ~48 MiB)."""
    try:
        cap = int(pltpu.get_tpu_info().vmem_capacity_bytes)
        return int(min(cap * 3 // 4, 100 * 1024 * 1024))
    except Exception:
        return 48 * 1024 * 1024


_VMEM_LIMIT_BYTES = _vmem_limit_bytes()


# ----------------------------------------------------------------------------
# Pallas kernels
# ----------------------------------------------------------------------------
def _conv_tap_kernel(*refs, kk, toh, wo_pad, slope, has_bias):
    """KxK stride-1 conv on an NHWC row tile as a sum of KxK tap matmuls.

    refs:
      x_ref   : (1, TOH, We, Ce)       main input row block
      h_ref   : (1, 8,   We, Ce)       halo block (next 8 input rows)
      w_ref   : (KK*KK, Ce, Cout)      full weight, VMEM-resident
      b_ref   : (1, Cout) f32          optional bias
      o_ref   : (1, TOH, Wo_pad, Cout) output row block
      rows_ref: (TOH+KK-1, We, Ce)     VMEM scratch (main rows + halo rows)
    """
    if has_bias:
        x_ref, h_ref, w_ref, b_ref, o_ref, rows_ref = refs
    else:
        x_ref, h_ref, w_ref, o_ref, rows_ref = refs
        b_ref = None

    ce = rows_ref.shape[-1]
    cout = o_ref.shape[-1]

    # Assemble the TOH + KK - 1 input rows needed by this output row tile.
    rows_ref[0:toh] = x_ref[0]
    rows_ref[toh:toh + kk - 1] = h_ref[0, 0:kk - 1]

    acc = jnp.zeros((toh * wo_pad, cout), jnp.float32)
    for a in range(kk):          # unrolled: KK*KK MXU matmuls, f32 accumulation
        for b in range(kk):
            win = rows_ref[a:a + toh, b:b + wo_pad, :]      # (TOH, Wo_pad, Ce)
            acc = acc + jnp.dot(win.reshape(toh * wo_pad, ce),
                                w_ref[a * kk + b],
                                preferred_element_type=jnp.float32)

    if b_ref is not None:
        acc = acc + b_ref[...]                              # f32 epilogue
    if slope is not None:
        acc = jnp.where(acc >= 0, acc, slope * acc)         # LeakyReLU
    o_ref[...] = acc.reshape(1, toh, wo_pad, cout).astype(o_ref.dtype)


def _instnorm_lrelu_kernel(x_ref, o_ref, *, eps, slope):
    """InstanceNorm2d(affine=False) + LeakyReLU on a (1, H*W, Ct) block.
    Statistics are exact (full spatial extent in-block) and kept in f32."""
    x = x_ref[...].astype(jnp.float32)
    mean = jnp.mean(x, axis=1, keepdims=True)
    xc = x - mean
    var = jnp.mean(xc * xc, axis=1, keepdims=True)
    y = xc * lax.rsqrt(var + eps)
    o_ref[...] = jnp.where(y >= 0, y, slope * y).astype(o_ref.dtype)


# ----------------------------------------------------------------------------
# Wrappers
# ----------------------------------------------------------------------------
def conv2d_pallas(x, w_hwio, b, *, stride, slope, has_bias, compute_dtype):
    """Conv2d(kernel=4, stride in {1,2}, padding=1) on NHWC input.

    Stride-2 is rewritten as a 2x2 stride-1 conv on a space-to-depth input,
    so the Pallas kernel only ever does unit-stride shifted-window matmuls.
    """
    n, h, w, cin = x.shape
    cout = w_hwio.shape[-1]
    xp = jnp.pad(x, ((0, 0), (1, 1), (1, 1), (0, 0)))

    if stride == 2:
        assert h % 2 == 0 and w % 2 == 0, "stride-2 conv expects even H, W"
        hp, wp = h + 2, w + 2
        # space-to-depth by 2: 4x4/s2 conv == 2x2/s1 conv over 4*Cin channels.
        xe = xp.reshape(n, hp // 2, 2, wp // 2, 2, cin)
        xe = xe.transpose(0, 1, 3, 2, 4, 5).reshape(n, hp // 2, wp // 2, 4 * cin)
        wt = w_hwio.reshape(2, 2, 2, 2, cin, cout)          # (a, p, b, q, ci, co)
        wt = wt.transpose(0, 2, 1, 3, 4, 5).reshape(4, 4 * cin, cout)
        kk, ce = 2, 4 * cin
        ho, wo = h // 2, w // 2
    else:
        xe = xp
        wt = w_hwio.reshape(16, cin, cout)                  # tap index = kh*4+kw
        kk, ce = 4, cin
        ho, wo = h - 1, w - 1

    # Width padded so in-kernel (TOH, Wo_pad) folds are layout-trivial and
    # stores are better aligned; extra columns are zero and sliced off.
    wo_pad = _round_up(wo, 16)
    we_pad = wo_pad + kk - 1

    # Row-tile size: multiple of 8, ~1 MiB main block, capped at 256 rows.
    row_bytes = we_pad * ce * jnp.dtype(compute_dtype).itemsize
    rows_fit = max(8, ((1 << 20) // max(row_bytes, 1)) // 8 * 8)
    toh = min(_round_up(ho, 8), rows_fit, 256)
    nblk = pl.cdiv(ho, toh)
    ho_pad = nblk * toh
    he_pad = ho_pad + 8                                     # main tiles + halo block

    he_cur, we_cur = xe.shape[1], xe.shape[2]
    xe = jnp.pad(xe, ((0, 0), (0, he_pad - he_cur), (0, we_pad - we_cur), (0, 0)))
    xe = xe.astype(compute_dtype)
    wt = wt.astype(compute_dtype)

    kernel = functools.partial(_conv_tap_kernel, kk=kk, toh=toh, wo_pad=wo_pad,
                               slope=slope, has_bias=has_bias)
    in_specs = [
        # main row block
        pl.BlockSpec((1, toh, we_pad, ce), lambda i, j: (i, j, 0, 0)),
        # 8-row halo block just below the main block (TOH is a multiple of 8)
        pl.BlockSpec((1, 8, we_pad, ce),
                     lambda i, j, _s=toh // 8: (i, (j + 1) * _s, 0, 0)),
        # full weight, constant index map -> stays resident (weight-stationary)
        pl.BlockSpec((kk * kk, ce, cout), lambda i, j: (0, 0, 0)),
    ]
    operands = [xe, xe, wt]
    if has_bias:
        in_specs.append(pl.BlockSpec((1, cout), lambda i, j: (0, 0)))
        operands.append(b.reshape(1, cout).astype(jnp.float32))

    out = pl.pallas_call(
        kernel,
        grid=(n, nblk),
        in_specs=in_specs,
        out_specs=pl.BlockSpec((1, toh, wo_pad, cout), lambda i, j: (i, j, 0, 0)),
        out_shape=jax.ShapeDtypeStruct((n, ho_pad, wo_pad, cout), compute_dtype),
        scratch_shapes=[pltpu.VMEM((toh + kk - 1, we_pad, ce), compute_dtype)],
        compiler_params=pltpu.CompilerParams(
            dimension_semantics=("parallel", "parallel"),
            vmem_limit_bytes=_VMEM_LIMIT_BYTES),
    )(*operands)
    return out[:, :ho, :wo, :]


def instance_norm_lrelu_pallas(x, *, eps=1e-5, slope=0.2):
    n, h, w, c = x.shape
    ct = 128 if c % 128 == 0 else c                         # lane-sized channel tiles
    xf = x.reshape(n, h * w, c)
    out = pl.pallas_call(
        functools.partial(_instnorm_lrelu_kernel, eps=eps, slope=slope),
        grid=(n, c // ct),
        in_specs=[pl.BlockSpec((1, h * w, ct), lambda i, j: (i, 0, j))],
        out_specs=pl.BlockSpec((1, h * w, ct), lambda i, j: (i, 0, j)),
        out_shape=jax.ShapeDtypeStruct((n, h * w, c), x.dtype),
        compiler_params=pltpu.CompilerParams(
            dimension_semantics=("parallel", "parallel"),
            vmem_limit_bytes=_VMEM_LIMIT_BYTES),
    )(xf)
    return out.reshape(n, h, w, c)


# ----------------------------------------------------------------------------
# Model
# ----------------------------------------------------------------------------
def init_params(key, input_nc=3, ndf=64, n_layers=3):
    """Deterministic synthetic weights in HWIO layout (== PyTorch OIHW permuted)."""
    kw = 4
    chans = [input_nc, ndf]
    for m in range(1, n_layers):
        chans.append(ndf * min(2 ** m, 8))
    chans.append(ndf * min(2 ** n_layers, 8))
    chans.append(1)
    params = []
    for cin, cout in zip(chans[:-1], chans[1:]):
        key, k_w, k_b = jax.random.split(key, 3)
        w = 0.02 * jax.random.normal(k_w, (kw, kw, cin, cout), jnp.float32)
        b = 0.01 * jax.random.normal(k_b, (cout,), jnp.float32)
        params.append({"w": w, "b": b})
    return params


def nlayer_discriminator(x_nchw, params, n_layers=3, matmul_dtype=jnp.bfloat16):
    """NCHW in / NCHW out; NHWC + `matmul_dtype` internally, f32 epilogues."""
    x = jnp.transpose(x_nchw, (0, 2, 3, 1)).astype(matmul_dtype)
    # layer 0: conv s2 + bias + LeakyReLU (fused into the conv kernel)
    x = conv2d_pallas(x, params[0]["w"], params[0]["b"], stride=2, slope=0.2,
                      has_bias=True, compute_dtype=matmul_dtype)
    # layers 1..n_layers-1: conv s2 (bias dropped: cancelled by InstanceNorm) + IN + LReLU
    for m in range(1, n_layers):
        x = conv2d_pallas(x, params[m]["w"], None, stride=2, slope=None,
                          has_bias=False, compute_dtype=matmul_dtype)
        x = instance_norm_lrelu_pallas(x)
    # layer n_layers: conv s1 + InstanceNorm + LeakyReLU
    x = conv2d_pallas(x, params[n_layers]["w"], None, stride=1, slope=None,
                      has_bias=False, compute_dtype=matmul_dtype)
    x = instance_norm_lrelu_pallas(x)
    # final conv s1 -> 1 channel; pad Cout to 128 for a lane-dense store.
    w_last, b_last = params[n_layers + 1]["w"], params[n_layers + 1]["b"]
    c_last = w_last.shape[-1]
    cpad = _round_up(c_last, 128) - c_last
    w_last = jnp.pad(w_last, ((0, 0), (0, 0), (0, 0), (0, cpad)))
    b_last = jnp.pad(b_last, (0, cpad))
    x = conv2d_pallas(x, w_last, b_last, stride=1, slope=None,
                      has_bias=True, compute_dtype=matmul_dtype)
    x = x[..., :c_last]
    return jnp.transpose(x, (0, 3, 1, 2)).astype(jnp.float32)


# ----------------------------------------------------------------------------
# Pure-JAX reference (mirrors the PyTorch module, f32)
# ----------------------------------------------------------------------------
def _ref_conv(x, w_hwio, b, stride):
    y = lax.conv_general_dilated(
        x, w_hwio, window_strides=(stride, stride), padding=((1, 1), (1, 1)),
        dimension_numbers=("NHWC", "HWIO", "NHWC"))
    return y + b


def _ref_inorm_lrelu(x, eps=1e-5, slope=0.2):
    mean = jnp.mean(x, axis=(1, 2), keepdims=True)
    var = jnp.mean((x - mean) ** 2, axis=(1, 2), keepdims=True)
    y = (x - mean) / jnp.sqrt(var + eps)
    return jnp.where(y >= 0, y, slope * y)


def nlayer_discriminator_ref(x_nchw, params, n_layers=3):
    x = jnp.transpose(x_nchw, (0, 2, 3, 1)).astype(jnp.float32)
    x = _ref_conv(x, params[0]["w"], params[0]["b"], 2)
    x = jnp.where(x >= 0, x, 0.2 * x)
    for m in range(1, n_layers):
        x = _ref_conv(x, params[m]["w"], params[m]["b"], 2)
        x = _ref_inorm_lrelu(x)
    x = _ref_conv(x, params[n_layers]["w"], params[n_layers]["b"], 1)
    x = _ref_inorm_lrelu(x)
    x = _ref_conv(x, params[n_layers + 1]["w"], params[n_layers + 1]["b"], 1)
    return jnp.transpose(x, (0, 3, 1, 2))


# ----------------------------------------------------------------------------
if __name__ == "__main__":
    key = jax.random.PRNGKey(0)
    k_x, k_p = jax.random.split(key)

    # Small-but-valid shapes: batch=2, input_nc=3, 32x32 spatial, ndf=16.
    N, INPUT_NC, H, W = 2, 3, 32, 32
    NDF, N_LAYERS = 16, 3

    x = jax.random.normal(k_x, (N, INPUT_NC, H, W), jnp.float32)
    params = init_params(k_p, input_nc=INPUT_NC, ndf=NDF, n_layers=N_LAYERS)

    ref = jax.block_until_ready(nlayer_discriminator_ref(x, params, n_layers=N_LAYERS))

    # float32 matmul path: tight check against the XLA conv reference.
    fwd_f32 = jax.jit(functools.partial(nlayer_discriminator, n_layers=N_LAYERS,
                                        matmul_dtype=jnp.float32))
    out_f32 = jax.block_until_ready(fwd_f32(x, params))
    assert out_f32.shape == ref.shape, (out_f32.shape, ref.shape)
    err32 = float(jnp.max(jnp.abs(out_f32 - ref)))
    assert jnp.allclose(out_f32, ref, rtol=1e-3, atol=1e-3), err32

    # bfloat16 matmul path (default, MXU-native): looser tolerance for bf16
    # operand rounding; accumulation and epilogues remain f32.
    fwd_bf16 = jax.jit(functools.partial(nlayer_discriminator, n_layers=N_LAYERS,
                                         matmul_dtype=jnp.bfloat16))
    out_bf16 = jax.block_until_ready(fwd_bf16(x, params))
    err16 = float(jnp.max(jnp.abs(out_bf16 - ref)))
    assert err16 < 1e-1, err16

    print("KERNEL_OK")
</pallas_src>

<mosaic_0001>
module attributes {stable_mosaic.version = 11 : i64} {
  func.func @_conv_tap_kernel(%arg0: i32, %arg1: i32, %arg2: memref<1x16x17x12xf32, #tpu.memory_space<vmem>>, %arg3: memref<1x8x17x12xf32, #tpu.memory_space<vmem>>, %arg4: memref<4x12x16xf32, #tpu.memory_space<vmem>>, %arg5: memref<1x16xf32, #tpu.memory_space<vmem>>, %arg6: memref<1x16x16x16xf32, #tpu.memory_space<vmem>>, %arg7: memref<17x17x12xf32, #tpu.memory_space<vmem>>) attributes {dimension_semantics = [#tpu.dimension_semantics<parallel>, #tpu.dimension_semantics<parallel>], iteration_bounds = array<i64: 2, 1>, scalar_prefetch = 0 : i64, scratch_operands = 1 : i64, tpu.core_type = #tpu.core_type<tc>, window_params = [{transform_indices = @transform_0, window_bounds = array<i64: 1, 16, 17, 12>}, {transform_indices = @transform_1, window_bounds = array<i64: 1, 8, 17, 12>}, {pipeline_mode = #tpu.pipeline_mode<synchronous>, transform_indices = @transform_2, window_bounds = array<i64: 4, 12, 16>}, {pipeline_mode = #tpu.pipeline_mode<synchronous>, transform_indices = @transform_3, window_bounds = array<i64: 1, 16>}, {transform_indices = @transform_4, window_bounds = array<i64: 1, 16, 16, 16>}]} {
    %c0 = arith.constant 0 : index
    %c0_0 = arith.constant 0 : index
    %c0_1 = arith.constant 0 : index
    %c0_2 = arith.constant 0 : index
    %0 = vector.load %arg2[%c0, %c0_0, %c0_1, %c0_2] : memref<1x16x17x12xf32, #tpu.memory_space<vmem>>, vector<1x16x17x12xf32>
    %1 = vector.shape_cast %0 : vector<1x16x17x12xf32> to vector<16x17x12xf32>
    %c0_3 = arith.constant 0 : index
    %c0_4 = arith.constant 0 : index
    %c0_5 = arith.constant 0 : index
    %2 = vector.load %arg7[%c0_3, %c0_4, %c0_5] : memref<17x17x12xf32, #tpu.memory_space<vmem>>, vector<16x17x12xf32>
    tpu.vector_store %arg7[%c0_3, %c0_4, %c0_5], %1 {strides = array<i32>} : memref<17x17x12xf32, #tpu.memory_space<vmem>>, vector<16x17x12xf32>,
    %c0_6 = arith.constant 0 : index
    %c0_7 = arith.constant 0 : index
    %c0_8 = arith.constant 0 : index
    %c0_9 = arith.constant 0 : index
    %3 = vector.load %arg3[%c0_6, %c0_7, %c0_8, %c0_9] : memref<1x8x17x12xf32, #tpu.memory_space<vmem>>, vector<1x1x17x12xf32>
    %4 = vector.shape_cast %3 : vector<1x1x17x12xf32> to vector<1x17x12xf32>
    %c16 = arith.constant 16 : index
    %c0_10 = arith.constant 0 : index
    %c0_11 = arith.constant 0 : index
    %5 = vector.load %arg7[%c16, %c0_10, %c0_11] : memref<17x17x12xf32, #tpu.memory_space<vmem>>, vector<1x17x12xf32>
    tpu.vector_store %arg7[%c16, %c0_10, %c0_11], %4 {strides = array<i32>} : memref<17x17x12xf32, #tpu.memory_space<vmem>>, vector<1x17x12xf32>,
    %cst = arith.constant 0.000000e+00 : f32
    %6 = vector.broadcast %cst : f32 to vector<256x16xf32>
    %c0_12 = arith.constant 0 : index
    %c0_13 = arith.constant 0 : index
    %c0_14 = arith.constant 0 : index
    %7 = vector.load %arg7[%c0_12, %c0_13, %c0_14] : memref<17x17x12xf32, #tpu.memory_space<vmem>>, vector<16x16x12xf32>
    %8 = vector.shape_cast %7 : vector<16x16x12xf32> to vector<256x12xf32>
    %c0_15 = arith.constant 0 : index
    %c0_16 = arith.constant 0 : index
    %c0_17 = arith.constant 0 : index
    %9 = vector.load %arg4[%c0_15, %c0_16, %c0_17] : memref<4x12x16xf32, #tpu.memory_space<vmem>>, vector<1x12x16xf32>
    %10 = vector.shape_cast %9 : vector<1x12x16xf32> to vector<12x16xf32>
    %cst_18 = arith.constant dense<0.000000e+00> : vector<256x16xf32>
    %11 = tpu.matmul %8, %10, %cst_18 {dimension_numbers = #tpu.dot_dimension_numbers<[1], [0], [0], [1], [0, 0, 1, 1], [], []>} : vector<256x12xf32>, vector<12x16xf32>, vector<256x16xf32> -> vector<256x16xf32>
    %12 = arith.addf %6, %11 : vector<256x16xf32>
    %c0_19 = arith.constant 0 : index
    %c1 = arith.constant 1 : index
    %c0_20 = arith.constant 0 : index
    %13 = vector.load %arg7[%c0_19, %c1, %c0_20] : memref<17x17x12xf32, #tpu.memory_space<vmem>>, vector<16x16x12xf32>
    %14 = vector.shape_cast %13 : vector<16x16x12xf32> to vector<256x12xf32>
    %c1_21 = arith.constant 1 : index
    %c0_22 = arith.constant 0 : index
    %c0_23 = arith.constant 0 : index
    %15 = vector.load %arg4[%c1_21, %c0_22, %c0_23] : memref<4x12x16xf32, #tpu.memory_space<vmem>>, vector<1x12x16xf32>
    %16 = vector.shape_cast %15 : vector<1x12x16xf32> to vector<12x16xf32>
    %cst_24 = arith.constant dense<0.000000e+00> : vector<256x16xf32>
    %17 = tpu.matmul %14, %16, %cst_24 {dimension_numbers = #tpu.dot_dimension_numbers<[1], [0], [0], [1], [0, 0, 1, 1], [], []>} : vector<256x12xf32>, vector<12x16xf32>, vector<256x16xf32> -> vector<256x16xf32>
    %18 = arith.addf %12, %17 : vector<256x16xf32>
    %c1_25 = arith.constant 1 : index
    %c0_26 = arith.constant 0 : index
    %c0_27 = arith.constant 0 : index
    %19 = vector.load %arg7[%c1_25, %c0_26, %c0_27] : memref<17x17x12xf32, #tpu.memory_space<vmem>>, vector<16x16x12xf32>
    %20 = vector.shape_cast %19 : vector<16x16x12xf32> to vector<256x12xf32>
    %c2 = arith.constant 2 : index
    %c0_28 = arith.constant 0 : index
    %c0_29 = arith.constant 0 : index
    %21 = vector.load %arg4[%c2, %c0_28, %c0_29] : memref<4x12x16xf32, #tpu.memory_space<vmem>>, vector<1x12x16xf32>
    %22 = vector.shape_cast %21 : vector<1x12x16xf32> to vector<12x16xf32>
    %cst_30 = arith.constant dense<0.000000e+00> : vector<256x16xf32>
    %23 = tpu.matmul %20, %22, %cst_30 {dimension_numbers = #tpu.dot_dimension_numbers<[1], [0], [0], [1], [0, 0, 1, 1], [], []>} : vector<256x12xf32>, vector<12x16xf32>, vector<256x16xf32> -> vector<256x16xf32>
    %24 = arith.addf %18, %23 : vector<256x16xf32>
    %c1_31 = arith.constant 1 : index
    %c1_32 = arith.constant 1 : index
    %c0_33 = arith.constant 0 : index
    %25 = vector.load %arg7[%c1_31, %c1_32, %c0_33] : memref<17x17x12xf32, #tpu.memory_space<vmem>>, vector<16x16x12xf32>
    %26 = vector.shape_cast %25 : vector<16x16x12xf32> to vector<256x12xf32>
    %c3 = arith.constant 3 : index
    %c0_34 = arith.constant 0 : index
    %c0_35 = arith.constant 0 : index
    %27 = vector.load %arg4[%c3, %c0_34, %c0_35] : memref<4x12x16xf32, #tpu.memory_space<vmem>>, vector<1x12x16xf32>
    %28 = vector.shape_cast %27 : vector<1x12x16xf32> to vector<12x16xf32>
    %cst_36 = arith.constant dense<0.000000e+00> : vector<256x16xf32>
    %29 = tpu.matmul %26, %28, %cst_36 {dimension_numbers = #tpu.dot_dimension_numbers<[1], [0], [0], [1], [0, 0, 1, 1], [], []>} : vector<256x12xf32>, vector<12x16xf32>, vector<256x16xf32> -> vector<256x16xf32>
    %30 = arith.addf %24, %29 : vector<256x16xf32>
    %c0_37 = arith.constant 0 : index
    %c0_38 = arith.constant 0 : index
    %31 = vector.load %arg5[%c0_37, %c0_38] : memref<1x16xf32, #tpu.memory_space<vmem>>, vector<1x16xf32>
    %32 = vector.broadcast %31 : vector<1x16xf32> to vector<256x16xf32>
    %33 = arith.addf %30, %32 : vector<256x16xf32>
    %cst_39 = arith.constant 0.000000e+00 : f32
    %34 = vector.broadcast %cst_39 : f32 to vector<256x16xf32>
    %35 = arith.cmpf oge, %33, %34 : vector<256x16xf32>
    %cst_40 = arith.constant 2.000000e-01 : f32
    %36 = vector.broadcast %cst_40 : f32 to vector<256x16xf32>
    %37 = arith.mulf %36, %33 : vector<256x16xf32>
    %38 = arith.select %35, %33, %37 : vector<256x16xi1>, vector<256x16xf32>
    %39 = vector.shape_cast %38 : vector<256x16xf32> to vector<1x16x16x16xf32>
    %c0_41 = arith.constant 0 : index
    %c0_42 = arith.constant 0 : index
    %c0_43 = arith.constant 0 : index
    %c0_44 = arith.constant 0 : index
    %40 = vector.load %arg6[%c0_41, %c0_42, %c0_43, %c0_44] : memref<1x16x16x16xf32, #tpu.memory_space<vmem>>, vector<1x16x16x16xf32>
    tpu.vector_store %arg6[%c0_41, %c0_42, %c0_43, %c0_44], %39 {strides = array<i32>} : memref<1x16x16x16xf32, #tpu.memory_space<vmem>>, vector<1x16x16x16xf32>,
    return
  }
  func.func @transform_0(%arg0: i32, %arg1: i32) -> (i32, i32, i32, i32) {
    %c0_i32 = arith.constant 0 : i32
    %c0_i32_0 = arith.constant 0 : i32
    %c0_i32_1 = arith.constant 0 : i32
    return %arg0, %arg1, %c0_i32, %c0_i32_0 : i32, i32, i32, i32
  }
  func.func @transform_1(%arg0: i32, %arg1: i32) -> (i32, i32, i32, i32) {
    %c1_i32 = arith.constant 1 : i32
    %0 = arith.addi %arg1, %c1_i32 : i32
    %c2_i32 = arith.constant 2 : i32
    %1 = arith.muli %0, %c2_i32 : i32
    %c0_i32 = arith.constant 0 : i32
    %c0_i32_0 = arith.constant 0 : i32
    %c0_i32_1 = arith.constant 0 : i32
    return %arg0, %1, %c0_i32, %c0_i32_0 : i32, i32, i32, i32
  }
  func.func @transform_2(%arg0: i32, %arg1: i32) -> (i32, i32, i32) {
    %c0_i32 = arith.constant 0 : i32
    %c0_i32_0 = arith.constant 0 : i32
    %c0_i32_1 = arith.constant 0 : i32
    %c0_i32_2 = arith.constant 0 : i32
    return %c0_i32, %c0_i32_0, %c0_i32_1 : i32, i32, i32
  }
  func.func @transform_3(%arg0: i32, %arg1: i32) -> (i32, i32) {
    %c0_i32 = arith.constant 0 : i32
    %c0_i32_0 = arith.constant 0 : i32
    %c0_i32_1 = arith.constant 0 : i32
    return %c0_i32, %c0_i32_0 : i32, i32
  }
  func.func @transform_4(%arg0: i32, %arg1: i32) -> (i32, i32, i32, i32) {
    %c0_i32 = arith.constant 0 : i32
    %c0_i32_0 = arith.constant 0 : i32
    %c0_i32_1 = arith.constant 0 : i32
    return %arg0, %arg1, %c0_i32, %c0_i32_0 : i32, i32, i32, i32
  }
}

module attributes {stable_mosaic.version = 11 : i64} {
  func.func @_conv_tap_kernel(%arg0: i32, %arg1: i32, %arg2: memref<1x8x17x64xf32, #tpu.memory_space<vmem>>, %arg3: memref<1x8x17x64xf32, #tpu.memory_space<vmem>>, %arg4: memref<4x64x32xf32, #tpu.memory_space<vmem>>, %arg5: memref<1x8x16x32xf32, #tpu.memory_space<vmem>>, %arg6: memref<9x17x64xf32, #tpu.memory_space<vmem>>) attributes {dimension_semantics = [#tpu.dimension_semantics<parallel>, #tpu.dimension_semantics<parallel>], iteration_bounds = array<i64: 2, 1>, scalar_prefetch = 0 : i64, scratch_operands = 1 : i64, tpu.core_type = #tpu.core_type<tc>, window_params = [{transform_indices = @transform_0, window_bounds = array<i64: 1, 8, 17, 64>}, {transform_indices = @transform_1, window_bounds = array<i64: 1, 8, 17, 64>}, {pipeline_mode = #tpu.pipeline_mode<synchronous>, transform_indices = @transform_2, window_bounds = array<i64: 4, 64, 32>}, {transform_indices = @transform_3, window_bounds = array<i64: 1, 8, 16, 32>}]} {
    %c0 = arith.constant 0 : index
    %c0_0 = arith.constant 0 : index
    %c0_1 = arith.constant 0 : index
    %c0_2 = arith.constant 0 : index
    %0 = vector.load %arg2[%c0, %c0_0, %c0_1, %c0_2] : memref<1x8x17x64xf32, #tpu.memory_space<vmem>>, vector<1x8x17x64xf32>
    %1 = vector.shape_cast %0 : vector<1x8x17x64xf32> to vector<8x17x64xf32>
    %c0_3 = arith.constant 0 : index
    %c0_4 = arith.constant 0 : index
    %c0_5 = arith.constant 0 : index
    %2 = vector.load %arg6[%c0_3, %c0_4, %c0_5] : memref<9x17x64xf32, #tpu.memory_space<vmem>>, vector<8x17x64xf32>
    tpu.vector_store %arg6[%c0_3, %c0_4, %c0_5], %1 {strides = array<i32>} : memref<9x17x64xf32, #tpu.memory_space<vmem>>, vector<8x17x64xf32>,
    %c0_6 = arith.constant 0 : index
    %c0_7 = arith.constant 0 : index
    %c0_8 = arith.constant 0 : index
    %c0_9 = arith.constant 0 : index
    %3 = vector.load %arg3[%c0_6, %c0_7, %c0_8, %c0_9] : memref<1x8x17x64xf32, #tpu.memory_space<vmem>>, vector<1x1x17x64xf32>
    %4 = vector.shape_cast %3 : vector<1x1x17x64xf32> to vector<1x17x64xf32>
    %c8 = arith.constant 8 : index
    %c0_10 = arith.constant 0 : index
    %c0_11 = arith.constant 0 : index
    %5 = vector.load %arg6[%c8, %c0_10, %c0_11] : memref<9x17x64xf32, #tpu.memory_space<vmem>>, vector<1x17x64xf32>
    tpu.vector_store %arg6[%c8, %c0_10, %c0_11], %4 {strides = array<i32>} : memref<9x17x64xf32, #tpu.memory_space<vmem>>, vector<1x17x64xf32>,
    %cst = arith.constant 0.000000e+00 : f32
    %6 = vector.broadcast %cst : f32 to vector<128x32xf32>
    %c0_12 = arith.constant 0 : index
    %c0_13 = arith.constant 0 : index
    %c0_14 = arith.constant 0 : index
    %7 = vector.load %arg6[%c0_12, %c0_13, %c0_14] : memref<9x17x64xf32, #tpu.memory_space<vmem>>, vector<8x16x64xf32>
    %8 = vector.shape_cast %7 : vector<8x16x64xf32> to vector<128x64xf32>
    %c0_15 = arith.constant 0 : index
    %c0_16 = arith.constant 0 : index
    %c0_17 = arith.constant 0 : index
    %9 = vector.load %arg4[%c0_15, %c0_16, %c0_17] : memref<4x64x32xf32, #tpu.memory_space<vmem>>, vector<1x64x32xf32>
    %10 = vector.shape_cast %9 : vector<1x64x32xf32> to vector<64x32xf32>
    %cst_18 = arith.constant dense<0.000000e+00> : vector<128x32xf32>
    %11 = tpu.matmul %8, %10, %cst_18 {dimension_numbers = #tpu.dot_dimension_numbers<[1], [0], [0], [1], [0, 0, 1, 1], [], []>} : vector<128x64xf32>, vector<64x32xf32>, vector<128x32xf32> -> vector<128x32xf32>
    %12 = arith.addf %6, %11 : vector<128x32xf32>
    %c0_19 = arith.constant 0 : index
    %c1 = arith.constant 1 : index
    %c0_20 = arith.constant 0 : index
    %13 = vector.load %arg6[%c0_19, %c1, %c0_20] : memref<9x17x64xf32, #tpu.memory_space<vmem>>, vector<8x16x64xf32>
    %14 = vector.shape_cast %13 : vector<8x16x64xf32> to vector<128x64xf32>
    %c1_21 = arith.constant 1 : index
    %c0_22 = arith.constant 0 : index
    %c0_23 = arith.constant 0 : index
    %15 = vector.load %arg4[%c1_21, %c0_22, %c0_23] : memref<4x64x32xf32, #tpu.memory_space<vmem>>, vector<1x64x32xf32>
    %16 = vector.shape_cast %15 : vector<1x64x32xf32> to vector<64x32xf32>
    %cst_24 = arith.constant dense<0.000000e+00> : vector<128x32xf32>
    %17 = tpu.matmul %14, %16, %cst_24 {dimension_numbers = #tpu.dot_dimension_numbers<[1], [0], [0], [1], [0, 0, 1, 1], [], []>} : vector<128x64xf32>, vector<64x32xf32>, vector<128x32xf32> -> vector<128x32xf32>
    %18 = arith.addf %12, %17 : vector<128x32xf32>
    %c1_25 = arith.constant 1 : index
    %c0_26 = arith.constant 0 : index
    %c0_27 = arith.constant 0 : index
    %19 = vector.load %arg6[%c1_25, %c0_26, %c0_27] : memref<9x17x64xf32, #tpu.memory_space<vmem>>, vector<8x16x64xf32>
    %20 = vector.shape_cast %19 : vector<8x16x64xf32> to vector<128x64xf32>
    %c2 = arith.constant 2 : index
    %c0_28 = arith.constant 0 : index
    %c0_29 = arith.constant 0 : index
    %21 = vector.load %arg4[%c2, %c0_28, %c0_29] : memref<4x64x32xf32, #tpu.memory_space<vmem>>, vector<1x64x32xf32>
    %22 = vector.shape_cast %21 : vector<1x64x32xf32> to vector<64x32xf32>
    %cst_30 = arith.constant dense<0.000000e+00> : vector<128x32xf32>
    %23 = tpu.matmul %20, %22, %cst_30 {dimension_numbers = #tpu.dot_dimension_numbers<[1], [0], [0], [1], [0, 0, 1, 1], [], []>} : vector<128x64xf32>, vector<64x32xf32>, vector<128x32xf32> -> vector<128x32xf32>
    %24 = arith.addf %18, %23 : vector<128x32xf32>
    %c1_31 = arith.constant 1 : index
    %c1_32 = arith.constant 1 : index
    %c0_33 = arith.constant 0 : index
    %25 = vector.load %arg6[%c1_31, %c1_32, %c0_33] : memref<9x17x64xf32, #tpu.memory_space<vmem>>, vector<8x16x64xf32>
    %26 = vector.shape_cast %25 : vector<8x16x64xf32> to vector<128x64xf32>
    %c3 = arith.constant 3 : index
    %c0_34 = arith.constant 0 : index
    %c0_35 = arith.constant 0 : index
    %27 = vector.load %arg4[%c3, %c0_34, %c0_35] : memref<4x64x32xf32, #tpu.memory_space<vmem>>, vector<1x64x32xf32>
    %28 = vector.shape_cast %27 : vector<1x64x32xf32> to vector<64x32xf32>
    %cst_36 = arith.constant dense<0.000000e+00> : vector<128x32xf32>
    %29 = tpu.matmul %26, %28, %cst_36 {dimension_numbers = #tpu.dot_dimension_numbers<[1], [0], [0], [1], [0, 0, 1, 1], [], []>} : vector<128x64xf32>, vector<64x32xf32>, vector<128x32xf32> -> vector<128x32xf32>
    %30 = arith.addf %24, %29 : vector<128x32xf32>
    %31 = vector.shape_cast %30 : vector<128x32xf32> to vector<1x8x16x32xf32>
    %c0_37 = arith.constant 0 : index
    %c0_38 = arith.constant 0 : index
    %c0_39 = arith.constant 0 : index
    %c0_40 = arith.constant 0 : index
    %32 = vector.load %arg5[%c0_37, %c0_38, %c0_39, %c0_40] : memref<1x8x16x32xf32, #tpu.memory_space<vmem>>, vector<1x8x16x32xf32>
    tpu.vector_store %arg5[%c0_37, %c0_38, %c0_39, %c0_40], %31 {strides = array<i32>} : memref<1x8x16x32xf32, #tpu.memory_space<vmem>>, vector<1x8x16x32xf32>,
    return
  }
  func.func @transform_0(%arg0: i32, %arg1: i32) -> (i32, i32, i32, i32) {
    %c0_i32 = arith.constant 0 : i32
    %c0_i32_0 = arith.constant 0 : i32
    %c0_i32_1 = arith.constant 0 : i32
    return %arg0, %arg1, %c0_i32, %c0_i32_0 : i32, i32, i32, i32
  }
  func.func @transform_1(%arg0: i32, %arg1: i32) -> (i32, i32, i32, i32) {
    %c1_i32 = arith.constant 1 : i32
    %0 = arith.addi %arg1, %c1_i32 : i32
    %c1_i32_0 = arith.constant 1 : i32
    %1 = arith.muli %0, %c1_i32_0 : i32
    %c0_i32 = arith.constant 0 : i32
    %c0_i32_1 = arith.constant 0 : i32
    %c0_i32_2 = arith.constant 0 : i32
    return %arg0, %1, %c0_i32, %c0_i32_1 : i32, i32, i32, i32
  }
  func.func @transform_2(%arg0: i32, %arg1: i32) -> (i32, i32, i32) {
    %c0_i32 = arith.constant 0 : i32
    %c0_i32_0 = arith.constant 0 : i32
    %c0_i32_1 = arith.constant 0 : i32
    %c0_i32_2 = arith.constant 0 : i32
    return %c0_i32, %c0_i32_0, %c0_i32_1 : i32, i32, i32
  }
  func.func @transform_3(%arg0: i32, %arg1: i32) -> (i32, i32, i32, i32) {
    %c0_i32 = arith.constant 0 : i32
    %c0_i32_0 = arith.constant 0 : i32
    %c0_i32_1 = arith.constant 0 : i32
    return %arg0, %arg1, %c0_i32, %c0_i32_0 : i32, i32, i32, i32
  }
}

module attributes {stable_mosaic.version = 11 : i64} {
  func.func @_instnorm_lrelu_kernel(%arg0: i32, %arg1: i32, %arg2: memref<1x64x32xf32, #tpu.memory_space<vmem>>, %arg3: memref<1x64x32xf32, #tpu.memory_space<vmem>>) attributes {dimension_semantics = [#tpu.dimension_semantics<parallel>, #tpu.dimension_semantics<parallel>], iteration_bounds = array<i64: 2, 1>, scalar_prefetch = 0 : i64, scratch_operands = 0 : i64, tpu.core_type = #tpu.core_type<tc>, window_params = [{transform_indices = @transform_0, window_bounds = array<i64: 1, 64, 32>}, {transform_indices = @transform_1, window_bounds = array<i64: 1, 64, 32>}]} {
    %c0 = arith.constant 0 : index
    %c0_0 = arith.constant 0 : index
    %c0_1 = arith.constant 0 : index
    %0 = vector.load %arg2[%c0, %c0_0, %c0_1] : memref<1x64x32xf32, #tpu.memory_space<vmem>>, vector<1x64x32xf32>
    %cst = arith.constant dense<0.000000e+00> : vector<1x32xf32>
    %1 = vector.multi_reduction <add>, %0, %cst [1] : vector<1x64x32xf32> to vector<1x32xf32>
    %2 = vector.shape_cast %1 : vector<1x32xf32> to vector<1x1x32xf32>
    %cst_2 = arith.constant 6.400000e+01 : f32
    %3 = vector.broadcast %cst_2 : f32 to vector<1x1x32xf32>
    %4 = arith.divf %2, %3 : vector<1x1x32xf32>
    %5 = vector.broadcast %4 : vector<1x1x32xf32> to vector<1x64x32xf32>
    %6 = arith.subf %0, %5 : vector<1x64x32xf32>
    %7 = arith.mulf %6, %6 : vector<1x64x32xf32>
    %cst_3 = arith.constant dense<0.000000e+00> : vector<1x32xf32>
    %8 = vector.multi_reduction <add>, %7, %cst_3 [1] : vector<1x64x32xf32> to vector<1x32xf32>
    %9 = vector.shape_cast %8 : vector<1x32xf32> to vector<1x1x32xf32>
    %cst_4 = arith.constant 6.400000e+01 : f32
    %10 = vector.broadcast %cst_4 : f32 to vector<1x1x32xf32>
    %11 = arith.divf %9, %10 : vector<1x1x32xf32>
    %cst_5 = arith.constant 9.99999974E-6 : f32
    %12 = vector.broadcast %cst_5 : f32 to vector<1x1x32xf32>
    %13 = arith.addf %11, %12 : vector<1x1x32xf32>
    %14 = math.rsqrt %13 : vector<1x1x32xf32>
    %15 = vector.broadcast %14 : vector<1x1x32xf32> to vector<1x64x32xf32>
    %16 = arith.mulf %6, %15 : vector<1x64x32xf32>
    %cst_6 = arith.constant 0.000000e+00 : f32
    %17 = vector.broadcast %cst_6 : f32 to vector<1x64x32xf32>
    %18 = arith.cmpf oge, %16, %17 : vector<1x64x32xf32>
    %cst_7 = arith.constant 2.000000e-01 : f32
    %19 = vector.broadcast %cst_7 : f32 to vector<1x64x32xf32>
    %20 = arith.mulf %19, %16 : vector<1x64x32xf32>
    %21 = arith.select %18, %16, %20 : vector<1x64x32xi1>, vector<1x64x32xf32>
    %c0_8 = arith.constant 0 : index
    %c0_9 = arith.constant 0 : index
    %c0_10 = arith.constant 0 : index
    %22 = vector.load %arg3[%c0_8, %c0_9, %c0_10] : memref<1x64x32xf32, #tpu.memory_space<vmem>>, vector<1x64x32xf32>
    tpu.vector_store %arg3[%c0_8, %c0_9, %c0_10], %21 {strides = array<i32>} : memref<1x64x32xf32, #tpu.memory_space<vmem>>, vector<1x64x32xf32>,
    return
  }
  func.func @transform_0(%arg0: i32, %arg1: i32) -> (i32, i32, i32) {
    %c0_i32 = arith.constant 0 : i32
    %c0_i32_0 = arith.constant 0 : i32
    return %arg0, %c0_i32, %arg1 : i32, i32, i32
  }
  func.func @transform_1(%arg0: i32, %arg1: i32) -> (i32, i32, i32) {
    %c0_i32 = arith.constant 0 : i32
    %c0_i32_0 = arith.constant 0 : i32
    return %arg0, %c0_i32, %arg1 : i32, i32, i32
  }
}

module attributes {stable_mosaic.version = 11 : i64} {
  func.func @_conv_tap_kernel(%arg0: i32, %arg1: i32, %arg2: memref<1x8x17x128xf32, #tpu.memory_space<vmem>>, %arg3: memref<1x8x17x128xf32, #tpu.memory_space<vmem>>, %arg4: memref<4x128x64xf32, #tpu.memory_space<vmem>>, %arg5: memref<1x8x16x64xf32, #tpu.memory_space<vmem>>, %arg6: memref<9x17x128xf32, #tpu.memory_space<vmem>>) attributes {dimension_semantics = [#tpu.dimension_semantics<parallel>, #tpu.dimension_semantics<parallel>], iteration_bounds = array<i64: 2, 1>, scalar_prefetch = 0 : i64, scratch_operands = 1 : i64, tpu.core_type = #tpu.core_type<tc>, window_params = [{transform_indices = @transform_0, window_bounds = array<i64: 1, 8, 17, 128>}, {transform_indices = @transform_1, window_bounds = array<i64: 1, 8, 17, 128>}, {pipeline_mode = #tpu.pipeline_mode<synchronous>, transform_indices = @transform_2, window_bounds = array<i64: 4, 128, 64>}, {transform_indices = @transform_3, window_bounds = array<i64: 1, 8, 16, 64>}]} {
    %c0 = arith.constant 0 : index
    %c0_0 = arith.constant 0 : index
    %c0_1 = arith.constant 0 : index
    %c0_2 = arith.constant 0 : index
    %0 = vector.load %arg2[%c0, %c0_0, %c0_1, %c0_2] : memref<1x8x17x128xf32, #tpu.memory_space<vmem>>, vector<1x8x17x128xf32>
    %1 = vector.shape_cast %0 : vector<1x8x17x128xf32> to vector<8x17x128xf32>
    %c0_3 = arith.constant 0 : index
    %c0_4 = arith.constant 0 : index
    %c0_5 = arith.constant 0 : index
    %2 = vector.load %arg6[%c0_3, %c0_4, %c0_5] : memref<9x17x128xf32, #tpu.memory_space<vmem>>, vector<8x17x128xf32>
    tpu.vector_store %arg6[%c0_3, %c0_4, %c0_5], %1 {strides = array<i32>} : memref<9x17x128xf32, #tpu.memory_space<vmem>>, vector<8x17x128xf32>,
    %c0_6 = arith.constant 0 : index
    %c0_7 = arith.constant 0 : index
    %c0_8 = arith.constant 0 : index
    %c0_9 = arith.constant 0 : index
    %3 = vector.load %arg3[%c0_6, %c0_7, %c0_8, %c0_9] : memref<1x8x17x128xf32, #tpu.memory_space<vmem>>, vector<1x1x17x128xf32>
    %4 = vector.shape_cast %3 : vector<1x1x17x128xf32> to vector<1x17x128xf32>
    %c8 = arith.constant 8 : index
    %c0_10 = arith.constant 0 : index
    %c0_11 = arith.constant 0 : index
    %5 = vector.load %arg6[%c8, %c0_10, %c0_11] : memref<9x17x128xf32, #tpu.memory_space<vmem>>, vector<1x17x128xf32>
    tpu.vector_store %arg6[%c8, %c0_10, %c0_11], %4 {strides = array<i32>} : memref<9x17x128xf32, #tpu.memory_space<vmem>>, vector<1x17x128xf32>,
    %cst = arith.constant 0.000000e+00 : f32
    %6 = vector.broadcast %cst : f32 to vector<128x64xf32>
    %c0_12 = arith.constant 0 : index
    %c0_13 = arith.constant 0 : index
    %c0_14 = arith.constant 0 : index
    %7 = vector.load %arg6[%c0_12, %c0_13, %c0_14] : memref<9x17x128xf32, #tpu.memory_space<vmem>>, vector<8x16x128xf32>
    %8 = vector.shape_cast %7 : vector<8x16x128xf32> to vector<128x128xf32>
    %c0_15 = arith.constant 0 : index
    %c0_16 = arith.constant 0 : index
    %c0_17 = arith.constant 0 : index
    %9 = vector.load %arg4[%c0_15, %c0_16, %c0_17] : memref<4x128x64xf32, #tpu.memory_space<vmem>>, vector<1x128x64xf32>
    %10 = vector.shape_cast %9 : vector<1x128x64xf32> to vector<128x64xf32>
    %cst_18 = arith.constant dense<0.000000e+00> : vector<128x64xf32>
    %11 = tpu.matmul %8, %10, %cst_18 {dimension_numbers = #tpu.dot_dimension_numbers<[1], [0], [0], [1], [0, 0, 1, 1], [], []>} : vector<128x128xf32>, vector<128x64xf32>, vector<128x64xf32> -> vector<128x64xf32>
    %12 = arith.addf %6, %11 : vector<128x64xf32>
    %c0_19 = arith.constant 0 : index
    %c1 = arith.constant 1 : index
    %c0_20 = arith.constant 0 : index
    %13 = vector.load %arg6[%c0_19, %c1, %c0_20] : memref<9x17x128xf32, #tpu.memory_space<vmem>>, vector<8x16x128xf32>
    %14 = vector.shape_cast %13 : vector<8x16x128xf32> to vector<128x128xf32>
    %c1_21 = arith.constant 1 : index
    %c0_22 = arith.constant 0 : index
    %c0_23 = arith.constant 0 : index
    %15 = vector.load %arg4[%c1_21, %c0_22, %c0_23] : memref<4x128x64xf32, #tpu.memory_space<vmem>>, vector<1x128x64xf32>
    %16 = vector.shape_cast %15 : vector<1x128x64xf32> to vector<128x64xf32>
    %cst_24 = arith.constant dense<0.000000e+00> : vector<128x64xf32>
    %17 = tpu.matmul %14, %16, %cst_24 {dimension_numbers = #tpu.dot_dimension_numbers<[1], [0], [0], [1], [0, 0, 1, 1], [], []>} : vector<128x128xf32>, vector<128x64xf32>, vector<128x64xf32> -> vector<128x64xf32>
    %18 = arith.addf %12, %17 : vector<128x64xf32>
    %c1_25 = arith.constant 1 : index
    %c0_26 = arith.constant 0 : index
    %c0_27 = arith.constant 0 : index
    %19 = vector.load %arg6[%c1_25, %c0_26, %c0_27] : memref<9x17x128xf32, #tpu.memory_space<vmem>>, vector<8x16x128xf32>
    %20 = vector.shape_cast %19 : vector<8x16x128xf32> to vector<128x128xf32>
    %c2 = arith.constant 2 : index
    %c0_28 = arith.constant 0 : index
    %c0_29 = arith.constant 0 : index
    %21 = vector.load %arg4[%c2, %c0_28, %c0_29] : memref<4x128x64xf32, #tpu.memory_space<vmem>>, vector<1x128x64xf32>
    %22 = vector.shape_cast %21 : vector<1x128x64xf32> to vector<128x64xf32>
    %cst_30 = arith.constant dense<0.000000e+00> : vector<128x64xf32>
    %23 = tpu.matmul %20, %22, %cst_30 {dimension_numbers = #tpu.dot_dimension_numbers<[1], [0], [0], [1], [0, 0, 1, 1], [], []>} : vector<128x128xf32>, vector<128x64xf32>, vector<128x64xf32> -> vector<128x64xf32>
    %24 = arith.addf %18, %23 : vector<128x64xf32>
    %c1_31 = arith.constant 1 : index
    %c1_32 = arith.constant 1 : index
    %c0_33 = arith.constant 0 : index
    %25 = vector.load %arg6[%c1_31, %c1_32, %c0_33] : memref<9x17x128xf32, #tpu.memory_space<vmem>>, vector<8x16x128xf32>
    %26 = vector.shape_cast %25 : vector<8x16x128xf32> to vector<128x128xf32>
    %c3 = arith.constant 3 : index
    %c0_34 = arith.constant 0 : index
    %c0_35 = arith.constant 0 : index
    %27 = vector.load %arg4[%c3, %c0_34, %c0_35] : memref<4x128x64xf32, #tpu.memory_space<vmem>>, vector<1x128x64xf32>
    %28 = vector.shape_cast %27 : vector<1x128x64xf32> to vector<128x64xf32>
    %cst_36 = arith.constant dense<0.000000e+00> : vector<128x64xf32>
    %29 = tpu.matmul %26, %28, %cst_36 {dimension_numbers = #tpu.dot_dimension_numbers<[1], [0], [0], [1], [0, 0, 1, 1], [], []>} : vector<128x128xf32>, vector<128x64xf32>, vector<128x64xf32> -> vector<128x64xf32>
    %30 = arith.addf %24, %29 : vector<128x64xf32>
    %31 = vector.shape_cast %30 : vector<128x64xf32> to vector<1x8x16x64xf32>
    %c0_37 = arith.constant 0 : index
    %c0_38 = arith.constant 0 : index
    %c0_39 = arith.constant 0 : index
    %c0_40 = arith.constant 0 : index
    %32 = vector.load %arg5[%c0_37, %c0_38, %c0_39, %c0_40] : memref<1x8x16x64xf32, #tpu.memory_space<vmem>>, vector<1x8x16x64xf32>
    tpu.vector_store %arg5[%c0_37, %c0_38, %c0_39, %c0_40], %31 {strides = array<i32>} : memref<1x8x16x64xf32, #tpu.memory_space<vmem>>, vector<1x8x16x64xf32>,
    return
  }
  func.func @transform_0(%arg0: i32, %arg1: i32) -> (i32, i32, i32, i32) {
    %c0_i32 = arith.constant 0 : i32
    %c0_i32_0 = arith.constant 0 : i32
    %c0_i32_1 = arith.constant 0 : i32
    return %arg0, %arg1, %c0_i32, %c0_i32_0 : i32, i32, i32, i32
  }
  func.func @transform_1(%arg0: i32, %arg1: i32) -> (i32, i32, i32, i32) {
    %c1_i32 = arith.constant 1 : i32
    %0 = arith.addi %arg1, %c1_i32 : i32
    %c1_i32_0 = arith.constant 1 : i32
    %1 = arith.muli %0, %c1_i32_0 : i32
    %c0_i32 = arith.constant 0 : i32
    %c0_i32_1 = arith.constant 0 : i32
    %c0_i32_2 = arith.constant 0 : i32
    return %arg0, %1, %c0_i32, %c0_i32_1 : i32, i32, i32, i32
  }
  func.func @transform_2(%arg0: i32, %arg1: i32) -> (i32, i32, i32) {
    %c0_i32 = arith.constant 0 : i32
    %c0_i32_0 = arith.constant 0 : i32
    %c0_i32_1 = arith.constant 0 : i32
    %c0_i32_2 = arith.constant 0 : i32
    return %c0_i32, %c0_i32_0, %c0_i32_1 : i32, i32, i32
  }
  func.func @transform_3(%arg0: i32, %arg1: i32) -> (i32, i32, i32, i32) {
    %c0_i32 = arith.constant 0 : i32
    %c0_i32_0 = arith.constant 0 : i32
    %c0_i32_1 = arith.constant 0 : i32
    return %arg0, %arg1, %c0_i32, %c0_i32_0 : i32, i32, i32, i32
  }
}

module attributes {stable_mosaic.version = 11 : i64} {
  func.func @_instnorm_lrelu_kernel(%arg0: i32, %arg1: i32, %arg2: memref<1x16x64xf32, #tpu.memory_space<vmem>>, %arg3: memref<1x16x64xf32, #tpu.memory_space<vmem>>) attributes {dimension_semantics = [#tpu.dimension_semantics<parallel>, #tpu.dimension_semantics<parallel>], iteration_bounds = array<i64: 2, 1>, scalar_prefetch = 0 : i64, scratch_operands = 0 : i64, tpu.core_type = #tpu.core_type<tc>, window_params = [{transform_indices = @transform_0, window_bounds = array<i64: 1, 16, 64>}, {transform_indices = @transform_1, window_bounds = array<i64: 1, 16, 64>}]} {
    %c0 = arith.constant 0 : index
    %c0_0 = arith.constant 0 : index
    %c0_1 = arith.constant 0 : index
    %0 = vector.load %arg2[%c0, %c0_0, %c0_1] : memref<1x16x64xf32, #tpu.memory_space<vmem>>, vector<1x16x64xf32>
    %cst = arith.constant dense<0.000000e+00> : vector<1x64xf32>
    %1 = vector.multi_reduction <add>, %0, %cst [1] : vector<1x16x64xf32> to vector<1x64xf32>
    %2 = vector.shape_cast %1 : vector<1x64xf32> to vector<1x1x64xf32>
    %cst_2 = arith.constant 1.600000e+01 : f32
    %3 = vector.broadcast %cst_2 : f32 to vector<1x1x64xf32>
    %4 = arith.divf %2, %3 : vector<1x1x64xf32>
    %5 = vector.broadcast %4 : vector<1x1x64xf32> to vector<1x16x64xf32>
    %6 = arith.subf %0, %5 : vector<1x16x64xf32>
    %7 = arith.mulf %6, %6 : vector<1x16x64xf32>
    %cst_3 = arith.constant dense<0.000000e+00> : vector<1x64xf32>
    %8 = vector.multi_reduction <add>, %7, %cst_3 [1] : vector<1x16x64xf32> to vector<1x64xf32>
    %9 = vector.shape_cast %8 : vector<1x64xf32> to vector<1x1x64xf32>
    %cst_4 = arith.constant 1.600000e+01 : f32
    %10 = vector.broadcast %cst_4 : f32 to vector<1x1x64xf32>
    %11 = arith.divf %9, %10 : vector<1x1x64xf32>
    %cst_5 = arith.constant 9.99999974E-6 : f32
    %12 = vector.broadcast %cst_5 : f32 to vector<1x1x64xf32>
    %13 = arith.addf %11, %12 : vector<1x1x64xf32>
    %14 = math.rsqrt %13 : vector<1x1x64xf32>
    %15 = vector.broadcast %14 : vector<1x1x64xf32> to vector<1x16x64xf32>
    %16 = arith.mulf %6, %15 : vector<1x16x64xf32>
    %cst_6 = arith.constant 0.000000e+00 : f32
    %17 = vector.broadcast %cst_6 : f32 to vector<1x16x64xf32>
    %18 = arith.cmpf oge, %16, %17 : vector<1x16x64xf32>
    %cst_7 = arith.constant 2.000000e-01 : f32
    %19 = vector.broadcast %cst_7 : f32 to vector<1x16x64xf32>
    %20 = arith.mulf %19, %16 : vector<1x16x64xf32>
    %21 = arith.select %18, %16, %20 : vector<1x16x64xi1>, vector<1x16x64xf32>
    %c0_8 = arith.constant 0 : index
    %c0_9 = arith.constant 0 : index
    %c0_10 = arith.constant 0 : index
    %22 = vector.load %arg3[%c0_8, %c0_9, %c0_10] : memref<1x16x64xf32, #tpu.memory_space<vmem>>, vector<1x16x64xf32>
    tpu.vector_store %arg3[%c0_8, %c0_9, %c0_10], %21 {strides = array<i32>} : memref<1x16x64xf32, #tpu.memory_space<vmem>>, vector<1x16x64xf32>,
    return
  }
  func.func @transform_0(%arg0: i32, %arg1: i32) -> (i32, i32, i32) {
    %c0_i32 = arith.constant 0 : i32
    %c0_i32_0 = arith.constant 0 : i32
    return %arg0, %c0_i32, %arg1 : i32, i32, i32
  }
  func.func @transform_1(%arg0: i32, %arg1: i32) -> (i32, i32, i32) {
    %c0_i32 = arith.constant 0 : i32
    %c0_i32_0 = arith.constant 0 : i32
    return %arg0, %c0_i32, %arg1 : i32, i32, i32
  }
}

module attributes {stable_mosaic.version = 11 : i64} {
  func.func @_conv_tap_kernel(%arg0: i32, %arg1: i32, %arg2: memref<1x8x19x64xf32, #tpu.memory_space<vmem>>, %arg3: memref<1x8x19x64xf32, #tpu.memory_space<vmem>>, %arg4: memref<16x64x128xf32, #tpu.memory_space<vmem>>, %arg5: memref<1x8x16x128xf32, #tpu.memory_space<vmem>>, %arg6: memref<11x19x64xf32, #tpu.memory_space<vmem>>) attributes {dimension_semantics = [#tpu.dimension_semantics<parallel>, #tpu.dimension_semantics<parallel>], iteration_bounds = array<i64: 2, 1>, scalar_prefetch = 0 : i64, scratch_operands = 1 : i64, tpu.core_type = #tpu.core_type<tc>, window_params = [{transform_indices = @transform_0, window_bounds = array<i64: 1, 8, 19, 64>}, {transform_indices = @transform_1, window_bounds = array<i64: 1, 8, 19, 64>}, {pipeline_mode = #tpu.pipeline_mode<synchronous>, transform_indices = @transform_2, window_bounds = array<i64: 16, 64, 128>}, {transform_indices = @transform_3, window_bounds = array<i64: 1, 8, 16, 128>}]} {
    %c0 = arith.constant 0 : index
    %c0_0 = arith.constant 0 : index
    %c0_1 = arith.constant 0 : index
    %c0_2 = arith.constant 0 : index
    %0 = vector.load %arg2[%c0, %c0_0, %c0_1, %c0_2] : memref<1x8x19x64xf32, #tpu.memory_space<vmem>>, vector<1x8x19x64xf32>
    %1 = vector.shape_cast %0 : vector<1x8x19x64xf32> to vector<8x19x64xf32>
    %c0_3 = arith.constant 0 : index
    %c0_4 = arith.constant 0 : index
    %c0_5 = arith.constant 0 : index
    %2 = vector.load %arg6[%c0_3, %c0_4, %c0_5] : memref<11x19x64xf32, #tpu.memory_space<vmem>>, vector<8x19x64xf32>
    tpu.vector_store %arg6[%c0_3, %c0_4, %c0_5], %1 {strides = array<i32>} : memref<11x19x64xf32, #tpu.memory_space<vmem>>, vector<8x19x64xf32>,
    %c0_6 = arith.constant 0 : index
    %c0_7 = arith.constant 0 : index
    %c0_8 = arith.constant 0 : index
    %c0_9 = arith.constant 0 : index
    %3 = vector.load %arg3[%c0_6, %c0_7, %c0_8, %c0_9] : memref<1x8x19x64xf32, #tpu.memory_space<vmem>>, vector<1x3x19x64xf32>
    %4 = vector.shape_cast %3 : vector<1x3x19x64xf32> to vector<3x19x64xf32>
    %c8 = arith.constant 8 : index
    %c0_10 = arith.constant 0 : index
    %c0_11 = arith.constant 0 : index
    %5 = vector.load %arg6[%c8, %c0_10, %c0_11] : memref<11x19x64xf32, #tpu.memory_space<vmem>>, vector<3x19x64xf32>
    tpu.vector_store %arg6[%c8, %c0_10, %c0_11], %4 {strides = array<i32>} : memref<11x19x64xf32, #tpu.memory_space<vmem>>, vector<3x19x64xf32>,
    %cst = arith.constant 0.000000e+00 : f32
    %6 = vector.broadcast %cst : f32 to vector<128x128xf32>
    %c0_12 = arith.constant 0 : index
    %c0_13 = arith.constant 0 : index
    %c0_14 = arith.constant 0 : index
    %7 = vector.load %arg6[%c0_12, %c0_13, %c0_14] : memref<11x19x64xf32, #tpu.memory_space<vmem>>, vector<8x16x64xf32>
    %8 = vector.shape_cast %7 : vector<8x16x64xf32> to vector<128x64xf32>
    %c0_15 = arith.constant 0 : index
    %c0_16 = arith.constant 0 : index
    %c0_17 = arith.constant 0 : index
    %9 = vector.load %arg4[%c0_15, %c0_16, %c0_17] : memref<16x64x128xf32, #tpu.memory_space<vmem>>, vector<1x64x128xf32>
    %10 = vector.shape_cast %9 : vector<1x64x128xf32> to vector<64x128xf32>
    %cst_18 = arith.constant dense<0.000000e+00> : vector<128x128xf32>
    %11 = tpu.matmul %8, %10, %cst_18 {dimension_numbers = #tpu.dot_dimension_numbers<[1], [0], [0], [1], [0, 0, 1, 1], [], []>} : vector<128x64xf32>, vector<64x128xf32>, vector<128x128xf32> -> vector<128x128xf32>
    %12 = arith.addf %6, %11 : vector<128x128xf32>
    %c0_19 = arith.constant 0 : index
    %c1 = arith.constant 1 : index
    %c0_20 = arith.constant 0 : index
    %13 = vector.load %arg6[%c0_19, %c1, %c0_20] : memref<11x19x64xf32, #tpu.memory_space<vmem>>, vector<8x16x64xf32>
    %14 = vector.shape_cast %13 : vector<8x16x64xf32> to vector<128x64xf32>
    %c1_21 = arith.constant 1 : index
    %c0_22 = arith.constant 0 : index
    %c0_23 = arith.constant 0 : index
    %15 = vector.load %arg4[%c1_21, %c0_22, %c0_23] : memref<16x64x128xf32, #tpu.memory_space<vmem>>, vector<1x64x128xf32>
    %16 = vector.shape_cast %15 : vector<1x64x128xf32> to vector<64x128xf32>
    %cst_24 = arith.constant dense<0.000000e+00> : vector<128x128xf32>
    %17 = tpu.matmul %14, %16, %cst_24 {dimension_numbers = #tpu.dot_dimension_numbers<[1], [0], [0], [1], [0, 0, 1, 1], [], []>} : vector<128x64xf32>, vector<64x128xf32>, vector<128x128xf32> -> vector<128x128xf32>
    %18 = arith.addf %12, %17 : vector<128x128xf32>
    %c0_25 = arith.constant 0 : index
    %c2 = arith.constant 2 : index
    %c0_26 = arith.constant 0 : index
    %19 = vector.load %arg6[%c0_25, %c2, %c0_26] : memref<11x19x64xf32, #tpu.memory_space<vmem>>, vector<8x16x64xf32>
    %20 = vector.shape_cast %19 : vector<8x16x64xf32> to vector<128x64xf32>
    %c2_27 = arith.constant 2 : index
    %c0_28 = arith.constant 0 : index
    %c0_29 = arith.constant 0 : index
    %21 = vector.load %arg4[%c2_27, %c0_28, %c0_29] : memref<16x64x128xf32, #tpu.memory_space<vmem>>, vector<1x64x128xf32>
    %22 = vector.shape_cast %21 : vector<1x64x128xf32> to vector<64x128xf32>
    %cst_30 = arith.constant dense<0.000000e+00> : vector<128x128xf32>
    %23 = tpu.matmul %20, %22, %cst_30 {dimension_numbers = #tpu.dot_dimension_numbers<[1], [0], [0], [1], [0, 0, 1, 1], [], []>} : vector<128x64xf32>, vector<64x128xf32>, vector<128x128xf32> -> vector<128x128xf32>
    %24 = arith.addf %18, %23 : vector<128x128xf32>
    %c0_31 = arith.constant 0 : index
    %c3 = arith.constant 3 : index
    %c0_32 = arith.constant 0 : index
    %25 = vector.load %arg6[%c0_31, %c3, %c0_32] : memref<11x19x64xf32, #tpu.memory_space<vmem>>, vector<8x16x64xf32>
    %26 = vector.shape_cast %25 : vector<8x16x64xf32> to vector<128x64xf32>
    %c3_33 = arith.constant 3 : index
    %c0_34 = arith.constant 0 : index
    %c0_35 = arith.constant 0 : index
    %27 = vector.load %arg4[%c3_33, %c0_34, %c0_35] : memref<16x64x128xf32, #tpu.memory_space<vmem>>, vector<1x64x128xf32>
    %28 = vector.shape_cast %27 : vector<1x64x128xf32> to vector<64x128xf32>
    %cst_36 = arith.constant dense<0.000000e+00> : vector<128x128xf32>
    %29 = tpu.matmul %26, %28, %cst_36 {dimension_numbers = #tpu.dot_dimension_numbers<[1], [0], [0], [1], [0, 0, 1, 1], [], []>} : vector<128x64xf32>, vector<64x128xf32>, vector<128x128xf32> -> vector<128x128xf32>
    %30 = arith.addf %24, %29 : vector<128x128xf32>
    %c1_37 = arith.constant 1 : index
    %c0_38 = arith.constant 0 : index
    %c0_39 = arith.constant 0 : index
    %31 = vector.load %arg6[%c1_37, %c0_38, %c0_39] : memref<11x19x64xf32, #tpu.memory_space<vmem>>, vector<8x16x64xf32>
    %32 = vector.shape_cast %31 : vector<8x16x64xf32> to vector<128x64xf32>
    %c4 = arith.constant 4 : index
    %c0_40 = arith.constant 0 : index
    %c0_41 = arith.constant 0 : index
    %33 = vector.load %arg4[%c4, %c0_40, %c0_41] : memref<16x64x128xf32, #tpu.memory_space<vmem>>, vector<1x64x128xf32>
    %34 = vector.shape_cast %33 : vector<1x64x128xf32> to vector<64x128xf32>
    %cst_42 = arith.constant dense<0.000000e+00> : vector<128x128xf32>
    %35 = tpu.matmul %32, %34, %cst_42 {dimension_numbers = #tpu.dot_dimension_numbers<[1], [0], [0], [1], [0, 0, 1, 1], [], []>} : vector<128x64xf32>, vector<64x128xf32>, vector<128x128xf32> -> vector<128x128xf32>
    %36 = arith.addf %30, %35 : vector<128x128xf32>
    %c1_43 = arith.constant 1 : index
    %c1_44 = arith.constant 1 : index
    %c0_45 = arith.constant 0 : index
    %37 = vector.load %arg6[%c1_43, %c1_44, %c0_45] : memref<11x19x64xf32, #tpu.memory_space<vmem>>, vector<8x16x64xf32>
    %38 = vector.shape_cast %37 : vector<8x16x64xf32> to vector<128x64xf32>
    %c5 = arith.constant 5 : index
    %c0_46 = arith.constant 0 : index
    %c0_47 = arith.constant 0 : index
    %39 = vector.load %arg4[%c5, %c0_46, %c0_47] : memref<16x64x128xf32, #tpu.memory_space<vmem>>, vector<1x64x128xf32>
    %40 = vector.shape_cast %39 : vector<1x64x128xf32> to vector<64x128xf32>
    %cst_48 = arith.constant dense<0.000000e+00> : vector<128x128xf32>
    %41 = tpu.matmul %38, %40, %cst_48 {dimension_numbers = #tpu.dot_dimension_numbers<[1], [0], [0], [1], [0, 0, 1, 1], [], []>} : vector<128x64xf32>, vector<64x128xf32>, vector<128x128xf32> -> vector<128x128xf32>
    %42 = arith.addf %36, %41 : vector<128x128xf32>
    %c1_49 = arith.constant 1 : index
    %c2_50 = arith.constant 2 : index
    %c0_51 = arith.constant 0 : index
    %43 = vector.load %arg6[%c1_49, %c2_50, %c0_51] : memref<11x19x64xf32, #tpu.memory_space<vmem>>, vector<8x16x64xf32>
    %44 = vector.shape_cast %43 : vector<8x16x64xf32> to vector<128x64xf32>
    %c6 = arith.constant 6 : index
    %c0_52 = arith.constant 0 : index
    %c0_53 = arith.constant 0 : index
    %45 = vector.load %arg4[%c6, %c0_52, %c0_53] : memref<16x64x128xf32, #tpu.memory_space<vmem>>, vector<1x64x128xf32>
    %46 = vector.shape_cast %45 : vector<1x64x128xf32> to vector<64x128xf32>
    %cst_54 = arith.constant dense<0.000000e+00> : vector<128x128xf32>
    %47 = tpu.matmul %44, %46, %cst_54 {dimension_numbers = #tpu.dot_dimension_numbers<[1], [0], [0], [1], [0, 0, 1, 1], [], []>} : vector<128x64xf32>, vector<64x128xf32>, vector<128x128xf32> -> vector<128x128xf32>
    %48 = arith.addf %42, %47 : vector<128x128xf32>
    %c1_55 = arith.constant 1 : index
    %c3_56 = arith.constant 3 : index
    %c0_57 = arith.constant 0 : index
    %49 = vector.load %arg6[%c1_55, %c3_56, %c0_57] : memref<11x19x64xf32, #tpu.memory_space<vmem>>, vector<8x16x64xf32>
    %50 = vector.shape_cast %49 : vector<8x16x64xf32> to vector<128x64xf32>
    %c7 = arith.constant 7 : index
    %c0_58 = arith.constant 0 : index
    %c0_59 = arith.constant 0 : index
    %51 = vector.load %arg4[%c7, %c0_58, %c0_59] : memref<16x64x128xf32, #tpu.memory_space<vmem>>, vector<1x64x128xf32>
    %52 = vector.shape_cast %51 : vector<1x64x128xf32> to vector<64x128xf32>
    %cst_60 = arith.constant dense<0.000000e+00> : vector<128x128xf32>
    %53 = tpu.matmul %50, %52, %cst_60 {dimension_numbers = #tpu.dot_dimension_numbers<[1], [0], [0], [1], [0, 0, 1, 1], [], []>} : vector<128x64xf32>, vector<64x128xf32>, vector<128x128xf32> -> vector<128x128xf32>
    %54 = arith.addf %48, %53 : vector<128x128xf32>
    %c2_61 = arith.constant 2 : index
    %c0_62 = arith.constant 0 : index
    %c0_63 = arith.constant 0 : index
    %55 = vector.load %arg6[%c2_61, %c0_62, %c0_63] : memref<11x19x64xf32, #tpu.memory_space<vmem>>, vector<8x16x64xf32>
    %56 = vector.shape_cast %55 : vector<8x16x64xf32> to vector<128x64xf32>
    %c8_64 = arith.constant 8 : index
    %c0_65 = arith.constant 0 : index
    %c0_66 = arith.constant 0 : index
    %57 = vector.load %arg4[%c8_64, %c0_65, %c0_66] : memref<16x64x128xf32, #tpu.memory_space<vmem>>, vector<1x64x128xf32>
    %58 = vector.shape_cast %57 : vector<1x64x128xf32> to vector<64x128xf32>
    %cst_67 = arith.constant dense<0.000000e+00> : vector<128x128xf32>
    %59 = tpu.matmul %56, %58, %cst_67 {dimension_numbers = #tpu.dot_dimension_numbers<[1], [0], [0], [1], [0, 0, 1, 1], [], []>} : vector<128x64xf32>, vector<64x128xf32>, vector<128x128xf32> -> vector<128x128xf32>
    %60 = arith.addf %54, %59 : vector<128x128xf32>
    %c2_68 = arith.constant 2 : index
    %c1_69 = arith.constant 1 : index
    %c0_70 = arith.constant 0 : index
    %61 = vector.load %arg6[%c2_68, %c1_69, %c0_70] : memref<11x19x64xf32, #tpu.memory_space<vmem>>, vector<8x16x64xf32>
    %62 = vector.shape_cast %61 : vector<8x16x64xf32> to vector<128x64xf32>
    %c9 = arith.constant 9 : index
    %c0_71 = arith.constant 0 : index
    %c0_72 = arith.constant 0 : index
    %63 = vector.load %arg4[%c9, %c0_71, %c0_72] : memref<16x64x128xf32, #tpu.memory_space<vmem>>, vector<1x64x128xf32>
    %64 = vector.shape_cast %63 : vector<1x64x128xf32> to vector<64x128xf32>
    %cst_73 = arith.constant dense<0.000000e+00> : vector<128x128xf32>
    %65 = tpu.matmul %62, %64, %cst_73 {dimension_numbers = #tpu.dot_dimension_numbers<[1], [0], [0], [1], [0, 0, 1, 1], [], []>} : vector<128x64xf32>, vector<64x128xf32>, vector<128x128xf32> -> vector<128x128xf32>
    %66 = arith.addf %60, %65 : vector<128x128xf32>
    %c2_74 = arith.constant 2 : index
    %c2_75 = arith.constant 2 : index
    %c0_76 = arith.constant 0 : index
    %67 = vector.load %arg6[%c2_74, %c2_75, %c0_76] : memref<11x19x64xf32, #tpu.memory_space<vmem>>, vector<8x16x64xf32>
    %68 = vector.shape_cast %67 : vector<8x16x64xf32> to vector<128x64xf32>
    %c10 = arith.constant 10 : index
    %c0_77 = arith.constant 0 : index
    %c0_78 = arith.constant 0 : index
    %69 = vector.load %arg4[%c10, %c0_77, %c0_78] : memref<16x64x128xf32, #tpu.memory_space<vmem>>, vector<1x64x128xf32>
    %70 = vector.shape_cast %69 : vector<1x64x128xf32> to vector<64x128xf32>
    %cst_79 = arith.constant dense<0.000000e+00> : vector<128x128xf32>
    %71 = tpu.matmul %68, %70, %cst_79 {dimension_numbers = #tpu.dot_dimension_numbers<[1], [0], [0], [1], [0, 0, 1, 1], [], []>} : vector<128x64xf32>, vector<64x128xf32>, vector<128x128xf32> -> vector<128x128xf32>
    %72 = arith.addf %66, %71 : vector<128x128xf32>
    %c2_80 = arith.constant 2 : index
    %c3_81 = arith.constant 3 : index
    %c0_82 = arith.constant 0 : index
    %73 = vector.load %arg6[%c2_80, %c3_81, %c0_82] : memref<11x19x64xf32, #tpu.memory_space<vmem>>, vector<8x16x64xf32>
    %74 = vector.shape_cast %73 : vector<8x16x64xf32> to vector<128x64xf32>
    %c11 = arith.constant 11 : index
    %c0_83 = arith.constant 0 : index
    %c0_84 = arith.constant 0 : index
    %75 = vector.load %arg4[%c11, %c0_83, %c0_84] : memref<16x64x128xf32, #tpu.memory_space<vmem>>, vector<1x64x128xf32>
    %76 = vector.shape_cast %75 : vector<1x64x128xf32> to vector<64x128xf32>
    %cst_85 = arith.constant dense<0.000000e+00> : vector<128x128xf32>
    %77 = tpu.matmul %74, %76, %cst_85 {dimension_numbers = #tpu.dot_dimension_numbers<[1], [0], [0], [1], [0, 0, 1, 1], [], []>} : vector<128x64xf32>, vector<64x128xf32>, vector<128x128xf32> -> vector<128x128xf32>
    %78 = arith.addf %72, %77 : vector<128x128xf32>
    %c3_86 = arith.constant 3 : index
    %c0_87 = arith.constant 0 : index
    %c0_88 = arith.constant 0 : index
    %79 = vector.load %arg6[%c3_86, %c0_87, %c0_88] : memref<11x19x64xf32, #tpu.memory_space<vmem>>, vector<8x16x64xf32>
    %80 = vector.shape_cast %79 : vector<8x16x64xf32> to vector<128x64xf32>
    %c12 = arith.constant 12 : index
    %c0_89 = arith.constant 0 : index
    %c0_90 = arith.constant 0 : index
    %81 = vector.load %arg4[%c12, %c0_89, %c0_90] : memref<16x64x128xf32, #tpu.memory_space<vmem>>, vector<1x64x128xf32>
    %82 = vector.shape_cast %81 : vector<1x64x128xf32> to vector<64x128xf32>
    %cst_91 = arith.constant dense<0.000000e+00> : vector<128x128xf32>
    %83 = tpu.matmul %80, %82, %cst_91 {dimension_numbers = #tpu.dot_dimension_numbers<[1], [0], [0], [1], [0, 0, 1, 1], [], []>} : vector<128x64xf32>, vector<64x128xf32>, vector<128x128xf32> -> vector<128x128xf32>
    %84 = arith.addf %78, %83 : vector<128x128xf32>
    %c3_92 = arith.constant 3 : index
    %c1_93 = arith.constant 1 : index
    %c0_94 = arith.constant 0 : index
    %85 = vector.load %arg6[%c3_92, %c1_93, %c0_94] : memref<11x19x64xf32, #tpu.memory_space<vmem>>, vector<8x16x64xf32>
    %86 = vector.shape_cast %85 : vector<8x16x64xf32> to vector<128x64xf32>
    %c13 = arith.constant 13 : index
    %c0_95 = arith.constant 0 : index
    %c0_96 = arith.constant 0 : index
    %87 = vector.load %arg4[%c13, %c0_95, %c0_96] : memref<16x64x128xf32, #tpu.memory_space<vmem>>, vector<1x64x128xf32>
    %88 = vector.shape_cast %87 : vector<1x64x128xf32> to vector<64x128xf32>
    %cst_97 = arith.constant dense<0.000000e+00> : vector<128x128xf32>
    %89 = tpu.matmul %86, %88, %cst_97 {dimension_numbers = #tpu.dot_dimension_numbers<[1], [0], [0], [1], [0, 0, 1, 1], [], []>} : vector<128x64xf32>, vector<64x128xf32>, vector<128x128xf32> -> vector<128x128xf32>
    %90 = arith.addf %84, %89 : vector<128x128xf32>
    %c3_98 = arith.constant 3 : index
    %c2_99 = arith.constant 2 : index
    %c0_100 = arith.constant 0 : index
    %91 = vector.load %arg6[%c3_98, %c2_99, %c0_100] : memref<11x19x64xf32, #tpu.memory_space<vmem>>, vector<8x16x64xf32>
    %92 = vector.shape_cast %91 : vector<8x16x64xf32> to vector<128x64xf32>
    %c14 = arith.constant 14 : index
    %c0_101 = arith.constant 0 : index
    %c0_102 = arith.constant 0 : index
    %93 = vector.load %arg4[%c14, %c0_101, %c0_102] : memref<16x64x128xf32, #tpu.memory_space<vmem>>, vector<1x64x128xf32>
    %94 = vector.shape_cast %93 : vector<1x64x128xf32> to vector<64x128xf32>
    %cst_103 = arith.constant dense<0.000000e+00> : vector<128x128xf32>
    %95 = tpu.matmul %92, %94, %cst_103 {dimension_numbers = #tpu.dot_dimension_numbers<[1], [0], [0], [1], [0, 0, 1, 1], [], []>} : vector<128x64xf32>, vector<64x128xf32>, vector<128x128xf32> -> vector<128x128xf32>
    %96 = arith.addf %90, %95 : vector<128x128xf32>
    %c3_104 = arith.constant 3 : index
    %c3_105 = arith.constant 3 : index
    %c0_106 = arith.constant 0 : index
    %97 = vector.load %arg6[%c3_104, %c3_105, %c0_106] : memref<11x19x64xf32, #tpu.memory_space<vmem>>, vector<8x16x64xf32>
    %98 = vector.shape_cast %97 : vector<8x16x64xf32> to vector<128x64xf32>
    %c15 = arith.constant 15 : index
    %c0_107 = arith.constant 0 : index
    %c0_108 = arith.constant 0 : index
    %99 = vector.load %arg4[%c15, %c0_107, %c0_108] : memref<16x64x128xf32, #tpu.memory_space<vmem>>, vector<1x64x128xf32>
    %100 = vector.shape_cast %99 : vector<1x64x128xf32> to vector<64x128xf32>
    %cst_109 = arith.constant dense<0.000000e+00> : vector<128x128xf32>
    %101 = tpu.matmul %98, %100, %cst_109 {dimension_numbers = #tpu.dot_dimension_numbers<[1], [0], [0], [1], [0, 0, 1, 1], [], []>} : vector<128x64xf32>, vector<64x128xf32>, vector<128x128xf32> -> vector<128x128xf32>
    %102 = arith.addf %96, %101 : vector<128x128xf32>
    %103 = vector.shape_cast %102 : vector<128x128xf32> to vector<1x8x16x128xf32>
    %c0_110 = arith.constant 0 : index
    %c0_111 = arith.constant 0 : index
    %c0_112 = arith.constant 0 : index
    %c0_113 = arith.constant 0 : index
    %104 = vector.load %arg5[%c0_110, %c0_111, %c0_112, %c0_113] : memref<1x8x16x128xf32, #tpu.memory_space<vmem>>, vector<1x8x16x128xf32>
    tpu.vector_store %arg5[%c0_110, %c0_111, %c0_112, %c0_113], %103 {strides = array<i32>} : memref<1x8x16x128xf32, #tpu.memory_space<vmem>>, vector<1x8x16x128xf32>,
    return
  }
  func.func @transform_0(%arg0: i32, %arg1: i32) -> (i32, i32, i32, i32) {
    %c0_i32 = arith.constant 0 : i32
    %c0_i32_0 = arith.constant 0 : i32
    %c0_i32_1 = arith.constant 0 : i32
    return %arg0, %arg1, %c0_i32, %c0_i32_0 : i32, i32, i32, i32
  }
  func.func @transform_1(%arg0: i32, %arg1: i32) -> (i32, i32, i32, i32) {
    %c1_i32 = arith.constant 1 : i32
    %0 = arith.addi %arg1, %c1_i32 : i32
    %c1_i32_0 = arith.constant 1 : i32
    %1 = arith.muli %0, %c1_i32_0 : i32
    %c0_i32 = arith.constant 0 : i32
    %c0_i32_1 = arith.constant 0 : i32
    %c0_i32_2 = arith.constant 0 : i32
    return %arg0, %1, %c0_i32, %c0_i32_1 : i32, i32, i32, i32
  }
  func.func @transform_2(%arg0: i32, %arg1: i32) -> (i32, i32, i32) {
    %c0_i32 = arith.constant 0 : i32
    %c0_i32_0 = arith.constant 0 : i32
    %c0_i32_1 = arith.constant 0 : i32
    %c0_i32_2 = arith.constant 0 : i32
    return %c0_i32, %c0_i32_0, %c0_i32_1 : i32, i32, i32
  }
  func.func @transform_3(%arg0: i32, %arg1: i32) -> (i32, i32, i32, i32) {
    %c0_i32 = arith.constant 0 : i32
    %c0_i32_0 = arith.constant 0 : i32
    %c0_i32_1 = arith.constant 0 : i32
    return %arg0, %arg1, %c0_i32, %c0_i32_0 : i32, i32, i32, i32
  }
}

module attributes {stable_mosaic.version = 11 : i64} {
  func.func @_instnorm_lrelu_kernel(%arg0: i32, %arg1: i32, %arg2: memref<1x9x128xf32, #tpu.memory_space<vmem>>, %arg3: memref<1x9x128xf32, #tpu.memory_space<vmem>>) attributes {dimension_semantics = [#tpu.dimension_semantics<parallel>, #tpu.dimension_semantics<parallel>], iteration_bounds = array<i64: 2, 1>, scalar_prefetch = 0 : i64, scratch_operands = 0 : i64, tpu.core_type = #tpu.core_type<tc>, window_params = [{transform_indices = @transform_0, window_bounds = array<i64: 1, 9, 128>}, {transform_indices = @transform_1, window_bounds = array<i64: 1, 9, 128>}]} {
    %c0 = arith.constant 0 : index
    %c0_0 = arith.constant 0 : index
    %c0_1 = arith.constant 0 : index
    %0 = vector.load %arg2[%c0, %c0_0, %c0_1] : memref<1x9x128xf32, #tpu.memory_space<vmem>>, vector<1x9x128xf32>
    %cst = arith.constant dense<0.000000e+00> : vector<1x128xf32>
    %1 = vector.multi_reduction <add>, %0, %cst [1] : vector<1x9x128xf32> to vector<1x128xf32>
    %2 = vector.shape_cast %1 : vector<1x128xf32> to vector<1x1x128xf32>
    %cst_2 = arith.constant 9.000000e+00 : f32
    %3 = vector.broadcast %cst_2 : f32 to vector<1x1x128xf32>
    %4 = arith.divf %2, %3 : vector<1x1x128xf32>
    %5 = vector.broadcast %4 : vector<1x1x128xf32> to vector<1x9x128xf32>
    %6 = arith.subf %0, %5 : vector<1x9x128xf32>
    %7 = arith.mulf %6, %6 : vector<1x9x128xf32>
    %cst_3 = arith.constant dense<0.000000e+00> : vector<1x128xf32>
    %8 = vector.multi_reduction <add>, %7, %cst_3 [1] : vector<1x9x128xf32> to vector<1x128xf32>
    %9 = vector.shape_cast %8 : vector<1x128xf32> to vector<1x1x128xf32>
    %cst_4 = arith.constant 9.000000e+00 : f32
    %10 = vector.broadcast %cst_4 : f32 to vector<1x1x128xf32>
    %11 = arith.divf %9, %10 : vector<1x1x128xf32>
    %cst_5 = arith.constant 9.99999974E-6 : f32
    %12 = vector.broadcast %cst_5 : f32 to vector<1x1x128xf32>
    %13 = arith.addf %11, %12 : vector<1x1x128xf32>
    %14 = math.rsqrt %13 : vector<1x1x128xf32>
    %15 = vector.broadcast %14 : vector<1x1x128xf32> to vector<1x9x128xf32>
    %16 = arith.mulf %6, %15 : vector<1x9x128xf32>
    %cst_6 = arith.constant 0.000000e+00 : f32
    %17 = vector.broadcast %cst_6 : f32 to vector<1x9x128xf32>
    %18 = arith.cmpf oge, %16, %17 : vector<1x9x128xf32>
    %cst_7 = arith.constant 2.000000e-01 : f32
    %19 = vector.broadcast %cst_7 : f32 to vector<1x9x128xf32>
    %20 = arith.mulf %19, %16 : vector<1x9x128xf32>
    %21 = arith.select %18, %16, %20 : vector<1x9x128xi1>, vector<1x9x128xf32>
    %c0_8 = arith.constant 0 : index
    %c0_9 = arith.constant 0 : index
    %c0_10 = arith.constant 0 : index
    %22 = vector.load %arg3[%c0_8, %c0_9, %c0_10] : memref<1x9x128xf32, #tpu.memory_space<vmem>>, vector<1x9x128xf32>
    tpu.vector_store %arg3[%c0_8, %c0_9, %c0_10], %21 {strides = array<i32>} : memref<1x9x128xf32, #tpu.memory_space<vmem>>, vector<1x9x128xf32>,
    return
  }
  func.func @transform_0(%arg0: i32, %arg1: i32) -> (i32, i32, i32) {
    %c0_i32 = arith.constant 0 : i32
    %c0_i32_0 = arith.constant 0 : i32
    return %arg0, %c0_i32, %arg1 : i32, i32, i32
  }
  func.func @transform_1(%arg0: i32, %arg1: i32) -> (i32, i32, i32) {
    %c0_i32 = arith.constant 0 : i32
    %c0_i32_0 = arith.constant 0 : i32
    return %arg0, %c0_i32, %arg1 : i32, i32, i32
  }
}

module attributes {stable_mosaic.version = 11 : i64} {
  func.func @_conv_tap_kernel(%arg0: i32, %arg1: i32, %arg2: memref<1x8x19x128xf32, #tpu.memory_space<vmem>>, %arg3: memref<1x8x19x128xf32, #tpu.memory_space<vmem>>, %arg4: memref<16x128x128xf32, #tpu.memory_space<vmem>>, %arg5: memref<1x128xf32, #tpu.memory_space<vmem>>, %arg6: memref<1x8x16x128xf32, #tpu.memory_space<vmem>>, %arg7: memref<11x19x128xf32, #tpu.memory_space<vmem>>) attributes {dimension_semantics = [#tpu.dimension_semantics<parallel>, #tpu.dimension_semantics<parallel>], iteration_bounds = array<i64: 2, 1>, scalar_prefetch = 0 : i64, scratch_operands = 1 : i64, tpu.core_type = #tpu.core_type<tc>, window_params = [{transform_indices = @transform_0, window_bounds = array<i64: 1, 8, 19, 128>}, {transform_indices = @transform_1, window_bounds = array<i64: 1, 8, 19, 128>}, {pipeline_mode = #tpu.pipeline_mode<synchronous>, transform_indices = @transform_2, window_bounds = array<i64: 16, 128, 128>}, {pipeline_mode = #tpu.pipeline_mode<synchronous>, transform_indices = @transform_3, window_bounds = array<i64: 1, 128>}, {transform_indices = @transform_4, window_bounds = array<i64: 1, 8, 16, 128>}]} {
    %c0 = arith.constant 0 : index
    %c0_0 = arith.constant 0 : index
    %c0_1 = arith.constant 0 : index
    %c0_2 = arith.constant 0 : index
    %0 = vector.load %arg2[%c0, %c0_0, %c0_1, %c0_2] : memref<1x8x19x128xf32, #tpu.memory_space<vmem>>, vector<1x8x19x128xf32>
    %1 = vector.shape_cast %0 : vector<1x8x19x128xf32> to vector<8x19x128xf32>
    %c0_3 = arith.constant 0 : index
    %c0_4 = arith.constant 0 : index
    %c0_5 = arith.constant 0 : index
    %2 = vector.load %arg7[%c0_3, %c0_4, %c0_5] : memref<11x19x128xf32, #tpu.memory_space<vmem>>, vector<8x19x128xf32>
    tpu.vector_store %arg7[%c0_3, %c0_4, %c0_5], %1 {strides = array<i32>} : memref<11x19x128xf32, #tpu.memory_space<vmem>>, vector<8x19x128xf32>,
    %c0_6 = arith.constant 0 : index
    %c0_7 = arith.constant 0 : index
    %c0_8 = arith.constant 0 : index
    %c0_9 = arith.constant 0 : index
    %3 = vector.load %arg3[%c0_6, %c0_7, %c0_8, %c0_9] : memref<1x8x19x128xf32, #tpu.memory_space<vmem>>, vector<1x3x19x128xf32>
    %4 = vector.shape_cast %3 : vector<1x3x19x128xf32> to vector<3x19x128xf32>
    %c8 = arith.constant 8 : index
    %c0_10 = arith.constant 0 : index
    %c0_11 = arith.constant 0 : index
    %5 = vector.load %arg7[%c8, %c0_10, %c0_11] : memref<11x19x128xf32, #tpu.memory_space<vmem>>, vector<3x19x128xf32>
    tpu.vector_store %arg7[%c8, %c0_10, %c0_11], %4 {strides = array<i32>} : memref<11x19x128xf32, #tpu.memory_space<vmem>>, vector<3x19x128xf32>,
    %cst = arith.constant 0.000000e+00 : f32
    %6 = vector.broadcast %cst : f32 to vector<128x128xf32>
    %c0_12 = arith.constant 0 : index
    %c0_13 = arith.constant 0 : index
    %c0_14 = arith.constant 0 : index
    %7 = vector.load %arg7[%c0_12, %c0_13, %c0_14] : memref<11x19x128xf32, #tpu.memory_space<vmem>>, vector<8x16x128xf32>
    %8 = vector.shape_cast %7 : vector<8x16x128xf32> to vector<128x128xf32>
    %c0_15 = arith.constant 0 : index
    %c0_16 = arith.constant 0 : index
    %c0_17 = arith.constant 0 : index
    %9 = vector.load %arg4[%c0_15, %c0_16, %c0_17] : memref<16x128x128xf32, #tpu.memory_space<vmem>>, vector<1x128x128xf32>
    %10 = vector.shape_cast %9 : vector<1x128x128xf32> to vector<128x128xf32>
    %cst_18 = arith.constant dense<0.000000e+00> : vector<128x128xf32>
    %11 = tpu.matmul %8, %10, %cst_18 {dimension_numbers = #tpu.dot_dimension_numbers<[1], [0], [0], [1], [0, 0, 1, 1], [], []>} : vector<128x128xf32>, vector<128x128xf32>, vector<128x128xf32> -> vector<128x128xf32>
    %12 = arith.addf %6, %11 : vector<128x128xf32>
    %c0_19 = arith.constant 0 : index
    %c1 = arith.constant 1 : index
    %c0_20 = arith.constant 0 : index
    %13 = vector.load %arg7[%c0_19, %c1, %c0_20] : memref<11x19x128xf32, #tpu.memory_space<vmem>>, vector<8x16x128xf32>
    %14 = vector.shape_cast %13 : vector<8x16x128xf32> to vector<128x128xf32>
    %c1_21 = arith.constant 1 : index
    %c0_22 = arith.constant 0 : index
    %c0_23 = arith.constant 0 : index
    %15 = vector.load %arg4[%c1_21, %c0_22, %c0_23] : memref<16x128x128xf32, #tpu.memory_space<vmem>>, vector<1x128x128xf32>
    %16 = vector.shape_cast %15 : vector<1x128x128xf32> to vector<128x128xf32>
    %cst_24 = arith.constant dense<0.000000e+00> : vector<128x128xf32>
    %17 = tpu.matmul %14, %16, %cst_24 {dimension_numbers = #tpu.dot_dimension_numbers<[1], [0], [0], [1], [0, 0, 1, 1], [], []>} : vector<128x128xf32>, vector<128x128xf32>, vector<128x128xf32> -> vector<128x128xf32>
    %18 = arith.addf %12, %17 : vector<128x128xf32>
    %c0_25 = arith.constant 0 : index
    %c2 = arith.constant 2 : index
    %c0_26 = arith.constant 0 : index
    %19 = vector.load %arg7[%c0_25, %c2, %c0_26] : memref<11x19x128xf32, #tpu.memory_space<vmem>>, vector<8x16x128xf32>
    %20 = vector.shape_cast %19 : vector<8x16x128xf32> to vector<128x128xf32>
    %c2_27 = arith.constant 2 : index
    %c0_28 = arith.constant 0 : index
    %c0_29 = arith.constant 0 : index
    %21 = vector.load %arg4[%c2_27, %c0_28, %c0_29] : memref<16x128x128xf32, #tpu.memory_space<vmem>>, vector<1x128x128xf32>
    %22 = vector.shape_cast %21 : vector<1x128x128xf32> to vector<128x128xf32>
    %cst_30 = arith.constant dense<0.000000e+00> : vector<128x128xf32>
    %23 = tpu.matmul %20, %22, %cst_30 {dimension_numbers = #tpu.dot_dimension_numbers<[1], [0], [0], [1], [0, 0, 1, 1], [], []>} : vector<128x128xf32>, vector<128x128xf32>, vector<128x128xf32> -> vector<128x128xf32>
    %24 = arith.addf %18, %23 : vector<128x128xf32>
    %c0_31 = arith.constant 0 : index
    %c3 = arith.constant 3 : index
    %c0_32 = arith.constant 0 : index
    %25 = vector.load %arg7[%c0_31, %c3, %c0_32] : memref<11x19x128xf32, #tpu.memory_space<vmem>>, vector<8x16x128xf32>
    %26 = vector.shape_cast %25 : vector<8x16x128xf32> to vector<128x128xf32>
    %c3_33 = arith.constant 3 : index
    %c0_34 = arith.constant 0 : index
    %c0_35 = arith.constant 0 : index
    %27 = vector.load %arg4[%c3_33, %c0_34, %c0_35] : memref<16x128x128xf32, #tpu.memory_space<vmem>>, vector<1x128x128xf32>
    %28 = vector.shape_cast %27 : vector<1x128x128xf32> to vector<128x128xf32>
    %cst_36 = arith.constant dense<0.000000e+00> : vector<128x128xf32>
    %29 = tpu.matmul %26, %28, %cst_36 {dimension_numbers = #tpu.dot_dimension_numbers<[1], [0], [0], [1], [0, 0, 1, 1], [], []>} : vector<128x128xf32>, vector<128x128xf32>, vector<128x128xf32> -> vector<128x128xf32>
    %30 = arith.addf %24, %29 : vector<128x128xf32>
    %c1_37 = arith.constant 1 : index
    %c0_38 = arith.constant 0 : index
    %c0_39 = arith.constant 0 : index
    %31 = vector.load %arg7[%c1_37, %c0_38, %c0_39] : memref<11x19x128xf32, #tpu.memory_space<vmem>>, vector<8x16x128xf32>
    %32 = vector.shape_cast %31 : vector<8x16x128xf32> to vector<128x128xf32>
    %c4 = arith.constant 4 : index
    %c0_40 = arith.constant 0 : index
    %c0_41 = arith.constant 0 : index
    %33 = vector.load %arg4[%c4, %c0_40, %c0_41] : memref<16x128x128xf32, #tpu.memory_space<vmem>>, vector<1x128x128xf32>
    %34 = vector.shape_cast %33 : vector<1x128x128xf32> to vector<128x128xf32>
    %cst_42 = arith.constant dense<0.000000e+00> : vector<128x128xf32>
    %35 = tpu.matmul %32, %34, %cst_42 {dimension_numbers = #tpu.dot_dimension_numbers<[1], [0], [0], [1], [0, 0, 1, 1], [], []>} : vector<128x128xf32>, vector<128x128xf32>, vector<128x128xf32> -> vector<128x128xf32>
    %36 = arith.addf %30, %35 : vector<128x128xf32>
    %c1_43 = arith.constant 1 : index
    %c1_44 = arith.constant 1 : index
    %c0_45 = arith.constant 0 : index
    %37 = vector.load %arg7[%c1_43, %c1_44, %c0_45] : memref<11x19x128xf32, #tpu.memory_space<vmem>>, vector<8x16x128xf32>
    %38 = vector.shape_cast %37 : vector<8x16x128xf32> to vector<128x128xf32>
    %c5 = arith.constant 5 : index
    %c0_46 = arith.constant 0 : index
    %c0_47 = arith.constant 0 : index
    %39 = vector.load %arg4[%c5, %c0_46, %c0_47] : memref<16x128x128xf32, #tpu.memory_space<vmem>>, vector<1x128x128xf32>
    %40 = vector.shape_cast %39 : vector<1x128x128xf32> to vector<128x128xf32>
    %cst_48 = arith.constant dense<0.000000e+00> : vector<128x128xf32>
    %41 = tpu.matmul %38, %40, %cst_48 {dimension_numbers = #tpu.dot_dimension_numbers<[1], [0], [0], [1], [0, 0, 1, 1], [], []>} : vector<128x128xf32>, vector<128x128xf32>, vector<128x128xf32> -> vector<128x128xf32>
    %42 = arith.addf %36, %41 : vector<128x128xf32>
    %c1_49 = arith.constant 1 : index
    %c2_50 = arith.constant 2 : index
    %c0_51 = arith.constant 0 : index
    %43 = vector.load %arg7[%c1_49, %c2_50, %c0_51] : memref<11x19x128xf32, #tpu.memory_space<vmem>>, vector<8x16x128xf32>
    %44 = vector.shape_cast %43 : vector<8x16x128xf32> to vector<128x128xf32>
    %c6 = arith.constant 6 : index
    %c0_52 = arith.constant 0 : index
    %c0_53 = arith.constant 0 : index
    %45 = vector.load %arg4[%c6, %c0_52, %c0_53] : memref<16x128x128xf32, #tpu.memory_space<vmem>>, vector<1x128x128xf32>
    %46 = vector.shape_cast %45 : vector<1x128x128xf32> to vector<128x128xf32>
    %cst_54 = arith.constant dense<0.000000e+00> : vector<128x128xf32>
    %47 = tpu.matmul %44, %46, %cst_54 {dimension_numbers = #tpu.dot_dimension_numbers<[1], [0], [0], [1], [0, 0, 1, 1], [], []>} : vector<128x128xf32>, vector<128x128xf32>, vector<128x128xf32> -> vector<128x128xf32>
    %48 = arith.addf %42, %47 : vector<128x128xf32>
    %c1_55 = arith.constant 1 : index
    %c3_56 = arith.constant 3 : index
    %c0_57 = arith.constant 0 : index
    %49 = vector.load %arg7[%c1_55, %c3_56, %c0_57] : memref<11x19x128xf32, #tpu.memory_space<vmem>>, vector<8x16x128xf32>
    %50 = vector.shape_cast %49 : vector<8x16x128xf32> to vector<128x128xf32>
    %c7 = arith.constant 7 : index
    %c0_58 = arith.constant 0 : index
    %c0_59 = arith.constant 0 : index
    %51 = vector.load %arg4[%c7, %c0_58, %c0_59] : memref<16x128x128xf32, #tpu.memory_space<vmem>>, vector<1x128x128xf32>
    %52 = vector.shape_cast %51 : vector<1x128x128xf32> to vector<128x128xf32>
    %cst_60 = arith.constant dense<0.000000e+00> : vector<128x128xf32>
    %53 = tpu.matmul %50, %52, %cst_60 {dimension_numbers = #tpu.dot_dimension_numbers<[1], [0], [0], [1], [0, 0, 1, 1], [], []>} : vector<128x128xf32>, vector<128x128xf32>, vector<128x128xf32> -> vector<128x128xf32>
    %54 = arith.addf %48, %53 : vector<128x128xf32>
    %c2_61 = arith.constant 2 : index
    %c0_62 = arith.constant 0 : index
    %c0_63 = arith.constant 0 : index
    %55 = vector.load %arg7[%c2_61, %c0_62, %c0_63] : memref<11x19x128xf32, #tpu.memory_space<vmem>>, vector<8x16x128xf32>
    %56 = vector.shape_cast %55 : vector<8x16x128xf32> to vector<128x128xf32>
    %c8_64 = arith.constant 8 : index
    %c0_65 = arith.constant 0 : index
    %c0_66 = arith.constant 0 : index
    %57 = vector.load %arg4[%c8_64, %c0_65, %c0_66] : memref<16x128x128xf32, #tpu.memory_space<vmem>>, vector<1x128x128xf32>
    %58 = vector.shape_cast %57 : vector<1x128x128xf32> to vector<128x128xf32>
    %cst_67 = arith.constant dense<0.000000e+00> : vector<128x128xf32>
    %59 = tpu.matmul %56, %58, %cst_67 {dimension_numbers = #tpu.dot_dimension_numbers<[1], [0], [0], [1], [0, 0, 1, 1], [], []>} : vector<128x128xf32>, vector<128x128xf32>, vector<128x128xf32> -> vector<128x128xf32>
    %60 = arith.addf %54, %59 : vector<128x128xf32>
    %c2_68 = arith.constant 2 : index
    %c1_69 = arith.constant 1 : index
    %c0_70 = arith.constant 0 : index
    %61 = vector.load %arg7[%c2_68, %c1_69, %c0_70] : memref<11x19x128xf32, #tpu.memory_space<vmem>>, vector<8x16x128xf32>
    %62 = vector.shape_cast %61 : vector<8x16x128xf32> to vector<128x128xf32>
    %c9 = arith.constant 9 : index
    %c0_71 = arith.constant 0 : index
    %c0_72 = arith.constant 0 : index
    %63 = vector.load %arg4[%c9, %c0_71, %c0_72] : memref<16x128x128xf32, #tpu.memory_space<vmem>>, vector<1x128x128xf32>
    %64 = vector.shape_cast %63 : vector<1x128x128xf32> to vector<128x128xf32>
    %cst_73 = arith.constant dense<0.000000e+00> : vector<128x128xf32>
    %65 = tpu.matmul %62, %64, %cst_73 {dimension_numbers = #tpu.dot_dimension_numbers<[1], [0], [0], [1], [0, 0, 1, 1], [], []>} : vector<128x128xf32>, vector<128x128xf32>, vector<128x128xf32> -> vector<128x128xf32>
    %66 = arith.addf %60, %65 : vector<128x128xf32>
    %c2_74 = arith.constant 2 : index
    %c2_75 = arith.constant 2 : index
    %c0_76 = arith.constant 0 : index
    %67 = vector.load %arg7[%c2_74, %c2_75, %c0_76] : memref<11x19x128xf32, #tpu.memory_space<vmem>>, vector<8x16x128xf32>
    %68 = vector.shape_cast %67 : vector<8x16x128xf32> to vector<128x128xf32>
    %c10 = arith.constant 10 : index
    %c0_77 = arith.constant 0 : index
    %c0_78 = arith.constant 0 : index
    %69 = vector.load %arg4[%c10, %c0_77, %c0_78] : memref<16x128x128xf32, #tpu.memory_space<vmem>>, vector<1x128x128xf32>
    %70 = vector.shape_cast %69 : vector<1x128x128xf32> to vector<128x128xf32>
    %cst_79 = arith.constant dense<0.000000e+00> : vector<128x128xf32>
    %71 = tpu.matmul %68, %70, %cst_79 {dimension_numbers = #tpu.dot_dimension_numbers<[1], [0], [0], [1], [0, 0, 1, 1], [], []>} : vector<128x128xf32>, vector<128x128xf32>, vector<128x128xf32> -> vector<128x128xf32>
    %72 = arith.addf %66, %71 : vector<128x128xf32>
    %c2_80 = arith.constant 2 : index
    %c3_81 = arith.constant 3 : index
    %c0_82 = arith.constant 0 : index
    %73 = vector.load %arg7[%c2_80, %c3_81, %c0_82] : memref<11x19x128xf32, #tpu.memory_space<vmem>>, vector<8x16x128xf32>
    %74 = vector.shape_cast %73 : vector<8x16x128xf32> to vector<128x128xf32>
    %c11 = arith.constant 11 : index
    %c0_83 = arith.constant 0 : index
    %c0_84 = arith.constant 0 : index
    %75 = vector.load %arg4[%c11, %c0_83, %c0_84] : memref<16x128x128xf32, #tpu.memory_space<vmem>>, vector<1x128x128xf32>
    %76 = vector.shape_cast %75 : vector<1x128x128xf32> to vector<128x128xf32>
    %cst_85 = arith.constant dense<0.000000e+00> : vector<128x128xf32>
    %77 = tpu.matmul %74, %76, %cst_85 {dimension_numbers = #tpu.dot_dimension_numbers<[1], [0], [0], [1], [0, 0, 1, 1], [], []>} : vector<128x128xf32>, vector<128x128xf32>, vector<128x128xf32> -> vector<128x128xf32>
    %78 = arith.addf %72, %77 : vector<128x128xf32>
    %c3_86 = arith.constant 3 : index
    %c0_87 = arith.constant 0 : index
    %c0_88 = arith.constant 0 : index
    %79 = vector.load %arg7[%c3_86, %c0_87, %c0_88] : memref<11x19x128xf32, #tpu.memory_space<vmem>>, vector<8x16x128xf32>
    %80 = vector.shape_cast %79 : vector<8x16x128xf32> to vector<128x128xf32>
    %c12 = arith.constant 12 : index
    %c0_89 = arith.constant 0 : index
    %c0_90 = arith.constant 0 : index
    %81 = vector.load %arg4[%c12, %c0_89, %c0_90] : memref<16x128x128xf32, #tpu.memory_space<vmem>>, vector<1x128x128xf32>
    %82 = vector.shape_cast %81 : vector<1x128x128xf32> to vector<128x128xf32>
    %cst_91 = arith.constant dense<0.000000e+00> : vector<128x128xf32>
    %83 = tpu.matmul %80, %82, %cst_91 {dimension_numbers = #tpu.dot_dimension_numbers<[1], [0], [0], [1], [0, 0, 1, 1], [], []>} : vector<128x128xf32>, vector<128x128xf32>, vector<128x128xf32> -> vector<128x128xf32>
    %84 = arith.addf %78, %83 : vector<128x128xf32>
    %c3_92 = arith.constant 3 : index
    %c1_93 = arith.constant 1 : index
    %c0_94 = arith.constant 0 : index
    %85 = vector.load %arg7[%c3_92, %c1_93, %c0_94] : memref<11x19x128xf32, #tpu.memory_space<vmem>>, vector<8x16x128xf32>
    %86 = vector.shape_cast %85 : vector<8x16x128xf32> to vector<128x128xf32>
    %c13 = arith.constant 13 : index
    %c0_95 = arith.constant 0 : index
    %c0_96 = arith.constant 0 : index
    %87 = vector.load %arg4[%c13, %c0_95, %c0_96] : memref<16x128x128xf32, #tpu.memory_space<vmem>>, vector<1x128x128xf32>
    %88 = vector.shape_cast %87 : vector<1x128x128xf32> to vector<128x128xf32>
    %cst_97 = arith.constant dense<0.000000e+00> : vector<128x128xf32>
    %89 = tpu.matmul %86, %88, %cst_97 {dimension_numbers = #tpu.dot_dimension_numbers<[1], [0], [0], [1], [0, 0, 1, 1], [], []>} : vector<128x128xf32>, vector<128x128xf32>, vector<128x128xf32> -> vector<128x128xf32>
    %90 = arith.addf %84, %89 : vector<128x128xf32>
    %c3_98 = arith.constant 3 : index
    %c2_99 = arith.constant 2 : index
    %c0_100 = arith.constant 0 : index
    %91 = vector.load %arg7[%c3_98, %c2_99, %c0_100] : memref<11x19x128xf32, #tpu.memory_space<vmem>>, vector<8x16x128xf32>
    %92 = vector.shape_cast %91 : vector<8x16x128xf32> to vector<128x128xf32>
    %c14 = arith.constant 14 : index
    %c0_101 = arith.constant 0 : index
    %c0_102 = arith.constant 0 : index
    %93 = vector.load %arg4[%c14, %c0_101, %c0_102] : memref<16x128x128xf32, #tpu.memory_space<vmem>>, vector<1x128x128xf32>
    %94 = vector.shape_cast %93 : vector<1x128x128xf32> to vector<128x128xf32>
    %cst_103 = arith.constant dense<0.000000e+00> : vector<128x128xf32>
    %95 = tpu.matmul %92, %94, %cst_103 {dimension_numbers = #tpu.dot_dimension_numbers<[1], [0], [0], [1], [0, 0, 1, 1], [], []>} : vector<128x128xf32>, vector<128x128xf32>, vector<128x128xf32> -> vector<128x128xf32>
    %96 = arith.addf %90, %95 : vector<128x128xf32>
    %c3_104 = arith.constant 3 : index
    %c3_105 = arith.constant 3 : index
    %c0_106 = arith.constant 0 : index
    %97 = vector.load %arg7[%c3_104, %c3_105, %c0_106] : memref<11x19x128xf32, #tpu.memory_space<vmem>>, vector<8x16x128xf32>
    %98 = vector.shape_cast %97 : vector<8x16x128xf32> to vector<128x128xf32>
    %c15 = arith.constant 15 : index
    %c0_107 = arith.constant 0 : index
    %c0_108 = arith.constant 0 : index
    %99 = vector.load %arg4[%c15, %c0_107, %c0_108] : memref<16x128x128xf32, #tpu.memory_space<vmem>>, vector<1x128x128xf32>
    %100 = vector.shape_cast %99 : vector<1x128x128xf32> to vector<128x128xf32>
    %cst_109 = arith.constant dense<0.000000e+00> : vector<128x128xf32>
    %101 = tpu.matmul %98, %100, %cst_109 {dimension_numbers = #tpu.dot_dimension_numbers<[1], [0], [0], [1], [0, 0, 1, 1], [], []>} : vector<128x128xf32>, vector<128x128xf32>, vector<128x128xf32> -> vector<128x128xf32>
    %102 = arith.addf %96, %101 : vector<128x128xf32>
    %c0_110 = arith.constant 0 : index
    %c0_111 = arith.constant 0 : index
    %103 = vector.load %arg5[%c0_110, %c0_111] : memref<1x128xf32, #tpu.memory_space<vmem>>, vector<1x128xf32>
    %104 = vector.broadcast %103 : vector<1x128xf32> to vector<128x128xf32>
    %105 = arith.addf %102, %104 : vector<128x128xf32>
    %106 = vector.shape_cast %105 : vector<128x128xf32> to vector<1x8x16x128xf32>
    %c0_112 = arith.constant 0 : index
    %c0_113 = arith.constant 0 : index
    %c0_114 = arith.constant 0 : index
    %c0_115 = arith.constant 0 : index
    %107 = vector.load %arg6[%c0_112, %c0_113, %c0_114, %c0_115] : memref<1x8x16x128xf32, #tpu.memory_space<vmem>>, vector<1x8x16x128xf32>
    tpu.vector_store %arg6[%c0_112, %c0_113, %c0_114, %c0_115], %106 {strides = array<i32>} : memref<1x8x16x128xf32, #tpu.memory_space<vmem>>, vector<1x8x16x128xf32>,
    return
  }
  func.func @transform_0(%arg0: i32, %arg1: i32) -> (i32, i32, i32, i32) {
    %c0_i32 = arith.constant 0 : i32
    %c0_i32_0 = arith.constant 0 : i32
    %c0_i32_1 = arith.constant 0 : i32
    return %arg0, %arg1, %c0_i32, %c0_i32_0 : i32, i32, i32, i32
  }
  func.func @transform_1(%arg0: i32, %arg1: i32) -> (i32, i32, i32, i32) {
    %c1_i32 = arith.constant 1 : i32
    %0 = arith.addi %arg1, %c1_i32 : i32
    %c1_i32_0 = arith.constant 1 : i32
    %1 = arith.muli %0, %c1_i32_0 : i32
    %c0_i32 = arith.constant 0 : i32
    %c0_i32_1 = arith.constant 0 : i32
    %c0_i32_2 = arith.constant 0 : i32
    return %arg0, %1, %c0_i32, %c0_i32_1 : i32, i32, i32, i32
  }
  func.func @transform_2(%arg0: i32, %arg1: i32) -> (i32, i32, i32) {
    %c0_i32 = arith.constant 0 : i32
    %c0_i32_0 = arith.constant 0 : i32
    %c0_i32_1 = arith.constant 0 : i32
    %c0_i32_2 = arith.constant 0 : i32
    return %c0_i32, %c0_i32_0, %c0_i32_1 : i32, i32, i32
  }
  func.func @transform_3(%arg0: i32, %arg1: i32) -> (i32, i32) {
    %c0_i32 = arith.constant 0 : i32
    %c0_i32_0 = arith.constant 0 : i32
    %c0_i32_1 = arith.constant 0 : i32
    return %c0_i32, %c0_i32_0 : i32, i32
  }
  func.func @transform_4(%arg0: i32, %arg1: i32) -> (i32, i32, i32, i32) {
    %c0_i32 = arith.constant 0 : i32
    %c0_i32_0 = arith.constant 0 : i32
    %c0_i32_1 = arith.constant 0 : i32
    return %arg0, %arg1, %c0_i32, %c0_i32_0 : i32, i32, i32, i32
  }
}

</mosaic_0001>

<bundles_post_ra>
// kernel: nlayer_discriminator.8
= control target key start
LH: loop header
LB: loop body
LE: loop exit
PB: predicated region body
PF: predicated region fallthrough
CT: control target
= control target key end

     0   :  { %s2906_s15 = smov 0   ;;  %s2908_s16 = smov 0   ;;  %s3579_s0 = inlined_call_operand.vmem [shape: f32[2,24,17,12], index: 0, kind: input, shape index: {}, may-alias: {0,1}]   ;;  %s3580_s1 = inlined_call_operand.vmem [shape: f32[2,24,17,12], index: 1, kind: input, shape index: {}, may-alias: {0,1}]   ;;  %s3581_s2 = inlined_call_operand.vmem [shape: f32[4,12,16], index: 2, kind: input, shape index: {}]   ;;  %s3582_s3 = inlined_call_operand.vmem [shape: f32[1,16], index: 3, kind: input, shape index: {}]   ;;  %s3583_s4 = inlined_call_operand.vmem [shape: f32[2,16,16,16], index: 4, kind: output, shape index: {}]  }
   0x1   :  { %s2910_s17 = smov 0  }
   0x2 LB: > { %s26_s18 = sadd.s32 1, %s2874_s16  ;;  %p2215_p0 = scmp.ge.s32.totalorder %s2878_s17, 1  ;;  %s2878_s17 = sphi %s2910_s17, %s14_s17   ;;  %s2874_s16 = sphi %s2908_s16, %s3587_s16   ;;  %s2870_s15 = sphi %s2906_s15, %s3586_s15  }
   0x3   : > { %p28_p1 = scmp.ge.s32.totalorder %s26_s18, 2  ;;  %p220_p2 = scmp.lt.s32.totalorder %s2878_s17, 3 }
   0x5   : > { %s3589_s18 = smov (%p28_p1, %s26_s18), 0  ;;  %p221_p3 = pnand %p2215_p0, %p220_p2 }
   0x6   : > { %v2220_v0 = vld [vmem:[%s3581_s2 + $0x10] sm:$0xff] (!%p221_p3)  ;;  %v2221_v1 = vld [vmem:[%s3581_s2 + $0x18] sm:$0xf] (!%p221_p3)  ;;  %vm590_vm0 = vcmask (!%p221_p3), 1043456   ;;  %v2288_v2 = vld [vmem:[%s3581_s2 + $0x20] sm:$0xff] (!%p221_p3)  ;;  %vm2880_vm1 = vmmov (!%p221_p3), 1  }
   0x7   : > { %224 = sbr.rel (%p221_p3) target bundleno = 377 (0x179), region = 36  ;;  %v2708_v3 = vpack.c.bf16 (!%p221_p3), %v2221_v1, %v2220_v0  ;;  %vm2933_vm2 = vmpackc.low (!%p221_p3), %vm590_vm0, %vm2880_vm1  ;;  %v2289_v5 = vld [vmem:[%s3581_s2 + $0x28] sm:$0xf] (!%p221_p3)  ;;  %p279_p4 = scmp.lt.s32.totalorder (!%p221_p3), %s2870_s15, 1  ;;  %v457_v6 = vld [vmem:[%s3581_s2] sm:$0xff] (!%p221_p3)  ;;  %vm368_vm3 = vcmask (!%p221_p3), 97280  }
   0x8   : > { %v2720_v7 = vpack.c.bf16 (!%p221_p3), %v2289_v5, %v2288_v2  ;;  %v458_v8 = vld [vmem:[%s3581_s2 + $0x8] sm:$0xf] (!%p221_p3)  ;;  %v2323_v9 = vld [vmem:[%s3581_s2 + $0x30] sm:$0xff] (!%p221_p3)  ;;  %v2324_v10 = vld [vmem:[%s3581_s2 + $0x38] sm:$0xf] (!%p221_p3)  ;;  %vm371_vm4 = vcmask (!%p221_p3), 90112  }
   0x9   : > { %2710 = vmatprep.subr.msk.bf16.mxu1 (!%p221_p3), %vm2933_vm2, %v2708_v3  ;;  %v2956_v11 = vpack.c.bf16 (!%p221_p3), %v458_v8, %v457_v6  ;;  %v2958_v12 = vpack.c.bf16 (!%p221_p3), %v2324_v10, %v2323_v9  ;;  %vm2061_vm6 = vcmask (!%p221_p3), 130048  }
   0xa   : > { %2722 = vmatprep.subr.msk.bf16.mxu0 (!%p221_p3), %vm2933_vm2, %v2720_v7  ;;  %2713 = vmatpush3.bf16.msk.msra.mxu1 (!%p221_p3), %vm2933_vm2, %v2708_v3 }
   0xb   : > { %2725 = vmatpush3.bf16.msk.msra.mxu0 (!%p221_p3), %vm2933_vm2, %v2720_v7  ;;  %2716 = vmatprep.subr.msk.bf16.mxu1 (!%p221_p3), %vm2933_vm2, %v2956_v11 }
   0xc   : > { %2728 = vmatprep.subr.msk.bf16.mxu0 (!%p221_p3), %vm2933_vm2, %v2958_v12 }
   0xe   : > { %s3591_s15 = smov (!%p279_p4, %s2870_s15), 1 }
   0xf   : > { %s2828_s9 = smul.u32 576, %s3591_s15  ;;  %s2363_s23 = sshll.u32 %s3591_s15, 8 }
  0x10   : > { %s3474_s26 = scalar_lea.vmem %s3583_s4, %s2363_s23 }
  0x11   : > { %s2978_s12 = scalar_lea.vmem %s3579_s0, %s2828_s9  ;;  %s2362_s13 = sadd.s32 384, %s2828_s9 }
  0x12   : > { %v320_v13 = vld [vmem:[%s2978_s12] sm:$0xff]  ;;  %v321_v14 = vld [vmem:[%s2978_s12 + $0x8] sm:$0xff]  ;;  %v323_v15 = vld [vmem:[%s2978_s12 + $0x18] sm:$0xff]  ;;  %s3144_s20 = scalar_lea.vmem %s3580_s1, %s2362_s13 }
  0x13   : > { %369 = vst.msk [vmem:[#allocation2] sm:$0xff] %vm368_vm3, %v320_v13  ;;  %370 = vst.msk [vmem:[#allocation2 + $0x8] sm:$0xff] %vm368_vm3, %v321_v14  ;;  %v322_v16 = vld [vmem:[%s2978_s12 + $0x10] sm:$0x1]  ;;  %v324_v17 = vld [vmem:[%s2978_s12 + $0x20] sm:$0xff] }
  0x14   : > { %373 = vst.msk [vmem:[#allocation2 + $0x18] sm:$0xff] %vm368_vm3, %v323_v15  ;;  %v326_v18 = vld [vmem:[%s2978_s12 + $0x30] sm:$0xff]  ;;  %374 = vst.msk [vmem:[#allocation2 + $0x20] sm:$0xff] %vm368_vm3, %v324_v17  ;;  %v325_v19 = vld [vmem:[%s2978_s12 + $0x28] sm:$0x1] }
  0x15   : > { %372 = vst.msk [vmem:[#allocation2 + $0x10] sm:$0x1] %vm371_vm4, %v322_v16  ;;  %v327_v20 = vld [vmem:[%s2978_s12 + $0x38] sm:$0xff]  ;;  %v329_v21 = vld [vmem:[%s2978_s12 + $0x48] sm:$0xff]  ;;  %375 = vst.msk [vmem:[#allocation2 + $0x28] sm:$0x1] %vm371_vm4, %v325_v19 }
  0x16   : > { %376 = vst.msk [vmem:[#allocation2 + $0x30] sm:$0xff] %vm368_vm3, %v326_v18  ;;  %377 = vst.msk [vmem:[#allocation2 + $0x38] sm:$0xff] %vm368_vm3, %v327_v20  ;;  %v328_v22 = vld [vmem:[%s2978_s12 + $0x40] sm:$0x1]  ;;  %v330_v23 = vld [vmem:[%s2978_s12 + $0x50] sm:$0xff] }
  0x17   : > { %379 = vst.msk [vmem:[#allocation2 + $0x48] sm:$0xff] %vm368_vm3, %v329_v21  ;;  %v332_v24 = vld [vmem:[%s2978_s12 + $0x60] sm:$0xff]  ;;  %380 = vst.msk [vmem:[#allocation2 + $0x50] sm:$0xff] %vm368_vm3, %v330_v23  ;;  %v331_v25 = vld [vmem:[%s2978_s12 + $0x58] sm:$0x1] }
  0x18   : > { %378 = vst.msk [vmem:[#allocation2 + $0x40] sm:$0x1] %vm371_vm4, %v328_v22  ;;  %v333_v26 = vld [vmem:[%s2978_s12 + $0x68] sm:$0xff]  ;;  %v335_v27 = vld [vmem:[%s2978_s12 + $0x78] sm:$0xff]  ;;  %381 = vst.msk [vmem:[#allocation2 + $0x58] sm:$0x1] %vm371_vm4, %v331_v25 }
  0x19   : > { %382 = vst.msk [vmem:[#allocation2 + $0x60] sm:$0xff] %vm368_vm3, %v332_v24  ;;  %383 = vst.msk [vmem:[#allocation2 + $0x68] sm:$0xff] %vm368_vm3, %v333_v26  ;;  %v334_v28 = vld [vmem:[%s2978_s12 + $0x70] sm:$0x1]  ;;  %v336_v29 = vld [vmem:[%s2978_s12 + $0x80] sm:$0xff] }
  0x1a   : > { %385 = vst.msk [vmem:[#allocation2 + $0x78] sm:$0xff] %vm368_vm3, %v335_v27  ;;  %v338_v30 = vld [vmem:[%s2978_s12 + $0x90] sm:$0xff]  ;;  %386 = vst.msk [vmem:[#allocation2 + $0x80] sm:$0xff] %vm368_vm3, %v336_v29  ;;  %v337_v31 = vld [vmem:[%s2978_s12 + $0x88] sm:$0x1] }
  0x1b   : > { %384 = vst.msk [vmem:[#allocation2 + $0x70] sm:$0x1] %vm371_vm4, %v334_v28  ;;  %v339_v32 = vld [vmem:[%s2978_s12 + $0x98] sm:$0xff]  ;;  %v341_v33 = vld [vmem:[%s2978_s12 + $0xa8] sm:$0xff]  ;;  %387 = vst.msk [vmem:[#allocation2 + $0x88] sm:$0x1] %vm371_vm4, %v337_v31 }
  0x1c   : > { %388 = vst.msk [vmem:[#allocation2 + $0x90] sm:$0xff] %vm368_vm3, %v338_v30  ;;  %389 = vst.msk [vmem:[#allocation2 + $0x98] sm:$0xff] %vm368_vm3, %v339_v32  ;;  %v340_v34 = vld [vmem:[%s2978_s12 + $0xa0] sm:$0x1]  ;;  %v342_v35 = vld [vmem:[%s2978_s12 + $0xb0] sm:$0xff] }
  0x1d   : > { %391 = vst.msk [vmem:[#allocation2 + $0xa8] sm:$0xff] %vm368_vm3, %v341_v33  ;;  %v344_v36 = vld [vmem:[%s2978_s12 + $0xc0] sm:$0xff]  ;;  %v3025_v38 = vld [vmem:[#allocation2 + $0x18] sm:$0xff]  ;;  %392 = vst.msk [vmem:[#allocation2 + $0xb0] sm:$0xff] %vm368_vm3, %v342_v35 }
  0x1e   : > { %v459_v37 = vld [vmem:[#allocation2 + $0x1] sm:$0xff]  ;;  %390 = vst.msk [vmem:[#allocation2 + $0xa0] sm:$0x1] %vm371_vm4, %v340_v34  ;;  %v343_v39 = vld [vmem:[%s2978_s12 + $0xb8] sm:$0x1]  ;;  %2608 = vmatprep.mubr.msk.f32.mxu0 %vm368_vm3, %v3025_v38  ;;  %v460_v40 = vld [vmem:[#allocation2 + $0x9] sm:$0xff] }
  0x1f   : > { %394 = vst.msk [vmem:[#allocation2 + $0xc0] sm:$0xff] %vm368_vm3, %v344_v36  ;;  %2504 = vmatprep.mubr.msk.f32.mxu1 %vm368_vm3, %v459_v37  ;;  %v3034_v41 = vld [vmem:[#allocation2 + $0x20] sm:$0xff]  ;;  %v3042_v43 = vld [vmem:[#allocation2 + $0x30] sm:$0xff]  ;;  %v3052_v45 = vld [vmem:[#allocation2 + $0x38] sm:$0xff] }
  0x20   : > { %v3036_v42 = vld [vmem:[#allocation2 + $0x19] sm:$0xff]  ;;  %393 = vst.msk [vmem:[#allocation2 + $0xb8] sm:$0x1] %vm371_vm4, %v343_v39  ;;  %2505 = vmatmul.mubr.msk.f32.vlgmr.msra.gmra.mrb[0].mxu1 %vm368_vm3, %v460_v40  ;;  %2609 = vmatmul.mubr.msk.f32.vlgmr.msra.gmra.mrb[0].mxu0 %vm368_vm3, %v3034_v41  ;;  %v3050_v44 = vld [vmem:[#allocation2 + $0x21] sm:$0xff]  ;;  %v3058_v46 = vld [vmem:[#allocation2 + $0x31] sm:$0xff] }
  0x21   : > { %2719 = vmatpush3.bf16.msk.msra.mxu1 %vm2933_vm2, %v2956_v11  ;;  %2731 = vmatpush3.bf16.msk.msra.mxu0 %vm2933_vm2, %v2958_v12  ;;  %v3060_v47 = vld [vmem:[#allocation2 + $0x48] sm:$0xff]  ;;  %v3070_v48 = vld [vmem:[#allocation2 + $0x39] sm:$0xff]  ;;  %v3072_v49 = vld [vmem:[#allocation2 + $0x50] sm:$0xff] }
  0x22   : > { %2507 = vmatprep.mubr.msk.f32.mxu1 %vm368_vm3, %v3036_v42  ;;  %2611 = vmatprep.mubr.msk.f32.mxu0 %vm368_vm3, %v3042_v43  ;;  %v3074_v50 = vld [vmem:[#allocation2 + $0x49] sm:$0xff]  ;;  %v3076_v51 = vld [vmem:[#allocation2 + $0x60] sm:$0xff]  ;;  %v3078_v52 = vld [vmem:[#allocation2 + $0x51] sm:$0xff] }
  0x23   : > { %v3080_v53 = vld [vmem:[#allocation2 + $0x68] sm:$0xff]  ;;  %v3088_v55 = vld [vmem:[#allocation2 + $0x78] sm:$0xff]  ;;  %v346_v58 = vld [vmem:[%s2978_s12 + $0xd0] sm:$0x1] }
  0x24   : > { %2508 = vmatmul.mubr.msk.f32.gmra.mrb[2].mxu1 %vm368_vm3, %v3050_v44  ;;  %2612 = vmatmul.mubr.msk.f32.gmra.mrb[2].mxu0 %vm368_vm3, %v3052_v45  ;;  %v3086_v54 = vld [vmem:[#allocation2 + $0x61] sm:$0xff]  ;;  %v347_v57 = vld [vmem:[%s2978_s12 + $0xd8] sm:$0xff]  ;;  %396 = vst.msk [vmem:[#allocation2 + $0xd0] sm:$0x1] %vm371_vm4, %v346_v58  ;;  %v350_v60 = vld [vmem:[%s2978_s12 + $0xf0] sm:$0xff] }
  0x25   : > { %2510 = vmatprep.mubr.msk.f32.mxu1 %vm368_vm3, %v3058_v46  ;;  %2614 = vmatprep.mubr.msk.f32.mxu0 %vm368_vm3, %v3060_v47  ;;  %v345_v56 = vld [vmem:[%s2978_s12 + $0xc8] sm:$0xff]  ;;  %v348_v59 = vld [vmem:[%s2978_s12 + $0xe0] sm:$0xff]  ;;  %397 = vst.msk [vmem:[#allocation2 + $0xd8] sm:$0xff] %vm368_vm3, %v347_v57  ;;  %v351_v62 = vld [vmem:[%s2978_s12 + $0xf8] sm:$0xff] }
  0x26   : > { %395 = vst.msk [vmem:[#allocation2 + $0xc8] sm:$0xff] %vm368_vm3, %v345_v56  ;;  %398 = vst.msk [vmem:[#allocation2 + $0xe0] sm:$0xff] %vm368_vm3, %v348_v59  ;;  %v349_v61 = vld [vmem:[%s2978_s12 + $0xe8] sm:$0x1]  ;;  %v3107_v63 = vld [vmem:[#allocation2 + $0x69] sm:$0xff] }
  0x27   : > { %v3109_v0 = vld [vmem:[#allocation2 + $0x80] sm:$0xff]  ;;  %400 = vst.msk [vmem:[#allocation2 + $0xf0] sm:$0xff] %vm368_vm3, %v350_v60  ;;  %401 = vst.msk [vmem:[#allocation2 + $0xf8] sm:$0xff] %vm368_vm3, %v351_v62  ;;  %v353_v1 = vld [vmem:[%s2978_s12 + $0x108] sm:$0xff] }
  0x28   : > { %2511 = vmatmul.mubr.msk.f32.gmra.mrb[4].mxu1 %vm368_vm3, %v3070_v48  ;;  %2615 = vmatmul.mubr.msk.f32.gmra.mrb[4].mxu0 %vm368_vm3, %v3072_v49  ;;  %399 = vst.msk [vmem:[#allocation2 + $0xe8] sm:$0x1] %vm371_vm4, %v349_v61  ;;  %v352_v2 = vld [vmem:[%s2978_s12 + $0x100] sm:$0x1]  ;;  %v354_v3 = vld [vmem:[%s2978_s12 + $0x110] sm:$0xff]  ;;  %v357_v8 = vld [vmem:[%s2978_s12 + $0x128] sm:$0xff] }
  0x29   : > { %2513 = vmatprep.mubr.msk.f32.mxu1 %vm368_vm3, %v3074_v50  ;;  %2617 = vmatprep.mubr.msk.f32.mxu0 %vm368_vm3, %v3076_v51  ;;  %v3121_v4 = vld [vmem:[#allocation2 + $0x79] sm:$0xff]  ;;  %v3123_v5 = vld [vmem:[#allocation2 + $0x90] sm:$0xff]  ;;  %403 = vst.msk [vmem:[#allocation2 + $0x108] sm:$0xff] %vm368_vm3, %v353_v1  ;;  %404 = vst.msk [vmem:[#allocation2 + $0x110] sm:$0xff] %vm368_vm3, %v354_v3 }
  0x2a   : > { %402 = vst.msk [vmem:[#allocation2 + $0x100] sm:$0x1] %vm371_vm4, %v352_v2  ;;  %v356_v6 = vld [vmem:[%s2978_s12 + $0x120] sm:$0xff]  ;;  %v355_v7 = vld [vmem:[%s2978_s12 + $0x118] sm:$0x1]  ;;  %v362_v12 = vld [vmem:[%s2978_s12 + $0x150] sm:$0xff] }
  0x2b   : > { %406 = vst.msk [vmem:[#allocation2 + $0x120] sm:$0xff] %vm368_vm3, %v356_v6  ;;  %407 = vst.msk [vmem:[#allocation2 + $0x128] sm:$0xff] %vm368_vm3, %v357_v8  ;;  %v359_v9 = vld [vmem:[%s2978_s12 + $0x138] sm:$0xff]  ;;  %v358_v10 = vld [vmem:[%s2978_s12 + $0x130] sm:$0x1] }
  0x2c   : > { %2514 = vmatmul.mubr.msk.f32.gmra.mrb[6].mxu1 %vm368_vm3, %v3078_v52  ;;  %2618 = vmatmul.mubr.msk.f32.gmra.mrb[6].mxu0 %vm368_vm3, %v3080_v53  ;;  %405 = vst.msk [vmem:[#allocation2 + $0x118] sm:$0x1] %vm371_vm4, %v355_v7  ;;  %v360_v11 = vld [vmem:[%s2978_s12 + $0x140] sm:$0xff]  ;;  %408 = vst.msk [vmem:[#allocation2 + $0x130] sm:$0x1] %vm371_vm4, %v358_v10  ;;  %v363_v14 = vld [vmem:[%s2978_s12 + $0x158] sm:$0xff] }
  0x2d   : > { %2516 = vmatprep.mubr.msk.f32.mxu1 %vm368_vm3, %v3086_v54  ;;  %2620 = vmatprep.mubr.msk.f32.mxu0 %vm368_vm3, %v3088_v55  ;;  %409 = vst.msk [vmem:[#allocation2 + $0x138] sm:$0xff] %vm368_vm3, %v359_v9  ;;  %410 = vst.msk [vmem:[#allocation2 + $0x140] sm:$0xff] %vm368_vm3, %v360_v11  ;;  %v361_v13 = vld [vmem:[%s2978_s12 + $0x148] sm:$0x1]  ;;  %v364_v16 = vld [vmem:[%s2978_s12 + $0x160] sm:$0x1] }
  0x2e   : > { %412 = vst.msk [vmem:[#allocation2 + $0x150] sm:$0xff] %vm368_vm3, %v362_v12  ;;  %413 = vst.msk [vmem:[#allocation2 + $0x158] sm:$0xff] %vm368_vm3, %v363_v14  ;;  %v365_v15 = vld [vmem:[%s2978_s12 + $0x168] sm:$0xff]  ;;  %v366_v17 = vld [vmem:[%s2978_s12 + $0x170] sm:$0xff] }
  0x2f   : > { %411 = vst.msk [vmem:[#allocation2 + $0x148] sm:$0x1] %vm371_vm4, %v361_v13  ;;  %414 = vst.msk [vmem:[#allocation2 + $0x160] sm:$0x1] %vm371_vm4, %v364_v16  ;;  %v418_v18 = vld [vmem:[%s3144_s20] sm:$0xff]  ;;  %v3172_v20 = vld [vmem:[#allocation2 + $0x98] sm:$0xff] }
  0x30   : > { %2517 = vmatmul.mubr.msk.f32.gmra.mrb[8].mxu1 %vm368_vm3, %v3107_v63  ;;  %2621 = vmatmul.mubr.msk.f32.gmra.mrb[8].mxu0 %vm368_vm3, %v3109_v0  ;;  %415 = vst.msk [vmem:[#allocation2 + $0x168] sm:$0xff] %vm368_vm3, %v365_v15  ;;  %416 = vst.msk [vmem:[#allocation2 + $0x170] sm:$0xff] %vm368_vm3, %v366_v17  ;;  %v3170_v19 = vld [vmem:[#allocation2 + $0x81] sm:$0xff]  ;;  %v3175_v21 = vld [vmem:[#allocation2 + $0x91] sm:$0xff] }
  0x31   : > { %2519 = vmatprep.mubr.msk.f32.mxu1 %vm368_vm3, %v3121_v4  ;;  %2623 = vmatprep.mubr.msk.f32.mxu0 %vm368_vm3, %v3123_v5  ;;  %422 = vst.msk [vmem:[#allocation2 + $0x180] sm:$0xff] %vm368_vm3, %v418_v18  ;;  %v3177_v22 = vld [vmem:[#allocation2 + $0xa8] sm:$0xff]  ;;  %v3187_v23 = vld [vmem:[#allocation2 + $0x99] sm:$0xff]  ;;  %v3189_v24 = vld [vmem:[#allocation2 + $0xb0] sm:$0xff] }
  0x32   : > { %v3191_v25 = vld [vmem:[#allocation2 + $0xa9] sm:$0xff]  ;;  %v3193_v26 = vld [vmem:[#allocation2 + $0xc0] sm:$0xff]  ;;  %v3203_v27 = vld [vmem:[#allocation2 + $0xb1] sm:$0xff] }
  0x33   : > { %v3205_v28 = vld [vmem:[#allocation2 + $0xc8] sm:$0xff]  ;;  %v3209_v30 = vld [vmem:[#allocation2 + $0xd8] sm:$0xff]  ;;  %v420_v33 = vld [vmem:[%s3144_s20 + $0x10] sm:$0x1] }
  0x34   : > { %2520 = vmatmul.mubr.msk.f32.gmra.mrb[10].mxu1 %vm368_vm3, %v3170_v19  ;;  %2624 = vmatmul.mubr.msk.f32.gmra.mrb[10].mxu0 %vm368_vm3, %v3172_v20  ;;  %v3207_v29 = vld [vmem:[#allocation2 + $0xc1] sm:$0xff]  ;;  %v367_v31 = vld [vmem:[%s2978_s12 + $0x178] sm:$0x1]  ;;  %v3224_v34 = vld [vmem:[#allocation2 + $0xc9] sm:$0xff]  ;;  %424 = vst.msk [vmem:[#allocation2 + $0x190] sm:$0x1] %vm371_vm4, %v420_v33 }
  0x35   : > { %2522 = vmatprep.mubr.msk.f32.mxu1 %vm368_vm3, %v3175_v21  ;;  %2626 = vmatprep.mubr.msk.f32.mxu0 %vm368_vm3, %v3177_v22  ;;  %417 = vst.msk [vmem:[#allocation2 + $0x178] sm:$0x1] %vm371_vm4, %v367_v31  ;;  %v419_v32 = vld [vmem:[%s3144_s20 + $0x8] sm:$0xff]  ;;  %v3226_v35 = vld [vmem:[#allocation2 + $0xe0] sm:$0xff]  ;;  %v3231_v37 = vld [vmem:[#allocation2 + $0xf0] sm:$0xff] }
  0x36   : > { %423 = vst.msk [vmem:[#allocation2 + $0x188] sm:$0xff] %vm368_vm3, %v419_v32  ;;  %v3229_v36 = vld [vmem:[#allocation2 + $0xd9] sm:$0xff]  ;;  %v3241_v39 = vld [vmem:[#allocation2 + $0xe1] sm:$0xff]  ;;  %v3245_v56 = vld [vmem:[#allocation2 + $0xf1] sm:$0xff] }
  0x37   : > { %v3243_v40 = vld [vmem:[#allocation2 + $0xf8] sm:$0xff]  ;;  %v3247_v57 = vld [vmem:[#allocation2 + $0x108] sm:$0xff]  ;;  %v3259_v59 = vld [vmem:[#allocation2 + $0x110] sm:$0xff] }
  0x38   : > { %2523 = vmatmul.mubr.msk.f32.gmra.mrb[12].mxu1 %vm368_vm3, %v3187_v23  ;;  %2627 = vmatmul.mubr.msk.f32.gmra.mrb[12].mxu0 %vm368_vm3, %v3189_v24  ;;  %v3257_v58 = vld [vmem:[#allocation2 + $0xf9] sm:$0xff]  ;;  %v3261_v60 = vld [vmem:[#allocation2 + $0x109] sm:$0xff]  ;;  %v3273_v62 = vld [vmem:[#allocation2 + $0x111] sm:$0xff] }
  0x39   : > { %2525 = vmatprep.mubr.msk.f32.mxu1 %vm368_vm3, %v3191_v25  ;;  %2629 = vmatprep.mubr.msk.f32.mxu0 %vm368_vm3, %v3193_v26  ;;  %v3263_v61 = vld [vmem:[#allocation2 + $0x120] sm:$0xff]  ;;  %v3275_v1 = vld [vmem:[#allocation2 + $0x128] sm:$0xff]  ;;  %v3279_v3 = vld [vmem:[#allocation2 + $0x138] sm:$0xff] }
  0x3a   : > { %v3277_v2 = vld [vmem:[#allocation2 + $0x121] sm:$0xff]  ;;  %v3289_v6 = vld [vmem:[#allocation2 + $0x129] sm:$0xff]  ;;  %v3293_v8 = vld [vmem:[#allocation2 + $0x139] sm:$0xff] }
  0x3b   : > { %v3291_v7 = vld [vmem:[#allocation2 + $0x140] sm:$0xff]  ;;  %v3295_v9 = vld [vmem:[#allocation2 + $0x150] sm:$0xff]  ;;  %v3307_v11 = vld [vmem:[#allocation2 + $0x158] sm:$0xff] }
  0x3c   : > { %2526 = vmatmul.mubr.msk.f32.gmra.mrb[14].mxu1 %vm368_vm3, %v3203_v27  ;;  %2630 = vmatmul.mubr.msk.f32.gmra.mrb[14].mxu0 %vm368_vm3, %v3205_v28  ;;  %v3305_v10 = vld [vmem:[#allocation2 + $0x141] sm:$0xff]  ;;  %v3309_v12 = vld [vmem:[#allocation2 + $0x151] sm:$0xff]  ;;  %v3321_v14 = vld [vmem:[#allocation2 + $0x159] sm:$0xff] }
  0x3d   : > { %2528 = vmatprep.mubr.msk.f32.mxu1 %vm368_vm3, %v3207_v29  ;;  %2632 = vmatprep.mubr.msk.f32.mxu0 %vm368_vm3, %v3209_v30  ;;  %v3311_v13 = vld [vmem:[#allocation2 + $0x168] sm:$0xff]  ;;  %v3323_v15 = vld [vmem:[#allocation2 + $0x170] sm:$0xff]  ;;  %v1174_v17 = vld [vmem:[#allocation2 + $0x180] sm:$0xff] }
  0x3e   : > { %v3325_v16 = vld [vmem:[#allocation2 + $0x169] sm:$0xff]  ;;  %v3334_v18 = vld [vmem:[#allocation2 + $0x171] sm:$0xff]  ;;  %v425_v32 = vld [vmem:[#allocation2] sm:$0xff] }
  0x3f   : > { %v1175_v31 = vld [vmem:[#allocation2 + $0x188] sm:$0xff] }
  0x40   : > { %2529 = vmatmul.mubr.msk.f32.gmra.mrb[16].mxu1 %vm368_vm3, %v3224_v34  ;;  %2633 = vmatmul.mubr.msk.f32.gmra.mrb[16].mxu0 %vm368_vm3, %v3226_v35  ;;  %v426_v33 = vld [vmem:[#allocation2 + $0x8] sm:$0xff] }
  0x41   : > { %2531 = vmatprep.mubr.msk.f32.mxu1 %vm368_vm3, %v3229_v36  ;;  %2635 = vmatprep.mubr.msk.f32.mxu0 %vm368_vm3, %v3231_v37 }
  0x44   : > { %2532 = vmatmul.mubr.msk.f32.gmra.mrb[18].mxu1 %vm368_vm3, %v3241_v39  ;;  %2636 = vmatmul.mubr.msk.f32.gmra.mrb[18].mxu0 %vm368_vm3, %v3243_v40 }
  0x45   : > { %2534 = vmatprep.mubr.msk.f32.mxu1 %vm368_vm3, %v3245_v56  ;;  %2638 = vmatprep.mubr.msk.f32.mxu0 %vm368_vm3, %v3247_v57 }
  0x48   : > { %2535 = vmatmul.mubr.msk.f32.gmra.mrb[20].mxu1 %vm368_vm3, %v3257_v58  ;;  %2639 = vmatmul.mubr.msk.f32.gmra.mrb[20].mxu0 %vm368_vm3, %v3259_v59 }
  0x49   : > { %2537 = vmatprep.mubr.msk.f32.mxu1 %vm368_vm3, %v3261_v60  ;;  %2641 = vmatprep.mubr.msk.f32.mxu0 %vm368_vm3, %v3263_v61 }
  0x4c   : > { %2538 = vmatmul.mubr.msk.f32.gmra.mrb[22].mxu1 %vm368_vm3, %v3273_v62  ;;  %2642 = vmatmul.mubr.msk.f32.gmra.mrb[22].mxu0 %vm368_vm3, %v3275_v1 }
  0x4d   : > { %2540 = vmatprep.mubr.msk.f32.mxu1 %vm368_vm3, %v3277_v2  ;;  %2644 = vmatprep.mubr.msk.f32.mxu0 %vm368_vm3, %v3279_v3 }
  0x50   : > { %2541 = vmatmul.mubr.msk.f32.gmra.mrb[24].mxu1 %vm368_vm3, %v3289_v6  ;;  %2645 = vmatmul.mubr.msk.f32.gmra.mrb[24].mxu0 %vm368_vm3, %v3291_v7 }
  0x51   : > { %2543 = vmatprep.mubr.msk.f32.mxu1 %vm368_vm3, %v3293_v8  ;;  %2647 = vmatprep.mubr.msk.f32.mxu0 %vm368_vm3, %v3295_v9 }
  0x54   : > { %2544 = vmatmul.mubr.msk.f32.gmra.mrb[26].mxu1 %vm368_vm3, %v3305_v10  ;;  %2648 = vmatmul.mubr.msk.f32.gmra.mrb[26].mxu0 %vm368_vm3, %v3307_v11 }
  0x55   : > { %2546 = vmatprep.mubr.msk.f32.mxu1 %vm368_vm3, %v3309_v12  ;;  %2650 = vmatprep.mubr.msk.f32.mxu0 %vm368_vm3, %v3311_v13 }
  0x58   : > { %2547 = vmatmul.mubr.msk.f32.gmra.mrb[28].mxu1 %vm368_vm3, %v3321_v14  ;;  %2651 = vmatmul.mubr.msk.f32.gmra.mrb[28].mxu0 %vm368_vm3, %v3323_v15 }
  0x59   : > { %2549 = vmatprep.mubr.msk.f32.mxu1 %vm368_vm3, %v3325_v16  ;;  %2653 = vmatprep.mubr.msk.f32.mxu0 %vm368_vm3, %v1174_v17 }
  0x5c   : > { %2550 = vmatmul.mubr.msk.f32.gmra.mrb[30].mxu1 %vm368_vm3, %v3334_v18  ;;  %2654 = vmatmul.mubr.msk.f32.gmra.mrb[30].mxu0 %vm368_vm3, %v1175_v31 }
  0x5d   : > { %2556 = vmatprep.mubr.msk.f32.mxu1 %vm368_vm3, %v425_v32  ;;  %2660 = vmatprep.mubr.msk.f32.mxu0 %vm368_vm3, %v3036_v42 }
  0x60   : > { %2557 = vmatmul.mubr.msk.f32.vlgmr.msra.gmra.mrb[0].mxu1 %vm368_vm3, %v426_v33  ;;  %2661 = vmatmul.mubr.msk.f32.vlgmr.msra.gmra.mrb[0].mxu0 %vm368_vm3, %v3050_v44  ;;  %v3466_v44 = vld [vmem:[%s3582_s3] ss:$0 sm:$0xff] }
  0x61   : > { %2559 = vmatprep.mubr.msk.f32.mxu1 %vm368_vm3, %v3025_v38  ;;  %2663 = vmatprep.mubr.msk.f32.mxu0 %vm368_vm3, %v3058_v46  ;;  %v1565_v38 = vld [vmem:[#allocation2 + $0x181] sm:$0xff] }
  0x64   : > { %2560 = vmatmul.mubr.msk.f32.gmra.mrb[2].mxu1 %vm368_vm3, %v3034_v41  ;;  %2664 = vmatmul.mubr.msk.f32.gmra.mrb[2].mxu0 %vm368_vm3, %v3070_v48  ;;  %v1566_v41 = vld [vmem:[#allocation2 + $0x189] sm:$0xff] }
  0x65   : > { %2562 = vmatprep.mubr.msk.f32.mxu1 %vm368_vm3, %v3042_v43  ;;  %2666 = vmatprep.mubr.msk.f32.mxu0 %vm368_vm3, %v3074_v50 }
  0x68   : > { %2563 = vmatmul.mubr.msk.f32.gmra.mrb[4].mxu1 %vm368_vm3, %v3052_v45  ;;  %2667 = vmatmul.mubr.msk.f32.gmra.mrb[4].mxu0 %vm368_vm3, %v3078_v52 }
  0x69   : > { %2565 = vmatprep.mubr.msk.f32.mxu1 %vm368_vm3, %v3060_v47  ;;  %2669 = vmatprep.mubr.msk.f32.mxu0 %vm368_vm3, %v3086_v54 }
  0x6c   : > { %2566 = vmatmul.mubr.msk.f32.gmra.mrb[6].mxu1 %vm368_vm3, %v3072_v49  ;;  %2670 = vmatmul.mubr.msk.f32.gmra.mrb[6].mxu0 %vm368_vm3, %v3107_v63 }
  0x6d   : > { %2568 = vmatprep.mubr.msk.f32.mxu1 %vm368_vm3, %v3076_v51  ;;  %2672 = vmatprep.mubr.msk.f32.mxu0 %vm368_vm3, %v3121_v4 }
  0x70   : > { %2569 = vmatmul.mubr.msk.f32.gmra.mrb[8].mxu1 %vm368_vm3, %v3080_v53  ;;  %2673 = vmatmul.mubr.msk.f32.gmra.mrb[8].mxu0 %vm368_vm3, %v3170_v19 }
  0x71   : > { %2571 = vmatprep.mubr.msk.f32.mxu1 %vm368_vm3, %v3088_v55  ;;  %2675 = vmatprep.mubr.msk.f32.mxu0 %vm368_vm3, %v3175_v21 }
  0x74   : > { %2572 = vmatmul.mubr.msk.f32.gmra.mrb[10].mxu1 %vm368_vm3, %v3109_v0  ;;  %2676 = vmatmul.mubr.msk.f32.gmra.mrb[10].mxu0 %vm368_vm3, %v3187_v23 }
  0x75   : > { %2574 = vmatprep.mubr.msk.f32.mxu1 %vm368_vm3, %v3123_v5  ;;  %2678 = vmatprep.mubr.msk.f32.mxu0 %vm368_vm3, %v3191_v25 }
  0x78   : > { %2575 = vmatmul.mubr.msk.f32.gmra.mrb[12].mxu1 %vm368_vm3, %v3172_v20  ;;  %2679 = vmatmul.mubr.msk.f32.gmra.mrb[12].mxu0 %vm368_vm3, %v3203_v27 }
  0x79   : > { %2577 = vmatprep.mubr.msk.f32.mxu1 %vm368_vm3, %v3177_v22  ;;  %2681 = vmatprep.mubr.msk.f32.mxu0 %vm368_vm3, %v3207_v29 }
  0x7c   : > { %2578 = vmatmul.mubr.msk.f32.gmra.mrb[14].mxu1 %vm368_vm3, %v3189_v24  ;;  %2682 = vmatmul.mubr.msk.f32.gmra.mrb[14].mxu0 %vm368_vm3, %v3224_v34 }
  0x7d   : > { %2580 = vmatprep.mubr.msk.f32.mxu1 %vm368_vm3, %v3193_v26  ;;  %2684 = vmatprep.mubr.msk.f32.mxu0 %vm368_vm3, %v3229_v36 }
  0x80   : > { %2581 = vmatmul.mubr.msk.f32.gmra.mrb[16].mxu1 %vm368_vm3, %v3205_v28  ;;  %2685 = vmatmul.mubr.msk.f32.gmra.mrb[16].mxu0 %vm368_vm3, %v3241_v39 }
  0x81   : > { %2583 = vmatprep.mubr.msk.f32.mxu1 %vm368_vm3, %v3209_v30  ;;  %2687 = vmatprep.mubr.msk.f32.mxu0 %vm368_vm3, %v3245_v56 }
  0x84   : > { %2584 = vmatmul.mubr.msk.f32.gmra.mrb[18].mxu1 %vm368_vm3, %v3226_v35  ;;  %2688 = vmatmul.mubr.msk.f32.gmra.mrb[18].mxu0 %vm368_vm3, %v3257_v58 }
  0x85   : > { %2586 = vmatprep.mubr.msk.f32.mxu1 %vm368_vm3, %v3231_v37  ;;  %2690 = vmatprep.mubr.msk.f32.mxu0 %vm368_vm3, %v3261_v60 }
  0x88   : > { %2587 = vmatmul.mubr.msk.f32.gmra.mrb[20].mxu1 %vm368_vm3, %v3243_v40  ;;  %2691 = vmatmul.mubr.msk.f32.gmra.mrb[20].mxu0 %vm368_vm3, %v3273_v62 }
  0x89   : > { %2589 = vmatprep.mubr.msk.f32.mxu1 %vm368_vm3, %v3247_v57  ;;  %2693 = vmatprep.mubr.msk.f32.mxu0 %vm368_vm3, %v3277_v2 }
  0x8c   : > { %2590 = vmatmul.mubr.msk.f32.gmra.mrb[22].mxu1 %vm368_vm3, %v3259_v59  ;;  %2694 = vmatmul.mubr.msk.f32.gmra.mrb[22].mxu0 %vm368_vm3, %v3289_v6 }
  0x8d   : > { %2592 = vmatprep.mubr.msk.f32.mxu1 %vm368_vm3, %v3263_v61  ;;  %2696 = vmatprep.mubr.msk.f32.mxu0 %vm368_vm3, %v3293_v8 }
  0x90   : > { %2593 = vmatmul.mubr.msk.f32.gmra.mrb[24].mxu1 %vm368_vm3, %v3275_v1  ;;  %2697 = vmatmul.mubr.msk.f32.gmra.mrb[24].mxu0 %vm368_vm3, %v3305_v10 }
  0x91   : > { %2595 = vmatprep.mubr.msk.f32.mxu1 %vm368_vm3, %v3279_v3  ;;  %2699 = vmatprep.mubr.msk.f32.mxu0 %vm368_vm3, %v3309_v12 }
  0x94   : > { %2596 = vmatmul.mubr.msk.f32.gmra.mrb[26].mxu1 %vm368_vm3, %v3291_v7  ;;  %2700 = vmatmul.mubr.msk.f32.gmra.mrb[26].mxu0 %vm368_vm3, %v3321_v14 }
  0x95   : > { %2598 = vmatprep.mubr.msk.f32.mxu1 %vm368_vm3, %v3295_v9  ;;  %2702 = vmatprep.mubr.msk.f32.mxu0 %vm368_vm3, %v3325_v16 }
  0x98   : > { %2599 = vmatmul.mubr.msk.f32.gmra.mrb[28].mxu1 %vm368_vm3, %v3307_v11  ;;  %2703 = vmatmul.mubr.msk.f32.gmra.mrb[28].mxu0 %vm368_vm3, %v3334_v18 }
  0x99   : > { %2601 = vmatprep.mubr.msk.f32.mxu1 %vm368_vm3, %v3311_v13  ;;  %2705 = vmatprep.mubr.msk.f32.mxu0 %vm368_vm3, %v1565_v38 }
  0x9c   : > { %2602 = vmatmul.mubr.msk.f32.gmra.mrb[30].mxu1 %vm368_vm3, %v3323_v15  ;;  %2706 = vmatmul.mubr.msk.f32.gmra.mrb[30].mxu0 %vm368_vm3, %v1566_v41 }
 0x133   : > { %v2558_v42 = vpop.f32.mrb[0].mxu1  ;;  %v2662_v43 = vpop.f32.mrb[0].mxu0 }
 0x134   : > { %v2732_v45 = vadd.f32 %v2662_v43, %v2558_v42  ;;  %v984_v46 = vpop.f32.mrb[1].mxu1  ;;  %v1735_v47 = vpop.f32.mrb[1].mxu0 }
 0x135   : > { %v2733_v48 = vadd.f32 %v1735_v47, %v984_v46 }
 0x136   : > { %v1934_v49 = vadd.f32 %v2732_v45, %v3466_v44 }
 0x137   : > { %v1933_v50 = vadd.f32 %v2733_v48, %v3466_v44  ;;  %v2561_v51 = vpop.f32.mrb[2].mxu1  ;;  %v2665_v52 = vpop.f32.mrb[2].mxu0 }
 0x138   : > { %vm1966_vm5 = vcmp.ge.f32.partialorder %v1934_v49, 0.0  ;;  %v1998_v53 = vmul.f32 0.2, %v1934_v49  ;;  %v2734_v54 = vadd.f32 %v2665_v52, %v2561_v51  ;;  %v994_v55 = vpop.f32.mrb[3].mxu1  ;;  %v1745_v63 = vpop.f32.mrb[3].mxu0 }
 0x139   : > { %vm1965_vm7 = vcmp.ge.f32.partialorder %v1933_v50, 0.0  ;;  %v1997_v0 = vmul.f32 0.2, %v1933_v50  ;;  %v2735_v4 = vadd.f32 %v1745_v63, %v994_v55 }
 0x13a   : > { %v2030_v5 = vsel %vm1966_vm5, %v1934_v49, %v1998_v53  ;;  %v1936_v19 = vadd.f32 %v2734_v54, %v3466_v44 }
 0x13b   : > { %2063 = vst.msk [vmem:[%s3474_s26 + $0x8] sm:$0xff] %vm2061_vm6, %v2030_v5  ;;  %v2029_v20 = vsel %vm1965_vm7, %v1933_v50, %v1997_v0  ;;  %v1935_v21 = vadd.f32 %v2735_v4, %v3466_v44  ;;  %v2564_v22 = vpop.f32.mrb[4].mxu1  ;;  %v2668_v23 = vpop.f32.mrb[4].mxu0 }
 0x13c   : > { %2062 = vst.msk [vmem:[%s3474_s26] sm:$0xff] %vm2061_vm6, %v2029_v20  ;;  %vm1968_vm8 = vcmp.ge.f32.partialorder %v1936_v19, 0.0  ;;  %v2000_v24 = vmul.f32 0.2, %v1936_v19  ;;  %v2736_v25 = vadd.f32 %v2668_v23, %v2564_v22  ;;  %v1004_v26 = vpop.f32.mrb[5].mxu1  ;;  %v1755_v27 = vpop.f32.mrb[5].mxu0 }
 0x13d   : > { %vm1967_vm9 = vcmp.ge.f32.partialorder %v1935_v21, 0.0  ;;  %v1999_v28 = vmul.f32 0.2, %v1935_v21  ;;  %v2737_v29 = vadd.f32 %v1755_v27, %v1004_v26 }
 0x13e   : > { %v2032_v30 = vsel %vm1968_vm8, %v1936_v19, %v2000_v24  ;;  %v1938_v34 = vadd.f32 %v2736_v25, %v3466_v44 }
 0x13f   : > { %2065 = vst.msk [vmem:[%s3474_s26 + $0x18] sm:$0xff] %vm2061_vm6, %v2032_v30  ;;  %v2031_v35 = vsel %vm1967_vm9, %v1935_v21, %v1999_v28  ;;  %v1937_v36 = vadd.f32 %v2737_v29, %v3466_v44  ;;  %v2567_v37 = vpop.f32.mrb[6].mxu1  ;;  %v2671_v39 = vpop.f32.mrb[6].mxu0 }
 0x140   : > { %2064 = vst.msk [vmem:[%s3474_s26 + $0x10] sm:$0xff] %vm2061_vm6, %v2031_v35  ;;  %vm1970_vm10 = vcmp.ge.f32.partialorder %v1938_v34, 0.0  ;;  %v2002_v40 = vmul.f32 0.2, %v1938_v34  ;;  %v2738_v56 = vadd.f32 %v2671_v39, %v2567_v37  ;;  %v1014_v57 = vpop.f32.mrb[7].mxu1  ;;  %v1765_v58 = vpop.f32.mrb[7].mxu0 }
 0x141   : > { %vm1969_vm11 = vcmp.ge.f32.partialorder %v1937_v36, 0.0  ;;  %v2001_v59 = vmul.f32 0.2, %v1937_v36  ;;  %v2739_v60 = vadd.f32 %v1765_v58, %v1014_v57 }
 0x142   : > { %v2034_v61 = vsel %vm1970_vm10, %v1938_v34, %v2002_v40  ;;  %v1940_v62 = vadd.f32 %v2738_v56, %v3466_v44 }
 0x143   : > { %2067 = vst.msk [vmem:[%s3474_s26 + $0x28] sm:$0xff] %vm2061_vm6, %v2034_v61  ;;  %v2033_v1 = vsel %vm1969_vm11, %v1937_v36, %v2001_v59  ;;  %v1939_v2 = vadd.f32 %v2739_v60, %v3466_v44  ;;  %v2570_v3 = vpop.f32.mrb[8].mxu1  ;;  %v2674_v6 = vpop.f32.mrb[8].mxu0 }
 0x144   : > { %2066 = vst.msk [vmem:[%s3474_s26 + $0x20] sm:$0xff] %vm2061_vm6, %v2033_v1  ;;  %vm1972_vm12 = vcmp.ge.f32.partialorder %v1940_v62, 0.0  ;;  %v2004_v7 = vmul.f32 0.2, %v1940_v62  ;;  %v2740_v8 = vadd.f32 %v2674_v6, %v2570_v3  ;;  %v1024_v9 = vpop.f32.mrb[9].mxu1  ;;  %v1775_v10 = vpop.f32.mrb[9].mxu0 }
 0x145   : > { %vm1971_vm13 = vcmp.ge.f32.partialorder %v1939_v2, 0.0  ;;  %v2003_v11 = vmul.f32 0.2, %v1939_v2  ;;  %v2741_v12 = vadd.f32 %v1775_v10, %v1024_v9 }
 0x146   : > { %v2036_v13 = vsel %vm1972_vm12, %v1940_v62, %v2004_v7  ;;  %v1942_v14 = vadd.f32 %v2740_v8, %v3466_v44 }
 0x147   : > { %2069 = vst.msk [vmem:[%s3474_s26 + $0x38] sm:$0xff] %vm2061_vm6, %v2036_v13  ;;  %v2035_v15 = vsel %vm1971_vm13, %v1939_v2, %v2003_v11  ;;  %v1941_v16 = vadd.f32 %v2741_v12, %v3466_v44  ;;  %v2573_v17 = vpop.f32.mrb[10].mxu1  ;;  %v2677_v18 = vpop.f32.mrb[10].mxu0 }
 0x148   : > { %2068 = vst.msk [vmem:[%s3474_s26 + $0x30] sm:$0xff] %vm2061_vm6, %v2035_v15  ;;  %vm1974_vm14 = vcmp.ge.f32.partialorder %v1942_v14, 0.0  ;;  %v2006_v31 = vmul.f32 0.2, %v1942_v14  ;;  %v2742_v32 = vadd.f32 %v2677_v18, %v2573_v17  ;;  %v1034_v33 = vpop.f32.mrb[11].mxu1  ;;  %v1785_v38 = vpop.f32.mrb[11].mxu0 }
 0x149   : > { %vm1973_vm15 = vcmp.ge.f32.partialorder %v1941_v16, 0.0  ;;  %v2005_v41 = vmul.f32 0.2, %v1941_v16  ;;  %v2743_v42 = vadd.f32 %v1785_v38, %v1034_v33 }
 0x14a   : > { %v2038_v43 = vsel %vm1974_vm14, %v1942_v14, %v2006_v31  ;;  %v1944_v45 = vadd.f32 %v2742_v32, %v3466_v44 }
 0x14b   : > { %2071 = vst.msk [vmem:[%s3474_s26 + $0x48] sm:$0xff] %vm2061_vm6, %v2038_v43  ;;  %v2037_v46 = vsel %vm1973_vm15, %v1941_v16, %v2005_v41  ;;  %v1943_v47 = vadd.f32 %v2743_v42, %v3466_v44  ;;  %v2576_v48 = vpop.f32.mrb[12].mxu1  ;;  %v2680_v49 = vpop.f32.mrb[12].mxu0 }
 0x14c   : > { %2070 = vst.msk [vmem:[%s3474_s26 + $0x40] sm:$0xff] %vm2061_vm6, %v2037_v46  ;;  %vm1976_vm0 = vcmp.ge.f32.partialorder %v1944_v45, 0.0  ;;  %v2008_v50 = vmul.f32 0.2, %v1944_v45  ;;  %v2744_v51 = vadd.f32 %v2680_v49, %v2576_v48  ;;  %v1044_v52 = vpop.f32.mrb[13].mxu1  ;;  %v1795_v53 = vpop.f32.mrb[13].mxu0 }
 0x14d   : > { %vm1975_vm1 = vcmp.ge.f32.partialorder %v1943_v47, 0.0  ;;  %v2007_v54 = vmul.f32 0.2, %v1943_v47  ;;  %v2745_v55 = vadd.f32 %v1795_v53, %v1044_v52 }
 0x14e   : > { %v2040_v63 = vsel %vm1976_vm0, %v1944_v45, %v2008_v50  ;;  %v1946_v0 = vadd.f32 %v2744_v51, %v3466_v44 }
 0x14f   : > { %2073 = vst.msk [vmem:[%s3474_s26 + $0x58] sm:$0xff] %vm2061_vm6, %v2040_v63  ;;  %v2039_v4 = vsel %vm1975_vm1, %v1943_v47, %v2007_v54  ;;  %v1945_v5 = vadd.f32 %v2745_v55, %v3466_v44  ;;  %v2579_v19 = vpop.f32.mrb[14].mxu1  ;;  %v2683_v20 = vpop.f32.mrb[14].mxu0 }
 0x150   : > { %2072 = vst.msk [vmem:[%s3474_s26 + $0x50] sm:$0xff] %vm2061_vm6, %v2039_v4  ;;  %vm1978_vm2 = vcmp.ge.f32.partialorder %v1946_v0, 0.0  ;;  %v2010_v21 = vmul.f32 0.2, %v1946_v0  ;;  %v2746_v22 = vadd.f32 %v2683_v20, %v2579_v19  ;;  %v1054_v23 = vpop.f32.mrb[15].mxu1  ;;  %v1805_v24 = vpop.f32.mrb[15].mxu0 }
 0x151   : > { %vm1977_vm3 = vcmp.ge.f32.partialorder %v1945_v5, 0.0  ;;  %v2009_v25 = vmul.f32 0.2, %v1945_v5  ;;  %v2747_v26 = vadd.f32 %v1805_v24, %v1054_v23 }
 0x152   : > { %v2042_v27 = vsel %vm1978_vm2, %v1946_v0, %v2010_v21  ;;  %v1948_v28 = vadd.f32 %v2746_v22, %v3466_v44 }
 0x153   : > { %2075 = vst.msk [vmem:[%s3474_s26 + $0x68] sm:$0xff] %vm2061_vm6, %v2042_v27  ;;  %v2041_v29 = vsel %vm1977_vm3, %v1945_v5, %v2009_v25  ;;  %v1947_v30 = vadd.f32 %v2747_v26, %v3466_v44  ;;  %v2582_v34 = vpop.f32.mrb[16].mxu1  ;;  %v2686_v35 = vpop.f32.mrb[16].mxu0 }
 0x154   : > { %2074 = vst.msk [vmem:[%s3474_s26 + $0x60] sm:$0xff] %vm2061_vm6, %v2041_v29  ;;  %vm1980_vm4 = vcmp.ge.f32.partialorder %v1948_v28, 0.0  ;;  %v2012_v36 = vmul.f32 0.2, %v1948_v28  ;;  %v2748_v37 = vadd.f32 %v2686_v35, %v2582_v34  ;;  %v1064_v39 = vpop.f32.mrb[17].mxu1  ;;  %v1815_v40 = vpop.f32.mrb[17].mxu0 }
 0x155   : > { %vm1979_vm5 = vcmp.ge.f32.partialorder %v1947_v30, 0.0  ;;  %v2011_v56 = vmul.f32 0.2, %v1947_v30  ;;  %v2749_v57 = vadd.f32 %v1815_v40, %v1064_v39 }
 0x156   : > { %v2044_v58 = vsel %vm1980_vm4, %v1948_v28, %v2012_v36  ;;  %v1950_v59 = vadd.f32 %v2748_v37, %v3466_v44 }
 0x157   : > { %2077 = vst.msk [vmem:[%s3474_s26 + $0x78] sm:$0xff] %vm2061_vm6, %v2044_v58  ;;  %v2043_v60 = vsel %vm1979_vm5, %v1947_v30, %v2011_v56  ;;  %v1949_v61 = vadd.f32 %v2749_v57, %v3466_v44  ;;  %v2585_v62 = vpop.f32.mrb[18].mxu1  ;;  %v2689_v1 = vpop.f32.mrb[18].mxu0 }
 0x158   : > { %2076 = vst.msk [vmem:[%s3474_s26 + $0x70] sm:$0xff] %vm2061_vm6, %v2043_v60  ;;  %vm1982_vm7 = vcmp.ge.f32.partialorder %v1950_v59, 0.0  ;;  %v2014_v2 = vmul.f32 0.2, %v1950_v59  ;;  %v2750_v3 = vadd.f32 %v2689_v1, %v2585_v62  ;;  %v1074_v6 = vpop.f32.mrb[19].mxu1  ;;  %v1825_v7 = vpop.f32.mrb[19].mxu0 }
 0x159   : > { %vm1981_vm8 = vcmp.ge.f32.partialorder %v1949_v61, 0.0  ;;  %v2013_v8 = vmul.f32 0.2, %v1949_v61  ;;  %v2751_v9 = vadd.f32 %v1825_v7, %v1074_v6 }
 0x15a   : > { %v2046_v10 = vsel %vm1982_vm7, %v1950_v59, %v2014_v2  ;;  %v1952_v11 = vadd.f32 %v2750_v3, %v3466_v44 }
 0x15b   : > { %2079 = vst.msk [vmem:[%s3474_s26 + $0x88] sm:$0xff] %vm2061_vm6, %v2046_v10  ;;  %v2045_v12 = vsel %vm1981_vm8, %v1949_v61, %v2013_v8  ;;  %v1951_v13 = vadd.f32 %v2751_v9, %v3466_v44  ;;  %v2588_v14 = vpop.f32.mrb[20].mxu1  ;;  %v2692_v15 = vpop.f32.mrb[20].mxu0 }
 0x15c   : > { %2078 = vst.msk [vmem:[%s3474_s26 + $0x80] sm:$0xff] %vm2061_vm6, %v2045_v12  ;;  %vm1984_vm9 = vcmp.ge.f32.partialorder %v1952_v11, 0.0  ;;  %v2016_v16 = vmul.f32 0.2, %v1952_v11  ;;  %v2752_v17 = vadd.f32 %v2692_v15, %v2588_v14  ;;  %v1084_v18 = vpop.f32.mrb[21].mxu1  ;;  %v1835_v31 = vpop.f32.mrb[21].mxu0 }
 0x15d   : > { %vm1983_vm10 = vcmp.ge.f32.partialorder %v1951_v13, 0.0  ;;  %v2015_v32 = vmul.f32 0.2, %v1951_v13  ;;  %v2753_v33 = vadd.f32 %v1835_v31, %v1084_v18 }
 0x15e   : > { %v2048_v38 = vsel %vm1984_vm9, %v1952_v11, %v2016_v16  ;;  %v1954_v41 = vadd.f32 %v2752_v17, %v3466_v44 }
 0x15f   : > { %2081 = vst.msk [vmem:[%s3474_s26 + $0x98] sm:$0xff] %vm2061_vm6, %v2048_v38  ;;  %v2047_v42 = vsel %vm1983_vm10, %v1951_v13, %v2015_v32  ;;  %v1953_v43 = vadd.f32 %v2753_v33, %v3466_v44  ;;  %v2591_v45 = vpop.f32.mrb[22].mxu1  ;;  %v2695_v46 = vpop.f32.mrb[22].mxu0 }
 0x160   : > { %2080 = vst.msk [vmem:[%s3474_s26 + $0x90] sm:$0xff] %vm2061_vm6, %v2047_v42  ;;  %vm1986_vm11 = vcmp.ge.f32.partialorder %v1954_v41, 0.0  ;;  %v2018_v47 = vmul.f32 0.2, %v1954_v41  ;;  %v2754_v48 = vadd.f32 %v2695_v46, %v2591_v45  ;;  %v1094_v49 = vpop.f32.mrb[23].mxu1  ;;  %v1845_v50 = vpop.f32.mrb[23].mxu0 }
 0x161   : > { %vm1985_vm12 = vcmp.ge.f32.partialorder %v1953_v43, 0.0  ;;  %v2017_v51 = vmul.f32 0.2, %v1953_v43  ;;  %v2755_v52 = vadd.f32 %v1845_v50, %v1094_v49 }
 0x162   : > { %v2050_v53 = vsel %vm1986_vm11, %v1954_v41, %v2018_v47  ;;  %v1956_v54 = vadd.f32 %v2754_v48, %v3466_v44 }
 0x163   : > { %2083 = vst.msk [vmem:[%s3474_s26 + $0xa8] sm:$0xff] %vm2061_vm6, %v2050_v53  ;;  %v2049_v55 = vsel %vm1985_vm12, %v1953_v43, %v2017_v51  ;;  %v1955_v63 = vadd.f32 %v2755_v52, %v3466_v44  ;;  %v2594_v0 = vpop.f32.mrb[24].mxu1  ;;  %v2698_v4 = vpop.f32.mrb[24].mxu0 }
 0x164   : > { %2082 = vst.msk [vmem:[%s3474_s26 + $0xa0] sm:$0xff] %vm2061_vm6, %v2049_v55  ;;  %vm1988_vm13 = vcmp.ge.f32.partialorder %v1956_v54, 0.0  ;;  %v2020_v5 = vmul.f32 0.2, %v1956_v54  ;;  %v2756_v19 = vadd.f32 %v2698_v4, %v2594_v0  ;;  %v1104_v20 = vpop.f32.mrb[25].mxu1  ;;  %v1855_v21 = vpop.f32.mrb[25].mxu0 }
 0x165   : > { %vm1987_vm14 = vcmp.ge.f32.partialorder %v1955_v63, 0.0  ;;  %v2019_v22 = vmul.f32 0.2, %v1955_v63  ;;  %v2757_v23 = vadd.f32 %v1855_v21, %v1104_v20 }
 0x166   : > { %v2052_v24 = vsel %vm1988_vm13, %v1956_v54, %v2020_v5  ;;  %v1958_v25 = vadd.f32 %v2756_v19, %v3466_v44 }
 0x167   : > { %2085 = vst.msk [vmem:[%s3474_s26 + $0xb8] sm:$0xff] %vm2061_vm6, %v2052_v24  ;;  %v2051_v26 = vsel %vm1987_vm14, %v1955_v63, %v2019_v22  ;;  %v1957_v27 = vadd.f32 %v2757_v23, %v3466_v44  ;;  %v2597_v28 = vpop.f32.mrb[26].mxu1  ;;  %v2701_v29 = vpop.f32.mrb[26].mxu0 }
 0x168   : > { %2084 = vst.msk [vmem:[%s3474_s26 + $0xb0] sm:$0xff] %vm2061_vm6, %v2051_v26  ;;  %vm1990_vm15 = vcmp.ge.f32.partialorder %v1958_v25, 0.0  ;;  %v2022_v30 = vmul.f32 0.2, %v1958_v25  ;;  %v2758_v34 = vadd.f32 %v2701_v29, %v2597_v28  ;;  %v1114_v35 = vpop.f32.mrb[27].mxu1  ;;  %v1865_v36 = vpop.f32.mrb[27].mxu0 }
 0x169   : > { %vm1989_vm0 = vcmp.ge.f32.partialorder %v1957_v27, 0.0  ;;  %v2021_v37 = vmul.f32 0.2, %v1957_v27  ;;  %v2759_v39 = vadd.f32 %v1865_v36, %v1114_v35 }
 0x16a   : > { %v2054_v40 = vsel %vm1990_vm15, %v1958_v25, %v2022_v30  ;;  %v1960_v56 = vadd.f32 %v2758_v34, %v3466_v44 }
 0x16b   : > { %2087 = vst.msk [vmem:[%s3474_s26 + $0xc8] sm:$0xff] %vm2061_vm6, %v2054_v40  ;;  %v2053_v57 = vsel %vm1989_vm0, %v1957_v27, %v2021_v37  ;;  %v1959_v58 = vadd.f32 %v2759_v39, %v3466_v44  ;;  %v2600_v59 = vpop.f32.mrb[28].mxu1  ;;  %v2704_v60 = vpop.f32.mrb[28].mxu0 }
 0x16c   : > { %2086 = vst.msk [vmem:[%s3474_s26 + $0xc0] sm:$0xff] %vm2061_vm6, %v2053_v57  ;;  %vm1992_vm1 = vcmp.ge.f32.partialorder %v1960_v56, 0.0  ;;  %v2024_v61 = vmul.f32 0.2, %v1960_v56  ;;  %v2760_v62 = vadd.f32 %v2704_v60, %v2600_v59  ;;  %v1124_v1 = vpop.f32.mrb[29].mxu1  ;;  %v1875_v2 = vpop.f32.mrb[29].mxu0 }
 0x16d   : > { %vm1991_vm2 = vcmp.ge.f32.partialorder %v1959_v58, 0.0  ;;  %v2023_v3 = vmul.f32 0.2, %v1959_v58  ;;  %v2761_v6 = vadd.f32 %v1875_v2, %v1124_v1 }
 0x16e   : > { %v2056_v7 = vsel %vm1992_vm1, %v1960_v56, %v2024_v61  ;;  %v1962_v8 = vadd.f32 %v2760_v62, %v3466_v44 }
 0x16f   : > { %2089 = vst.msk [vmem:[%s3474_s26 + $0xd8] sm:$0xff] %vm2061_vm6, %v2056_v7  ;;  %v2055_v9 = vsel %vm1991_vm2, %v1959_v58, %v2023_v3  ;;  %v1961_v10 = vadd.f32 %v2761_v6, %v3466_v44  ;;  %v2603_v11 = vpop.f32.mrb[30].mxu1  ;;  %v2707_v12 = vpop.f32.mrb[30].mxu0 }
 0x170   : > { %2088 = vst.msk [vmem:[%s3474_s26 + $0xd0] sm:$0xff] %vm2061_vm6, %v2055_v9  ;;  %vm1994_vm3 = vcmp.ge.f32.partialorder %v1962_v8, 0.0  ;;  %v2026_v13 = vmul.f32 0.2, %v1962_v8  ;;  %v2762_v14 = vadd.f32 %v2707_v12, %v2603_v11  ;;  %v1134_v15 = vpop.f32.mrb[31].mxu1  ;;  %v1885_v16 = vpop.f32.mrb[31].mxu0 }
 0x171   : > { %vm1993_vm4 = vcmp.ge.f32.partialorder %v1961_v10, 0.0  ;;  %v2025_v17 = vmul.f32 0.2, %v1961_v10  ;;  %v2763_v18 = vadd.f32 %v1885_v16, %v1134_v15 }
 0x172   : > { %v2058_v31 = vsel %vm1994_vm3, %v1962_v8, %v2026_v13  ;;  %v1964_v32 = vadd.f32 %v2762_v14, %v3466_v44 }
 0x173   : > { %2091 = vst.msk [vmem:[%s3474_s26 + $0xe8] sm:$0xff] %vm2061_vm6, %v2058_v31  ;;  %v2057_v33 = vsel %vm1993_vm4, %v1961_v10, %v2025_v17  ;;  %v1963_v38 = vadd.f32 %v2763_v18, %v3466_v44 }
 0x174   : > { %2090 = vst.msk [vmem:[%s3474_s26 + $0xe0] sm:$0xff] %vm2061_vm6, %v2057_v33  ;;  %vm1996_vm5 = vcmp.ge.f32.partialorder %v1964_v32, 0.0  ;;  %v2028_v41 = vmul.f32 0.2, %v1964_v32 }
 0x175   : > { %vm1995_vm7 = vcmp.ge.f32.partialorder %v1963_v38, 0.0  ;;  %v2027_v42 = vmul.f32 0.2, %v1963_v38 }
 0x176   : > { %v2060_v43 = vsel %vm1996_vm5, %v1964_v32, %v2028_v41 }
 0x177   : > { %2093 = vst.msk [vmem:[%s3474_s26 + $0xf8] sm:$0xff] %vm2061_vm6, %v2060_v43  ;;  %v2059_v45 = vsel %vm1995_vm7, %v1963_v38, %v2027_v42 }
 0x178   : > { %2092 = vst.msk [vmem:[%s3474_s26 + $0xf0] sm:$0xff] %vm2061_vm6, %v2059_v45 }
 0x179 PF: > { %s14_s17 = sadd.s32 1, %s2878_s17   ;;  %s3586_s15 = smov %s2874_s16 }
 0x17a   : > { %p11_p5 = scmp.ge.s32.totalorder %s14_s17, 4   ;;  %s3587_s16 = smov %s3589_s18 }
 0x17c   :  { %13 = sbr.rel (!%p11_p5) target bundleno = 2 (0x2), region = 74 }

// kernel: nlayer_discriminator.10
= control target key start
LH: loop header
LB: loop body
LE: loop exit
PB: predicated region body
PF: predicated region fallthrough
CT: control target
= control target key end

     0   :  { %s416_s6 = smov 0   ;;  %s418_s7 = smov 0   ;;  %s490_s0 = inlined_call_operand.vmem [shape: f32[2,64,32], index: 0, kind: input, shape index: {}]   ;;  %s491_s1 = inlined_call_operand.vmem [shape: f32[2,64,32], index: 1, kind: output, shape index: {}]  }
   0x1   :  { %s420_s8 = smov 0  }
   0x2 LB: > { %s23_s9 = sadd.s32 1, %s400_s7  ;;  %p347_p0 = scmp.ge.s32.totalorder %s404_s8, 1  ;;  %s404_s8 = sphi %s420_s8, %s11_s8   ;;  %s400_s7 = sphi %s418_s7, %s493_s7   ;;  %s396_s6 = sphi %s416_s6, %s492_s6  }
   0x3   : > { %p25_p1 = scmp.ge.s32.totalorder %s23_s9, 2  ;;  %p106_p2 = scmp.lt.s32.totalorder %s404_s8, 3 }
   0x5   : > { %s495_s9 = smov (%p25_p1, %s23_s9), 0  ;;  %p107_p3 = pnand %p347_p0, %p106_p2 }
   0x6   : > { %p132_p4 = scmp.lt.s32.totalorder (!%p107_p3), %s396_s6, 1  ;;  %vm156_vm0 = vcmask (!%p107_p3), 261120  }
   0x7   : > { %110 = sbr.rel (%p107_p3) target bundleno = 104 (0x68), region = 24 }
   0xe   : > { %s497_s6 = smov (!%p132_p4, %s396_s6), 1 }
   0xf   : > { %s354_s10 = sshll.u32 %s497_s6, 6 }
  0x10   : > { %s139_s13 = scalar_lea.vmem %s490_s0, %s354_s10  ;;  %s463_s16 = scalar_lea.vmem %s491_s1, %s354_s10 }
  0x11   : > { %v148_v0 = vld [vmem:[%s139_s13] sm:$0xff]  ;;  %v149_v1 = vld [vmem:[%s139_s13 + $0x8] sm:$0xff]  ;;  %v150_v2 = vld [vmem:[%s139_s13 + $0x10] sm:$0xff] }
  0x12   : > { %v151_v3 = vld [vmem:[%s139_s13 + $0x18] sm:$0xff]  ;;  %v157_v4 = vsel %vm156_vm0, %v148_v0, 0.0  ;;  %v158_v5 = vsel %vm156_vm0, %v149_v1, 0.0  ;;  %v160_v6 = vsel %vm156_vm0, %v150_v2, 0.0  ;;  %v152_v7 = vld [vmem:[%s139_s13 + $0x20] sm:$0xff]  ;;  %v153_v10 = vld [vmem:[%s139_s13 + $0x28] sm:$0xff] }
  0x13   : > { %v159_v8 = vadd.f32 %v158_v5, %v157_v4  ;;  %v162_v9 = vsel %vm156_vm0, %v151_v3, 0.0  ;;  %v164_v12 = vsel %vm156_vm0, %v152_v7, 0.0  ;;  %v154_v13 = vld [vmem:[%s139_s13 + $0x30] sm:$0xff]  ;;  %v166_v15 = vsel %vm156_vm0, %v153_v10, 0.0  ;;  %v155_v16 = vld [vmem:[%s139_s13 + $0x38] sm:$0xff] }
  0x14   : > { %v168_v18 = vsel %vm156_vm0, %v154_v13, 0.0  ;;  %v170_v20 = vsel %vm156_vm0, %v155_v16, 0.0 }
  0x15   : > { %v161_v11 = vadd.f32 %v160_v6, %v159_v8 }
  0x17   : > { %v163_v14 = vadd.f32 %v162_v9, %v161_v11 }
  0x19   : > { %v165_v17 = vadd.f32 %v164_v12, %v163_v14 }
  0x1b   : > { %v167_v19 = vadd.f32 %v166_v15, %v165_v17 }
  0x1d   : > { %v169_v21 = vadd.f32 %v168_v18, %v167_v19 }
  0x1f   : > { %v171_v22 = vadd.f32 %v170_v20, %v169_v21 }
  0x21   : > { %v172_v23 = vrot.slane %v171_v22, 4 }
  0x23   : > { %v173_v24 = vadd.f32 %v172_v23, %v171_v22 }
  0x25   : > { %v174_v25 = vrot.slane %v173_v24, 2 }
  0x27   : > { %v175_v26 = vadd.f32 %v174_v25, %v173_v24 }
  0x29   : > { %v176_v27 = vrot.slane %v175_v26, 1 }
  0x2b   : > { %v177_v28 = vadd.f32 %v176_v27, %v175_v26 }
  0x2d   : > { %v179_v29 = vmul.f32 0.015625, %v177_v28 }
  0x2f   : > { %v180_v30 = vsub.f32 %v148_v0, %v179_v29  ;;  %v181_v31 = vsub.f32 %v149_v1, %v179_v29  ;;  %v182_v32 = vsub.f32 %v150_v2, %v179_v29  ;;  %v183_v33 = vsub.f32 %v151_v3, %v179_v29 }
  0x30   : > { %v184_v34 = vsub.f32 %v152_v7, %v179_v29  ;;  %v185_v35 = vsub.f32 %v153_v10, %v179_v29  ;;  %v186_v40 = vsub.f32 %v154_v13, %v179_v29  ;;  %v187_v46 = vsub.f32 %v155_v16, %v179_v29 }
  0x31   : > { %v188_v36 = vmul.f32 %v180_v30, %v180_v30  ;;  %v189_v37 = vmul.f32 %v181_v31, %v181_v31  ;;  %v190_v38 = vmul.f32 %v182_v32, %v182_v32  ;;  %v191_v39 = vmul.f32 %v183_v33, %v183_v33 }
  0x32   : > { %v192_v41 = vmul.f32 %v184_v34, %v184_v34  ;;  %v193_v47 = vmul.f32 %v185_v35, %v185_v35  ;;  %v194_v50 = vmul.f32 %v186_v40, %v186_v40  ;;  %v195_v53 = vmul.f32 %v187_v46, %v187_v46 }
  0x33   : > { %v196_v42 = vsel %vm156_vm0, %v188_v36, 0.0  ;;  %v197_v43 = vsel %vm156_vm0, %v189_v37, 0.0  ;;  %v199_v44 = vsel %vm156_vm0, %v190_v38, 0.0  ;;  %v201_v48 = vsel %vm156_vm0, %v191_v39, 0.0 }
  0x34   : > { %v198_v45 = vadd.f32 %v197_v43, %v196_v42  ;;  %v203_v51 = vsel %vm156_vm0, %v192_v41, 0.0  ;;  %v205_v54 = vsel %vm156_vm0, %v193_v47, 0.0  ;;  %v207_v56 = vsel %vm156_vm0, %v194_v50, 0.0 }
  0x35   : > { %v209_v58 = vsel %vm156_vm0, %v195_v53, 0.0 }
  0x36   : > { %v200_v49 = vadd.f32 %v199_v44, %v198_v45 }
  0x38   : > { %v202_v52 = vadd.f32 %v201_v48, %v200_v49 }
  0x3a   : > { %v204_v55 = vadd.f32 %v203_v51, %v202_v52 }
  0x3c   : > { %v206_v57 = vadd.f32 %v205_v54, %v204_v55 }
  0x3e   : > { %v208_v59 = vadd.f32 %v207_v56, %v206_v57 }
  0x40   : > { %v210_v60 = vadd.f32 %v209_v58, %v208_v59 }
  0x42   : > { %v211_v61 = vrot.slane %v210_v60, 4 }
  0x44   : > { %v212_v62 = vadd.f32 %v211_v61, %v210_v60 }
  0x46   : > { %v213_v63 = vrot.slane %v212_v62, 2 }
  0x48   : > { %v214_v0 = vadd.f32 %v213_v63, %v212_v62 }
  0x4a   : > { %v215_v1 = vrot.slane %v214_v0, 1 }
  0x4c   : > { %v216_v2 = vadd.f32 %v215_v1, %v214_v0 }
  0x4e   : > { %v217_v3 = vmul.f32 0.015625, %v216_v2 }
  0x50   : > { %v218_v4 = vadd.f32 1e-05, %v217_v3 }
  0x52   : > { %380 = vrsqrt.f32 %v218_v4 }
  0x5c   : > { %v381_v5 = vpop.eup %380 }
  0x5d   : > { %v220_v6 = vmul.f32 %v381_v5, %v180_v30  ;;  %v221_v7 = vmul.f32 %v381_v5, %v181_v31  ;;  %v222_v8 = vmul.f32 %v381_v5, %v182_v32  ;;  %v223_v9 = vmul.f32 %v381_v5, %v183_v33 }
  0x5e   : > { %v224_v10 = vmul.f32 %v381_v5, %v184_v34  ;;  %v225_v11 = vmul.f32 %v381_v5, %v185_v35  ;;  %v226_v12 = vmul.f32 %v381_v5, %v186_v40  ;;  %v227_v13 = vmul.f32 %v381_v5, %v187_v46 }
  0x5f   : > { %vm228_vm1 = vcmp.ge.f32.partialorder %v220_v6, 0.0  ;;  %v236_v14 = vmul.f32 0.2, %v220_v6  ;;  %vm229_vm2 = vcmp.ge.f32.partialorder %v221_v7, 0.0  ;;  %v237_v15 = vmul.f32 0.2, %v221_v7 }
  0x60   : > { %vm230_vm3 = vcmp.ge.f32.partialorder %v222_v8, 0.0  ;;  %v238_v16 = vmul.f32 0.2, %v222_v8  ;;  %vm231_vm4 = vcmp.ge.f32.partialorder %v223_v9, 0.0  ;;  %v239_v17 = vmul.f32 0.2, %v223_v9 }
  0x61   : > { %v244_v18 = vsel %vm228_vm1, %v220_v6, %v236_v14  ;;  %v245_v19 = vsel %vm229_vm2, %v221_v7, %v237_v15  ;;  %vm232_vm5 = vcmp.ge.f32.partialorder %v224_v10, 0.0  ;;  %v240_v20 = vmul.f32 0.2, %v224_v10 }
  0x62   : > { %252 = vst.msk [vmem:[%s463_s16] sm:$0xff] %vm156_vm0, %v244_v18  ;;  %253 = vst.msk [vmem:[%s463_s16 + $0x8] sm:$0xff] %vm156_vm0, %v245_v19  ;;  %v246_v21 = vsel %vm230_vm3, %v222_v8, %v238_v16  ;;  %v247_v22 = vsel %vm231_vm4, %v223_v9, %v239_v17  ;;  %vm233_vm6 = vcmp.ge.f32.partialorder %v225_v11, 0.0  ;;  %v241_v23 = vmul.f32 0.2, %v225_v11 }
  0x63   : > { %254 = vst.msk [vmem:[%s463_s16 + $0x10] sm:$0xff] %vm156_vm0, %v246_v21  ;;  %255 = vst.msk [vmem:[%s463_s16 + $0x18] sm:$0xff] %vm156_vm0, %v247_v22  ;;  %v248_v24 = vsel %vm232_vm5, %v224_v10, %v240_v20  ;;  %vm234_vm7 = vcmp.ge.f32.partialorder %v226_v12, 0.0  ;;  %v242_v25 = vmul.f32 0.2, %v226_v12  ;;  %vm235_vm8 = vcmp.ge.f32.partialorder %v227_v13, 0.0 }
  0x64   : > { %256 = vst.msk [vmem:[%s463_s16 + $0x20] sm:$0xff] %vm156_vm0, %v248_v24  ;;  %v249_v26 = vsel %vm233_vm6, %v225_v11, %v241_v23  ;;  %v243_v27 = vmul.f32 0.2, %v227_v13 }
  0x65   : > { %257 = vst.msk [vmem:[%s463_s16 + $0x28] sm:$0xff] %vm156_vm0, %v249_v26  ;;  %v250_v28 = vsel %vm234_vm7, %v226_v12, %v242_v25 }
  0x66   : > { %258 = vst.msk [vmem:[%s463_s16 + $0x30] sm:$0xff] %vm156_vm0, %v250_v28  ;;  %v251_v29 = vsel %vm235_vm8, %v227_v13, %v243_v27 }
  0x67   : > { %259 = vst.msk [vmem:[%s463_s16 + $0x38] sm:$0xff] %vm156_vm0, %v251_v29 }
  0x68 PF: > { %s11_s8 = sadd.s32 1, %s404_s8   ;;  %s492_s6 = smov %s400_s7 }
  0x69   : > { %p8_p5 = scmp.ge.s32.totalorder %s11_s8, 4   ;;  %s493_s7 = smov %s495_s9 }
  0x6b   :  { %10 = sbr.rel (!%p8_p5) target bundleno = 2 (0x2), region = 54 }

// kernel: nlayer_discriminator.9
= control target key start
LH: loop header
LB: loop body
LE: loop exit
PB: predicated region body
PF: predicated region fallthrough
CT: control target
= control target key end

     0   :  { %s1897_s12 = smov 0   ;;  %s1899_s13 = smov 0   ;;  %s2241_s0 = inlined_call_operand.vmem [shape: f32[2,16,17,64], index: 0, kind: input, shape index: {}, may-alias: {0,1}]   ;;  %s2242_s1 = inlined_call_operand.vmem [shape: f32[2,16,17,64], index: 1, kind: input, shape index: {}, may-alias: {0,1}]   ;;  %s2243_s2 = inlined_call_operand.vmem [shape: f32[4,64,32], index: 2, kind: input, shape index: {}]   ;;  %s2244_s3 = inlined_call_operand.vmem [shape: f32[2,8,16,32], index: 3, kind: output, shape index: {}]  }
   0x1   :  { %s1901_s14 = smov 0  }
   0x2 LB: > { %s25_s15 = sadd.s32 1, %s1871_s13  ;;  %p1360_p0 = scmp.ge.s32.totalorder %s1875_s14, 1  ;;  %s1875_s14 = sphi %s1901_s14, %s13_s14   ;;  %s1871_s13 = sphi %s1899_s13, %s2246_s13   ;;  %s1867_s12 = sphi %s1897_s12, %s2245_s12  }
   0x3   : > { %p27_p1 = scmp.ge.s32.totalorder %s25_s15, 2  ;;  %p181_p2 = scmp.lt.s32.totalorder %s1875_s14, 3 }
   0x5   : > { %s2248_s15 = smov (%p27_p1, %s25_s15), 0  ;;  %p182_p3 = pnand %p1360_p0, %p181_p2 }
   0x6   : > { %v1365_v0 = vld [vmem:[%s2243_s2 + $0x40] sm:$0xff] (!%p182_p3)  ;;  %v1366_v1 = vld [vmem:[%s2243_s2 + $0x48] sm:$0xff] (!%p182_p3)  ;;  %p227_p4 = scmp.lt.s32.totalorder (!%p182_p3), %s1867_s12, 1  ;;  %v1367_v5 = vld [vmem:[%s2243_s2 + $0x50] sm:$0xff] (!%p182_p3)  ;;  %vm285_vm0 = vcmask (!%p182_p3), 523264   ;;  %vm288_vm1 = vcmask (!%p182_p3), 516096  }
   0x7   : > { %185 = sbr.rel (%p182_p3) target bundleno = 305 (0x131), region = 32  ;;  %v1405_v2 = vld [vmem:[%s2243_s2 + $0x80] sm:$0xff] (!%p182_p3)  ;;  %v1714_v3 = vpack.c.bf16 (!%p182_p3), %v1366_v1, %v1365_v0  ;;  %v1406_v4 = vld [vmem:[%s2243_s2 + $0x88] sm:$0xff] (!%p182_p3)  ;;  %v1368_v6 = vld [vmem:[%s2243_s2 + $0x58] sm:$0xff] (!%p182_p3)  ;;  %vm1222_vm2 = vcmask (!%p182_p3), 261120  }
   0x8   : > { %v1746_v7 = vpack.c.bf16 (!%p182_p3), %v1406_v4, %v1405_v2  ;;  %v1718_v8 = vpack.c.bf16 (!%p182_p3), %v1368_v6, %v1367_v5  ;;  %v1407_v9 = vld [vmem:[%s2243_s2 + $0x90] sm:$0xff] (!%p182_p3)  ;;  %v1408_v10 = vld [vmem:[%s2243_s2 + $0x98] sm:$0xff] (!%p182_p3)  ;;  %v1369_v11 = vld [vmem:[%s2243_s2 + $0x60] sm:$0xff] (!%p182_p3) }
   0x9   : > { %1715 = vmatprep.subr.bf16.mxu1 (!%p182_p3), %v1714_v3  ;;  %v1750_v12 = vpack.c.bf16 (!%p182_p3), %v1408_v10, %v1407_v9  ;;  %v1370_v13 = vld [vmem:[%s2243_s2 + $0x68] sm:$0xff] (!%p182_p3)  ;;  %v1409_v14 = vld [vmem:[%s2243_s2 + $0xa0] sm:$0xff] (!%p182_p3)  ;;  %v1371_v17 = vld [vmem:[%s2243_s2 + $0x70] sm:$0xff] (!%p182_p3) }
   0xa   : > { %v1410_v15 = vld [vmem:[%s2243_s2 + $0xa8] sm:$0xff] (!%p182_p3)  ;;  %1747 = vmatprep.subr.bf16.mxu0 (!%p182_p3), %v1746_v7  ;;  %1717 = vmatpush3.bf16.msra.mxu1 (!%p182_p3), %v1714_v3  ;;  %v1722_v16 = vpack.c.bf16 (!%p182_p3), %v1370_v13, %v1369_v11  ;;  %v1372_v19 = vld [vmem:[%s2243_s2 + $0x78] sm:$0xff] (!%p182_p3)  ;;  %v1411_v20 = vld [vmem:[%s2243_s2 + $0xb0] sm:$0xff] (!%p182_p3) }
   0xb   : > { %1749 = vmatpush3.bf16.msra.mxu0 (!%p182_p3), %v1746_v7  ;;  %1719 = vmatprep.subr.bf16.mxu1 (!%p182_p3), %v1718_v8  ;;  %v1754_v18 = vpack.c.bf16 (!%p182_p3), %v1410_v15, %v1409_v14  ;;  %v1412_v21 = vld [vmem:[%s2243_s2 + $0xb8] sm:$0xff] (!%p182_p3)  ;;  %v1726_v28 = vpack.c.bf16 (!%p182_p3), %v1372_v19, %v1371_v17  ;;  %v334_v29 = vld [vmem:[%s2243_s2] sm:$0xff] (!%p182_p3)  ;;  %v335_v34 = vld [vmem:[%s2243_s2 + $0x8] sm:$0xff] (!%p182_p3) }
   0xc   : > { %1751 = vmatprep.subr.bf16.mxu0 (!%p182_p3), %v1750_v12  ;;  %v1758_v33 = vpack.c.bf16 (!%p182_p3), %v1412_v21, %v1411_v20  ;;  %v1429_v37 = vld [vmem:[%s2243_s2 + $0xc0] sm:$0xff] (!%p182_p3)  ;;  %v1430_v38 = vld [vmem:[%s2243_s2 + $0xc8] sm:$0xff] (!%p182_p3)  ;;  %v1730_v44 = vpack.c.bf16 (!%p182_p3), %v335_v34, %v334_v29  ;;  %v336_v46 = vld [vmem:[%s2243_s2 + $0x10] sm:$0xff] (!%p182_p3) }
   0xd   : > { %v1762_v45 = vpack.c.bf16 (!%p182_p3), %v1430_v38, %v1429_v37  ;;  %v337_v47 = vld [vmem:[%s2243_s2 + $0x18] sm:$0xff] (!%p182_p3)  ;;  %v1431_v53 = vld [vmem:[%s2243_s2 + $0xd0] sm:$0xff] (!%p182_p3)  ;;  %v338_v60 = vld [vmem:[%s2243_s2 + $0x20] sm:$0xff] (!%p182_p3) }
   0xe   : > { %s2250_s12 = smov (!%p227_p4, %s1867_s12), 1  ;;  %1721 = vmatpush3.bf16.msra.mxu1 %v1718_v8  ;;  %v1432_v54 = vld [vmem:[%s2243_s2 + $0xd8] sm:$0xff]  ;;  %v1734_v57 = vpack.c.bf16 %v337_v47, %v336_v46  ;;  %v339_v61 = vld [vmem:[%s2243_s2 + $0x28] sm:$0xff]  ;;  %v1433_v63 = vld [vmem:[%s2243_s2 + $0xe0] sm:$0xff] }
   0xf   : > { %s1826_s17 = smul.u32 384, %s2250_s12  ;;  %1753 = vmatpush3.bf16.msra.mxu0 %v1750_v12  ;;  %1723 = vmatprep.subr.bf16.mxu1 %v1722_v16  ;;  %v1766_v59 = vpack.c.bf16 %v1432_v54, %v1431_v53  ;;  %v1434_v0 = vld [vmem:[%s2243_s2 + $0xe8] sm:$0xff]  ;;  %v1738_v6 = vpack.c.bf16 %v339_v61, %v338_v60  ;;  %v340_v13 = vld [vmem:[%s2243_s2 + $0x30] sm:$0xff]  ;;  %v341_v14 = vld [vmem:[%s2243_s2 + $0x38] sm:$0xff] }
  0x10   : > { %1755 = vmatprep.subr.bf16.mxu0 %v1754_v18  ;;  %v1770_v10 = vpack.c.bf16 %v1434_v0, %v1433_v63  ;;  %v1436_v17 = vld [vmem:[%s2243_s2 + $0xf8] sm:$0xff]  ;;  %v1742_v20 = vpack.c.bf16 %v341_v14, %v340_v13 }
  0x11   : > { %s1971_s28 = scalar_lea.vmem %s2241_s0, %s1826_s17  ;;  %s1456_s27 = sadd.s32 192, %s1826_s17 }
  0x12   : > { %v261_v22 = vld [vmem:[%s1971_s28] sm:$0xff]  ;;  %v262_v23 = vld [vmem:[%s1971_s28 + $0x8] sm:$0xff]  ;;  %v264_v24 = vld [vmem:[%s1971_s28 + $0x18] sm:$0xff]  ;;  %1725 = vmatpush3.bf16.msra.mxu1 %v1722_v16  ;;  %s2081_s7 = scalar_lea.vmem %s2242_s1, %s1456_s27 }
  0x13   : > { %286 = vst.msk [vmem:[#allocation2] sm:$0xff] %vm285_vm0, %v261_v22  ;;  %287 = vst.msk [vmem:[#allocation2 + $0x8] sm:$0xff] %vm285_vm0, %v262_v23  ;;  %v263_v25 = vld [vmem:[%s1971_s28 + $0x10] sm:$0x1]  ;;  %v265_v26 = vld [vmem:[%s1971_s28 + $0x20] sm:$0xff]  ;;  %1757 = vmatpush3.bf16.msra.mxu0 %v1754_v18  ;;  %1727 = vmatprep.subr.bf16.mxu1 %v1726_v28 }
  0x14   : > { %290 = vst.msk [vmem:[#allocation2 + $0x18] sm:$0xff] %vm285_vm0, %v264_v24  ;;  %v267_v27 = vld [vmem:[%s1971_s28 + $0x30] sm:$0xff]  ;;  %291 = vst.msk [vmem:[#allocation2 + $0x20] sm:$0xff] %vm285_vm0, %v265_v26  ;;  %v266_v30 = vld [vmem:[%s1971_s28 + $0x28] sm:$0x1]  ;;  %1759 = vmatprep.subr.bf16.mxu0 %v1758_v33 }
  0x15   : > { %289 = vst.msk [vmem:[#allocation2 + $0x10] sm:$0x1] %vm288_vm1, %v263_v25  ;;  %v268_v31 = vld [vmem:[%s1971_s28 + $0x38] sm:$0xff]  ;;  %v270_v32 = vld [vmem:[%s1971_s28 + $0x48] sm:$0xff]  ;;  %292 = vst.msk [vmem:[#allocation2 + $0x28] sm:$0x1] %vm288_vm1, %v266_v30 }
  0x16   : > { %293 = vst.msk [vmem:[#allocation2 + $0x30] sm:$0xff] %vm285_vm0, %v267_v27  ;;  %294 = vst.msk [vmem:[#allocation2 + $0x38] sm:$0xff] %vm285_vm0, %v268_v31  ;;  %v269_v35 = vld [vmem:[%s1971_s28 + $0x40] sm:$0x1]  ;;  %v271_v36 = vld [vmem:[%s1971_s28 + $0x50] sm:$0xff]  ;;  %1729 = vmatpush3.bf16.msra.mxu1 %v1726_v28 }
  0x17   : > { %296 = vst.msk [vmem:[#allocation2 + $0x48] sm:$0xff] %vm285_vm0, %v270_v32  ;;  %297 = vst.msk [vmem:[#allocation2 + $0x50] sm:$0xff] %vm285_vm0, %v271_v36  ;;  %v273_v39 = vld [vmem:[%s1971_s28 + $0x60] sm:$0xff]  ;;  %v272_v40 = vld [vmem:[%s1971_s28 + $0x58] sm:$0x1]  ;;  %1761 = vmatpush3.bf16.msra.mxu0 %v1758_v33  ;;  %1731 = vmatprep.subr.bf16.mxu1 %v1730_v44 }
  0x18   : > { %295 = vst.msk [vmem:[#allocation2 + $0x40] sm:$0x1] %vm288_vm1, %v269_v35  ;;  %v274_v41 = vld [vmem:[%s1971_s28 + $0x68] sm:$0xff]  ;;  %v276_v42 = vld [vmem:[%s1971_s28 + $0x78] sm:$0xff]  ;;  %298 = vst.msk [vmem:[#allocation2 + $0x58] sm:$0x1] %vm288_vm1, %v272_v40  ;;  %1763 = vmatprep.subr.bf16.mxu0 %v1762_v45 }
  0x19   : > { %299 = vst.msk [vmem:[#allocation2 + $0x60] sm:$0xff] %vm285_vm0, %v273_v39  ;;  %300 = vst.msk [vmem:[#allocation2 + $0x68] sm:$0xff] %vm285_vm0, %v274_v41  ;;  %v275_v43 = vld [vmem:[%s1971_s28 + $0x70] sm:$0x1]  ;;  %v277_v48 = vld [vmem:[%s1971_s28 + $0x80] sm:$0xff] }
  0x1a   : > { %302 = vst.msk [vmem:[#allocation2 + $0x78] sm:$0xff] %vm285_vm0, %v276_v42  ;;  %v342_v49 = vld [vmem:[#allocation2 + $0x1] sm:$0xff]  ;;  %303 = vst.msk [vmem:[#allocation2 + $0x80] sm:$0xff] %vm285_vm0, %v277_v48  ;;  %v279_v51 = vld [vmem:[%s1971_s28 + $0x90] sm:$0xff] }
  0x1b   : > { %301 = vst.msk [vmem:[#allocation2 + $0x70] sm:$0x1] %vm288_vm1, %v275_v43  ;;  %v2024_v50 = vld [vmem:[#allocation2 + $0x18] sm:$0xff]  ;;  %1570 = vmatprep.mubr.msk.f32.mxu1 %vm285_vm0, %v342_v49  ;;  %v2038_v55 = vld [vmem:[#allocation2 + $0x20] sm:$0xff]  ;;  %v278_v3 = vld [vmem:[%s1971_s28 + $0x88] sm:$0x1] }
  0x1c   : > { %v343_v52 = vld [vmem:[#allocation2 + $0x9] sm:$0xff]  ;;  %305 = vst.msk [vmem:[#allocation2 + $0x90] sm:$0xff] %vm285_vm0, %v279_v51  ;;  %1650 = vmatprep.mubr.msk.f32.mxu0 %vm285_vm0, %v2024_v50  ;;  %v2040_v56 = vld [vmem:[#allocation2 + $0x19] sm:$0xff]  ;;  %v2055_v62 = vld [vmem:[#allocation2 + $0x21] sm:$0xff] }
  0x1d   : > { %1571 = vmatmul.mubr.msk.f32.vlgmr.msra.gmra.mrb[0].mxu1 %vm285_vm0, %v343_v52  ;;  %v2043_v58 = vld [vmem:[#allocation2 + $0x30] sm:$0xff]  ;;  %1651 = vmatmul.mubr.msk.f32.vlgmr.msra.gmra.mrb[0].mxu0 %vm285_vm0, %v2038_v55  ;;  %v2065_v1 = vld [vmem:[#allocation2 + $0x38] sm:$0xff]  ;;  %304 = vst.msk [vmem:[#allocation2 + $0x88] sm:$0x1] %vm288_vm1, %v278_v3  ;;  %v282_v11 = vld [vmem:[%s1971_s28 + $0xa8] sm:$0xff] }
  0x1e   : > { %1733 = vmatpush3.bf16.msra.mxu1 %v1730_v44  ;;  %1765 = vmatpush3.bf16.msra.mxu0 %v1762_v45  ;;  %v2067_v2 = vld [vmem:[#allocation2 + $0x31] sm:$0xff]  ;;  %v2072_v4 = vld [vmem:[#allocation2 + $0x48] sm:$0xff]  ;;  %v281_v12 = vld [vmem:[%s1971_s28 + $0xa0] sm:$0x1]  ;;  %308 = vst.msk [vmem:[#allocation2 + $0xa8] sm:$0xff] %vm285_vm0, %v282_v11 }
  0x1f   : > { %1573 = vmatprep.mubr.msk.f32.mxu1 %vm285_vm0, %v2040_v56  ;;  %1653 = vmatprep.mubr.msk.f32.mxu0 %vm285_vm0, %v2043_v58  ;;  %v2074_v5 = vld [vmem:[#allocation2 + $0x39] sm:$0xff]  ;;  %v2085_v8 = vld [vmem:[#allocation2 + $0x50] sm:$0xff]  ;;  %307 = vst.msk [vmem:[#allocation2 + $0xa0] sm:$0x1] %vm288_vm1, %v281_v12  ;;  %v284_v21 = vld [vmem:[%s1971_s28 + $0xb8] sm:$0x1] }
  0x20   : > { %1735 = vmatprep.subr.bf16.mxu1 %v1734_v57  ;;  %v280_v7 = vld [vmem:[%s1971_s28 + $0x98] sm:$0xff]  ;;  %1767 = vmatprep.subr.bf16.mxu0 %v1766_v59  ;;  %v2087_v9 = vld [vmem:[#allocation2 + $0x49] sm:$0xff]  ;;  %v311_v18 = vld [vmem:[%s2081_s7] sm:$0xff]  ;;  %310 = vst.msk [vmem:[#allocation2 + $0xb8] sm:$0x1] %vm288_vm1, %v284_v21 }
  0x21   : > { %1574 = vmatmul.mubr.msk.f32.gmra.mrb[2].mxu1 %vm285_vm0, %v2055_v62  ;;  %306 = vst.msk [vmem:[#allocation2 + $0x98] sm:$0xff] %vm285_vm0, %v280_v7  ;;  %1654 = vmatmul.mubr.msk.f32.gmra.mrb[2].mxu0 %vm285_vm0, %v2065_v1  ;;  %v283_v15 = vld [vmem:[%s1971_s28 + $0xb0] sm:$0xff]  ;;  %v2115_v19 = vld [vmem:[#allocation2 + $0x60] sm:$0xff]  ;;  %315 = vst.msk [vmem:[#allocation2 + $0xc0] sm:$0xff] %vm285_vm0, %v311_v18  ;;  %s1457_s28 = sshll.u32 %s2250_s12, 7 }
  0x22   : > { %1576 = vmatprep.mubr.msk.f32.mxu1 %vm285_vm0, %v2067_v2  ;;  %1656 = vmatprep.mubr.msk.f32.mxu0 %vm285_vm0, %v2072_v4  ;;  %309 = vst.msk [vmem:[#allocation2 + $0xb0] sm:$0xff] %vm285_vm0, %v283_v15  ;;  %v1435_v16 = vld [vmem:[%s2243_s2 + $0xf0] sm:$0xff]  ;;  %v312_v22 = vld [vmem:[%s2081_s7 + $0x8] sm:$0xff]  ;;  %v762_v28 = vld [vmem:[#allocation2 + $0x78] sm:$0xff]  ;;  %s2198_s23 = scalar_lea.vmem %s2244_s3, %s1457_s28 }
  0x23   : > { %1737 = vmatpush3.bf16.msra.mxu1 %v1734_v57  ;;  %1769 = vmatpush3.bf16.msra.mxu0 %v1766_v59  ;;  %v1774_v23 = vpack.c.bf16 %v1436_v17, %v1435_v16  ;;  %316 = vst.msk [vmem:[#allocation2 + $0xc8] sm:$0xff] %vm285_vm0, %v312_v22  ;;  %v313_v24 = vld [vmem:[%s2081_s7 + $0x10] sm:$0x1]  ;;  %v349_v25 = vld [vmem:[#allocation2 + $0x51] sm:$0xff]  ;;  %v761_v26 = vld [vmem:[#allocation2 + $0x68] sm:$0xff] }
  0x24   : > { %1739 = vmatprep.subr.bf16.mxu1 %v1738_v6  ;;  %1771 = vmatprep.subr.bf16.mxu0 %v1770_v10  ;;  %317 = vst.msk [vmem:[#allocation2 + $0xd0] sm:$0x1] %vm288_vm1, %v313_v24  ;;  %v350_v27 = vld [vmem:[#allocation2 + $0x61] sm:$0xff]  ;;  %v351_v29 = vld [vmem:[#allocation2 + $0x69] sm:$0xff]  ;;  %v352_v31 = vld [vmem:[#allocation2 + $0x79] sm:$0xff] }
  0x25   : > { %1577 = vmatmul.mubr.msk.f32.gmra.mrb[4].mxu1 %vm285_vm0, %v2074_v5  ;;  %1657 = vmatmul.mubr.msk.f32.gmra.mrb[4].mxu0 %vm285_vm0, %v2085_v8  ;;  %v763_v30 = vld [vmem:[#allocation2 + $0x80] sm:$0xff]  ;;  %v764_v32 = vld [vmem:[#allocation2 + $0x90] sm:$0xff]  ;;  %v766_v36 = vld [vmem:[#allocation2 + $0xa8] sm:$0xff] }
  0x26   : > { %1579 = vmatprep.mubr.msk.f32.mxu1 %vm285_vm0, %v2087_v9  ;;  %1659 = vmatprep.mubr.msk.f32.mxu0 %vm285_vm0, %v2115_v19  ;;  %v353_v33 = vld [vmem:[#allocation2 + $0x81] sm:$0xff] }
  0x27   : > { %1741 = vmatpush3.bf16.msra.mxu1 %v1738_v6  ;;  %1773 = vmatpush3.bf16.msra.mxu0 %v1770_v10  ;;  %v318_v43 = vld [vmem:[#allocation2] sm:$0xff]  ;;  %v319_v44 = vld [vmem:[#allocation2 + $0x8] sm:$0xff] }
  0x28   : > { %1743 = vmatprep.subr.bf16.mxu1 %v1742_v20  ;;  %1775 = vmatprep.subr.bf16.mxu0 %v1774_v23  ;;  %v765_v34 = vld [vmem:[#allocation2 + $0x98] sm:$0xff]  ;;  %v768_v40 = vld [vmem:[#allocation2 + $0xc0] sm:$0xff] }
  0x29   : > { %1580 = vmatmul.mubr.msk.f32.gmra.mrb[6].mxu1 %vm285_vm0, %v349_v25  ;;  %1660 = vmatmul.mubr.msk.f32.gmra.mrb[6].mxu0 %vm285_vm0, %v761_v26  ;;  %v354_v35 = vld [vmem:[#allocation2 + $0x91] sm:$0xff]  ;;  %v355_v37 = vld [vmem:[#allocation2 + $0x99] sm:$0xff]  ;;  %v356_v39 = vld [vmem:[#allocation2 + $0xa9] sm:$0xff] }
  0x2a   : > { %1582 = vmatprep.mubr.msk.f32.mxu1 %vm285_vm0, %v350_v27  ;;  %1662 = vmatprep.mubr.msk.f32.mxu0 %vm285_vm0, %v762_v28  ;;  %v767_v38 = vld [vmem:[#allocation2 + $0xb0] sm:$0xff]  ;;  %v769_v42 = vld [vmem:[#allocation2 + $0xc8] sm:$0xff] }
  0x2b   : > { %1745 = vmatpush3.bf16.msra.mxu1 %v1742_v20  ;;  %1777 = vmatpush3.bf16.msra.mxu0 %v1774_v23  ;;  %v357_v41 = vld [vmem:[#allocation2 + $0xb1] sm:$0xff]  ;;  %v1002_v45 = vld [vmem:[#allocation2 + $0xc1] sm:$0xff]  ;;  %v1003_v46 = vld [vmem:[#allocation2 + $0xc9] sm:$0xff] }
  0x2d   : > { %1583 = vmatmul.mubr.msk.f32.gmra.mrb[8].mxu1 %vm285_vm0, %v351_v29  ;;  %1663 = vmatmul.mubr.msk.f32.gmra.mrb[8].mxu0 %vm285_vm0, %v763_v30 }
  0x2e   : > { %1585 = vmatprep.mubr.msk.f32.mxu1 %vm285_vm0, %v352_v31  ;;  %1665 = vmatprep.mubr.msk.f32.mxu0 %vm285_vm0, %v764_v32 }
  0x31   : > { %1586 = vmatmul.mubr.msk.f32.gmra.mrb[10].mxu1 %vm285_vm0, %v353_v33  ;;  %1666 = vmatmul.mubr.msk.f32.gmra.mrb[10].mxu0 %vm285_vm0, %v765_v34 }
  0x32   : > { %1588 = vmatprep.mubr.msk.f32.mxu1 %vm285_vm0, %v354_v35  ;;  %1668 = vmatprep.mubr.msk.f32.mxu0 %vm285_vm0, %v766_v36 }
  0x35   : > { %1589 = vmatmul.mubr.msk.f32.gmra.mrb[12].mxu1 %vm285_vm0, %v355_v37  ;;  %1669 = vmatmul.mubr.msk.f32.gmra.mrb[12].mxu0 %vm285_vm0, %v767_v38 }
  0x36   : > { %1591 = vmatprep.mubr.msk.f32.mxu1 %vm285_vm0, %v356_v39  ;;  %1671 = vmatprep.mubr.msk.f32.mxu0 %vm285_vm0, %v768_v40 }
  0x39   : > { %1592 = vmatmul.mubr.msk.f32.gmra.mrb[14].mxu1 %vm285_vm0, %v357_v41  ;;  %1672 = vmatmul.mubr.msk.f32.gmra.mrb[14].mxu0 %vm285_vm0, %v769_v42 }
  0x3a   : > { %1610 = vmatprep.mubr.msk.f32.mxu1 %vm285_vm0, %v318_v43  ;;  %1690 = vmatprep.mubr.msk.f32.mxu0 %vm285_vm0, %v2040_v56 }
  0x3d   : > { %1611 = vmatmul.mubr.msk.f32.vlgmr.msra.gmra.mrb[0].mxu1 %vm285_vm0, %v319_v44  ;;  %1691 = vmatmul.mubr.msk.f32.vlgmr.msra.gmra.mrb[0].mxu0 %vm285_vm0, %v2055_v62 }
  0x3e   : > { %1613 = vmatprep.mubr.msk.f32.mxu1 %vm285_vm0, %v2024_v50  ;;  %1693 = vmatprep.mubr.msk.f32.mxu0 %vm285_vm0, %v2067_v2 }
  0x41   : > { %1614 = vmatmul.mubr.msk.f32.gmra.mrb[2].mxu1 %vm285_vm0, %v2038_v55  ;;  %1694 = vmatmul.mubr.msk.f32.gmra.mrb[2].mxu0 %vm285_vm0, %v2074_v5 }
  0x42   : > { %1616 = vmatprep.mubr.msk.f32.mxu1 %vm285_vm0, %v2043_v58  ;;  %1696 = vmatprep.mubr.msk.f32.mxu0 %vm285_vm0, %v2087_v9 }
  0x45   : > { %1617 = vmatmul.mubr.msk.f32.gmra.mrb[4].mxu1 %vm285_vm0, %v2065_v1  ;;  %1697 = vmatmul.mubr.msk.f32.gmra.mrb[4].mxu0 %vm285_vm0, %v349_v25 }
  0x46   : > { %1619 = vmatprep.mubr.msk.f32.mxu1 %vm285_vm0, %v2072_v4  ;;  %1699 = vmatprep.mubr.msk.f32.mxu0 %vm285_vm0, %v350_v27 }
  0x49   : > { %1620 = vmatmul.mubr.msk.f32.gmra.mrb[6].mxu1 %vm285_vm0, %v2085_v8  ;;  %1700 = vmatmul.mubr.msk.f32.gmra.mrb[6].mxu0 %vm285_vm0, %v351_v29 }
  0x4a   : > { %1622 = vmatprep.mubr.msk.f32.mxu1 %vm285_vm0, %v2115_v19  ;;  %1702 = vmatprep.mubr.msk.f32.mxu0 %vm285_vm0, %v352_v31 }
  0x4d   : > { %1623 = vmatmul.mubr.msk.f32.gmra.mrb[8].mxu1 %vm285_vm0, %v761_v26  ;;  %1703 = vmatmul.mubr.msk.f32.gmra.mrb[8].mxu0 %vm285_vm0, %v353_v33 }
  0x4e   : > { %1625 = vmatprep.mubr.msk.f32.mxu1 %vm285_vm0, %v762_v28  ;;  %1705 = vmatprep.mubr.msk.f32.mxu0 %vm285_vm0, %v354_v35 }
  0x51   : > { %1626 = vmatmul.mubr.msk.f32.gmra.mrb[10].mxu1 %vm285_vm0, %v763_v30  ;;  %1706 = vmatmul.mubr.msk.f32.gmra.mrb[10].mxu0 %vm285_vm0, %v355_v37 }
  0x52   : > { %1628 = vmatprep.mubr.msk.f32.mxu1 %vm285_vm0, %v764_v32  ;;  %1708 = vmatprep.mubr.msk.f32.mxu0 %vm285_vm0, %v356_v39 }
  0x55   : > { %1629 = vmatmul.mubr.msk.f32.gmra.mrb[12].mxu1 %vm285_vm0, %v765_v34  ;;  %1709 = vmatmul.mubr.msk.f32.gmra.mrb[12].mxu0 %vm285_vm0, %v357_v41 }
  0x56   : > { %1631 = vmatprep.mubr.msk.f32.mxu1 %vm285_vm0, %v766_v36  ;;  %1711 = vmatprep.mubr.msk.f32.mxu0 %vm285_vm0, %v1002_v45 }
  0x59   : > { %1632 = vmatmul.mubr.msk.f32.gmra.mrb[14].mxu1 %vm285_vm0, %v767_v38  ;;  %1712 = vmatmul.mubr.msk.f32.gmra.mrb[14].mxu0 %vm285_vm0, %v1003_v46 }
 0x110   : > { %v1612_v47 = vpop.f32.mrb[0].mxu1  ;;  %v1692_v48 = vpop.f32.mrb[0].mxu0 }
 0x111   : > { %v674_v49 = vpop.f32.mrb[1].mxu1  ;;  %v1778_v50 = vadd.f32 %v1692_v48, %v1612_v47  ;;  %v1127_v51 = vpop.f32.mrb[1].mxu0 }
 0x112   : > { %v1779_v52 = vadd.f32 %v1127_v51, %v674_v49 }
 0x113   : > { %1224 = vst.msk [vmem:[%s2198_s23 + $0x8] sm:$0xff] %vm1222_vm2, %v1778_v50 }
 0x114   : > { %v1615_v53 = vpop.f32.mrb[2].mxu1  ;;  %1223 = vst.msk [vmem:[%s2198_s23] sm:$0xff] %vm1222_vm2, %v1779_v52  ;;  %v1695_v54 = vpop.f32.mrb[2].mxu0 }
 0x115   : > { %v684_v55 = vpop.f32.mrb[3].mxu1  ;;  %v1780_v56 = vadd.f32 %v1695_v54, %v1615_v53  ;;  %v1137_v57 = vpop.f32.mrb[3].mxu0 }
 0x116   : > { %v1781_v58 = vadd.f32 %v1137_v57, %v684_v55 }
 0x117   : > { %1226 = vst.msk [vmem:[%s2198_s23 + $0x18] sm:$0xff] %vm1222_vm2, %v1780_v56 }
 0x118   : > { %v1618_v59 = vpop.f32.mrb[4].mxu1  ;;  %1225 = vst.msk [vmem:[%s2198_s23 + $0x10] sm:$0xff] %vm1222_vm2, %v1781_v58  ;;  %v1698_v60 = vpop.f32.mrb[4].mxu0 }
 0x119   : > { %v694_v61 = vpop.f32.mrb[5].mxu1  ;;  %v1782_v62 = vadd.f32 %v1698_v60, %v1618_v59  ;;  %v1147_v63 = vpop.f32.mrb[5].mxu0 }
 0x11a   : > { %v1783_v0 = vadd.f32 %v1147_v63, %v694_v61 }
 0x11b   : > { %1228 = vst.msk [vmem:[%s2198_s23 + $0x28] sm:$0xff] %vm1222_vm2, %v1782_v62 }
 0x11c   : > { %v1621_v1 = vpop.f32.mrb[6].mxu1  ;;  %1227 = vst.msk [vmem:[%s2198_s23 + $0x20] sm:$0xff] %vm1222_vm2, %v1783_v0  ;;  %v1701_v2 = vpop.f32.mrb[6].mxu0 }
 0x11d   : > { %v704_v3 = vpop.f32.mrb[7].mxu1  ;;  %v1784_v4 = vadd.f32 %v1701_v2, %v1621_v1  ;;  %v1157_v5 = vpop.f32.mrb[7].mxu0 }
 0x11e   : > { %v1785_v6 = vadd.f32 %v1157_v5, %v704_v3 }
 0x11f   : > { %1230 = vst.msk [vmem:[%s2198_s23 + $0x38] sm:$0xff] %vm1222_vm2, %v1784_v4 }
 0x120   : > { %v1624_v7 = vpop.f32.mrb[8].mxu1  ;;  %1229 = vst.msk [vmem:[%s2198_s23 + $0x30] sm:$0xff] %vm1222_vm2, %v1785_v6  ;;  %v1704_v8 = vpop.f32.mrb[8].mxu0 }
 0x121   : > { %v714_v9 = vpop.f32.mrb[9].mxu1  ;;  %v1786_v10 = vadd.f32 %v1704_v8, %v1624_v7  ;;  %v1167_v11 = vpop.f32.mrb[9].mxu0 }
 0x122   : > { %v1787_v12 = vadd.f32 %v1167_v11, %v714_v9 }
 0x123   : > { %1232 = vst.msk [vmem:[%s2198_s23 + $0x48] sm:$0xff] %vm1222_vm2, %v1786_v10 }
 0x124   : > { %v1627_v13 = vpop.f32.mrb[10].mxu1  ;;  %1231 = vst.msk [vmem:[%s2198_s23 + $0x40] sm:$0xff] %vm1222_vm2, %v1787_v12  ;;  %v1707_v14 = vpop.f32.mrb[10].mxu0 }
 0x125   : > { %v724_v15 = vpop.f32.mrb[11].mxu1  ;;  %v1788_v16 = vadd.f32 %v1707_v14, %v1627_v13  ;;  %v1177_v17 = vpop.f32.mrb[11].mxu0 }
 0x126   : > { %v1789_v18 = vadd.f32 %v1177_v17, %v724_v15 }
 0x127   : > { %1234 = vst.msk [vmem:[%s2198_s23 + $0x58] sm:$0xff] %vm1222_vm2, %v1788_v16 }
 0x128   : > { %v1630_v19 = vpop.f32.mrb[12].mxu1  ;;  %1233 = vst.msk [vmem:[%s2198_s23 + $0x50] sm:$0xff] %vm1222_vm2, %v1789_v18  ;;  %v1710_v20 = vpop.f32.mrb[12].mxu0 }
 0x129   : > { %v734_v21 = vpop.f32.mrb[13].mxu1  ;;  %v1790_v22 = vadd.f32 %v1710_v20, %v1630_v19  ;;  %v1187_v23 = vpop.f32.mrb[13].mxu0 }
 0x12a   : > { %v1791_v24 = vadd.f32 %v1187_v23, %v734_v21 }
 0x12b   : > { %1236 = vst.msk [vmem:[%s2198_s23 + $0x68] sm:$0xff] %vm1222_vm2, %v1790_v22 }
 0x12c   : > { %v1633_v25 = vpop.f32.mrb[14].mxu1  ;;  %1235 = vst.msk [vmem:[%s2198_s23 + $0x60] sm:$0xff] %vm1222_vm2, %v1791_v24  ;;  %v1713_v26 = vpop.f32.mrb[14].mxu0 }
 0x12d   : > { %v744_v27 = vpop.f32.mrb[15].mxu1  ;;  %v1792_v28 = vadd.f32 %v1713_v26, %v1633_v25  ;;  %v1197_v29 = vpop.f32.mrb[15].mxu0 }
 0x12e   : > { %v1793_v30 = vadd.f32 %v1197_v29, %v744_v27 }
 0x12f   : > { %1238 = vst.msk [vmem:[%s2198_s23 + $0x78] sm:$0xff] %vm1222_vm2, %v1792_v28 }
 0x130   : > { %1237 = vst.msk [vmem:[%s2198_s23 + $0x70] sm:$0xff] %vm1222_vm2, %v1793_v30 }
 0x131 PF: > { %s13_s14 = sadd.s32 1, %s1875_s14   ;;  %s2245_s12 = smov %s1871_s13 }
 0x132   : > { %p10_p5 = scmp.ge.s32.totalorder %s13_s14, 4   ;;  %s2246_s13 = smov %s2248_s15 }
 0x134   :  { %12 = sbr.rel (!%p10_p5) target bundleno = 2 (0x2), region = 70 }

// kernel: nlayer_discriminator.12
= control target key start
LH: loop header
LB: loop body
LE: loop exit
PB: predicated region body
PF: predicated region fallthrough
CT: control target
= control target key end

     0   :  { %s344_s6 = smov 0   ;;  %s346_s7 = smov 0   ;;  %s390_s0 = inlined_call_operand.vmem [shape: f32[2,16,64], index: 0, kind: input, shape index: {}]   ;;  %s391_s1 = inlined_call_operand.vmem [shape: f32[2,16,64], index: 1, kind: output, shape index: {}]  }
   0x1   :  { %s348_s8 = smov 0  }
   0x2 LB: > { %s23_s9 = sadd.s32 1, %s328_s7  ;;  %p275_p0 = scmp.ge.s32.totalorder %s332_s8, 1  ;;  %s332_s8 = sphi %s348_s8, %s11_s8   ;;  %s328_s7 = sphi %s346_s7, %s393_s7   ;;  %s324_s6 = sphi %s344_s6, %s392_s6  }
   0x3   : > { %p25_p1 = scmp.ge.s32.totalorder %s23_s9, 2  ;;  %p106_p2 = scmp.lt.s32.totalorder %s332_s8, 3 }
   0x5   : > { %s395_s9 = smov (%p25_p1, %s23_s9), 0  ;;  %p107_p3 = pnand %p275_p0, %p106_p2 }
   0x6   : > { %p132_p4 = scmp.lt.s32.totalorder (!%p107_p3), %s324_s6, 1  ;;  %vm150_vm0 = vcmask (!%p107_p3), 523264  }
   0x7   : > { %110 = sbr.rel (%p107_p3) target bundleno = 75 (0x4b), region = 24 }
   0xe   : > { %s397_s6 = smov (!%p132_p4, %s324_s6), 1 }
   0xf   : > { %s282_s10 = sshll.u32 %s397_s6, 4 }
  0x10   : > { %s139_s13 = scalar_lea.vmem %s390_s0, %s282_s10  ;;  %s147_s16 = scalar_lea.vmem %s391_s1, %s282_s10 }
  0x11   : > { %v148_v0 = vld [vmem:[%s139_s13] sm:$0xff]  ;;  %v149_v1 = vld [vmem:[%s139_s13 + $0x8] sm:$0xff] }
  0x12   : > { %v151_v2 = vsel %vm150_vm0, %v148_v0, 0.0  ;;  %v152_v3 = vsel %vm150_vm0, %v149_v1, 0.0 }
  0x13   : > { %v153_v4 = vadd.f32 %v152_v3, %v151_v2 }
  0x15   : > { %v154_v5 = vrot.slane %v153_v4, 4 }
  0x17   : > { %v155_v6 = vadd.f32 %v154_v5, %v153_v4 }
  0x19   : > { %v156_v7 = vrot.slane %v155_v6, 2 }
  0x1b   : > { %v157_v8 = vadd.f32 %v156_v7, %v155_v6 }
  0x1d   : > { %v158_v9 = vrot.slane %v157_v8, 1 }
  0x1f   : > { %v159_v10 = vadd.f32 %v158_v9, %v157_v8 }
  0x21   : > { %v161_v11 = vmul.f32 0.0625, %v159_v10 }
  0x23   : > { %v162_v12 = vsub.f32 %v148_v0, %v161_v11  ;;  %v163_v13 = vsub.f32 %v149_v1, %v161_v11 }
  0x25   : > { %v164_v14 = vmul.f32 %v162_v12, %v162_v12  ;;  %v165_v15 = vmul.f32 %v163_v13, %v163_v13 }
  0x27   : > { %v166_v16 = vsel %vm150_vm0, %v164_v14, 0.0  ;;  %v167_v17 = vsel %vm150_vm0, %v165_v15, 0.0 }
  0x28   : > { %v168_v18 = vadd.f32 %v167_v17, %v166_v16 }
  0x2a   : > { %v169_v19 = vrot.slane %v168_v18, 4 }
  0x2c   : > { %v170_v20 = vadd.f32 %v169_v19, %v168_v18 }
  0x2e   : > { %v171_v21 = vrot.slane %v170_v20, 2 }
  0x30   : > { %v172_v22 = vadd.f32 %v171_v21, %v170_v20 }
  0x32   : > { %v173_v23 = vrot.slane %v172_v22, 1 }
  0x34   : > { %v174_v24 = vadd.f32 %v173_v23, %v172_v22 }
  0x36   : > { %v175_v25 = vmul.f32 0.0625, %v174_v24 }
  0x38   : > { %v176_v26 = vadd.f32 1e-05, %v175_v25 }
  0x3a   : > { %308 = vrsqrt.f32 %v176_v26 }
  0x44   : > { %v309_v27 = vpop.eup %308 }
  0x45   : > { %v178_v28 = vmul.f32 %v309_v27, %v162_v12  ;;  %v179_v29 = vmul.f32 %v309_v27, %v163_v13 }
  0x47   : > { %vm180_vm1 = vcmp.ge.f32.partialorder %v178_v28, 0.0  ;;  %v182_v30 = vmul.f32 0.2, %v178_v28  ;;  %vm181_vm2 = vcmp.ge.f32.partialorder %v179_v29, 0.0  ;;  %v183_v31 = vmul.f32 0.2, %v179_v29 }
  0x49   : > { %v184_v32 = vsel %vm180_vm1, %v178_v28, %v182_v30  ;;  %v185_v33 = vsel %vm181_vm2, %v179_v29, %v183_v31 }
  0x4a   : > { %186 = vst.msk [vmem:[%s147_s16] sm:$0xff] %vm150_vm0, %v184_v32  ;;  %187 = vst.msk [vmem:[%s147_s16 + $0x8] sm:$0xff] %vm150_vm0, %v185_v33 }
  0x4b PF: > { %s11_s8 = sadd.s32 1, %s332_s8   ;;  %s392_s6 = smov %s328_s7 }
  0x4c   : > { %p8_p5 = scmp.ge.s32.totalorder %s11_s8, 4   ;;  %s393_s7 = smov %s395_s9 }
  0x4e   :  { %10 = sbr.rel (!%p8_p5) target bundleno = 2 (0x2), region = 54 }

// kernel: nlayer_discriminator.11
= control target key start
LH: loop header
LB: loop body
LE: loop exit
PB: predicated region body
PF: predicated region fallthrough
CT: control target
= control target key end

     0   :  { %s1855_s12 = smov 0   ;;  %s1857_s13 = smov 0   ;;  %s2273_s0 = inlined_call_operand.vmem [shape: f32[2,16,17,128], index: 0, kind: input, shape index: {}, may-alias: {0,1}]   ;;  %s2274_s1 = inlined_call_operand.vmem [shape: f32[2,16,17,128], index: 1, kind: input, shape index: {}, may-alias: {0,1}]   ;;  %s2275_s2 = inlined_call_operand.vmem [shape: f32[4,128,64], index: 2, kind: input, shape index: {}]   ;;  %s2276_s3 = inlined_call_operand.vmem [shape: f32[2,8,16,64], index: 3, kind: output, shape index: {}]  }
   0x1   :  { %s1859_s14 = smov 0  }
   0x2 LB: > { %s25_s15 = sadd.s32 1, %s1829_s13  ;;  %p1198_p0 = scmp.ge.s32.totalorder %s1833_s14, 1  ;;  %s1833_s14 = sphi %s1859_s14, %s13_s14   ;;  %s1829_s13 = sphi %s1857_s13, %s2278_s13   ;;  %s1825_s12 = sphi %s1855_s12, %s2277_s12  }
   0x3   : > { %p27_p1 = scmp.ge.s32.totalorder %s25_s15, 2  ;;  %p181_p2 = scmp.lt.s32.totalorder %s1833_s14, 3 }
   0x5   : > { %s2280_s15 = smov (%p27_p1, %s25_s15), 0  ;;  %p182_p3 = pnand %p1198_p0, %p181_p2 }
   0x6   : > { %v1203_v0 = vld [vmem:[%s2275_s2 + $0x80] sm:$0xff] (!%p182_p3)  ;;  %v1204_v1 = vld [vmem:[%s2275_s2 + $0x88] sm:$0xff] (!%p182_p3)  ;;  %p227_p4 = scmp.lt.s32.totalorder (!%p182_p3), %s1825_s12, 1  ;;  %v1205_v5 = vld [vmem:[%s2275_s2 + $0x90] sm:$0xff] (!%p182_p3)  ;;  %vm1060_vm0 = vcmask (!%p182_p3), 523264  }
   0x7   : > { %185 = sbr.rel (%p182_p3) target bundleno = 318 (0x13e), region = 32  ;;  %v1219_v2 = vld [vmem:[%s2275_s2 + $0x100] sm:$0xff] (!%p182_p3)  ;;  %v1608_v3 = vpack.c.bf16 (!%p182_p3), %v1204_v1, %v1203_v0  ;;  %v1220_v4 = vld [vmem:[%s2275_s2 + $0x108] sm:$0xff] (!%p182_p3)  ;;  %v1206_v6 = vld [vmem:[%s2275_s2 + $0x98] sm:$0xff] (!%p182_p3) }
   0x8   : > { %v1672_v7 = vpack.c.bf16 (!%p182_p3), %v1220_v4, %v1219_v2  ;;  %v1612_v8 = vpack.c.bf16 (!%p182_p3), %v1206_v6, %v1205_v5  ;;  %v1221_v9 = vld [vmem:[%s2275_s2 + $0x110] sm:$0xff] (!%p182_p3)  ;;  %v1222_v10 = vld [vmem:[%s2275_s2 + $0x118] sm:$0xff] (!%p182_p3)  ;;  %v1207_v11 = vld [vmem:[%s2275_s2 + $0xa0] sm:$0xff] (!%p182_p3) }
   0x9   : > { %1609 = vmatprep.subr.bf16.mxu1 (!%p182_p3), %v1608_v3  ;;  %v1676_v12 = vpack.c.bf16 (!%p182_p3), %v1222_v10, %v1221_v9  ;;  %v1208_v13 = vld [vmem:[%s2275_s2 + $0xa8] sm:$0xff] (!%p182_p3)  ;;  %v1223_v14 = vld [vmem:[%s2275_s2 + $0x120] sm:$0xff] (!%p182_p3)  ;;  %v1209_v18 = vld [vmem:[%s2275_s2 + $0xb0] sm:$0xff] (!%p182_p3) }
   0xa   : > { %v1224_v15 = vld [vmem:[%s2275_s2 + $0x128] sm:$0xff] (!%p182_p3)  ;;  %1673 = vmatprep.subr.bf16.mxu0 (!%p182_p3), %v1672_v7  ;;  %1611 = vmatpush3.bf16.msra.mxu1 (!%p182_p3), %v1608_v3  ;;  %v1616_v16 = vpack.c.bf16 (!%p182_p3), %v1208_v13, %v1207_v11  ;;  %v1210_v19 = vld [vmem:[%s2275_s2 + $0xb8] sm:$0xff] (!%p182_p3)  ;;  %v1225_v20 = vld [vmem:[%s2275_s2 + $0x130] sm:$0xff] (!%p182_p3) }
   0xb   : > { %1675 = vmatpush3.bf16.msra.mxu0 (!%p182_p3), %v1672_v7  ;;  %1613 = vmatprep.subr.bf16.mxu1 (!%p182_p3), %v1612_v8  ;;  %v1680_v17 = vpack.c.bf16 (!%p182_p3), %v1224_v15, %v1223_v14  ;;  %v1226_v21 = vld [vmem:[%s2275_s2 + $0x138] sm:$0xff] (!%p182_p3)  ;;  %v1620_v22 = vpack.c.bf16 (!%p182_p3), %v1210_v19, %v1209_v18  ;;  %v1211_v23 = vld [vmem:[%s2275_s2 + $0xc0] sm:$0xff] (!%p182_p3)  ;;  %v1212_v24 = vld [vmem:[%s2275_s2 + $0xc8] sm:$0xff] (!%p182_p3) }
   0xc   : > { %1677 = vmatprep.subr.bf16.mxu0 (!%p182_p3), %v1676_v12  ;;  %v1684_v25 = vpack.c.bf16 (!%p182_p3), %v1226_v21, %v1225_v20  ;;  %v1227_v26 = vld [vmem:[%s2275_s2 + $0x140] sm:$0xff] (!%p182_p3)  ;;  %v1228_v27 = vld [vmem:[%s2275_s2 + $0x148] sm:$0xff] (!%p182_p3)  ;;  %v1624_v33 = vpack.c.bf16 (!%p182_p3), %v1212_v24, %v1211_v23  ;;  %v1213_v36 = vld [vmem:[%s2275_s2 + $0xd0] sm:$0xff] (!%p182_p3) }
   0xd   : > { %v1688_v35 = vpack.c.bf16 (!%p182_p3), %v1228_v27, %v1227_v26  ;;  %v1214_v37 = vld [vmem:[%s2275_s2 + $0xd8] sm:$0xff] (!%p182_p3)  ;;  %v1229_v39 = vld [vmem:[%s2275_s2 + $0x150] sm:$0xff] (!%p182_p3)  ;;  %v1215_v45 = vld [vmem:[%s2275_s2 + $0xe0] sm:$0xff] (!%p182_p3) }
   0xe   : > { %s2282_s12 = smov (!%p227_p4, %s1825_s12), 1  ;;  %1615 = vmatpush3.bf16.msra.mxu1 %v1612_v8  ;;  %v1230_v40 = vld [vmem:[%s2275_s2 + $0x158] sm:$0xff]  ;;  %v1628_v44 = vpack.c.bf16 %v1214_v37, %v1213_v36  ;;  %v1216_v48 = vld [vmem:[%s2275_s2 + $0xe8] sm:$0xff]  ;;  %v1231_v51 = vld [vmem:[%s2275_s2 + $0x160] sm:$0xff] }
   0xf   : > { %s1784_s17 = smul.u32 384, %s2282_s12  ;;  %1679 = vmatpush3.bf16.msra.mxu0 %v1676_v12  ;;  %1617 = vmatprep.subr.bf16.mxu1 %v1616_v16  ;;  %v1692_v47 = vpack.c.bf16 %v1230_v40, %v1229_v39  ;;  %v1232_v52 = vld [vmem:[%s2275_s2 + $0x168] sm:$0xff]  ;;  %v1632_v55 = vpack.c.bf16 %v1216_v48, %v1215_v45  ;;  %v1217_v58 = vld [vmem:[%s2275_s2 + $0xf0] sm:$0xff]  ;;  %v1218_v59 = vld [vmem:[%s2275_s2 + $0xf8] sm:$0xff]  ;;  %s1255_s16 = sshll.u32 %s2282_s12, 7 }
  0x10   : > { %1681 = vmatprep.subr.bf16.mxu0 %v1680_v17  ;;  %v1696_v57 = vpack.c.bf16 %v1232_v52, %v1231_v51  ;;  %v1233_v61 = vld [vmem:[%s2275_s2 + $0x170] sm:$0xff]  ;;  %v1234_v62 = vld [vmem:[%s2275_s2 + $0x178] sm:$0xff]  ;;  %v1636_v0 = vpack.c.bf16 %v1218_v59, %v1217_v58  ;;  %v332_v4 = vld [vmem:[%s2275_s2] sm:$0xff]  ;;  %s2230_s20 = scalar_lea.vmem %s2276_s3, %s1255_s16 }
  0x11   : > { %s1929_s28 = scalar_lea.vmem %s2273_s0, %s1784_s17  ;;  %s1254_s18 = sadd.s32 192, %s1784_s17  ;;  %v1700_v3 = vpack.c.bf16 %v1234_v62, %v1233_v61  ;;  %v333_v5 = vld [vmem:[%s2275_s2 + $0x8] sm:$0xff]  ;;  %v1235_v6 = vld [vmem:[%s2275_s2 + $0x180] sm:$0xff]  ;;  %v334_v14 = vld [vmem:[%s2275_s2 + $0x10] sm:$0xff] }
  0x12   : > { %v1944_v28 = vld [vmem:[%s1929_s28] sm:$0xff]  ;;  %v1947_v29 = vld [vmem:[%s1929_s28 + $0x8] sm:$0xff]  ;;  %v1951_v30 = vld [vmem:[%s1929_s28 + $0x18] sm:$0xff]  ;;  %1619 = vmatpush3.bf16.msra.mxu1 %v1616_v16  ;;  %s247_s29 = scalar_lea.vmem %s2274_s1, %s1254_s18  ;;  %v1640_v11 = vpack.c.bf16 %v333_v5, %v332_v4 }
  0x13   : > { %285 = vst [vmem:[#allocation2] sm:$0xff] %v1944_v28  ;;  %v263_v31 = vld [vmem:[%s1929_s28 + $0x10] sm:$0x1]  ;;  %286 = vst [vmem:[#allocation2 + $0x8] sm:$0xff] %v1947_v29  ;;  %1528 = vmatprep.mubr.f32.mxu0 %v1951_v30  ;;  %v1958_v32 = vld [vmem:[%s1929_s28 + $0x20] sm:$0xff]  ;;  %1683 = vmatpush3.bf16.msra.mxu0 %v1680_v17 }
  0x14   : > { %288 = vst [vmem:[#allocation2 + $0x18] sm:$0xff] %v1951_v30  ;;  %287 = vst [vmem:[#allocation2 + $0x10] sm:$0x1] %v263_v31  ;;  %1621 = vmatprep.subr.bf16.mxu1 %v1620_v22  ;;  %v1962_v34 = vld [vmem:[%s1929_s28 + $0x30] sm:$0xff]  ;;  %1685 = vmatprep.subr.bf16.mxu0 %v1684_v25  ;;  %v266_v38 = vld [vmem:[%s1929_s28 + $0x28] sm:$0x1] }
  0x15   : > { %289 = vst [vmem:[#allocation2 + $0x20] sm:$0xff] %v1958_v32  ;;  %291 = vst [vmem:[#allocation2 + $0x30] sm:$0xff] %v1962_v34  ;;  %v1979_v41 = vld [vmem:[%s1929_s28 + $0x38] sm:$0xff]  ;;  %v1983_v42 = vld [vmem:[%s1929_s28 + $0x48] sm:$0xff] }
  0x16   : > { %290 = vst [vmem:[#allocation2 + $0x28] sm:$0x1] %v266_v38  ;;  %1623 = vmatpush3.bf16.msra.mxu1 %v1620_v22  ;;  %292 = vst [vmem:[#allocation2 + $0x38] sm:$0xff] %v1979_v41  ;;  %v269_v43 = vld [vmem:[%s1929_s28 + $0x40] sm:$0x1]  ;;  %v1991_v46 = vld [vmem:[%s1929_s28 + $0x50] sm:$0xff] }
  0x17   : > { %1687 = vmatpush3.bf16.msra.mxu0 %v1684_v25  ;;  %1625 = vmatprep.subr.bf16.mxu1 %v1624_v33  ;;  %294 = vst [vmem:[#allocation2 + $0x48] sm:$0xff] %v1983_v42  ;;  %293 = vst [vmem:[#allocation2 + $0x40] sm:$0x1] %v269_v43  ;;  %v1998_v49 = vld [vmem:[%s1929_s28 + $0x60] sm:$0xff]  ;;  %v272_v50 = vld [vmem:[%s1929_s28 + $0x58] sm:$0x1] }
  0x18   : > { %1689 = vmatprep.subr.bf16.mxu0 %v1688_v35  ;;  %295 = vst [vmem:[#allocation2 + $0x50] sm:$0xff] %v1991_v46  ;;  %297 = vst [vmem:[#allocation2 + $0x60] sm:$0xff] %v1998_v49  ;;  %v2009_v54 = vld [vmem:[%s1929_s28 + $0x68] sm:$0xff]  ;;  %v2013_v56 = vld [vmem:[%s1929_s28 + $0x78] sm:$0xff] }
  0x19   : > { %296 = vst [vmem:[#allocation2 + $0x58] sm:$0x1] %v272_v50  ;;  %298 = vst [vmem:[#allocation2 + $0x68] sm:$0xff] %v2009_v54  ;;  %v275_v60 = vld [vmem:[%s1929_s28 + $0x70] sm:$0x1]  ;;  %v2030_v63 = vld [vmem:[%s1929_s28 + $0x80] sm:$0xff] }
  0x1a   : > { %v348_v53 = vld [vmem:[#allocation2 + $0x1] sm:$0xff]  ;;  %1627 = vmatpush3.bf16.msra.mxu1 %v1624_v33  ;;  %300 = vst [vmem:[#allocation2 + $0x78] sm:$0xff] %v2013_v56  ;;  %299 = vst [vmem:[#allocation2 + $0x70] sm:$0x1] %v275_v60  ;;  %v2034_v1 = vld [vmem:[%s1929_s28 + $0x90] sm:$0xff] }
  0x1b   : > { %1416 = vmatprep.mubr.f32.mxu1 %v348_v53  ;;  %1691 = vmatpush3.bf16.msra.mxu0 %v1688_v35  ;;  %301 = vst [vmem:[#allocation2 + $0x80] sm:$0xff] %v2030_v63  ;;  %v278_v2 = vld [vmem:[%s1929_s28 + $0x88] sm:$0x1]  ;;  %303 = vst [vmem:[#allocation2 + $0x90] sm:$0xff] %v2034_v1  ;;  %v2053_v8 = vld [vmem:[%s1929_s28 + $0x98] sm:$0xff] }
  0x1c   : > { %1629 = vmatprep.subr.bf16.mxu1 %v1628_v44  ;;  %1693 = vmatprep.subr.bf16.mxu0 %v1692_v47  ;;  %302 = vst [vmem:[#allocation2 + $0x88] sm:$0x1] %v278_v2  ;;  %v1236_v7 = vld [vmem:[%s2275_s2 + $0x188] sm:$0xff]  ;;  %304 = vst [vmem:[#allocation2 + $0x98] sm:$0xff] %v2053_v8  ;;  %v281_v10 = vld [vmem:[%s1929_s28 + $0xa0] sm:$0x1] }
  0x1d   : > { %v2057_v9 = vld [vmem:[%s1929_s28 + $0xa8] sm:$0xff]  ;;  %305 = vst [vmem:[#allocation2 + $0xa0] sm:$0x1] %v281_v10  ;;  %v2065_v12 = vld [vmem:[%s1929_s28 + $0xb0] sm:$0xff]  ;;  %v1704_v13 = vpack.c.bf16 %v1236_v7, %v1235_v6  ;;  %v335_v15 = vld [vmem:[%s2275_s2 + $0x18] sm:$0xff] }
  0x1e   : > { %1631 = vmatpush3.bf16.msra.mxu1 %v1628_v44  ;;  %306 = vst [vmem:[#allocation2 + $0xa8] sm:$0xff] %v2057_v9  ;;  %307 = vst [vmem:[#allocation2 + $0xb0] sm:$0xff] %v2065_v12  ;;  %v1237_v16 = vld [vmem:[%s2275_s2 + $0x190] sm:$0xff]  ;;  %v2077_v17 = vld [vmem:[%s247_s29] sm:$0xff]  ;;  %v1644_v23 = vpack.c.bf16 %v335_v15, %v334_v14 }
  0x1f   : > { %1695 = vmatpush3.bf16.msra.mxu0 %v1692_v47  ;;  %1633 = vmatprep.subr.bf16.mxu1 %v1632_v55  ;;  %v284_v18 = vld [vmem:[%s1929_s28 + $0xb8] sm:$0x1]  ;;  %v349_v19 = vld [vmem:[#allocation2 + $0x9] sm:$0xff]  ;;  %313 = vst [vmem:[#allocation2 + $0xc0] sm:$0xff] %v2077_v17  ;;  %v2087_v22 = vld [vmem:[#allocation2 + $0x19] sm:$0xff] }
  0x20   : > { %1697 = vmatprep.subr.bf16.mxu0 %v1696_v57  ;;  %v1238_v20 = vld [vmem:[%s2275_s2 + $0x198] sm:$0xff]  ;;  %308 = vst [vmem:[#allocation2 + $0xb8] sm:$0x1] %v284_v18  ;;  %v2084_v21 = vld [vmem:[%s247_s29 + $0x8] sm:$0xff]  ;;  %v311_v24 = vld [vmem:[%s247_s29 + $0x10] sm:$0x1] }
  0x21   : > { %314 = vst [vmem:[#allocation2 + $0xc8] sm:$0xff] %v2084_v21  ;;  %v1708_v25 = vpack.c.bf16 %v1238_v20, %v1237_v16  ;;  %v336_v26 = vld [vmem:[%s2275_s2 + $0x20] sm:$0xff]  ;;  %v337_v27 = vld [vmem:[%s2275_s2 + $0x28] sm:$0xff]  ;;  %315 = vst [vmem:[#allocation2 + $0xd0] sm:$0x1] %v311_v24 }
  0x22   : > { %1635 = vmatpush3.bf16.msra.mxu1 %v1632_v55  ;;  %v2096_v31 = vld [vmem:[#allocation2 + $0x21] sm:$0xff]  ;;  %v2106_v36 = vld [vmem:[#allocation2 + $0x31] sm:$0xff]  ;;  %v1648_v37 = vpack.c.bf16 %v337_v27, %v336_v26  ;;  %v2116_v43 = vld [vmem:[#allocation2 + $0x39] sm:$0xff] }
  0x23   : > { %1699 = vmatpush3.bf16.msra.mxu0 %v1696_v57  ;;  %1637 = vmatprep.subr.bf16.mxu1 %v1636_v0  ;;  %v1239_v33 = vld [vmem:[%s2275_s2 + $0x1a0] sm:$0xff]  ;;  %v1240_v35 = vld [vmem:[%s2275_s2 + $0x1a8] sm:$0xff]  ;;  %v338_v39 = vld [vmem:[%s2275_s2 + $0x30] sm:$0xff] }
  0x24   : > { %1701 = vmatprep.subr.bf16.mxu0 %v1700_v3  ;;  %v1712_v38 = vpack.c.bf16 %v1240_v35, %v1239_v33  ;;  %v339_v40 = vld [vmem:[%s2275_s2 + $0x38] sm:$0xff]  ;;  %v1241_v44 = vld [vmem:[%s2275_s2 + $0x1b0] sm:$0xff]  ;;  %v340_v51 = vld [vmem:[%s2275_s2 + $0x40] sm:$0xff] }
  0x25   : > { %v1242_v45 = vld [vmem:[%s2275_s2 + $0x1b8] sm:$0xff]  ;;  %v2126_v47 = vld [vmem:[#allocation2 + $0x49] sm:$0xff]  ;;  %v1652_v48 = vpack.c.bf16 %v339_v40, %v338_v39  ;;  %v1243_v55 = vld [vmem:[%s2275_s2 + $0x1c0] sm:$0xff] }
  0x26   : > { %1639 = vmatpush3.bf16.msra.mxu1 %v1636_v0  ;;  %v1716_v50 = vpack.c.bf16 %v1242_v45, %v1241_v44  ;;  %v341_v52 = vld [vmem:[%s2275_s2 + $0x48] sm:$0xff]  ;;  %v2136_v53 = vld [vmem:[#allocation2 + $0x51] sm:$0xff]  ;;  %v2166_v4 = vld [vmem:[#allocation2 + $0x79] sm:$0xff] }
  0x27   : > { %1703 = vmatpush3.bf16.msra.mxu0 %v1700_v3  ;;  %1641 = vmatprep.subr.bf16.mxu1 %v1640_v11  ;;  %v1244_v57 = vld [vmem:[%s2275_s2 + $0x1c8] sm:$0xff]  ;;  %v1656_v59 = vpack.c.bf16 %v341_v52, %v340_v51  ;;  %v342_v61 = vld [vmem:[%s2275_s2 + $0x50] sm:$0xff]  ;;  %v343_v62 = vld [vmem:[%s2275_s2 + $0x58] sm:$0xff] }
  0x28   : > { %1705 = vmatprep.subr.bf16.mxu0 %v1704_v13  ;;  %v2146_v58 = vld [vmem:[#allocation2 + $0x61] sm:$0xff]  ;;  %v1720_v60 = vpack.c.bf16 %v1244_v57, %v1243_v55  ;;  %v2156_v0 = vld [vmem:[#allocation2 + $0x69] sm:$0xff]  ;;  %v1246_v3 = vld [vmem:[%s2275_s2 + $0x1d8] sm:$0xff]  ;;  %v1660_v5 = vpack.c.bf16 %v343_v62, %v342_v61 }
  0x29   : > { %1417 = vmatmul.mubr.f32.vlgmr.msra.gmra.mrb[0].mxu1 %v349_v19  ;;  %v1245_v2 = vld [vmem:[%s2275_s2 + $0x1d0] sm:$0xff]  ;;  %v344_v7 = vld [vmem:[%s2275_s2 + $0x60] sm:$0xff]  ;;  %v345_v10 = vld [vmem:[%s2275_s2 + $0x68] sm:$0xff] }
  0x2a   : > { %1529 = vmatmul.mubr.f32.vlgmr.msra.gmra.mrb[0].mxu0 %v1958_v32  ;;  %1643 = vmatpush3.bf16.msra.mxu1 %v1640_v11  ;;  %v1724_v6 = vpack.c.bf16 %v1246_v3, %v1245_v2  ;;  %v359_v11 = vld [vmem:[#allocation2 + $0x81] sm:$0xff]  ;;  %v360_v15 = vld [vmem:[#allocation2 + $0x91] sm:$0xff]  ;;  %v1664_v16 = vpack.c.bf16 %v345_v10, %v344_v7  ;;  %v362_v26 = vld [vmem:[#allocation2 + $0xa9] sm:$0xff] }
  0x2b   : > { %1707 = vmatpush3.bf16.msra.mxu0 %v1704_v13  ;;  %1419 = vmatprep.mubr.f32.mxu1 %v2087_v22  ;;  %v1247_v13 = vld [vmem:[%s2275_s2 + $0x1e0] sm:$0xff]  ;;  %v1248_v14 = vld [vmem:[%s2275_s2 + $0x1e8] sm:$0xff]  ;;  %v346_v19 = vld [vmem:[%s2275_s2 + $0x70] sm:$0xff] }
  0x2c   : > { %1531 = vmatprep.mubr.f32.mxu0 %v1962_v34  ;;  %1645 = vmatprep.subr.bf16.mxu1 %v1644_v23  ;;  %v1728_v18 = vpack.c.bf16 %v1248_v14, %v1247_v13  ;;  %v347_v20 = vld [vmem:[%s2275_s2 + $0x78] sm:$0xff]  ;;  %v1249_v24 = vld [vmem:[%s2275_s2 + $0x1f0] sm:$0xff] }
  0x2d   : > { %1420 = vmatmul.mubr.f32.gmra.mrb[2].mxu1 %v2096_v31  ;;  %1709 = vmatprep.subr.bf16.mxu0 %v1708_v25  ;;  %v1668_v27 = vpack.c.bf16 %v347_v20, %v346_v19  ;;  %v363_v35 = vld [vmem:[#allocation2 + $0xb1] sm:$0xff] }
  0x2e   : > { %1532 = vmatmul.mubr.f32.gmra.mrb[2].mxu0 %v1979_v41  ;;  %1647 = vmatpush3.bf16.msra.mxu1 %v1644_v23  ;;  %v361_v23 = vld [vmem:[#allocation2 + $0x99] sm:$0xff] }
  0x2f   : > { %1711 = vmatpush3.bf16.msra.mxu0 %v1708_v25  ;;  %1422 = vmatprep.mubr.f32.mxu1 %v2106_v36  ;;  %v1250_v25 = vld [vmem:[%s2275_s2 + $0x1f8] sm:$0xff] }
  0x30   : > { %1534 = vmatprep.mubr.f32.mxu0 %v1983_v42  ;;  %1649 = vmatprep.subr.bf16.mxu1 %v1648_v37  ;;  %v1732_v33 = vpack.c.bf16 %v1250_v25, %v1249_v24 }
  0x31   : > { %1423 = vmatmul.mubr.f32.gmra.mrb[4].mxu1 %v2116_v43  ;;  %1713 = vmatprep.subr.bf16.mxu0 %v1712_v38 }
  0x32   : > { %1535 = vmatmul.mubr.f32.gmra.mrb[4].mxu0 %v1991_v46  ;;  %1651 = vmatpush3.bf16.msra.mxu1 %v1648_v37 }
  0x33   : > { %1715 = vmatpush3.bf16.msra.mxu0 %v1712_v38  ;;  %1425 = vmatprep.mubr.f32.mxu1 %v2126_v47 }
  0x34   : > { %1537 = vmatprep.mubr.f32.mxu0 %v1998_v49  ;;  %1653 = vmatprep.subr.bf16.mxu1 %v1652_v48 }
  0x35   : > { %1426 = vmatmul.mubr.f32.gmra.mrb[6].mxu1 %v2136_v53  ;;  %1717 = vmatprep.subr.bf16.mxu0 %v1716_v50 }
  0x36   : > { %1538 = vmatmul.mubr.f32.gmra.mrb[6].mxu0 %v2009_v54  ;;  %1655 = vmatpush3.bf16.msra.mxu1 %v1652_v48 }
  0x37   : > { %1719 = vmatpush3.bf16.msra.mxu0 %v1716_v50  ;;  %1428 = vmatprep.mubr.f32.mxu1 %v2146_v58 }
  0x38   : > { %1540 = vmatprep.mubr.f32.mxu0 %v2013_v56  ;;  %1657 = vmatprep.subr.bf16.mxu1 %v1656_v59 }
  0x39   : > { %1429 = vmatmul.mubr.f32.gmra.mrb[8].mxu1 %v2156_v0  ;;  %1721 = vmatprep.subr.bf16.mxu0 %v1720_v60 }
  0x3a   : > { %1541 = vmatmul.mubr.f32.gmra.mrb[8].mxu0 %v2030_v63  ;;  %1659 = vmatpush3.bf16.msra.mxu1 %v1656_v59 }
  0x3b   : > { %1723 = vmatpush3.bf16.msra.mxu0 %v1720_v60  ;;  %1431 = vmatprep.mubr.f32.mxu1 %v2166_v4 }
  0x3c   : > { %1543 = vmatprep.mubr.f32.mxu0 %v2034_v1  ;;  %1661 = vmatprep.subr.bf16.mxu1 %v1660_v5 }
  0x3d   : > { %1432 = vmatmul.mubr.f32.gmra.mrb[10].mxu1 %v359_v11  ;;  %1725 = vmatprep.subr.bf16.mxu0 %v1724_v6 }
  0x3e   : > { %1544 = vmatmul.mubr.f32.gmra.mrb[10].mxu0 %v2053_v8  ;;  %1663 = vmatpush3.bf16.msra.mxu1 %v1660_v5 }
  0x3f   : > { %1727 = vmatpush3.bf16.msra.mxu0 %v1724_v6  ;;  %1434 = vmatprep.mubr.f32.mxu1 %v360_v15 }
  0x40   : > { %1546 = vmatprep.mubr.f32.mxu0 %v2057_v9  ;;  %1665 = vmatprep.subr.bf16.mxu1 %v1664_v16 }
  0x41   : > { %1435 = vmatmul.mubr.f32.gmra.mrb[12].mxu1 %v361_v23  ;;  %1729 = vmatprep.subr.bf16.mxu0 %v1728_v18 }
  0x42   : > { %1547 = vmatmul.mubr.f32.gmra.mrb[12].mxu0 %v2065_v12  ;;  %1667 = vmatpush3.bf16.msra.mxu1 %v1664_v16 }
  0x43   : > { %1731 = vmatpush3.bf16.msra.mxu0 %v1728_v18  ;;  %1437 = vmatprep.mubr.f32.mxu1 %v362_v26 }
  0x44   : > { %1549 = vmatprep.mubr.f32.mxu0 %v2077_v17  ;;  %1669 = vmatprep.subr.bf16.mxu1 %v1668_v27 }
  0x45   : > { %1438 = vmatmul.mubr.f32.gmra.mrb[14].mxu1 %v363_v35  ;;  %1733 = vmatprep.subr.bf16.mxu0 %v1732_v33 }
  0x46   : > { %1550 = vmatmul.mubr.f32.gmra.mrb[14].mxu0 %v2084_v21  ;;  %1671 = vmatpush3.bf16.msra.mxu1 %v1668_v27 }
  0x47   : > { %1735 = vmatpush3.bf16.msra.mxu0 %v1732_v33  ;;  %1472 = vmatprep.mubr.f32.mxu1 %v1944_v28  ;;  %v880_v28 = vld [vmem:[#allocation2 + $0xc1] sm:$0xff] }
  0x48   : > { %1584 = vmatprep.mubr.f32.mxu0 %v2087_v22 }
  0x49   : > { %1473 = vmatmul.mubr.f32.vlgmr.msra.gmra.mrb[0].mxu1 %v1947_v29  ;;  %v881_v29 = vld [vmem:[#allocation2 + $0xc9] sm:$0xff] }
  0x4a   : > { %1585 = vmatmul.mubr.f32.vlgmr.msra.gmra.mrb[0].mxu0 %v2096_v31  ;;  %1475 = vmatprep.mubr.f32.mxu1 %v1951_v30 }
  0x4b   : > { %1587 = vmatprep.mubr.f32.mxu0 %v2106_v36 }
  0x4d   : > { %1476 = vmatmul.mubr.f32.gmra.mrb[2].mxu1 %v1958_v32 }
  0x4e   : > { %1588 = vmatmul.mubr.f32.gmra.mrb[2].mxu0 %v2116_v43  ;;  %1478 = vmatprep.mubr.f32.mxu1 %v1962_v34 }
  0x4f   : > { %1590 = vmatprep.mubr.f32.mxu0 %v2126_v47 }
  0x51   : > { %1479 = vmatmul.mubr.f32.gmra.mrb[4].mxu1 %v1979_v41 }
  0x52   : > { %1591 = vmatmul.mubr.f32.gmra.mrb[4].mxu0 %v2136_v53  ;;  %1481 = vmatprep.mubr.f32.mxu1 %v1983_v42 }
  0x53   : > { %1593 = vmatprep.mubr.f32.mxu0 %v2146_v58 }
  0x55   : > { %1482 = vmatmul.mubr.f32.gmra.mrb[6].mxu1 %v1991_v46 }
  0x56   : > { %1594 = vmatmul.mubr.f32.gmra.mrb[6].mxu0 %v2156_v0  ;;  %1484 = vmatprep.mubr.f32.mxu1 %v1998_v49 }
  0x57   : > { %1596 = vmatprep.mubr.f32.mxu0 %v2166_v4 }
  0x59   : > { %1485 = vmatmul.mubr.f32.gmra.mrb[8].mxu1 %v2009_v54 }
  0x5a   : > { %1597 = vmatmul.mubr.f32.gmra.mrb[8].mxu0 %v359_v11  ;;  %1487 = vmatprep.mubr.f32.mxu1 %v2013_v56 }
  0x5b   : > { %1599 = vmatprep.mubr.f32.mxu0 %v360_v15 }
  0x5d   : > { %1488 = vmatmul.mubr.f32.gmra.mrb[10].mxu1 %v2030_v63 }
  0x5e   : > { %1600 = vmatmul.mubr.f32.gmra.mrb[10].mxu0 %v361_v23  ;;  %1490 = vmatprep.mubr.f32.mxu1 %v2034_v1 }
  0x5f   : > { %1602 = vmatprep.mubr.f32.mxu0 %v362_v26 }
  0x61   : > { %1491 = vmatmul.mubr.f32.gmra.mrb[12].mxu1 %v2053_v8 }
  0x62   : > { %1603 = vmatmul.mubr.f32.gmra.mrb[12].mxu0 %v363_v35  ;;  %1493 = vmatprep.mubr.f32.mxu1 %v2057_v9 }
  0x63   : > { %1605 = vmatprep.mubr.f32.mxu0 %v880_v28 }
  0x65   : > { %1494 = vmatmul.mubr.f32.gmra.mrb[14].mxu1 %v2065_v12 }
  0x66   : > { %1606 = vmatmul.mubr.f32.gmra.mrb[14].mxu0 %v881_v29 }
 0x11c   : > { %v1474_v30 = vpop.f32.mrb[0].mxu1 }
 0x11d   : > { %v1586_v32 = vpop.f32.mrb[0].mxu0  ;;  %v592_v34 = vpop.f32.mrb[1].mxu1 }
 0x11e   : > { %v1736_v41 = vadd.f32 %v1586_v32, %v1474_v30  ;;  %v965_v42 = vpop.f32.mrb[1].mxu0 }
 0x11f   : > { %v1737_v46 = vadd.f32 %v965_v42, %v592_v34 }
 0x120   : > { %1062 = vst.msk [vmem:[%s2230_s20 + $0x8] sm:$0xff] %vm1060_vm0, %v1736_v41  ;;  %v1477_v49 = vpop.f32.mrb[2].mxu1 }
 0x121   : > { %1061 = vst.msk [vmem:[%s2230_s20] sm:$0xff] %vm1060_vm0, %v1737_v46  ;;  %v1589_v54 = vpop.f32.mrb[2].mxu0  ;;  %v602_v56 = vpop.f32.mrb[3].mxu1 }
 0x122   : > { %v1738_v63 = vadd.f32 %v1589_v54, %v1477_v49  ;;  %v975_v1 = vpop.f32.mrb[3].mxu0 }
 0x123   : > { %v1739_v8 = vadd.f32 %v975_v1, %v602_v56 }
 0x124   : > { %1064 = vst.msk [vmem:[%s2230_s20 + $0x18] sm:$0xff] %vm1060_vm0, %v1738_v63  ;;  %v1480_v9 = vpop.f32.mrb[4].mxu1 }
 0x125   : > { %1063 = vst.msk [vmem:[%s2230_s20 + $0x10] sm:$0xff] %vm1060_vm0, %v1739_v8  ;;  %v1592_v12 = vpop.f32.mrb[4].mxu0  ;;  %v612_v17 = vpop.f32.mrb[5].mxu1 }
 0x126   : > { %v1740_v21 = vadd.f32 %v1592_v12, %v1480_v9  ;;  %v985_v22 = vpop.f32.mrb[5].mxu0 }
 0x127   : > { %v1741_v31 = vadd.f32 %v985_v22, %v612_v17 }
 0x128   : > { %1066 = vst.msk [vmem:[%s2230_s20 + $0x28] sm:$0xff] %vm1060_vm0, %v1740_v21  ;;  %v1483_v36 = vpop.f32.mrb[6].mxu1 }
 0x129   : > { %1065 = vst.msk [vmem:[%s2230_s20 + $0x20] sm:$0xff] %vm1060_vm0, %v1741_v31  ;;  %v1595_v37 = vpop.f32.mrb[6].mxu0  ;;  %v622_v38 = vpop.f32.mrb[7].mxu1 }
 0x12a   : > { %v1742_v39 = vadd.f32 %v1595_v37, %v1483_v36  ;;  %v995_v40 = vpop.f32.mrb[7].mxu0 }
 0x12b   : > { %v1743_v43 = vadd.f32 %v995_v40, %v622_v38 }
 0x12c   : > { %1068 = vst.msk [vmem:[%s2230_s20 + $0x38] sm:$0xff] %vm1060_vm0, %v1742_v39  ;;  %v1486_v44 = vpop.f32.mrb[8].mxu1 }
 0x12d   : > { %1067 = vst.msk [vmem:[%s2230_s20 + $0x30] sm:$0xff] %vm1060_vm0, %v1743_v43  ;;  %v1598_v45 = vpop.f32.mrb[8].mxu0  ;;  %v632_v47 = vpop.f32.mrb[9].mxu1 }
 0x12e   : > { %v1744_v48 = vadd.f32 %v1598_v45, %v1486_v44  ;;  %v1005_v50 = vpop.f32.mrb[9].mxu0 }
 0x12f   : > { %v1745_v51 = vadd.f32 %v1005_v50, %v632_v47 }
 0x130   : > { %1070 = vst.msk [vmem:[%s2230_s20 + $0x48] sm:$0xff] %vm1060_vm0, %v1744_v48  ;;  %v1489_v52 = vpop.f32.mrb[10].mxu1 }
 0x131   : > { %1069 = vst.msk [vmem:[%s2230_s20 + $0x40] sm:$0xff] %vm1060_vm0, %v1745_v51  ;;  %v1601_v53 = vpop.f32.mrb[10].mxu0  ;;  %v642_v55 = vpop.f32.mrb[11].mxu1 }
 0x132   : > { %v1746_v57 = vadd.f32 %v1601_v53, %v1489_v52  ;;  %v1015_v58 = vpop.f32.mrb[11].mxu0 }
 0x133   : > { %v1747_v59 = vadd.f32 %v1015_v58, %v642_v55 }
 0x134   : > { %1072 = vst.msk [vmem:[%s2230_s20 + $0x58] sm:$0xff] %vm1060_vm0, %v1746_v57  ;;  %v1492_v60 = vpop.f32.mrb[12].mxu1 }
 0x135   : > { %1071 = vst.msk [vmem:[%s2230_s20 + $0x50] sm:$0xff] %vm1060_vm0, %v1747_v59  ;;  %v1604_v61 = vpop.f32.mrb[12].mxu0  ;;  %v652_v62 = vpop.f32.mrb[13].mxu1 }
 0x136   : > { %v1748_v0 = vadd.f32 %v1604_v61, %v1492_v60  ;;  %v1025_v2 = vpop.f32.mrb[13].mxu0 }
 0x137   : > { %v1749_v3 = vadd.f32 %v1025_v2, %v652_v62 }
 0x138   : > { %1074 = vst.msk [vmem:[%s2230_s20 + $0x68] sm:$0xff] %vm1060_vm0, %v1748_v0  ;;  %v1495_v4 = vpop.f32.mrb[14].mxu1 }
 0x139   : > { %1073 = vst.msk [vmem:[%s2230_s20 + $0x60] sm:$0xff] %vm1060_vm0, %v1749_v3  ;;  %v1607_v5 = vpop.f32.mrb[14].mxu0  ;;  %v662_v6 = vpop.f32.mrb[15].mxu1 }
 0x13a   : > { %v1750_v7 = vadd.f32 %v1607_v5, %v1495_v4  ;;  %v1035_v10 = vpop.f32.mrb[15].mxu0 }
 0x13b   : > { %v1751_v11 = vadd.f32 %v1035_v10, %v662_v6 }
 0x13c   : > { %1076 = vst.msk [vmem:[%s2230_s20 + $0x78] sm:$0xff] %vm1060_vm0, %v1750_v7 }
 0x13d   : > { %1075 = vst.msk [vmem:[%s2230_s20 + $0x70] sm:$0xff] %vm1060_vm0, %v1751_v11 }
 0x13e PF: > { %s13_s14 = sadd.s32 1, %s1833_s14   ;;  %s2277_s12 = smov %s1829_s13 }
 0x13f   : > { %p10_p5 = scmp.ge.s32.totalorder %s13_s14, 4   ;;  %s2278_s13 = smov %s2280_s15 }
 0x141   :  { %12 = sbr.rel (!%p10_p5) target bundleno = 2 (0x2), region = 70 }

// kernel: nlayer_discriminator.14
= control target key start
LH: loop header
LB: loop body
LE: loop exit
PB: predicated region body
PF: predicated region fallthrough
CT: control target
= control target key end

     0   :  { %s342_s6 = smov 0   ;;  %s344_s7 = smov 0   ;;  %s384_s0 = inlined_call_operand.vmem [shape: f32[2,9,128], index: 0, kind: input, shape index: {}]   ;;  %s385_s1 = inlined_call_operand.vmem [shape: f32[2,9,128], index: 1, kind: output, shape index: {}]  }
   0x1   :  { %s346_s8 = smov 0  }
   0x2 LB: > { %s23_s9 = sadd.s32 1, %s326_s7  ;;  %p273_p0 = scmp.ge.s32.totalorder %s330_s8, 1  ;;  %s330_s8 = sphi %s346_s8, %s11_s8   ;;  %s326_s7 = sphi %s344_s7, %s387_s7   ;;  %s322_s6 = sphi %s342_s6, %s386_s6  }
   0x3   : > { %p25_p1 = scmp.ge.s32.totalorder %s23_s9, 2  ;;  %p106_p2 = scmp.lt.s32.totalorder %s330_s8, 3 }
   0x5   : > { %s389_s9 = smov (%p25_p1, %s23_s9), 0  ;;  %p107_p3 = pnand %p273_p0, %p106_p2 }
   0x6   : > { %p132_p4 = scmp.lt.s32.totalorder (!%p107_p3), %s322_s6, 1  ;;  %vm150_vm0 = vcmask (!%p107_p3), 1040384  }
   0x7   : > { %110 = sbr.rel (%p107_p3) target bundleno = 75 (0x4b), region = 24 }
   0xe   : > { %s391_s6 = smov (!%p132_p4, %s322_s6), 1 }
   0xf   : > { %s280_s10 = sshll.u32 %s391_s6, 4 }
  0x10   : > { %s139_s13 = scalar_lea.vmem %s384_s0, %s280_s10  ;;  %s147_s16 = scalar_lea.vmem %s385_s1, %s280_s10 }
  0x11   : > { %v148_v0 = vld [vmem:[%s139_s13] sm:$0xff]  ;;  %v149_v1 = vld [vmem:[%s139_s13 + $0x8] sm:$0x1] }
  0x12   : > { %v151_v2 = vsel %vm150_vm0, %v149_v1, 0.0 }
  0x13   : > { %v152_v3 = vadd.f32 %v151_v2, %v148_v0 }
  0x15   : > { %v153_v4 = vrot.slane %v152_v3, 4 }
  0x17   : > { %v154_v5 = vadd.f32 %v153_v4, %v152_v3 }
  0x19   : > { %v155_v6 = vrot.slane %v154_v5, 2 }
  0x1b   : > { %v156_v7 = vadd.f32 %v155_v6, %v154_v5 }
  0x1d   : > { %v157_v8 = vrot.slane %v156_v7, 1 }
  0x1f   : > { %v158_v9 = vadd.f32 %v157_v8, %v156_v7 }
  0x21   : > { %v160_v10 = vmul.f32 0.11111111, %v158_v9 }
  0x23   : > { %v161_v11 = vsub.f32 %v148_v0, %v160_v10  ;;  %v162_v12 = vsub.f32 %v149_v1, %v160_v10 }
  0x25   : > { %v163_v13 = vmul.f32 %v161_v11, %v161_v11  ;;  %v164_v14 = vmul.f32 %v162_v12, %v162_v12 }
  0x27   : > { %v165_v15 = vsel %vm150_vm0, %v164_v14, 0.0 }
  0x28   : > { %v166_v16 = vadd.f32 %v165_v15, %v163_v13 }
  0x2a   : > { %v167_v17 = vrot.slane %v166_v16, 4 }
  0x2c   : > { %v168_v18 = vadd.f32 %v167_v17, %v166_v16 }
  0x2e   : > { %v169_v19 = vrot.slane %v168_v18, 2 }
  0x30   : > { %v170_v20 = vadd.f32 %v169_v19, %v168_v18 }
  0x32   : > { %v171_v21 = vrot.slane %v170_v20, 1 }
  0x34   : > { %v172_v22 = vadd.f32 %v171_v21, %v170_v20 }
  0x36   : > { %v173_v23 = vmul.f32 0.11111111, %v172_v22 }
  0x38   : > { %v174_v24 = vadd.f32 1e-05, %v173_v23 }
  0x3a   : > { %306 = vrsqrt.f32 %v174_v24 }
  0x44   : > { %v307_v25 = vpop.eup %306 }
  0x45   : > { %v176_v26 = vmul.f32 %v307_v25, %v161_v11  ;;  %v177_v27 = vmul.f32 %v307_v25, %v162_v12 }
  0x47   : > { %vm178_vm1 = vcmp.ge.f32.partialorder %v176_v26, 0.0  ;;  %v180_v28 = vmul.f32 0.2, %v176_v26  ;;  %vm179_vm2 = vcmp.ge.f32.partialorder %v177_v27, 0.0  ;;  %v181_v29 = vmul.f32 0.2, %v177_v27 }
  0x49   : > { %v182_v30 = vsel %vm178_vm1, %v176_v26, %v180_v28  ;;  %v183_v31 = vsel %vm179_vm2, %v177_v27, %v181_v29 }
  0x4a   : > { %184 = vst [vmem:[%s147_s16] sm:$0xff] %v182_v30  ;;  %185 = vst [vmem:[%s147_s16 + $0x8] sm:$0x1] %v183_v31 }
  0x4b PF: > { %s11_s8 = sadd.s32 1, %s330_s8   ;;  %s386_s6 = smov %s326_s7 }
  0x4c   : > { %p8_p5 = scmp.ge.s32.totalorder %s11_s8, 4   ;;  %s387_s7 = smov %s389_s9 }
  0x4e   :  { %10 = sbr.rel (!%p8_p5) target bundleno = 2 (0x2), region = 54 }

// kernel: nlayer_discriminator.13
= control target key start
LH: loop header
LB: loop body
LE: loop exit
PB: predicated region body
PF: predicated region fallthrough
CT: control target
= control target key end

     0   :  { %s6158_s12 = smov 0   ;;  %s6160_s13 = smov 0   ;;  %s7291_s0 = inlined_call_operand.vmem [shape: f32[2,16,19,64], index: 0, kind: input, shape index: {}, may-alias: {0,1}]   ;;  %s7292_s1 = inlined_call_operand.vmem [shape: f32[2,16,19,64], index: 1, kind: input, shape index: {}, may-alias: {0,1}]   ;;  %s7293_s2 = inlined_call_operand.vmem [shape: f32[16,64,128], index: 2, kind: input, shape index: {}]   ;;  %s7294_s3 = inlined_call_operand.vmem [shape: f32[2,8,16,128], index: 3, kind: output, shape index: {}]  }
   0x1   :  { %s6162_s14 = smov 0  }
   0x2 LB: > { %s25_s15 = sadd.s32 1, %s6132_s13  ;;  %p4181_p0 = scmp.ge.s32.totalorder %s6136_s14, 1  ;;  %s6136_s14 = sphi %s6162_s14, %s13_s14   ;;  %s6132_s13 = sphi %s6160_s13, %s7327_s13   ;;  %s6128_s12 = sphi %s6158_s12, %s7326_s12  }
   0x3   : > { %p27_p1 = scmp.ge.s32.totalorder %s25_s15, 2  ;;  %p181_p2 = scmp.lt.s32.totalorder %s6136_s14, 3 }
   0x5   : > { %s7329_s15 = smov (%p27_p1, %s25_s15), 0  ;;  %p182_p3 = pnand %p4181_p0, %p181_p2 }
   0x7   : > { %185 = sbr.rel (%p182_p3) target bundleno = 502 (0x1f6), region = 32 }
   0xe   : > { %v4186_v0 = vld [vmem:[%s7293_s2 + $0x40] sm:$0xff]  ;;  %v4187_v1 = vld [vmem:[%s7293_s2 + $0x48] sm:$0xff]  ;;  %p227_p4 = scmp.lt.s32.totalorder %s6128_s12, 1  ;;  %v4188_v5 = vld [vmem:[%s7293_s2 + $0x50] sm:$0xff]  ;;  %vm285_vm0 = vcmask 523264   ;;  %vm288_vm1 = vcmask 518144  }
   0xf   : > { %v4370_v2 = vld [vmem:[%s7293_s2 + $0x200] sm:$0xff]  ;;  %v5591_v3 = vpack.c.bf16 %v4187_v1, %v4186_v0  ;;  %v4371_v4 = vld [vmem:[%s7293_s2 + $0x208] sm:$0xff]  ;;  %v4189_v6 = vld [vmem:[%s7293_s2 + $0x58] sm:$0xff] }
  0x10   : > { %v5719_v7 = vpack.c.bf16 %v4371_v4, %v4370_v2  ;;  %v5595_v8 = vpack.c.bf16 %v4189_v6, %v4188_v5  ;;  %v4372_v9 = vld [vmem:[%s7293_s2 + $0x210] sm:$0xff]  ;;  %v4373_v10 = vld [vmem:[%s7293_s2 + $0x218] sm:$0xff]  ;;  %v4190_v11 = vld [vmem:[%s7293_s2 + $0x60] sm:$0xff]  ;;  %s7331_s12 = smov (!%p227_p4, %s6128_s12), 1 }
  0x11   : > { %5592 = vmatprep.subr.bf16.mxu1 %v5591_v3  ;;  %v5723_v12 = vpack.c.bf16 %v4373_v10, %v4372_v9  ;;  %v4191_v13 = vld [vmem:[%s7293_s2 + $0x68] sm:$0xff]  ;;  %v4374_v14 = vld [vmem:[%s7293_s2 + $0x220] sm:$0xff]  ;;  %s6087_s17 = smul.u32 384, %s7331_s12  ;;  %v4192_v17 = vld [vmem:[%s7293_s2 + $0x70] sm:$0xff]  ;;  %s4566_s29 = sshll.u32 %s7331_s12, 7 }
  0x12   : > { %v4375_v15 = vld [vmem:[%s7293_s2 + $0x228] sm:$0xff]  ;;  %5720 = vmatprep.subr.bf16.mxu0 %v5719_v7  ;;  %5594 = vmatpush3.bf16.msra.mxu1 %v5591_v3  ;;  %v5599_v16 = vpack.c.bf16 %v4191_v13, %v4190_v11  ;;  %v4193_v19 = vld [vmem:[%s7293_s2 + $0x78] sm:$0xff]  ;;  %v4376_v20 = vld [vmem:[%s7293_s2 + $0x230] sm:$0xff]  ;;  %s7264_s5 = scalar_lea.vmem %s7294_s3, %s4566_s29 }
  0x13   : > { %5722 = vmatpush3.bf16.msra.mxu0 %v5719_v7  ;;  %5596 = vmatprep.subr.bf16.mxu1 %v5595_v8  ;;  %v5727_v18 = vpack.c.bf16 %v4375_v15, %v4374_v14  ;;  %v4377_v21 = vld [vmem:[%s7293_s2 + $0x238] sm:$0xff]  ;;  %s6232_s28 = scalar_lea.vmem %s7291_s0, %s6087_s17  ;;  %v5603_v28 = vpack.c.bf16 %v4193_v19, %v4192_v17  ;;  %v346_v29 = vld [vmem:[%s7293_s2] sm:$0xff]  ;;  %v347_v30 = vld [vmem:[%s7293_s2 + $0x8] sm:$0xff]  ;;  %s4565_s23 = sadd.s32 192, %s6087_s17 }
  0x14   : > { %5724 = vmatprep.subr.bf16.mxu0 %v5723_v12  ;;  %v261_v22 = vld [vmem:[%s6232_s28] sm:$0xff]  ;;  %v262_v23 = vld [vmem:[%s6232_s28 + $0x8] sm:$0xff]  ;;  %v267_v24 = vld [vmem:[%s6232_s28 + $0x30] sm:$0xff]  ;;  %v5731_v34 = vpack.c.bf16 %v4377_v21, %v4376_v20  ;;  %v5607_v46 = vpack.c.bf16 %v347_v30, %v346_v29  ;;  %s6330_s7 = scalar_lea.vmem %s7292_s1, %s4565_s23 }
  0x15   : > { %286 = vst.msk [vmem:[#allocation2] sm:$0xff] %vm285_vm0, %v261_v22  ;;  %287 = vst.msk [vmem:[#allocation2 + $0x8] sm:$0xff] %vm285_vm0, %v262_v23  ;;  %v263_v25 = vld [vmem:[%s6232_s28 + $0x10] sm:$0x7]  ;;  %v268_v26 = vld [vmem:[%s6232_s28 + $0x38] sm:$0xff] }
  0x16   : > { %5598 = vmatpush3.bf16.msra.mxu1 %v5595_v8  ;;  %293 = vst.msk [vmem:[#allocation2 + $0x30] sm:$0xff] %vm285_vm0, %v267_v24  ;;  %v264_v27 = vld [vmem:[%s6232_s28 + $0x18] sm:$0xff]  ;;  %294 = vst.msk [vmem:[#allocation2 + $0x38] sm:$0xff] %vm285_vm0, %v268_v26  ;;  %v265_v31 = vld [vmem:[%s6232_s28 + $0x20] sm:$0xff] }
  0x17   : > { %5726 = vmatpush3.bf16.msra.mxu0 %v5723_v12  ;;  %5600 = vmatprep.subr.bf16.mxu1 %v5599_v16  ;;  %289 = vst.msk [vmem:[#allocation2 + $0x10] sm:$0x7] %vm288_vm1, %v263_v25  ;;  %v270_v32 = vld [vmem:[%s6232_s28 + $0x48] sm:$0xff]  ;;  %v271_v35 = vld [vmem:[%s6232_s28 + $0x50] sm:$0xff]  ;;  %v273_v36 = vld [vmem:[%s6232_s28 + $0x60] sm:$0xff] }
  0x18   : > { %290 = vst.msk [vmem:[#allocation2 + $0x18] sm:$0xff] %vm285_vm0, %v264_v27  ;;  %v266_v33 = vld [vmem:[%s6232_s28 + $0x28] sm:$0x7]  ;;  %5728 = vmatprep.subr.bf16.mxu0 %v5727_v18  ;;  %291 = vst.msk [vmem:[#allocation2 + $0x20] sm:$0xff] %vm285_vm0, %v265_v31  ;;  %v269_v37 = vld [vmem:[%s6232_s28 + $0x40] sm:$0x7] }
  0x19   : > { %296 = vst.msk [vmem:[#allocation2 + $0x48] sm:$0xff] %vm285_vm0, %v270_v32  ;;  %v4394_v38 = vld [vmem:[%s7293_s2 + $0x240] sm:$0xff]  ;;  %v4395_v39 = vld [vmem:[%s7293_s2 + $0x248] sm:$0xff]  ;;  %297 = vst.msk [vmem:[#allocation2 + $0x50] sm:$0xff] %vm285_vm0, %v271_v35 }
  0x1a   : > { %292 = vst.msk [vmem:[#allocation2 + $0x28] sm:$0x7] %vm288_vm1, %v266_v33  ;;  %295 = vst.msk [vmem:[#allocation2 + $0x40] sm:$0x7] %vm288_vm1, %v269_v37  ;;  %v274_v40 = vld [vmem:[%s6232_s28 + $0x68] sm:$0xff]  ;;  %5602 = vmatpush3.bf16.msra.mxu1 %v5599_v16  ;;  %v276_v41 = vld [vmem:[%s6232_s28 + $0x78] sm:$0xff]  ;;  %v5735_v47 = vpack.c.bf16 %v4395_v39, %v4394_v38 }
  0x1b   : > { %299 = vst.msk [vmem:[#allocation2 + $0x60] sm:$0xff] %vm285_vm0, %v273_v36  ;;  %300 = vst.msk [vmem:[#allocation2 + $0x68] sm:$0xff] %vm285_vm0, %v274_v40  ;;  %v272_v42 = vld [vmem:[%s6232_s28 + $0x58] sm:$0x7]  ;;  %5730 = vmatpush3.bf16.msra.mxu0 %v5727_v18  ;;  %5604 = vmatprep.subr.bf16.mxu1 %v5603_v28  ;;  %v277_v43 = vld [vmem:[%s6232_s28 + $0x80] sm:$0xff] }
  0x1c   : > { %302 = vst.msk [vmem:[#allocation2 + $0x78] sm:$0xff] %vm285_vm0, %v276_v41  ;;  %v279_v44 = vld [vmem:[%s6232_s28 + $0x90] sm:$0xff]  ;;  %5732 = vmatprep.subr.bf16.mxu0 %v5731_v34  ;;  %303 = vst.msk [vmem:[#allocation2 + $0x80] sm:$0xff] %vm285_vm0, %v277_v43  ;;  %v280_v49 = vld [vmem:[%s6232_s28 + $0x98] sm:$0xff] }
  0x1d   : > { %298 = vst.msk [vmem:[#allocation2 + $0x58] sm:$0x7] %vm288_vm1, %v272_v42  ;;  %v275_v45 = vld [vmem:[%s6232_s28 + $0x70] sm:$0x7]  ;;  %v354_v50 = vld [vmem:[#allocation2 + $0x1] sm:$0xff]  ;;  %v349_v52 = vld [vmem:[%s7293_s2 + $0x18] sm:$0xff] }
  0x1e   : > { %v348_v48 = vld [vmem:[%s7293_s2 + $0x10] sm:$0xff]  ;;  %305 = vst.msk [vmem:[#allocation2 + $0x90] sm:$0xff] %vm285_vm0, %v279_v44  ;;  %306 = vst.msk [vmem:[#allocation2 + $0x98] sm:$0xff] %vm285_vm0, %v280_v49  ;;  %5606 = vmatpush3.bf16.msra.mxu1 %v5603_v28  ;;  %4967 = vmatprep.mubr.msk.f32.mxu1 %vm285_vm0, %v354_v50  ;;  %v4397_v55 = vld [vmem:[%s7293_s2 + $0x258] sm:$0xff] }
  0x1f   : > { %301 = vst.msk [vmem:[#allocation2 + $0x70] sm:$0x7] %vm288_vm1, %v275_v45  ;;  %v6286_v51 = vld [vmem:[#allocation2 + $0x30] sm:$0xff]  ;;  %5734 = vmatpush3.bf16.msra.mxu0 %v5731_v34  ;;  %v6301_v56 = vld [vmem:[#allocation2 + $0x38] sm:$0xff]  ;;  %5608 = vmatprep.subr.bf16.mxu1 %v5607_v46  ;;  %v5611_v58 = vpack.c.bf16 %v349_v52, %v348_v48  ;;  %v350_v61 = vld [vmem:[%s7293_s2 + $0x20] sm:$0xff] }
  0x20   : > { %v355_v53 = vld [vmem:[#allocation2 + $0x9] sm:$0xff]  ;;  %5287 = vmatprep.mubr.msk.f32.mxu0 %vm285_vm0, %v6286_v51  ;;  %5736 = vmatprep.subr.bf16.mxu0 %v5735_v47  ;;  %v356_v57 = vld [vmem:[#allocation2 + $0x19] sm:$0xff]  ;;  %v6325_v3 = vld [vmem:[#allocation2 + $0x31] sm:$0xff] }
  0x21   : > { %v4396_v54 = vld [vmem:[%s7293_s2 + $0x250] sm:$0xff]  ;;  %4968 = vmatmul.mubr.msk.f32.vlgmr.msra.gmra.mrb[0].mxu1 %vm285_vm0, %v355_v53  ;;  %v6306_v59 = vld [vmem:[#allocation2 + $0x48] sm:$0xff]  ;;  %v4398_v0 = vld [vmem:[%s7293_s2 + $0x260] sm:$0xff] }
  0x22   : > { %v5739_v60 = vpack.c.bf16 %v4397_v55, %v4396_v54  ;;  %v351_v62 = vld [vmem:[%s7293_s2 + $0x28] sm:$0xff]  ;;  %5288 = vmatmul.mubr.msk.f32.vlgmr.msra.gmra.mrb[0].mxu0 %vm285_vm0, %v6301_v56  ;;  %5610 = vmatpush3.bf16.msra.mxu1 %v5607_v46  ;;  %v6323_v2 = vld [vmem:[#allocation2 + $0x50] sm:$0xff]  ;;  %v6334_v4 = vld [vmem:[#allocation2 + $0x60] sm:$0xff] }
  0x23   : > { %v357_v63 = vld [vmem:[#allocation2 + $0x21] sm:$0xff]  ;;  %5738 = vmatpush3.bf16.msra.mxu0 %v5735_v47  ;;  %4970 = vmatprep.mubr.msk.f32.mxu1 %vm285_vm0, %v356_v57  ;;  %v6336_v5 = vld [vmem:[#allocation2 + $0x39] sm:$0xff]  ;;  %v5615_v6 = vpack.c.bf16 %v351_v62, %v350_v61  ;;  %v6342_v9 = vld [vmem:[#allocation2 + $0x49] sm:$0xff] }
  0x24   : > { %v4399_v1 = vld [vmem:[%s7293_s2 + $0x268] sm:$0xff]  ;;  %5290 = vmatprep.mubr.msk.f32.mxu0 %vm285_vm0, %v6306_v59  ;;  %5612 = vmatprep.subr.bf16.mxu1 %v5611_v58  ;;  %v283_v12 = vld [vmem:[%s6232_s28 + $0xb0] sm:$0xff]  ;;  %v6351_v13 = vld [vmem:[#allocation2 + $0x78] sm:$0xff] }
  0x25   : > { %v282_v7 = vld [vmem:[%s6232_s28 + $0xa8] sm:$0xff]  ;;  %4971 = vmatmul.mubr.msk.f32.gmra.mrb[2].mxu1 %vm285_vm0, %v357_v63  ;;  %5740 = vmatprep.subr.bf16.mxu0 %v5739_v60  ;;  %v5743_v10 = vpack.c.bf16 %v4399_v1, %v4398_v0  ;;  %309 = vst.msk [vmem:[#allocation2 + $0xb0] sm:$0xff] %vm285_vm0, %v283_v12  ;;  %v311_v14 = vld [vmem:[%s6330_s7] sm:$0xff]  ;;  %v352_v16 = vld [vmem:[%s7293_s2 + $0x30] sm:$0xff] }
  0x26   : > { %v6340_v8 = vld [vmem:[#allocation2 + $0x68] sm:$0xff]  ;;  %308 = vst.msk [vmem:[#allocation2 + $0xa8] sm:$0xff] %vm285_vm0, %v282_v7  ;;  %5291 = vmatmul.mubr.msk.f32.gmra.mrb[2].mxu0 %vm285_vm0, %v6323_v2  ;;  %4973 = vmatprep.mubr.msk.f32.mxu1 %vm285_vm0, %v6325_v3  ;;  %v281_v15 = vld [vmem:[%s6232_s28 + $0xa0] sm:$0x7]  ;;  %321 = vst.msk [vmem:[#allocation2 + $0xc0] sm:$0xff] %vm285_vm0, %v311_v14 }
  0x27   : > { %v278_v11 = vld [vmem:[%s6232_s28 + $0x88] sm:$0x7]  ;;  %5293 = vmatprep.mubr.msk.f32.mxu0 %vm285_vm0, %v6334_v4  ;;  %5614 = vmatpush3.bf16.msra.mxu1 %v5611_v58  ;;  %307 = vst.msk [vmem:[#allocation2 + $0xa0] sm:$0x7] %vm288_vm1, %v281_v15  ;;  %v353_v17 = vld [vmem:[%s7293_s2 + $0x38] sm:$0xff]  ;;  %v4400_v19 = vld [vmem:[%s7293_s2 + $0x270] sm:$0xff] }
  0x28   : > { %304 = vst.msk [vmem:[#allocation2 + $0x88] sm:$0x7] %vm288_vm1, %v278_v11  ;;  %v312_v18 = vld [vmem:[%s6330_s7 + $0x8] sm:$0xff]  ;;  %5742 = vmatpush3.bf16.msra.mxu0 %v5739_v60  ;;  %5616 = vmatprep.subr.bf16.mxu1 %v5615_v6  ;;  %v5619_v20 = vpack.c.bf16 %v353_v17, %v352_v16  ;;  %v4401_v21 = vld [vmem:[%s7293_s2 + $0x278] sm:$0xff]  ;;  %v315_v26 = vld [vmem:[%s6330_s7 + $0x20] sm:$0xff] }
  0x29   : > { %322 = vst.msk [vmem:[#allocation2 + $0xc8] sm:$0xff] %vm285_vm0, %v312_v18  ;;  %v314_v22 = vld [vmem:[%s6330_s7 + $0x18] sm:$0xff]  ;;  %4974 = vmatmul.mubr.msk.f32.gmra.mrb[4].mxu1 %vm285_vm0, %v6336_v5  ;;  %5744 = vmatprep.subr.bf16.mxu0 %v5743_v10  ;;  %v5747_v25 = vpack.c.bf16 %v4401_v21, %v4400_v19  ;;  %325 = vst.msk [vmem:[#allocation2 + $0xe0] sm:$0xff] %vm285_vm0, %v315_v26  ;;  %v4226_v27 = vld [vmem:[%s7293_s2 + $0x80] sm:$0xff] }
  0x2a   : > { %v284_v23 = vld [vmem:[%s6232_s28 + $0xb8] sm:$0x7]  ;;  %324 = vst.msk [vmem:[#allocation2 + $0xd8] sm:$0xff] %vm285_vm0, %v314_v22  ;;  %5294 = vmatmul.mubr.msk.f32.gmra.mrb[4].mxu0 %vm285_vm0, %v6340_v8  ;;  %4976 = vmatprep.mubr.msk.f32.mxu1 %vm285_vm0, %v6342_v9  ;;  %v4227_v28 = vld [vmem:[%s7293_s2 + $0x88] sm:$0xff]  ;;  %v4418_v29 = vld [vmem:[%s7293_s2 + $0x280] sm:$0xff] }
  0x2b   : > { %v6379_v24 = vld [vmem:[#allocation2 + $0x51] sm:$0xff]  ;;  %310 = vst.msk [vmem:[#allocation2 + $0xb8] sm:$0x7] %vm288_vm1, %v284_v23  ;;  %5296 = vmatprep.mubr.msk.f32.mxu0 %vm285_vm0, %v6351_v13  ;;  %v6400_v30 = vld [vmem:[#allocation2 + $0x80] sm:$0xff]  ;;  %5618 = vmatpush3.bf16.msra.mxu1 %v5615_v6  ;;  %v4419_v32 = vld [vmem:[%s7293_s2 + $0x288] sm:$0xff]  ;;  %v5623_v34 = vpack.c.bf16 %v4227_v28, %v4226_v27 }
  0x2c   : > { %v6402_v31 = vld [vmem:[#allocation2 + $0x61] sm:$0xff]  ;;  %v6407_v33 = vld [vmem:[#allocation2 + $0x90] sm:$0xff]  ;;  %5746 = vmatpush3.bf16.msra.mxu0 %v5743_v10  ;;  %5620 = vmatprep.subr.bf16.mxu1 %v5619_v20  ;;  %v5751_v35 = vpack.c.bf16 %v4419_v32, %v4418_v29  ;;  %v6419_v37 = vld [vmem:[#allocation2 + $0x98] sm:$0xff] }
  0x2d   : > { %4977 = vmatmul.mubr.msk.f32.gmra.mrb[6].mxu1 %vm285_vm0, %v6379_v24  ;;  %5748 = vmatprep.subr.bf16.mxu0 %v5747_v25  ;;  %v6415_v36 = vld [vmem:[#allocation2 + $0x69] sm:$0xff]  ;;  %v6421_v38 = vld [vmem:[#allocation2 + $0x79] sm:$0xff]  ;;  %v6437_v42 = vld [vmem:[#allocation2 + $0x91] sm:$0xff] }
  0x2e   : > { %5297 = vmatmul.mubr.msk.f32.gmra.mrb[6].mxu0 %vm285_vm0, %v6400_v30  ;;  %4979 = vmatprep.mubr.msk.f32.mxu1 %vm285_vm0, %v6402_v31  ;;  %v6423_v39 = vld [vmem:[#allocation2 + $0xa8] sm:$0xff]  ;;  %v6435_v41 = vld [vmem:[#allocation2 + $0xb0] sm:$0xff]  ;;  %v6440_v44 = vld [vmem:[#allocation2 + $0xc0] sm:$0xff] }
  0x2f   : > { %5299 = vmatprep.mubr.msk.f32.mxu0 %vm285_vm0, %v6407_v33  ;;  %5622 = vmatpush3.bf16.msra.mxu1 %v5619_v20  ;;  %v6431_v40 = vld [vmem:[#allocation2 + $0x81] sm:$0xff]  ;;  %v313_v43 = vld [vmem:[%s6330_s7 + $0x10] sm:$0x7]  ;;  %v6451_v46 = vld [vmem:[#allocation2 + $0x99] sm:$0xff] }
  0x30   : > { %5750 = vmatpush3.bf16.msra.mxu0 %v5747_v25  ;;  %5624 = vmatprep.subr.bf16.mxu1 %v5623_v34  ;;  %323 = vst.msk [vmem:[#allocation2 + $0xd0] sm:$0x7] %vm288_vm1, %v313_v43  ;;  %v316_v45 = vld [vmem:[%s6330_s7 + $0x28] sm:$0x7]  ;;  %v6471_v52 = vld [vmem:[#allocation2 + $0xe0] sm:$0xff]  ;;  %v4228_v54 = vld [vmem:[%s7293_s2 + $0x90] sm:$0xff] }
  0x31   : > { %4980 = vmatmul.mubr.msk.f32.gmra.mrb[8].mxu1 %vm285_vm0, %v6415_v36  ;;  %5752 = vmatprep.subr.bf16.mxu0 %v5751_v35  ;;  %326 = vst.msk [vmem:[#allocation2 + $0xe8] sm:$0x7] %vm288_vm1, %v316_v45  ;;  %v6455_v47 = vld [vmem:[#allocation2 + $0xc8] sm:$0xff]  ;;  %v6459_v49 = vld [vmem:[#allocation2 + $0xd8] sm:$0xff]  ;;  %v330_v53 = vld [vmem:[#allocation2] sm:$0xff] }
  0x32   : > { %5300 = vmatmul.mubr.msk.f32.gmra.mrb[8].mxu0 %vm285_vm0, %v6419_v37  ;;  %4982 = vmatprep.mubr.msk.f32.mxu1 %vm285_vm0, %v6421_v38  ;;  %v6457_v48 = vld [vmem:[#allocation2 + $0xa9] sm:$0xff]  ;;  %v6467_v50 = vld [vmem:[#allocation2 + $0xb1] sm:$0xff]  ;;  %v4230_v0 = vld [vmem:[%s7293_s2 + $0xa0] sm:$0xff] }
  0x33   : > { %5302 = vmatprep.mubr.msk.f32.mxu0 %vm285_vm0, %v6423_v39  ;;  %v4229_v55 = vld [vmem:[%s7293_s2 + $0x98] sm:$0xff]  ;;  %v331_v57 = vld [vmem:[#allocation2 + $0x8] sm:$0xff]  ;;  %v4420_v58 = vld [vmem:[%s7293_s2 + $0x290] sm:$0xff] }
  0x34   : > { %v4421_v60 = vld [vmem:[%s7293_s2 + $0x298] sm:$0xff]  ;;  %v5627_v62 = vpack.c.bf16 %v4229_v55, %v4228_v54  ;;  %v4231_v1 = vld [vmem:[%s7293_s2 + $0xa8] sm:$0xff]  ;;  %v6503_v6 = vld [vmem:[#allocation2 + $0x20] sm:$0xff] }
  0x35   : > { %4983 = vmatmul.mubr.msk.f32.gmra.mrb[10].mxu1 %vm285_vm0, %v6431_v40  ;;  %v6492_v61 = vld [vmem:[#allocation2 + $0x18] sm:$0xff]  ;;  %v5755_v63 = vpack.c.bf16 %v4421_v60, %v4420_v58  ;;  %v4423_v7 = vld [vmem:[%s7293_s2 + $0x2a8] sm:$0xff]  ;;  %v4232_v11 = vld [vmem:[%s7293_s2 + $0xb0] sm:$0xff] }
  0x36   : > { %5303 = vmatmul.mubr.msk.f32.gmra.mrb[10].mxu0 %vm285_vm0, %v6435_v41  ;;  %4985 = vmatprep.mubr.msk.f32.mxu1 %vm285_vm0, %v6437_v42  ;;  %v4233_v12 = vld [vmem:[%s7293_s2 + $0xb8] sm:$0xff]  ;;  %v4250_v17 = vld [vmem:[%s7293_s2 + $0xc0] sm:$0xff]  ;;  %v4251_v18 = vld [vmem:[%s7293_s2 + $0xc8] sm:$0xff] }
  0x37   : > { %5305 = vmatprep.mubr.msk.f32.mxu0 %vm285_vm0, %v6440_v44  ;;  %v4425_v14 = vld [vmem:[%s7293_s2 + $0x2b8] sm:$0xff]  ;;  %v5635_v15 = vpack.c.bf16 %v4233_v12, %v4232_v11  ;;  %v4442_v19 = vld [vmem:[%s7293_s2 + $0x2c0] sm:$0xff]  ;;  %v4443_v20 = vld [vmem:[%s7293_s2 + $0x2c8] sm:$0xff]  ;;  %v5639_v21 = vpack.c.bf16 %v4251_v18, %v4250_v17 }
  0x38   : > { %v5767_v22 = vpack.c.bf16 %v4443_v20, %v4442_v19  ;;  %v317_v23 = vld [vmem:[%s6330_s7 + $0x30] sm:$0xff]  ;;  %v6574_v25 = vld [vmem:[#allocation2 + $0xc1] sm:$0xff]  ;;  %v6587_v27 = vld [vmem:[#allocation2 + $0xd9] sm:$0xff] }
  0x39   : > { %4986 = vmatmul.mubr.msk.f32.gmra.mrb[12].mxu1 %vm285_vm0, %v6451_v46  ;;  %327 = vst.msk [vmem:[#allocation2 + $0xf0] sm:$0xff] %vm285_vm0, %v317_v23  ;;  %v6585_v26 = vld [vmem:[#allocation2 + $0xc9] sm:$0xff]  ;;  %v6597_v28 = vld [vmem:[#allocation2 + $0xe1] sm:$0xff]  ;;  %v4445_v43 = vld [vmem:[%s7293_s2 + $0x2d8] sm:$0xff] }
  0x3a   : > { %5306 = vmatmul.mubr.msk.f32.gmra.mrb[12].mxu0 %vm285_vm0, %v6455_v47  ;;  %4988 = vmatprep.mubr.msk.f32.mxu1 %vm285_vm0, %v6457_v48  ;;  %v765_v29 = vld [vmem:[#allocation2 + $0x2] sm:$0xff]  ;;  %v766_v32 = vld [vmem:[#allocation2 + $0xa] sm:$0xff]  ;;  %v6624_v54 = vld [vmem:[#allocation2 + $0x1a] sm:$0xff] }
  0x3b   : > { %5308 = vmatprep.mubr.msk.f32.mxu0 %vm285_vm0, %v6459_v49  ;;  %v319_v45 = vld [vmem:[%s6330_s7 + $0x40] sm:$0x7]  ;;  %v4256_v11 = vld [vmem:[%s7293_s2 + $0xf0] sm:$0xff]  ;;  %v4257_v12 = vld [vmem:[%s7293_s2 + $0xf8] sm:$0xff] }
  0x3c   : > { %329 = vst.msk [vmem:[#allocation2 + $0x100] sm:$0x7] %vm288_vm1, %v319_v45  ;;  %v4254_v60 = vld [vmem:[%s7293_s2 + $0xe0] sm:$0xff]  ;;  %v5651_v17 = vpack.c.bf16 %v4257_v12, %v4256_v11  ;;  %v4275_v20 = vld [vmem:[%s7293_s2 + $0x108] sm:$0xff]  ;;  %v4469_v11 = vld [vmem:[%s7293_s2 + $0x318] sm:$0xff] }
  0x3d   : > { %4989 = vmatmul.mubr.msk.f32.gmra.mrb[14].mxu1 %vm285_vm0, %v6467_v50  ;;  %v4274_v19 = vld [vmem:[%s7293_s2 + $0x100] sm:$0xff]  ;;  %v6733_v45 = vld [vmem:[#allocation2 + $0xca] sm:$0xff] }
  0x3e   : > { %5309 = vmatmul.mubr.msk.f32.gmra.mrb[14].mxu0 %vm285_vm0, %v6471_v52  ;;  %5007 = vmatprep.mubr.msk.f32.mxu1 %vm285_vm0, %v330_v53  ;;  %v6621_v53 = vld [vmem:[#allocation2 + $0x3a] sm:$0xff]  ;;  %v6697_v23 = vld [vmem:[#allocation2 + $0x82] sm:$0xff] }
  0x3f   : > { %5327 = vmatprep.mubr.msk.f32.mxu0 %vm285_vm0, %v6325_v3  ;;  %v4422_v3 = vld [vmem:[%s7293_s2 + $0x2a0] sm:$0xff] }
  0x40   : > { %v5759_v10 = vpack.c.bf16 %v4423_v7, %v4422_v3  ;;  %v6647_v3 = vld [vmem:[#allocation2 + $0x52] sm:$0xff]  ;;  %v6651_v7 = vld [vmem:[#allocation2 + $0x62] sm:$0xff] }
  0x41   : > { %5008 = vmatmul.mubr.msk.f32.vlgmr.msra.gmra.mrb[0].mxu1 %vm285_vm0, %v331_v57  ;;  %v6627_v57 = vld [vmem:[#allocation2 + $0x4a] sm:$0xff]  ;;  %v6768_v12 = vld [vmem:[#allocation2 + $0x3b] sm:$0xff] }
  0x42   : > { %5328 = vmatmul.mubr.msk.f32.vlgmr.msra.gmra.mrb[0].mxu0 %vm285_vm0, %v6336_v5  ;;  %5626 = vmatpush3.bf16.msra.mxu1 %v5623_v34  ;;  %v5631_v5 = vpack.c.bf16 %v4231_v1, %v4230_v0  ;;  %v4252_v34 = vld [vmem:[%s7293_s2 + $0xd0] sm:$0xff]  ;;  %v4446_v0 = vld [vmem:[%s7293_s2 + $0x2e0] sm:$0xff]  ;;  %v4447_v1 = vld [vmem:[%s7293_s2 + $0x2e8] sm:$0xff] }
  0x43   : > { %5754 = vmatpush3.bf16.msra.mxu0 %v5751_v35  ;;  %5010 = vmatprep.mubr.msk.f32.mxu1 %vm285_vm0, %v6492_v61  ;;  %v4253_v35 = vld [vmem:[%s7293_s2 + $0xd8] sm:$0xff] }
  0x44   : > { %5330 = vmatprep.mubr.msk.f32.mxu0 %vm285_vm0, %v6342_v9  ;;  %5628 = vmatprep.subr.bf16.mxu1 %v5627_v62  ;;  %v4424_v9 = vld [vmem:[%s7293_s2 + $0x2b0] sm:$0xff]  ;;  %v5643_v55 = vpack.c.bf16 %v4253_v35, %v4252_v34  ;;  %v6709_v34 = vld [vmem:[#allocation2 + $0x9a] sm:$0xff] }
  0x45   : > { %5011 = vmatmul.mubr.msk.f32.gmra.mrb[2].mxu1 %vm285_vm0, %v6503_v6  ;;  %5756 = vmatprep.subr.bf16.mxu0 %v5755_v63  ;;  %v5763_v16 = vpack.c.bf16 %v4425_v14, %v4424_v9  ;;  %v4448_v9 = vld [vmem:[%s7293_s2 + $0x2f0] sm:$0xff]  ;;  %v4449_v14 = vld [vmem:[%s7293_s2 + $0x2f8] sm:$0xff] }
  0x46   : > { %5331 = vmatmul.mubr.msk.f32.gmra.mrb[2].mxu0 %vm285_vm0, %v6379_v24  ;;  %5013 = vmatprep.mubr.msk.f32.mxu1 %vm285_vm0, %v6286_v51  ;;  %v318_v24 = vld [vmem:[%s6330_s7 + $0x38] sm:$0xff]  ;;  %v5779_v18 = vpack.c.bf16 %v4449_v14, %v4448_v9  ;;  %v6711_v35 = vld [vmem:[#allocation2 + $0xaa] sm:$0xff] }
  0x47   : > { %5333 = vmatprep.mubr.msk.f32.mxu0 %vm285_vm0, %v6402_v31  ;;  %5630 = vmatpush3.bf16.msra.mxu1 %v5627_v62  ;;  %328 = vst.msk [vmem:[#allocation2 + $0xf8] sm:$0xff] %vm285_vm0, %v318_v24  ;;  %v6599_v31 = vld [vmem:[#allocation2 + $0x32] sm:$0xff]  ;;  %v4255_v62 = vld [vmem:[%s7293_s2 + $0xe8] sm:$0xff]  ;;  %v6770_v9 = vld [vmem:[#allocation2 + $0x1b] sm:$0xff] }
  0x48   : > { %5758 = vmatpush3.bf16.msra.mxu0 %v5755_v63  ;;  %5632 = vmatprep.subr.bf16.mxu1 %v5631_v5  ;;  %v6637_v63 = vld [vmem:[#allocation2 + $0x22] sm:$0xff]  ;;  %v6699_v24 = vld [vmem:[#allocation2 + $0x92] sm:$0xff]  ;;  %7309 = vst [vmem:[#allocation4_spill] sm:$0xff] %v6770_v9 }
  0x49   : > { %5014 = vmatmul.mubr.msk.f32.gmra.mrb[4].mxu1 %vm285_vm0, %v6301_v56  ;;  %5760 = vmatprep.subr.bf16.mxu0 %v5759_v10 }
  0x4a   : > { %5334 = vmatmul.mubr.msk.f32.gmra.mrb[4].mxu0 %vm285_vm0, %v6415_v36  ;;  %5016 = vmatprep.mubr.msk.f32.mxu1 %vm285_vm0, %v6306_v59  ;;  %v4444_v36 = vld [vmem:[%s7293_s2 + $0x2d0] sm:$0xff] }
  0x4b   : > { %5336 = vmatprep.mubr.msk.f32.mxu0 %vm285_vm0, %v6421_v38  ;;  %5634 = vmatpush3.bf16.msra.mxu1 %v5631_v5  ;;  %v5771_v58 = vpack.c.bf16 %v4445_v43, %v4444_v36  ;;  %v5647_v5 = vpack.c.bf16 %v4255_v62, %v4254_v60  ;;  %v6721_v36 = vld [vmem:[#allocation2 + $0xb2] sm:$0xff]  ;;  %v6723_v43 = vld [vmem:[#allocation2 + $0xc2] sm:$0xff] }
  0x4c   : > { %5762 = vmatpush3.bf16.msra.mxu0 %v5759_v10  ;;  %5636 = vmatprep.subr.bf16.mxu1 %v5635_v15  ;;  %v5775_v10 = vpack.c.bf16 %v4447_v1, %v4446_v0  ;;  %v999_v60 = vld [vmem:[#allocation2 + $0x3] sm:$0xff]  ;;  %v6747_v62 = vld [vmem:[#allocation2 + $0x33] sm:$0xff] }
  0x4d   : > { %5017 = vmatmul.mubr.msk.f32.gmra.mrb[6].mxu1 %vm285_vm0, %v6323_v2  ;;  %5764 = vmatprep.subr.bf16.mxu0 %v5763_v16  ;;  %7308 = vst [vmem:[#allocation3_spill] sm:$0xff] %v6747_v62  ;;  %v4276_v0 = vld [vmem:[%s7293_s2 + $0x110] sm:$0xff]  ;;  %v4277_v1 = vld [vmem:[%s7293_s2 + $0x118] sm:$0xff] }
  0x4e   : > { %5337 = vmatmul.mubr.msk.f32.gmra.mrb[6].mxu0 %vm285_vm0, %v6431_v40  ;;  %5019 = vmatprep.mubr.msk.f32.mxu1 %vm285_vm0, %v6334_v4  ;;  %v5659_v14 = vpack.c.bf16 %v4277_v1, %v4276_v0  ;;  %v6793_v0 = vld [vmem:[#allocation2 + $0x53] sm:$0xff] }
  0x4f   : > { %5339 = vmatprep.mubr.msk.f32.mxu0 %vm285_vm0, %v6437_v42  ;;  %5638 = vmatpush3.bf16.msra.mxu1 %v5635_v15  ;;  %v6673_v15 = vld [vmem:[#allocation2 + $0x6a] sm:$0xff] }
  0x50   : > { %5766 = vmatpush3.bf16.msra.mxu0 %v5763_v16  ;;  %5640 = vmatprep.subr.bf16.mxu1 %v5639_v21  ;;  %v6675_v16 = vld [vmem:[#allocation2 + $0x7a] sm:$0xff] }
  0x51   : > { %5020 = vmatmul.mubr.msk.f32.gmra.mrb[8].mxu1 %vm285_vm0, %v6340_v8  ;;  %5768 = vmatprep.subr.bf16.mxu0 %v5767_v22 }
  0x52   : > { %5340 = vmatmul.mubr.msk.f32.gmra.mrb[8].mxu0 %vm285_vm0, %v6451_v46  ;;  %5022 = vmatprep.mubr.msk.f32.mxu1 %vm285_vm0, %v6351_v13 }
  0x53   : > { %5342 = vmatprep.mubr.msk.f32.mxu0 %vm285_vm0, %v6457_v48 }
  0x55   : > { %5023 = vmatmul.mubr.msk.f32.gmra.mrb[10].mxu1 %vm285_vm0, %v6400_v30 }
  0x56   : > { %5343 = vmatmul.mubr.msk.f32.gmra.mrb[10].mxu0 %vm285_vm0, %v6467_v50  ;;  %5025 = vmatprep.mubr.msk.f32.mxu1 %vm285_vm0, %v6407_v33 }
  0x57   : > { %5345 = vmatprep.mubr.msk.f32.mxu0 %vm285_vm0, %v6574_v25 }
  0x59   : > { %5026 = vmatmul.mubr.msk.f32.gmra.mrb[12].mxu1 %vm285_vm0, %v6419_v37 }
  0x5a   : > { %5346 = vmatmul.mubr.msk.f32.gmra.mrb[12].mxu0 %vm285_vm0, %v6585_v26  ;;  %5028 = vmatprep.mubr.msk.f32.mxu1 %vm285_vm0, %v6423_v39 }
  0x5b   : > { %5348 = vmatprep.mubr.msk.f32.mxu0 %vm285_vm0, %v6587_v27 }
  0x5d   : > { %5029 = vmatmul.mubr.msk.f32.gmra.mrb[14].mxu1 %vm285_vm0, %v6435_v41 }
  0x5e   : > { %5349 = vmatmul.mubr.msk.f32.gmra.mrb[14].mxu0 %vm285_vm0, %v6597_v28  ;;  %5047 = vmatprep.mubr.msk.f32.mxu1 %vm285_vm0, %v765_v29  ;;  %v5655_v29 = vpack.c.bf16 %v4275_v20, %v4274_v19  ;;  %v4278_v19 = vld [vmem:[%s7293_s2 + $0x120] sm:$0xff]  ;;  %v4279_v20 = vld [vmem:[%s7293_s2 + $0x128] sm:$0xff] }
  0x5f   : > { %5367 = vmatprep.mubr.msk.f32.mxu0 %vm285_vm0, %v6599_v31  ;;  %v5663_v1 = vpack.c.bf16 %v4279_v20, %v4278_v19  ;;  %v4473_v19 = vld [vmem:[%s7293_s2 + $0x338] sm:$0xff]  ;;  %v6819_v20 = vld [vmem:[#allocation2 + $0x6b] sm:$0xff] }
  0x61   : > { %5048 = vmatmul.mubr.msk.f32.vlgmr.msra.gmra.mrb[0].mxu1 %vm285_vm0, %v766_v32 }
  0x62   : > { %5368 = vmatmul.mubr.msk.f32.vlgmr.msra.gmra.mrb[0].mxu0 %vm285_vm0, %v6621_v53  ;;  %5642 = vmatpush3.bf16.msra.mxu1 %v5639_v21  ;;  %v4466_v21 = vld [vmem:[%s7293_s2 + $0x300] sm:$0xff] }
  0x63   : > { %5770 = vmatpush3.bf16.msra.mxu0 %v5767_v22  ;;  %5050 = vmatprep.mubr.msk.f32.mxu1 %vm285_vm0, %v6624_v54  ;;  %v4467_v22 = vld [vmem:[%s7293_s2 + $0x308] sm:$0xff] }
  0x64   : > { %5370 = vmatprep.mubr.msk.f32.mxu0 %vm285_vm0, %v6627_v57  ;;  %5644 = vmatprep.subr.bf16.mxu1 %v5643_v55  ;;  %v5783_v32 = vpack.c.bf16 %v4467_v22, %v4466_v21  ;;  %v6783_v21 = vld [vmem:[#allocation2 + $0x23] sm:$0xff] }
  0x65   : > { %5051 = vmatmul.mubr.msk.f32.gmra.mrb[2].mxu1 %vm285_vm0, %v6637_v63  ;;  %5772 = vmatprep.subr.bf16.mxu0 %v5771_v58  ;;  %7310 = vst [vmem:[#allocation5_spill] sm:$0xff] %v6783_v21  ;;  %v4470_v22 = vld [vmem:[%s7293_s2 + $0x320] sm:$0xff] }
  0x66   : > { %5371 = vmatmul.mubr.msk.f32.gmra.mrb[2].mxu0 %vm285_vm0, %v6647_v3  ;;  %5053 = vmatprep.mubr.msk.f32.mxu1 %vm285_vm0, %v6599_v31 }
  0x67   : > { %5373 = vmatprep.mubr.msk.f32.mxu0 %vm285_vm0, %v6651_v7  ;;  %5646 = vmatpush3.bf16.msra.mxu1 %v5643_v55  ;;  %v6735_v55 = vld [vmem:[#allocation2 + $0xda] sm:$0xff] }
  0x68   : > { %5774 = vmatpush3.bf16.msra.mxu0 %v5771_v58  ;;  %5648 = vmatprep.subr.bf16.mxu1 %v5647_v5  ;;  %v6745_v58 = vld [vmem:[#allocation2 + $0xe2] sm:$0xff] }
  0x69   : > { %5054 = vmatmul.mubr.msk.f32.gmra.mrb[4].mxu1 %vm285_vm0, %v6621_v53  ;;  %5776 = vmatprep.subr.bf16.mxu0 %v5775_v10 }
  0x6a   : > { %5374 = vmatmul.mubr.msk.f32.gmra.mrb[4].mxu0 %vm285_vm0, %v6673_v15  ;;  %5056 = vmatprep.mubr.msk.f32.mxu1 %vm285_vm0, %v6627_v57 }
  0x6b   : > { %5376 = vmatprep.mubr.msk.f32.mxu0 %vm285_vm0, %v6675_v16  ;;  %5650 = vmatpush3.bf16.msra.mxu1 %v5647_v5  ;;  %v1000_v5 = vld [vmem:[#allocation2 + $0xb] sm:$0xff] }
  0x6c   : > { %5778 = vmatpush3.bf16.msra.mxu0 %v5775_v10  ;;  %5652 = vmatprep.subr.bf16.mxu1 %v5651_v17  ;;  %v4468_v10 = vld [vmem:[%s7293_s2 + $0x310] sm:$0xff] }
  0x6d   : > { %5057 = vmatmul.mubr.msk.f32.gmra.mrb[6].mxu1 %vm285_vm0, %v6647_v3  ;;  %5780 = vmatprep.subr.bf16.mxu0 %v5779_v18 }
  0x6e   : > { %5377 = vmatmul.mubr.msk.f32.gmra.mrb[6].mxu0 %vm285_vm0, %v6697_v23  ;;  %5059 = vmatprep.mubr.msk.f32.mxu1 %vm285_vm0, %v6651_v7 }
  0x6f   : > { %5379 = vmatprep.mubr.msk.f32.mxu0 %vm285_vm0, %v6699_v24  ;;  %5654 = vmatpush3.bf16.msra.mxu1 %v5651_v17  ;;  %v6773_v17 = vld [vmem:[#allocation2 + $0x4b] sm:$0xff] }
  0x70   : > { %5782 = vmatpush3.bf16.msra.mxu0 %v5779_v18  ;;  %5656 = vmatprep.subr.bf16.mxu1 %v5655_v29  ;;  %v5787_v18 = vpack.c.bf16 %v4469_v11, %v4468_v10  ;;  %v4281_v10 = vld [vmem:[%s7293_s2 + $0x138] sm:$0xff]  ;;  %v4472_v11 = vld [vmem:[%s7293_s2 + $0x330] sm:$0xff] }
  0x71   : > { %5060 = vmatmul.mubr.msk.f32.gmra.mrb[8].mxu1 %vm285_vm0, %v6673_v15  ;;  %5784 = vmatprep.subr.bf16.mxu0 %v5783_v32 }
  0x72   : > { %5380 = vmatmul.mubr.msk.f32.gmra.mrb[8].mxu0 %vm285_vm0, %v6709_v34  ;;  %5062 = vmatprep.mubr.msk.f32.mxu1 %vm285_vm0, %v6675_v16 }
  0x73   : > { %5382 = vmatprep.mubr.msk.f32.mxu0 %vm285_vm0, %v6711_v35 }
  0x75   : > { %5063 = vmatmul.mubr.msk.f32.gmra.mrb[10].mxu1 %vm285_vm0, %v6697_v23 }
  0x76   : > { %5383 = vmatmul.mubr.msk.f32.gmra.mrb[10].mxu0 %vm285_vm0, %v6721_v36  ;;  %5065 = vmatprep.mubr.msk.f32.mxu1 %vm285_vm0, %v6699_v24 }
  0x77   : > { %5385 = vmatprep.mubr.msk.f32.mxu0 %vm285_vm0, %v6723_v43 }
  0x79   : > { %5066 = vmatmul.mubr.msk.f32.gmra.mrb[12].mxu1 %vm285_vm0, %v6709_v34 }
  0x7a   : > { %5386 = vmatmul.mubr.msk.f32.gmra.mrb[12].mxu0 %vm285_vm0, %v6733_v45  ;;  %5068 = vmatprep.mubr.msk.f32.mxu1 %vm285_vm0, %v6711_v35 }
  0x7b   : > { %5388 = vmatprep.mubr.msk.f32.mxu0 %vm285_vm0, %v6735_v55 }
  0x7d   : > { %5069 = vmatmul.mubr.msk.f32.gmra.mrb[14].mxu1 %vm285_vm0, %v6721_v36 }
  0x7e   : > { %5389 = vmatmul.mubr.msk.f32.gmra.mrb[14].mxu0 %vm285_vm0, %v6745_v58  ;;  %5087 = vmatprep.mubr.msk.f32.mxu1 %vm285_vm0, %v999_v60  ;;  %v4471_v60 = vld [vmem:[%s7293_s2 + $0x328] sm:$0xff] }
  0x7f   : > { %5407 = vmatprep.mubr.msk.f32.mxu0 %vm285_vm0, %v6747_v62 }
  0x81   : > { %5088 = vmatmul.mubr.msk.f32.vlgmr.msra.gmra.mrb[0].mxu1 %vm285_vm0, %v1000_v5  ;;  %v5791_v5 = vpack.c.bf16 %v4471_v60, %v4470_v22  ;;  %v6821_v22 = vld [vmem:[#allocation2 + $0x7b] sm:$0xff] }
  0x82   : > { %5408 = vmatmul.mubr.msk.f32.vlgmr.msra.gmra.mrb[0].mxu0 %vm285_vm0, %v6768_v12  ;;  %5658 = vmatpush3.bf16.msra.mxu1 %v5655_v29  ;;  %v6797_v29 = vld [vmem:[#allocation2 + $0x63] sm:$0xff] }
  0x83   : > { %5786 = vmatpush3.bf16.msra.mxu0 %v5783_v32  ;;  %5090 = vmatprep.mubr.msk.f32.mxu1 %vm285_vm0, %v6770_v9  ;;  %v4280_v32 = vld [vmem:[%s7293_s2 + $0x130] sm:$0xff]  ;;  %v4299_v9 = vld [vmem:[%s7293_s2 + $0x148] sm:$0xff] }
  0x84   : > { %5410 = vmatprep.mubr.msk.f32.mxu0 %vm285_vm0, %v6773_v17  ;;  %5660 = vmatprep.subr.bf16.mxu1 %v5659_v14  ;;  %v5667_v60 = vpack.c.bf16 %v4281_v10, %v4280_v32  ;;  %v6843_v32 = vld [vmem:[#allocation2 + $0x83] sm:$0xff]  ;;  %v6845_v10 = vld [vmem:[#allocation2 + $0x93] sm:$0xff] }
  0x85   : > { %5091 = vmatmul.mubr.msk.f32.gmra.mrb[2].mxu1 %vm285_vm0, %v6783_v21  ;;  %5788 = vmatprep.subr.bf16.mxu0 %v5787_v18  ;;  %v4298_v21 = vld [vmem:[%s7293_s2 + $0x140] sm:$0xff] }
  0x86   : > { %5411 = vmatmul.mubr.msk.f32.gmra.mrb[2].mxu0 %vm285_vm0, %v6793_v0  ;;  %5093 = vmatprep.mubr.msk.f32.mxu1 %vm285_vm0, %v6747_v62  ;;  %v5795_v62 = vpack.c.bf16 %v4473_v19, %v4472_v11  ;;  %v5671_v11 = vpack.c.bf16 %v4299_v9, %v4298_v21  ;;  %v6867_v9 = vld [vmem:[#allocation2 + $0xb3] sm:$0xff]  ;;  %v6869_v21 = vld [vmem:[#allocation2 + $0xc3] sm:$0xff] }
  0x87   : > { %5413 = vmatprep.mubr.msk.f32.mxu0 %vm285_vm0, %v6797_v29  ;;  %5662 = vmatpush3.bf16.msra.mxu1 %v5659_v14  ;;  %v4490_v14 = vld [vmem:[%s7293_s2 + $0x340] sm:$0xff]  ;;  %7312 = vst [vmem:[#allocation7_spill] sm:$0xff] %v6867_v9  ;;  %7313 = vst [vmem:[#allocation8_spill] sm:$0xff] %v6869_v21 }
  0x88   : > { %5790 = vmatpush3.bf16.msra.mxu0 %v5787_v18  ;;  %5664 = vmatprep.subr.bf16.mxu1 %v5663_v1  ;;  %v4491_v18 = vld [vmem:[%s7293_s2 + $0x348] sm:$0xff] }
  0x89   : > { %5094 = vmatmul.mubr.msk.f32.gmra.mrb[4].mxu1 %vm285_vm0, %v6768_v12  ;;  %5792 = vmatprep.subr.bf16.mxu0 %v5791_v5  ;;  %v5799_v19 = vpack.c.bf16 %v4491_v18, %v4490_v14  ;;  %v6891_v14 = vld [vmem:[#allocation2 + $0xe3] sm:$0xff]  ;;  %v4300_v18 = vld [vmem:[%s7293_s2 + $0x150] sm:$0xff] }
  0x8a   : > { %5414 = vmatmul.mubr.msk.f32.gmra.mrb[4].mxu0 %vm285_vm0, %v6819_v20  ;;  %5096 = vmatprep.mubr.msk.f32.mxu1 %vm285_vm0, %v6773_v17  ;;  %7316 = vst [vmem:[#allocation11_spill] sm:$0xff] %v6891_v14 }
  0x8b   : > { %5416 = vmatprep.mubr.msk.f32.mxu0 %vm285_vm0, %v6821_v22  ;;  %5666 = vmatpush3.bf16.msra.mxu1 %v5663_v1  ;;  %v6855_v1 = vld [vmem:[#allocation2 + $0x9b] sm:$0xff] }
  0x8c   : > { %5794 = vmatpush3.bf16.msra.mxu0 %v5791_v5  ;;  %5668 = vmatprep.subr.bf16.mxu1 %v5667_v60  ;;  %v6857_v5 = vld [vmem:[#allocation2 + $0xab] sm:$0xff] }
  0x8d   : > { %5097 = vmatmul.mubr.msk.f32.gmra.mrb[6].mxu1 %vm285_vm0, %v6793_v0  ;;  %5796 = vmatprep.subr.bf16.mxu0 %v5795_v62  ;;  %7311 = vst [vmem:[#allocation6_spill] sm:$0xff] %v6857_v5 }
  0x8e   : > { %5417 = vmatmul.mubr.msk.f32.gmra.mrb[6].mxu0 %vm285_vm0, %v6843_v32  ;;  %5099 = vmatprep.mubr.msk.f32.mxu1 %vm285_vm0, %v6797_v29 }
  0x8f   : > { %5419 = vmatprep.mubr.msk.f32.mxu0 %vm285_vm0, %v6845_v10  ;;  %5670 = vmatpush3.bf16.msra.mxu1 %v5667_v60  ;;  %v6881_v60 = vld [vmem:[#allocation2 + $0xdb] sm:$0xff] }
  0x90   : > { %5798 = vmatpush3.bf16.msra.mxu0 %v5795_v62  ;;  %5672 = vmatprep.subr.bf16.mxu1 %v5671_v11  ;;  %v6879_v62 = vld [vmem:[#allocation2 + $0xcb] sm:$0xff]  ;;  %7315 = vst [vmem:[#allocation10_spill] sm:$0xff] %v6881_v60 }
  0x91   : > { %5100 = vmatmul.mubr.msk.f32.gmra.mrb[8].mxu1 %vm285_vm0, %v6819_v20  ;;  %5800 = vmatprep.subr.bf16.mxu0 %v5799_v19  ;;  %7314 = vst [vmem:[#allocation9_spill] sm:$0xff] %v6879_v62 }
  0x92   : > { %5420 = vmatmul.mubr.msk.f32.gmra.mrb[8].mxu0 %vm285_vm0, %v6855_v1  ;;  %5102 = vmatprep.mubr.msk.f32.mxu1 %vm285_vm0, %v6821_v22 }
  0x93   : > { %5422 = vmatprep.mubr.msk.f32.mxu0 %vm285_vm0, %v6857_v5 }
  0x95   : > { %5103 = vmatmul.mubr.msk.f32.gmra.mrb[10].mxu1 %vm285_vm0, %v6843_v32 }
  0x96   : > { %5423 = vmatmul.mubr.msk.f32.gmra.mrb[10].mxu0 %vm285_vm0, %v6867_v9  ;;  %5105 = vmatprep.mubr.msk.f32.mxu1 %vm285_vm0, %v6845_v10 }
  0x97   : > { %5425 = vmatprep.mubr.msk.f32.mxu0 %vm285_vm0, %v6869_v21  ;;  %v4301_v21 = vld [vmem:[%s7293_s2 + $0x158] sm:$0xff] }
  0x99   : > { %5106 = vmatmul.mubr.msk.f32.gmra.mrb[12].mxu1 %vm285_vm0, %v6855_v1 }
  0x9a   : > { %5426 = vmatmul.mubr.msk.f32.gmra.mrb[12].mxu0 %vm285_vm0, %v6879_v62  ;;  %5108 = vmatprep.mubr.msk.f32.mxu1 %vm285_vm0, %v6857_v5  ;;  %v4493_v62 = vld [vmem:[%s7293_s2 + $0x358] sm:$0xff] }
  0x9b   : > { %5428 = vmatprep.mubr.msk.f32.mxu0 %vm285_vm0, %v6881_v60  ;;  %v4492_v60 = vld [vmem:[%s7293_s2 + $0x350] sm:$0xff] }
  0x9c   : > { %v5803_v5 = vpack.c.bf16 %v4493_v62, %v4492_v60  ;;  %v4304_v60 = vld [vmem:[%s7293_s2 + $0x170] sm:$0xff] }
  0x9d   : > { %5109 = vmatmul.mubr.msk.f32.gmra.mrb[14].mxu1 %vm285_vm0, %v6867_v9  ;;  %v5675_v9 = vpack.c.bf16 %v4301_v21, %v4300_v18  ;;  %v4494_v21 = vld [vmem:[%s7293_s2 + $0x360] sm:$0xff] }
  0x9e   : > { %5429 = vmatmul.mubr.msk.f32.gmra.mrb[14].mxu0 %vm285_vm0, %v6891_v14  ;;  %5127 = vmatprep.mubr.msk.f32.mxu1 %vm285_vm0, %v6492_v61  ;;  %v4302_v61 = vld [vmem:[%s7293_s2 + $0x160] sm:$0xff]  ;;  %v4303_v14 = vld [vmem:[%s7293_s2 + $0x168] sm:$0xff] }
  0x9f   : > { %5447 = vmatprep.mubr.msk.f32.mxu0 %vm285_vm0, %v6306_v59  ;;  %v5679_v62 = vpack.c.bf16 %v4303_v14, %v4302_v61  ;;  %v4322_v18 = vld [vmem:[%s7293_s2 + $0x180] sm:$0xff]  ;;  %v4323_v61 = vld [vmem:[%s7293_s2 + $0x188] sm:$0xff] }
  0xa1   : > { %5128 = vmatmul.mubr.msk.f32.vlgmr.msra.gmra.mrb[0].mxu1 %vm285_vm0, %v6503_v6  ;;  %v4495_v6 = vld [vmem:[%s7293_s2 + $0x368] sm:$0xff] }
  0xa2   : > { %5448 = vmatmul.mubr.msk.f32.vlgmr.msra.gmra.mrb[0].mxu0 %vm285_vm0, %v6323_v2  ;;  %5674 = vmatpush3.bf16.msra.mxu1 %v5671_v11  ;;  %v5807_v11 = vpack.c.bf16 %v4495_v6, %v4494_v21  ;;  %v3344_v6 = vld [vmem:[#allocation2 + $0x61] sm:$0xff] }
  0xa3   : > { %5802 = vmatpush3.bf16.msra.mxu0 %v5799_v19  ;;  %5130 = vmatprep.mubr.msk.f32.mxu1 %vm285_vm0, %v6286_v51  ;;  %v4305_v19 = vld [vmem:[%s7293_s2 + $0x178] sm:$0xff]  ;;  %v4496_v51 = vld [vmem:[%s7293_s2 + $0x370] sm:$0xff] }
  0xa4   : > { %5450 = vmatprep.mubr.msk.f32.mxu0 %vm285_vm0, %v6334_v4  ;;  %5676 = vmatprep.subr.bf16.mxu1 %v5675_v9  ;;  %v5683_v14 = vpack.c.bf16 %v4305_v19, %v4304_v60  ;;  %v4327_v60 = vld [vmem:[%s7293_s2 + $0x1a8] sm:$0xff]  ;;  %v1471_v19 = vld [vmem:[#allocation2 + $0x39] sm:$0xff] }
  0xa5   : > { %5131 = vmatmul.mubr.msk.f32.gmra.mrb[2].mxu1 %vm285_vm0, %v6301_v56  ;;  %5804 = vmatprep.subr.bf16.mxu0 %v5803_v5  ;;  %v4497_v56 = vld [vmem:[%s7293_s2 + $0x378] sm:$0xff] }
  0xa6   : > { %5451 = vmatmul.mubr.msk.f32.gmra.mrb[2].mxu0 %vm285_vm0, %v6340_v8  ;;  %5133 = vmatprep.mubr.msk.f32.mxu1 %vm285_vm0, %v6306_v59  ;;  %v5811_v59 = vpack.c.bf16 %v4497_v56, %v4496_v51  ;;  %v4518_v51 = vld [vmem:[%s7293_s2 + $0x3a0] sm:$0xff]  ;;  %v4519_v56 = vld [vmem:[%s7293_s2 + $0x3a8] sm:$0xff] }
  0xa7   : > { %5453 = vmatprep.mubr.msk.f32.mxu0 %vm285_vm0, %v6351_v13  ;;  %5678 = vmatpush3.bf16.msra.mxu1 %v5675_v9  ;;  %v5687_v9 = vpack.c.bf16 %v4323_v61, %v4322_v18  ;;  %v5823_v18 = vpack.c.bf16 %v4519_v56, %v4518_v51  ;;  %v4328_v61 = vld [vmem:[%s7293_s2 + $0x1b0] sm:$0xff] }
  0xa8   : > { %5806 = vmatpush3.bf16.msra.mxu0 %v5803_v5  ;;  %5680 = vmatprep.subr.bf16.mxu1 %v5679_v62  ;;  %v4515_v5 = vld [vmem:[%s7293_s2 + $0x388] sm:$0xff] }
  0xa9   : > { %5134 = vmatmul.mubr.msk.f32.gmra.mrb[4].mxu1 %vm285_vm0, %v6323_v2  ;;  %5808 = vmatprep.subr.bf16.mxu0 %v5807_v11  ;;  %v4514_v2 = vld [vmem:[%s7293_s2 + $0x380] sm:$0xff] }
  0xaa   : > { %5454 = vmatmul.mubr.msk.f32.gmra.mrb[4].mxu0 %vm285_vm0, %v6400_v30  ;;  %5136 = vmatprep.mubr.msk.f32.mxu1 %vm285_vm0, %v6334_v4  ;;  %v5815_v4 = vpack.c.bf16 %v4515_v5, %v4514_v2  ;;  %v4329_v2 = vld [vmem:[%s7293_s2 + $0x1b8] sm:$0xff]  ;;  %v4520_v5 = vld [vmem:[%s7293_s2 + $0x3b0] sm:$0xff] }
  0xab   : > { %5456 = vmatprep.mubr.msk.f32.mxu0 %vm285_vm0, %v6407_v33  ;;  %5682 = vmatpush3.bf16.msra.mxu1 %v5679_v62 }
  0xac   : > { %5810 = vmatpush3.bf16.msra.mxu0 %v5807_v11  ;;  %5684 = vmatprep.subr.bf16.mxu1 %v5683_v14  ;;  %v4326_v11 = vld [vmem:[%s7293_s2 + $0x1a0] sm:$0xff] }
  0xad   : > { %5137 = vmatmul.mubr.msk.f32.gmra.mrb[6].mxu1 %vm285_vm0, %v6340_v8  ;;  %5812 = vmatprep.subr.bf16.mxu0 %v5811_v59  ;;  %v3122_v8 = vld [vmem:[#allocation2 + $0xf0] sm:$0xff] }
  0xae   : > { %5457 = vmatmul.mubr.msk.f32.gmra.mrb[6].mxu0 %vm285_vm0, %v6419_v37  ;;  %5139 = vmatprep.mubr.msk.f32.mxu1 %vm285_vm0, %v6351_v13  ;;  %v3123_v13 = vld [vmem:[#allocation2 + $0xf8] sm:$0xff] }
  0xaf   : > { %5459 = vmatprep.mubr.msk.f32.mxu0 %vm285_vm0, %v6423_v39  ;;  %5686 = vmatpush3.bf16.msra.mxu1 %v5683_v14  ;;  %v3345_v14 = vld [vmem:[#allocation2 + $0x69] sm:$0xff] }
  0xb0   : > { %5814 = vmatpush3.bf16.msra.mxu0 %v5811_v59  ;;  %5688 = vmatprep.subr.bf16.mxu1 %v5687_v9  ;;  %v5695_v59 = vpack.c.bf16 %v4327_v60, %v4326_v11  ;;  %v4352_v11 = vld [vmem:[%s7293_s2 + $0x1f0] sm:$0xff]  ;;  %v4353_v60 = vld [vmem:[%s7293_s2 + $0x1f8] sm:$0xff] }
  0xb1   : > { %5140 = vmatmul.mubr.msk.f32.gmra.mrb[8].mxu1 %vm285_vm0, %v6400_v30  ;;  %5816 = vmatprep.subr.bf16.mxu0 %v5815_v4  ;;  %v1468_v30 = vld [vmem:[#allocation2 + $0x19] sm:$0xff] }
  0xb2   : > { %5460 = vmatmul.mubr.msk.f32.gmra.mrb[8].mxu0 %vm285_vm0, %v6435_v41  ;;  %5142 = vmatprep.mubr.msk.f32.mxu1 %vm285_vm0, %v6407_v33  ;;  %v3342_v33 = vld [vmem:[#allocation2 + $0x49] sm:$0xff] }
  0xb3   : > { %5462 = vmatprep.mubr.msk.f32.mxu0 %vm285_vm0, %v6440_v44 }
  0xb5   : > { %5143 = vmatmul.mubr.msk.f32.gmra.mrb[10].mxu1 %vm285_vm0, %v6419_v37  ;;  %v4324_v37 = vld [vmem:[%s7293_s2 + $0x190] sm:$0xff] }
  0xb6   : > { %5463 = vmatmul.mubr.msk.f32.gmra.mrb[10].mxu0 %vm285_vm0, %v6455_v47  ;;  %5145 = vmatprep.mubr.msk.f32.mxu1 %vm285_vm0, %v6423_v39  ;;  %v4325_v39 = vld [vmem:[%s7293_s2 + $0x198] sm:$0xff] }
  0xb7   : > { %5465 = vmatprep.mubr.msk.f32.mxu0 %vm285_vm0, %v6459_v49  ;;  %v3343_v49 = vld [vmem:[#allocation2 + $0x51] sm:$0xff]  ;;  %v5691_v21 = vpack.c.bf16 %v4325_v39, %v4324_v37  ;;  %v1476_v37 = vld [vmem:[#allocation2 + $0x79] sm:$0xff] }
  0xb9   : > { %5146 = vmatmul.mubr.msk.f32.gmra.mrb[12].mxu1 %vm285_vm0, %v6435_v41  ;;  %v1469_v41 = vld [vmem:[#allocation2 + $0x21] sm:$0xff] }
  0xba   : > { %5466 = vmatmul.mubr.msk.f32.gmra.mrb[12].mxu0 %vm285_vm0, %v6471_v52  ;;  %5148 = vmatprep.mubr.msk.f32.mxu1 %vm285_vm0, %v6440_v44  ;;  %v4516_v44 = vld [vmem:[%s7293_s2 + $0x390] sm:$0xff] }
  0xbb   : > { %5468 = vmatprep.mubr.msk.f32.mxu0 %vm285_vm0, %v3122_v8  ;;  %v1470_v52 = vld [vmem:[#allocation2 + $0x31] sm:$0xff] }
  0xbd   : > { %5149 = vmatmul.mubr.msk.f32.gmra.mrb[14].mxu1 %vm285_vm0, %v6455_v47  ;;  %v4517_v47 = vld [vmem:[%s7293_s2 + $0x398] sm:$0xff] }
  0xbe   : > { %5469 = vmatmul.mubr.msk.f32.gmra.mrb[14].mxu0 %vm285_vm0, %v3123_v13  ;;  %5167 = vmatprep.mubr.msk.f32.mxu1 %vm285_vm0, %v1468_v30  ;;  %v5819_v62 = vpack.c.bf16 %v4517_v47, %v4516_v44  ;;  %v4346_v13 = vld [vmem:[%s7293_s2 + $0x1c0] sm:$0xff]  ;;  %v4347_v30 = vld [vmem:[%s7293_s2 + $0x1c8] sm:$0xff]  ;;  %v1478_v44 = vld [vmem:[#allocation2 + $0x91] sm:$0xff] }
  0xbf   : > { %5487 = vmatprep.mubr.msk.f32.mxu0 %vm285_vm0, %v3342_v33  ;;  %v5703_v39 = vpack.c.bf16 %v4347_v30, %v4346_v13  ;;  %v3357_v47 = vld [vmem:[#allocation2 + $0xf9] sm:$0xff] }
  0xc1   : > { %5168 = vmatmul.mubr.msk.f32.vlgmr.msra.gmra.mrb[0].mxu1 %vm285_vm0, %v1469_v41  ;;  %v1477_v41 = vld [vmem:[#allocation2 + $0x81] sm:$0xff] }
  0xc2   : > { %5488 = vmatmul.mubr.msk.f32.vlgmr.msra.gmra.mrb[0].mxu0 %vm285_vm0, %v3343_v49  ;;  %5690 = vmatpush3.bf16.msra.mxu1 %v5687_v9  ;;  %v4521_v9 = vld [vmem:[%s7293_s2 + $0x3b8] sm:$0xff] }
  0xc3   : > { %5818 = vmatpush3.bf16.msra.mxu0 %v5815_v4  ;;  %5170 = vmatprep.mubr.msk.f32.mxu1 %vm285_vm0, %v1470_v52  ;;  %v5699_v4 = vpack.c.bf16 %v4329_v2, %v4328_v61  ;;  %v5827_v8 = vpack.c.bf16 %v4521_v9, %v4520_v5  ;;  %v4351_v52 = vld [vmem:[%s7293_s2 + $0x1e8] sm:$0xff] }
  0xc4   : > { %5490 = vmatprep.mubr.msk.f32.mxu0 %vm285_vm0, %v3344_v6  ;;  %5692 = vmatprep.subr.bf16.mxu1 %v5691_v21 }
  0xc5   : > { %5171 = vmatmul.mubr.msk.f32.gmra.mrb[2].mxu1 %vm285_vm0, %v1471_v19  ;;  %5820 = vmatprep.subr.bf16.mxu0 %v5819_v62  ;;  %v5715_v19 = vpack.c.bf16 %v4353_v60, %v4352_v11 }
  0xc6   : > { %5491 = vmatmul.mubr.msk.f32.gmra.mrb[2].mxu0 %vm285_vm0, %v3345_v14  ;;  %5173 = vmatprep.mubr.msk.f32.mxu1 %vm285_vm0, %v3342_v33  ;;  %v4539_v33 = vld [vmem:[%s7293_s2 + $0x3c8] sm:$0xff] }
  0xc7   : > { %5493 = vmatprep.mubr.msk.f32.mxu0 %vm285_vm0, %v6421_v38  ;;  %5694 = vmatpush3.bf16.msra.mxu1 %v5691_v21  ;;  %v4538_v38 = vld [vmem:[%s7293_s2 + $0x3c0] sm:$0xff] }
  0xc8   : > { %5822 = vmatpush3.bf16.msra.mxu0 %v5819_v62  ;;  %5696 = vmatprep.subr.bf16.mxu1 %v5695_v59  ;;  %v4542_v21 = vld [vmem:[%s7293_s2 + $0x3e0] sm:$0xff] }
  0xc9   : > { %5174 = vmatmul.mubr.msk.f32.gmra.mrb[4].mxu1 %vm285_vm0, %v3343_v49  ;;  %5824 = vmatprep.subr.bf16.mxu0 %v5823_v18 }
  0xca   : > { %5494 = vmatmul.mubr.msk.f32.gmra.mrb[4].mxu0 %vm285_vm0, %v6431_v40  ;;  %5176 = vmatprep.mubr.msk.f32.mxu1 %vm285_vm0, %v3344_v6  ;;  %v5831_v40 = vpack.c.bf16 %v4539_v33, %v4538_v38 }
  0xcb   : > { %5496 = vmatprep.mubr.msk.f32.mxu0 %vm285_vm0, %v6437_v42  ;;  %5698 = vmatpush3.bf16.msra.mxu1 %v5695_v59  ;;  %v1479_v42 = vld [vmem:[#allocation2 + $0x99] sm:$0xff] }
  0xcc   : > { %5826 = vmatpush3.bf16.msra.mxu0 %v5823_v18  ;;  %5700 = vmatprep.subr.bf16.mxu1 %v5699_v4 }
  0xcd   : > { %5177 = vmatmul.mubr.msk.f32.gmra.mrb[6].mxu1 %vm285_vm0, %v3345_v14  ;;  %5828 = vmatprep.subr.bf16.mxu0 %v5827_v8 }
  0xce   : > { %5497 = vmatmul.mubr.msk.f32.gmra.mrb[6].mxu0 %vm285_vm0, %v6451_v46  ;;  %5179 = vmatprep.mubr.msk.f32.mxu1 %vm285_vm0, %v1476_v37  ;;  %v1480_v46 = vld [vmem:[#allocation2 + $0xa9] sm:$0xff] }
  0xcf   : > { %5499 = vmatprep.mubr.msk.f32.mxu0 %vm285_vm0, %v6457_v48  ;;  %5702 = vmatpush3.bf16.msra.mxu1 %v5699_v4  ;;  %v3356_v48 = vld [vmem:[#allocation2 + $0xf1] sm:$0xff] }
  0xd0   : > { %5830 = vmatpush3.bf16.msra.mxu0 %v5827_v8  ;;  %5704 = vmatprep.subr.bf16.mxu1 %v5703_v39 }
  0xd1   : > { %5180 = vmatmul.mubr.msk.f32.gmra.mrb[8].mxu1 %vm285_vm0, %v1477_v41  ;;  %5832 = vmatprep.subr.bf16.mxu0 %v5831_v40 }
  0xd2   : > { %5500 = vmatmul.mubr.msk.f32.gmra.mrb[8].mxu0 %vm285_vm0, %v6467_v50  ;;  %5182 = vmatprep.mubr.msk.f32.mxu1 %vm285_vm0, %v1478_v44 }
  0xd3   : > { %5502 = vmatprep.mubr.msk.f32.mxu0 %vm285_vm0, %v6574_v25 }
  0xd5   : > { %5183 = vmatmul.mubr.msk.f32.gmra.mrb[10].mxu1 %vm285_vm0, %v1479_v42 }
  0xd6   : > { %5503 = vmatmul.mubr.msk.f32.gmra.mrb[10].mxu0 %vm285_vm0, %v6585_v26  ;;  %5185 = vmatprep.mubr.msk.f32.mxu1 %vm285_vm0, %v1480_v46 }
  0xd7   : > { %5505 = vmatprep.mubr.msk.f32.mxu0 %vm285_vm0, %v6587_v27  ;;  %v4348_v27 = vld [vmem:[%s7293_s2 + $0x1d0] sm:$0xff] }
  0xd9   : > { %5186 = vmatmul.mubr.msk.f32.gmra.mrb[12].mxu1 %vm285_vm0, %v6467_v50  ;;  %v4349_v50 = vld [vmem:[%s7293_s2 + $0x1d8] sm:$0xff] }
  0xda   : > { %5506 = vmatmul.mubr.msk.f32.gmra.mrb[12].mxu0 %vm285_vm0, %v6597_v28  ;;  %5188 = vmatprep.mubr.msk.f32.mxu1 %vm285_vm0, %v6574_v25  ;;  %v4540_v25 = vld [vmem:[%s7293_s2 + $0x3d0] sm:$0xff]  ;;  %v5707_v28 = vpack.c.bf16 %v4349_v50, %v4348_v27 }
  0xdb   : > { %5508 = vmatprep.mubr.msk.f32.mxu0 %vm285_vm0, %v3356_v48 }
  0xdd   : > { %5189 = vmatmul.mubr.msk.f32.gmra.mrb[14].mxu1 %vm285_vm0, %v6585_v26  ;;  %v4541_v26 = vld [vmem:[%s7293_s2 + $0x3d8] sm:$0xff] }
  0xde   : > { %5509 = vmatmul.mubr.msk.f32.gmra.mrb[14].mxu0 %vm285_vm0, %v3357_v47  ;;  %5207 = vmatprep.mubr.msk.f32.mxu1 %vm285_vm0, %v6624_v54  ;;  %v5835_v49 = vpack.c.bf16 %v4541_v26, %v4540_v25  ;;  %v4350_v54 = vld [vmem:[%s7293_s2 + $0x1e0] sm:$0xff] }
  0xdf   : > { %5527 = vmatprep.mubr.msk.f32.mxu0 %vm285_vm0, %v6627_v57  ;;  %v5711_v6 = vpack.c.bf16 %v4351_v52, %v4350_v54 }
  0xe1   : > { %5208 = vmatmul.mubr.msk.f32.vlgmr.msra.gmra.mrb[0].mxu1 %vm285_vm0, %v6637_v63  ;;  %v4543_v63 = vld [vmem:[%s7293_s2 + $0x3e8] sm:$0xff] }
  0xe2   : > { %5528 = vmatmul.mubr.msk.f32.vlgmr.msra.gmra.mrb[0].mxu0 %vm285_vm0, %v6647_v3  ;;  %5706 = vmatpush3.bf16.msra.mxu1 %v5703_v39  ;;  %v5839_v62 = vpack.c.bf16 %v4543_v63, %v4542_v21 }
  0xe3   : > { %5834 = vmatpush3.bf16.msra.mxu0 %v5831_v40  ;;  %5210 = vmatprep.mubr.msk.f32.mxu1 %vm285_vm0, %v6599_v31  ;;  %v4544_v31 = vld [vmem:[%s7293_s2 + $0x3f0] sm:$0xff] }
  0xe4   : > { %5530 = vmatprep.mubr.msk.f32.mxu0 %vm285_vm0, %v6651_v7  ;;  %5708 = vmatprep.subr.bf16.mxu1 %v5707_v28 }
  0xe5   : > { %5211 = vmatmul.mubr.msk.f32.gmra.mrb[2].mxu1 %vm285_vm0, %v6621_v53  ;;  %5836 = vmatprep.subr.bf16.mxu0 %v5835_v49  ;;  %v4545_v53 = vld [vmem:[%s7293_s2 + $0x3f8] sm:$0xff] }
  0xe6   : > { %5531 = vmatmul.mubr.msk.f32.gmra.mrb[2].mxu0 %vm285_vm0, %v6673_v15  ;;  %5213 = vmatprep.mubr.msk.f32.mxu1 %vm285_vm0, %v6627_v57  ;;  %v5843_v57 = vpack.c.bf16 %v4545_v53, %v4544_v31 }
  0xe7   : > { %5533 = vmatprep.mubr.msk.f32.mxu0 %vm285_vm0, %v6675_v16  ;;  %5710 = vmatpush3.bf16.msra.mxu1 %v5707_v28 }
  0xe8   : > { %5838 = vmatpush3.bf16.msra.mxu0 %v5835_v49  ;;  %5712 = vmatprep.subr.bf16.mxu1 %v5711_v6 }
  0xe9   : > { %5214 = vmatmul.mubr.msk.f32.gmra.mrb[4].mxu1 %vm285_vm0, %v6647_v3  ;;  %5840 = vmatprep.subr.bf16.mxu0 %v5839_v62  ;;  %v3590_v3 = vld [vmem:[#allocation2 + $0xf2] sm:$0xff] }
  0xea   : > { %5534 = vmatmul.mubr.msk.f32.gmra.mrb[4].mxu0 %vm285_vm0, %v6697_v23  ;;  %5216 = vmatprep.mubr.msk.f32.mxu1 %vm285_vm0, %v6651_v7  ;;  %v3591_v7 = vld [vmem:[#allocation2 + $0xfa] sm:$0xff] }
  0xeb   : > { %5536 = vmatprep.mubr.msk.f32.mxu0 %vm285_vm0, %v6699_v24  ;;  %5714 = vmatpush3.bf16.msra.mxu1 %v5711_v6 }
  0xec   : > { %5842 = vmatpush3.bf16.msra.mxu0 %v5839_v62  ;;  %5716 = vmatprep.subr.bf16.mxu1 %v5715_v19 }
  0xed   : > { %5217 = vmatmul.mubr.msk.f32.gmra.mrb[6].mxu1 %vm285_vm0, %v6673_v15  ;;  %5844 = vmatprep.subr.bf16.mxu0 %v5843_v57  ;;  %v7317_v15 = vld [vmem:[#allocation4_spill] sm:$0xff] }
  0xee   : > { %5537 = vmatmul.mubr.msk.f32.gmra.mrb[6].mxu0 %vm285_vm0, %v6709_v34  ;;  %5219 = vmatprep.mubr.msk.f32.mxu1 %vm285_vm0, %v6675_v16  ;;  %v7318_v16 = vld [vmem:[#allocation5_spill] sm:$0xff] }
  0xef   : > { %5539 = vmatprep.mubr.msk.f32.mxu0 %vm285_vm0, %v6711_v35  ;;  %5718 = vmatpush3.bf16.msra.mxu1 %v5715_v19 }
  0xf0   : > { %5846 = vmatpush3.bf16.msra.mxu0 %v5843_v57 }
  0xf1   : > { %5220 = vmatmul.mubr.msk.f32.gmra.mrb[8].mxu1 %vm285_vm0, %v6697_v23  ;;  %v7319_v23 = vld [vmem:[#allocation3_spill] sm:$0xff] }
  0xf2   : > { %5540 = vmatmul.mubr.msk.f32.gmra.mrb[8].mxu0 %vm285_vm0, %v6721_v36  ;;  %5222 = vmatprep.mubr.msk.f32.mxu1 %vm285_vm0, %v6699_v24  ;;  %v7320_v24 = vld [vmem:[#allocation6_spill] sm:$0xff] }
  0xf3   : > { %5542 = vmatprep.mubr.msk.f32.mxu0 %vm285_vm0, %v6723_v43 }
  0xf5   : > { %5223 = vmatmul.mubr.msk.f32.gmra.mrb[10].mxu1 %vm285_vm0, %v6709_v34  ;;  %v7321_v34 = vld [vmem:[#allocation7_spill] sm:$0xff] }
  0xf6   : > { %5543 = vmatmul.mubr.msk.f32.gmra.mrb[10].mxu0 %vm285_vm0, %v6733_v45  ;;  %5225 = vmatprep.mubr.msk.f32.mxu1 %vm285_vm0, %v6711_v35  ;;  %v7322_v35 = vld [vmem:[#allocation8_spill] sm:$0xff] }
  0xf7   : > { %5545 = vmatprep.mubr.msk.f32.mxu0 %vm285_vm0, %v6735_v55  ;;  %v7325_v55 = vld [vmem:[#allocation11_spill] sm:$0xff] }
  0xf9   : > { %5226 = vmatmul.mubr.msk.f32.gmra.mrb[12].mxu1 %vm285_vm0, %v6721_v36  ;;  %v7323_v36 = vld [vmem:[#allocation9_spill] sm:$0xff] }
  0xfa   : > { %5546 = vmatmul.mubr.msk.f32.gmra.mrb[12].mxu0 %vm285_vm0, %v6745_v58  ;;  %5228 = vmatprep.mubr.msk.f32.mxu1 %vm285_vm0, %v6723_v43  ;;  %v7324_v43 = vld [vmem:[#allocation10_spill] sm:$0xff] }
  0xfb   : > { %5548 = vmatprep.mubr.msk.f32.mxu0 %vm285_vm0, %v3590_v3  ;;  %v3825_v58 = vld [vmem:[#allocation2 + $0xfb] sm:$0xff] }
  0xfd   : > { %5229 = vmatmul.mubr.msk.f32.gmra.mrb[14].mxu1 %vm285_vm0, %v6733_v45  ;;  %v3824_v45 = vld [vmem:[#allocation2 + $0xf3] sm:$0xff] }
  0xfe   : > { %5549 = vmatmul.mubr.msk.f32.gmra.mrb[14].mxu0 %vm285_vm0, %v3591_v7  ;;  %5247 = vmatprep.mubr.msk.f32.mxu1 %vm285_vm0, %v7317_v15 }
  0xff   : > { %5567 = vmatprep.mubr.msk.f32.mxu0 %vm285_vm0, %v6773_v17 }
 0x101   : > { %5248 = vmatmul.mubr.msk.f32.vlgmr.msra.gmra.mrb[0].mxu1 %vm285_vm0, %v7318_v16 }
 0x102   : > { %5568 = vmatmul.mubr.msk.f32.vlgmr.msra.gmra.mrb[0].mxu0 %vm285_vm0, %v6793_v0  ;;  %5250 = vmatprep.mubr.msk.f32.mxu1 %vm285_vm0, %v7319_v23 }
 0x103   : > { %5570 = vmatprep.mubr.msk.f32.mxu0 %vm285_vm0, %v6797_v29 }
 0x105   : > { %5251 = vmatmul.mubr.msk.f32.gmra.mrb[2].mxu1 %vm285_vm0, %v6768_v12 }
 0x106   : > { %5571 = vmatmul.mubr.msk.f32.gmra.mrb[2].mxu0 %vm285_vm0, %v6819_v20  ;;  %5253 = vmatprep.mubr.msk.f32.mxu1 %vm285_vm0, %v6773_v17 }
 0x107   : > { %5573 = vmatprep.mubr.msk.f32.mxu0 %vm285_vm0, %v6821_v22 }
 0x109   : > { %5254 = vmatmul.mubr.msk.f32.gmra.mrb[4].mxu1 %vm285_vm0, %v6793_v0 }
 0x10a   : > { %5574 = vmatmul.mubr.msk.f32.gmra.mrb[4].mxu0 %vm285_vm0, %v6843_v32  ;;  %5256 = vmatprep.mubr.msk.f32.mxu1 %vm285_vm0, %v6797_v29 }
 0x10b   : > { %5576 = vmatprep.mubr.msk.f32.mxu0 %vm285_vm0, %v6845_v10 }
 0x10d   : > { %5257 = vmatmul.mubr.msk.f32.gmra.mrb[6].mxu1 %vm285_vm0, %v6819_v20 }
 0x10e   : > { %5577 = vmatmul.mubr.msk.f32.gmra.mrb[6].mxu0 %vm285_vm0, %v6855_v1  ;;  %5259 = vmatprep.mubr.msk.f32.mxu1 %vm285_vm0, %v6821_v22 }
 0x10f   : > { %5579 = vmatprep.mubr.msk.f32.mxu0 %vm285_vm0, %v7320_v24 }
 0x111   : > { %5260 = vmatmul.mubr.msk.f32.gmra.mrb[8].mxu1 %vm285_vm0, %v6843_v32 }
 0x112   : > { %5580 = vmatmul.mubr.msk.f32.gmra.mrb[8].mxu0 %vm285_vm0, %v7321_v34  ;;  %5262 = vmatprep.mubr.msk.f32.mxu1 %vm285_vm0, %v6845_v10 }
 0x113   : > { %5582 = vmatprep.mubr.msk.f32.mxu0 %vm285_vm0, %v7322_v35 }
 0x115   : > { %5263 = vmatmul.mubr.msk.f32.gmra.mrb[10].mxu1 %vm285_vm0, %v6855_v1 }
 0x116   : > { %5583 = vmatmul.mubr.msk.f32.gmra.mrb[10].mxu0 %vm285_vm0, %v7323_v36  ;;  %5265 = vmatprep.mubr.msk.f32.mxu1 %vm285_vm0, %v7320_v24 }
 0x117   : > { %5585 = vmatprep.mubr.msk.f32.mxu0 %vm285_vm0, %v7324_v43 }
 0x119   : > { %5266 = vmatmul.mubr.msk.f32.gmra.mrb[12].mxu1 %vm285_vm0, %v7321_v34 }
 0x11a   : > { %5586 = vmatmul.mubr.msk.f32.gmra.mrb[12].mxu0 %vm285_vm0, %v7325_v55  ;;  %5268 = vmatprep.mubr.msk.f32.mxu1 %vm285_vm0, %v7322_v35 }
 0x11b   : > { %5588 = vmatprep.mubr.msk.f32.mxu0 %vm285_vm0, %v3824_v45 }
 0x11d   : > { %5269 = vmatmul.mubr.msk.f32.gmra.mrb[14].mxu1 %vm285_vm0, %v7323_v36 }
 0x11e   : > { %5589 = vmatmul.mubr.msk.f32.gmra.mrb[14].mxu0 %vm285_vm0, %v3825_v58 }
 0x1d4   : > { %v5249_v12 = vpop.f32.mrb[0].mxu1 }
 0x1d5   : > { %v5569_v17 = vpop.f32.mrb[0].mxu0  ;;  %v2075_v0 = vpop.f32.mrb[1].mxu1 }
 0x1d6   : > { %v5847_v29 = vadd.f32 %v5569_v17, %v5249_v12  ;;  %v3949_v20 = vpop.f32.mrb[1].mxu0 }
 0x1d7   : > { %v5848_v22 = vadd.f32 %v3949_v20, %v2075_v0 }
 0x1d8   : > { %4045 = vst [vmem:[%s7264_s5 + $0x8] sm:$0xff] %v5847_v29  ;;  %v5252_v32 = vpop.f32.mrb[2].mxu1 }
 0x1d9   : > { %4044 = vst [vmem:[%s7264_s5] sm:$0xff] %v5848_v22  ;;  %v5572_v10 = vpop.f32.mrb[2].mxu0  ;;  %v2085_v1 = vpop.f32.mrb[3].mxu1 }
 0x1da   : > { %v5849_v51 = vadd.f32 %v5572_v10, %v5252_v32  ;;  %v3959_v56 = vpop.f32.mrb[3].mxu0 }
 0x1db   : > { %v5850_v14 = vadd.f32 %v3959_v56, %v2085_v1 }
 0x1dc   : > { %4047 = vst [vmem:[%s7264_s5 + $0x18] sm:$0xff] %v5849_v51  ;;  %v5255_v59 = vpop.f32.mrb[4].mxu1 }
 0x1dd   : > { %4046 = vst [vmem:[%s7264_s5 + $0x10] sm:$0xff] %v5850_v14  ;;  %v5575_v18 = vpop.f32.mrb[4].mxu0  ;;  %v2095_v61 = vpop.f32.mrb[5].mxu1 }
 0x1de   : > { %v5851_v2 = vadd.f32 %v5575_v18, %v5255_v59  ;;  %v3969_v5 = vpop.f32.mrb[5].mxu0 }
 0x1df   : > { %v5852_v9 = vadd.f32 %v3969_v5, %v2095_v61 }
 0x1e0   : > { %4049 = vst [vmem:[%s7264_s5 + $0x28] sm:$0xff] %v5851_v2  ;;  %v5258_v4 = vpop.f32.mrb[6].mxu1 }
 0x1e1   : > { %4048 = vst [vmem:[%s7264_s5 + $0x20] sm:$0xff] %v5852_v9  ;;  %v5578_v8 = vpop.f32.mrb[6].mxu0  ;;  %v2105_v13 = vpop.f32.mrb[7].mxu1 }
 0x1e2   : > { %v5853_v30 = vadd.f32 %v5578_v8, %v5258_v4  ;;  %v3979_v38 = vpop.f32.mrb[7].mxu0 }
 0x1e3   : > { %v5854_v33 = vadd.f32 %v3979_v38, %v2105_v13 }
 0x1e4   : > { %4051 = vst [vmem:[%s7264_s5 + $0x38] sm:$0xff] %v5853_v30  ;;  %v5261_v37 = vpop.f32.mrb[8].mxu1 }
 0x1e5   : > { %4050 = vst [vmem:[%s7264_s5 + $0x30] sm:$0xff] %v5854_v33  ;;  %v5581_v39 = vpop.f32.mrb[8].mxu0  ;;  %v2115_v40 = vpop.f32.mrb[9].mxu1 }
 0x1e6   : > { %v5855_v41 = vadd.f32 %v5581_v39, %v5261_v37  ;;  %v3989_v44 = vpop.f32.mrb[9].mxu0 }
 0x1e7   : > { %v5856_v42 = vadd.f32 %v3989_v44, %v2115_v40 }
 0x1e8   : > { %4053 = vst [vmem:[%s7264_s5 + $0x48] sm:$0xff] %v5855_v41  ;;  %v5264_v46 = vpop.f32.mrb[10].mxu1 }
 0x1e9   : > { %4052 = vst [vmem:[%s7264_s5 + $0x40] sm:$0xff] %v5856_v42  ;;  %v5584_v48 = vpop.f32.mrb[10].mxu0  ;;  %v2125_v47 = vpop.f32.mrb[11].mxu1 }
 0x1ea   : > { %v5857_v27 = vadd.f32 %v5584_v48, %v5264_v46  ;;  %v3999_v50 = vpop.f32.mrb[11].mxu0 }
 0x1eb   : > { %v5858_v25 = vadd.f32 %v3999_v50, %v2125_v47 }
 0x1ec   : > { %4055 = vst [vmem:[%s7264_s5 + $0x58] sm:$0xff] %v5857_v27  ;;  %v5267_v26 = vpop.f32.mrb[12].mxu1 }
 0x1ed   : > { %4054 = vst [vmem:[%s7264_s5 + $0x50] sm:$0xff] %v5858_v25  ;;  %v5587_v28 = vpop.f32.mrb[12].mxu0  ;;  %v2135_v49 = vpop.f32.mrb[13].mxu1 }
 0x1ee   : > { %v5859_v54 = vadd.f32 %v5587_v28, %v5267_v26  ;;  %v4009_v52 = vpop.f32.mrb[13].mxu0 }
 0x1ef   : > { %v5860_v21 = vadd.f32 %v4009_v52, %v2135_v49 }
 0x1f0   : > { %4057 = vst [vmem:[%s7264_s5 + $0x68] sm:$0xff] %v5859_v54  ;;  %v5270_v63 = vpop.f32.mrb[14].mxu1 }
 0x1f1   : > { %4056 = vst [vmem:[%s7264_s5 + $0x60] sm:$0xff] %v5860_v21  ;;  %v5590_v6 = vpop.f32.mrb[14].mxu0  ;;  %v2145_v62 = vpop.f32.mrb[15].mxu1 }
 0x1f2   : > { %v5861_v11 = vadd.f32 %v5590_v6, %v5270_v63  ;;  %v4019_v60 = vpop.f32.mrb[15].mxu0 }
 0x1f3   : > { %v5862_v31 = vadd.f32 %v4019_v60, %v2145_v62 }
 0x1f4   : > { %4059 = vst [vmem:[%s7264_s5 + $0x78] sm:$0xff] %v5861_v11 }
 0x1f5   : > { %4058 = vst [vmem:[%s7264_s5 + $0x70] sm:$0xff] %v5862_v31 }
 0x1f6 PF: > { %s13_s14 = sadd.s32 1, %s6136_s14   ;;  %s7326_s12 = smov %s6132_s13 }
 0x1f7   : > { %p10_p5 = scmp.ge.s32.totalorder %s13_s14, 4   ;;  %s7327_s13 = smov %s7329_s15 }
 0x1f9   :  { %12 = sbr.rel (!%p10_p5) target bundleno = 2 (0x2), region = 84 }

// kernel: nlayer_discriminator.15
= control target key start
LH: loop header
LB: loop body
LE: loop exit
PB: predicated region body
PF: predicated region fallthrough
CT: control target
= control target key end

     0   :  { %s6076_s15 = smov 0   ;;  %s6078_s16 = smov 0   ;;  %s7124_s0 = inlined_call_operand.vmem [shape: f32[2,16,19,128], index: 0, kind: input, shape index: {}, may-alias: {0,1}]   ;;  %s7125_s1 = inlined_call_operand.vmem [shape: f32[2,16,19,128], index: 1, kind: input, shape index: {}, may-alias: {0,1}]   ;;  %s7126_s2 = inlined_call_operand.vmem [shape: f32[16,128,128], index: 2, kind: input, shape index: {}]   ;;  %s7127_s3 = inlined_call_operand.vmem [shape: f32[1,128], index: 3, kind: input, shape index: {}]   ;;  %s7128_s4 = inlined_call_operand.vmem [shape: f32[2,8,16,128], index: 4, kind: output, shape index: {}]  }
   0x1   :  { %s6080_s17 = smov 0  }
   0x2 LB: > { %s26_s18 = sadd.s32 1, %s6045_s16  ;;  %p3589_p0 = scmp.ge.s32.totalorder %s6049_s17, 1  ;;  %s6049_s17 = sphi %s6080_s17, %s14_s17   ;;  %s6045_s16 = sphi %s6078_s16, %s7130_s16   ;;  %s6041_s15 = sphi %s6076_s15, %s7129_s15  }
   0x3   : > { %p28_p1 = scmp.ge.s32.totalorder %s26_s18, 2  ;;  %p206_p2 = scmp.lt.s32.totalorder %s6049_s17, 3 }
   0x5   : > { %s7132_s18 = smov (%p28_p1, %s26_s18), 0  ;;  %p207_p3 = pnand %p3589_p0, %p206_p2 }
   0x6   : > { %v3594_v0 = vld [vmem:[%s7126_s2 + $0x80] sm:$0xff] (!%p207_p3)  ;;  %v3595_v1 = vld [vmem:[%s7126_s2 + $0x88] sm:$0xff] (!%p207_p3)  ;;  %p254_p4 = scmp.lt.s32.totalorder (!%p207_p3), %s6041_s15, 1  ;;  %v3596_v5 = vld [vmem:[%s7126_s2 + $0x90] sm:$0xff] (!%p207_p3) }
   0x7   : > { %210 = sbr.rel (%p207_p3) target bundleno = 512 (0x200), region = 36  ;;  %v3706_v2 = vld [vmem:[%s7126_s2 + $0x400] sm:$0xff] (!%p207_p3)  ;;  %v5248_v3 = vpack.c.bf16 (!%p207_p3), %v3595_v1, %v3594_v0  ;;  %v3707_v4 = vld [vmem:[%s7126_s2 + $0x408] sm:$0xff] (!%p207_p3)  ;;  %v3597_v6 = vld [vmem:[%s7126_s2 + $0x98] sm:$0xff] (!%p207_p3) }
   0x8   : > { %v5504_v7 = vpack.c.bf16 (!%p207_p3), %v3707_v4, %v3706_v2  ;;  %v5252_v8 = vpack.c.bf16 (!%p207_p3), %v3597_v6, %v3596_v5  ;;  %v3708_v9 = vld [vmem:[%s7126_s2 + $0x410] sm:$0xff] (!%p207_p3)  ;;  %v3709_v10 = vld [vmem:[%s7126_s2 + $0x418] sm:$0xff] (!%p207_p3)  ;;  %v3598_v11 = vld [vmem:[%s7126_s2 + $0xa0] sm:$0xff] (!%p207_p3) }
   0x9   : > { %5249 = vmatprep.subr.bf16.mxu1 (!%p207_p3), %v5248_v3  ;;  %v5508_v12 = vpack.c.bf16 (!%p207_p3), %v3709_v10, %v3708_v9  ;;  %v3599_v13 = vld [vmem:[%s7126_s2 + $0xa8] sm:$0xff] (!%p207_p3)  ;;  %v3710_v14 = vld [vmem:[%s7126_s2 + $0x420] sm:$0xff] (!%p207_p3)  ;;  %v3600_v18 = vld [vmem:[%s7126_s2 + $0xb0] sm:$0xff] (!%p207_p3) }
   0xa   : > { %v3711_v15 = vld [vmem:[%s7126_s2 + $0x428] sm:$0xff] (!%p207_p3)  ;;  %5505 = vmatprep.subr.bf16.mxu0 (!%p207_p3), %v5504_v7  ;;  %5251 = vmatpush3.bf16.msra.mxu1 (!%p207_p3), %v5248_v3  ;;  %v5256_v16 = vpack.c.bf16 (!%p207_p3), %v3599_v13, %v3598_v11  ;;  %v3601_v19 = vld [vmem:[%s7126_s2 + $0xb8] sm:$0xff] (!%p207_p3)  ;;  %v3712_v20 = vld [vmem:[%s7126_s2 + $0x430] sm:$0xff] (!%p207_p3) }
   0xb   : > { %5507 = vmatpush3.bf16.msra.mxu0 (!%p207_p3), %v5504_v7  ;;  %5253 = vmatprep.subr.bf16.mxu1 (!%p207_p3), %v5252_v8  ;;  %v5512_v17 = vpack.c.bf16 (!%p207_p3), %v3711_v15, %v3710_v14  ;;  %v3713_v21 = vld [vmem:[%s7126_s2 + $0x438] sm:$0xff] (!%p207_p3)  ;;  %v5260_v22 = vpack.c.bf16 (!%p207_p3), %v3601_v19, %v3600_v18  ;;  %v3602_v23 = vld [vmem:[%s7126_s2 + $0xc0] sm:$0xff] (!%p207_p3)  ;;  %v3603_v24 = vld [vmem:[%s7126_s2 + $0xc8] sm:$0xff] (!%p207_p3) }
   0xc   : > { %5509 = vmatprep.subr.bf16.mxu0 (!%p207_p3), %v5508_v12  ;;  %v5516_v25 = vpack.c.bf16 (!%p207_p3), %v3713_v21, %v3712_v20  ;;  %v3714_v26 = vld [vmem:[%s7126_s2 + $0x440] sm:$0xff] (!%p207_p3)  ;;  %v3715_v27 = vld [vmem:[%s7126_s2 + $0x448] sm:$0xff] (!%p207_p3)  ;;  %v5264_v33 = vpack.c.bf16 (!%p207_p3), %v3603_v24, %v3602_v23  ;;  %v3604_v34 = vld [vmem:[%s7126_s2 + $0xd0] sm:$0xff] (!%p207_p3) }
   0xd   : > { %v3605_v35 = vld [vmem:[%s7126_s2 + $0xd8] sm:$0xff] (!%p207_p3)  ;;  %v5520_v37 = vpack.c.bf16 (!%p207_p3), %v3715_v27, %v3714_v26  ;;  %v3716_v41 = vld [vmem:[%s7126_s2 + $0x450] sm:$0xff] (!%p207_p3)  ;;  %v3606_v46 = vld [vmem:[%s7126_s2 + $0xe0] sm:$0xff] (!%p207_p3) }
   0xe   : > { %s7134_s15 = smov (!%p254_p4, %s6041_s15), 1  ;;  %5255 = vmatpush3.bf16.msra.mxu1 %v5252_v8  ;;  %v3717_v42 = vld [vmem:[%s7126_s2 + $0x458] sm:$0xff]  ;;  %v5268_v45 = vpack.c.bf16 %v3605_v35, %v3604_v34  ;;  %v3607_v49 = vld [vmem:[%s7126_s2 + $0xe8] sm:$0xff]  ;;  %v3718_v50 = vld [vmem:[%s7126_s2 + $0x460] sm:$0xff] }
   0xf   : > { %s6000_s21 = smul.u32 384, %s7134_s15  ;;  %5511 = vmatpush3.bf16.msra.mxu0 %v5508_v12  ;;  %5257 = vmatprep.subr.bf16.mxu1 %v5256_v16  ;;  %v5524_v48 = vpack.c.bf16 %v3717_v42, %v3716_v41  ;;  %v3719_v52 = vld [vmem:[%s7126_s2 + $0x468] sm:$0xff]  ;;  %v5272_v56 = vpack.c.bf16 %v3607_v49, %v3606_v46  ;;  %v3608_v59 = vld [vmem:[%s7126_s2 + $0xf0] sm:$0xff]  ;;  %v3609_v60 = vld [vmem:[%s7126_s2 + $0xf8] sm:$0xff]  ;;  %s3839_s23 = sshll.u32 %s7134_s15, 7 }
  0x10   : > { %5513 = vmatprep.subr.bf16.mxu0 %v5512_v17  ;;  %v5528_v58 = vpack.c.bf16 %v3719_v52, %v3718_v50  ;;  %v3720_v61 = vld [vmem:[%s7126_s2 + $0x470] sm:$0xff]  ;;  %v3721_v62 = vld [vmem:[%s7126_s2 + $0x478] sm:$0xff]  ;;  %v5276_v2 = vpack.c.bf16 %v3609_v60, %v3608_v59  ;;  %v371_v3 = vld [vmem:[%s7126_s2] sm:$0xff] }
  0x11   : > { %s6150_s6 = scalar_lea.vmem %s7124_s0, %s6000_s21  ;;  %s3838_s24 = sadd.s32 192, %s6000_s21  ;;  %v5532_v4 = vpack.c.bf16 %v3721_v62, %v3720_v61  ;;  %v372_v5 = vld [vmem:[%s7126_s2 + $0x8] sm:$0xff]  ;;  %v3722_v8 = vld [vmem:[%s7126_s2 + $0x480] sm:$0xff]  ;;  %v373_v15 = vld [vmem:[%s7126_s2 + $0x10] sm:$0xff] }
  0x12   : > { %v6165_v28 = vld [vmem:[%s6150_s6] sm:$0xff]  ;;  %v6168_v29 = vld [vmem:[%s6150_s6 + $0x8] sm:$0xff]  ;;  %v6172_v30 = vld [vmem:[%s6150_s6 + $0x30] sm:$0xff]  ;;  %5259 = vmatpush3.bf16.msra.mxu1 %v5256_v16  ;;  %s6277_s30 = scalar_lea.vmem %s7125_s1, %s3838_s24  ;;  %v5280_v11 = vpack.c.bf16 %v372_v5, %v371_v3 }
  0x13   : > { %312 = vst [vmem:[#allocation2] sm:$0xff] %v6165_v28  ;;  %v290_v31 = vld [vmem:[%s6150_s6 + $0x10] sm:$0x7]  ;;  %313 = vst [vmem:[#allocation2 + $0x8] sm:$0xff] %v6168_v29  ;;  %4832 = vmatprep.mubr.f32.mxu0 %v6172_v30  ;;  %v6179_v32 = vld [vmem:[%s6150_s6 + $0x38] sm:$0xff]  ;;  %5515 = vmatpush3.bf16.msra.mxu0 %v5512_v17 }
  0x14   : > { %318 = vst [vmem:[#allocation2 + $0x30] sm:$0xff] %v6172_v30  ;;  %314 = vst [vmem:[#allocation2 + $0x10] sm:$0x7] %v290_v31  ;;  %5261 = vmatprep.subr.bf16.mxu1 %v5260_v22  ;;  %v6189_v36 = vld [vmem:[%s6150_s6 + $0x18] sm:$0xff]  ;;  %5517 = vmatprep.subr.bf16.mxu0 %v5516_v25  ;;  %v6192_v38 = vld [vmem:[%s6150_s6 + $0x20] sm:$0xff] }
  0x15   : > { %319 = vst [vmem:[#allocation2 + $0x38] sm:$0xff] %v6179_v32  ;;  %315 = vst [vmem:[#allocation2 + $0x18] sm:$0xff] %v6189_v36  ;;  %v6196_v39 = vld [vmem:[%s6150_s6 + $0x48] sm:$0xff]  ;;  %v6208_v43 = vld [vmem:[%s6150_s6 + $0x50] sm:$0xff] }
  0x16   : > { %v293_v40 = vld [vmem:[%s6150_s6 + $0x28] sm:$0x7]  ;;  %316 = vst [vmem:[#allocation2 + $0x20] sm:$0xff] %v6192_v38  ;;  %321 = vst [vmem:[#allocation2 + $0x48] sm:$0xff] %v6196_v39  ;;  %5263 = vmatpush3.bf16.msra.mxu1 %v5260_v22  ;;  %v6212_v44 = vld [vmem:[%s6150_s6 + $0x60] sm:$0xff] }
  0x17   : > { %317 = vst [vmem:[#allocation2 + $0x28] sm:$0x7] %v293_v40  ;;  %322 = vst [vmem:[#allocation2 + $0x50] sm:$0xff] %v6208_v43  ;;  %5519 = vmatpush3.bf16.msra.mxu0 %v5516_v25  ;;  %5265 = vmatprep.subr.bf16.mxu1 %v5264_v33  ;;  %v296_v47 = vld [vmem:[%s6150_s6 + $0x40] sm:$0x7]  ;;  %v6226_v51 = vld [vmem:[%s6150_s6 + $0x68] sm:$0xff] }
  0x18   : > { %324 = vst [vmem:[#allocation2 + $0x60] sm:$0xff] %v6212_v44  ;;  %5521 = vmatprep.subr.bf16.mxu0 %v5520_v37  ;;  %320 = vst [vmem:[#allocation2 + $0x40] sm:$0x7] %v296_v47  ;;  %v6233_v54 = vld [vmem:[%s6150_s6 + $0x78] sm:$0xff]  ;;  %v6238_v57 = vld [vmem:[%s6150_s6 + $0x80] sm:$0xff] }
  0x19   : > { %325 = vst [vmem:[#allocation2 + $0x68] sm:$0xff] %v6226_v51  ;;  %327 = vst [vmem:[#allocation2 + $0x78] sm:$0xff] %v6233_v54  ;;  %v299_v55 = vld [vmem:[%s6150_s6 + $0x58] sm:$0x7]  ;;  %v6254_v63 = vld [vmem:[%s6150_s6 + $0x90] sm:$0xff] }
  0x1a   : > { %v387_v53 = vld [vmem:[#allocation2 + $0x1] sm:$0xff]  ;;  %5267 = vmatpush3.bf16.msra.mxu1 %v5264_v33  ;;  %323 = vst [vmem:[#allocation2 + $0x58] sm:$0x7] %v299_v55  ;;  %328 = vst [vmem:[#allocation2 + $0x80] sm:$0xff] %v6238_v57  ;;  %v302_v0 = vld [vmem:[%s6150_s6 + $0x70] sm:$0x7] }
  0x1b   : > { %4384 = vmatprep.mubr.f32.mxu1 %v387_v53  ;;  %5523 = vmatpush3.bf16.msra.mxu0 %v5520_v37  ;;  %330 = vst [vmem:[#allocation2 + $0x90] sm:$0xff] %v6254_v63  ;;  %326 = vst [vmem:[#allocation2 + $0x70] sm:$0x7] %v302_v0  ;;  %v6261_v1 = vld [vmem:[%s6150_s6 + $0x98] sm:$0xff]  ;;  %v6271_v6 = vld [vmem:[%s6150_s6 + $0xa8] sm:$0xff] }
  0x1c   : > { %5269 = vmatprep.subr.bf16.mxu1 %v5268_v45  ;;  %5525 = vmatprep.subr.bf16.mxu0 %v5524_v48  ;;  %331 = vst [vmem:[#allocation2 + $0x98] sm:$0xff] %v6261_v1  ;;  %v305_v7 = vld [vmem:[%s6150_s6 + $0x88] sm:$0x7]  ;;  %333 = vst [vmem:[#allocation2 + $0xa8] sm:$0xff] %v6271_v6  ;;  %v6287_v10 = vld [vmem:[%s6150_s6 + $0xb0] sm:$0xff] }
  0x1d   : > { %v3723_v9 = vld [vmem:[%s7126_s2 + $0x488] sm:$0xff]  ;;  %329 = vst [vmem:[#allocation2 + $0x88] sm:$0x7] %v305_v7  ;;  %334 = vst [vmem:[#allocation2 + $0xb0] sm:$0xff] %v6287_v10  ;;  %v6291_v12 = vld [vmem:[%s6277_s30] sm:$0xff] }
  0x1e   : > { %5271 = vmatpush3.bf16.msra.mxu1 %v5268_v45  ;;  %v308_v13 = vld [vmem:[%s6150_s6 + $0xa0] sm:$0x7]  ;;  %v5536_v14 = vpack.c.bf16 %v3723_v9, %v3722_v8  ;;  %346 = vst [vmem:[#allocation2 + $0xc0] sm:$0xff] %v6291_v12  ;;  %v6299_v16 = vld [vmem:[%s6277_s30 + $0x8] sm:$0xff]  ;;  %v374_v17 = vld [vmem:[%s7126_s2 + $0x18] sm:$0xff] }
  0x1f   : > { %5527 = vmatpush3.bf16.msra.mxu0 %v5524_v48  ;;  %5273 = vmatprep.subr.bf16.mxu1 %v5272_v56  ;;  %332 = vst [vmem:[#allocation2 + $0xa0] sm:$0x7] %v308_v13  ;;  %v3724_v18 = vld [vmem:[%s7126_s2 + $0x490] sm:$0xff]  ;;  %v3725_v19 = vld [vmem:[%s7126_s2 + $0x498] sm:$0xff]  ;;  %347 = vst [vmem:[#allocation2 + $0xc8] sm:$0xff] %v6299_v16  ;;  %v5284_v25 = vpack.c.bf16 %v374_v17, %v373_v15 }
  0x20   : > { %5529 = vmatprep.subr.bf16.mxu0 %v5528_v58  ;;  %v388_v20 = vld [vmem:[#allocation2 + $0x9] sm:$0xff]  ;;  %v6312_v21 = vld [vmem:[%s6277_s30 + $0x18] sm:$0xff]  ;;  %v6317_v23 = vld [vmem:[%s6277_s30 + $0x20] sm:$0xff]  ;;  %v5540_v26 = vpack.c.bf16 %v3725_v19, %v3724_v18 }
  0x21   : > { %v311_v22 = vld [vmem:[%s6150_s6 + $0xb8] sm:$0x7]  ;;  %349 = vst [vmem:[#allocation2 + $0xd8] sm:$0xff] %v6312_v21  ;;  %350 = vst [vmem:[#allocation2 + $0xe0] sm:$0xff] %v6317_v23  ;;  %v375_v27 = vld [vmem:[%s7126_s2 + $0x20] sm:$0xff] }
  0x22   : > { %5275 = vmatpush3.bf16.msra.mxu1 %v5272_v56  ;;  %335 = vst [vmem:[#allocation2 + $0xb8] sm:$0x7] %v311_v22  ;;  %v389_v24 = vld [vmem:[#allocation2 + $0x19] sm:$0xff]  ;;  %v376_v31 = vld [vmem:[%s7126_s2 + $0x28] sm:$0xff]  ;;  %v6334_v37 = vld [vmem:[#allocation2 + $0x31] sm:$0xff] }
  0x23   : > { %5531 = vmatpush3.bf16.msra.mxu0 %v5528_v58  ;;  %5277 = vmatprep.subr.bf16.mxu1 %v5276_v2  ;;  %v390_v33 = vld [vmem:[#allocation2 + $0x21] sm:$0xff]  ;;  %v5288_v40 = vpack.c.bf16 %v376_v31, %v375_v27  ;;  %v377_v42 = vld [vmem:[%s7126_s2 + $0x30] sm:$0xff]  ;;  %v378_v45 = vld [vmem:[%s7126_s2 + $0x38] sm:$0xff] }
  0x24   : > { %5533 = vmatprep.subr.bf16.mxu0 %v5532_v4  ;;  %v3726_v34 = vld [vmem:[%s7126_s2 + $0x4a0] sm:$0xff]  ;;  %v3727_v35 = vld [vmem:[%s7126_s2 + $0x4a8] sm:$0xff]  ;;  %v3728_v47 = vld [vmem:[%s7126_s2 + $0x4b0] sm:$0xff]  ;;  %v5292_v50 = vpack.c.bf16 %v378_v45, %v377_v42 }
  0x25   : > { %v5544_v41 = vpack.c.bf16 %v3727_v35, %v3726_v34  ;;  %v6343_v46 = vld [vmem:[#allocation2 + $0x39] sm:$0xff]  ;;  %v6353_v49 = vld [vmem:[#allocation2 + $0x49] sm:$0xff]  ;;  %v6363_v56 = vld [vmem:[#allocation2 + $0x51] sm:$0xff] }
  0x26   : > { %5279 = vmatpush3.bf16.msra.mxu1 %v5276_v2  ;;  %v3729_v48 = vld [vmem:[%s7126_s2 + $0x4b8] sm:$0xff]  ;;  %v379_v53 = vld [vmem:[%s7126_s2 + $0x40] sm:$0xff]  ;;  %v380_v55 = vld [vmem:[%s7126_s2 + $0x48] sm:$0xff] }
  0x27   : > { %5535 = vmatpush3.bf16.msra.mxu0 %v5532_v4  ;;  %5281 = vmatprep.subr.bf16.mxu1 %v5280_v11  ;;  %v5548_v52 = vpack.c.bf16 %v3729_v48, %v3728_v47  ;;  %v3730_v58 = vld [vmem:[%s7126_s2 + $0x4c0] sm:$0xff]  ;;  %v3731_v59 = vld [vmem:[%s7126_s2 + $0x4c8] sm:$0xff]  ;;  %v338_v60 = vld [vmem:[%s6277_s30 + $0x10] sm:$0x7]  ;;  %v5296_v62 = vpack.c.bf16 %v380_v55, %v379_v53 }
  0x28   : > { %5537 = vmatprep.subr.bf16.mxu0 %v5536_v14  ;;  %v6374_v61 = vld [vmem:[#allocation2 + $0x61] sm:$0xff]  ;;  %348 = vst [vmem:[#allocation2 + $0xd0] sm:$0x7] %v338_v60  ;;  %v5552_v0 = vpack.c.bf16 %v3731_v59, %v3730_v58  ;;  %v381_v2 = vld [vmem:[%s7126_s2 + $0x50] sm:$0xff]  ;;  %v382_v3 = vld [vmem:[%s7126_s2 + $0x58] sm:$0xff] }
  0x29   : > { %4385 = vmatmul.mubr.f32.vlgmr.msra.gmra.mrb[0].mxu1 %v388_v20  ;;  %v341_v4 = vld [vmem:[%s6277_s30 + $0x28] sm:$0x7]  ;;  %v3732_v7 = vld [vmem:[%s7126_s2 + $0x4d0] sm:$0xff]  ;;  %v3733_v8 = vld [vmem:[%s7126_s2 + $0x4d8] sm:$0xff] }
  0x2a   : > { %4833 = vmatmul.mubr.f32.vlgmr.msra.gmra.mrb[0].mxu0 %v6179_v32  ;;  %5283 = vmatpush3.bf16.msra.mxu1 %v5280_v11  ;;  %v6385_v5 = vld [vmem:[#allocation2 + $0x69] sm:$0xff]  ;;  %351 = vst [vmem:[#allocation2 + $0xe8] sm:$0x7] %v341_v4  ;;  %v6395_v9 = vld [vmem:[#allocation2 + $0x79] sm:$0xff]  ;;  %v5300_v11 = vpack.c.bf16 %v382_v3, %v381_v2  ;;  %v5556_v13 = vpack.c.bf16 %v3733_v8, %v3732_v7  ;;  %v6405_v17 = vld [vmem:[#allocation2 + $0x81] sm:$0xff] }
  0x2b   : > { %5539 = vmatpush3.bf16.msra.mxu0 %v5536_v14  ;;  %4387 = vmatprep.mubr.f32.mxu1 %v389_v24  ;;  %v383_v14 = vld [vmem:[%s7126_s2 + $0x60] sm:$0xff]  ;;  %v384_v15 = vld [vmem:[%s7126_s2 + $0x68] sm:$0xff]  ;;  %v6415_v20 = vld [vmem:[#allocation2 + $0x91] sm:$0xff] }
  0x2c   : > { %4835 = vmatprep.mubr.f32.mxu0 %v6196_v39  ;;  %5285 = vmatprep.subr.bf16.mxu1 %v5284_v25  ;;  %v3734_v18 = vld [vmem:[%s7126_s2 + $0x4e0] sm:$0xff]  ;;  %v3735_v19 = vld [vmem:[%s7126_s2 + $0x4e8] sm:$0xff]  ;;  %v5304_v22 = vpack.c.bf16 %v384_v15, %v383_v14  ;;  %v3736_v31 = vld [vmem:[%s7126_s2 + $0x4f0] sm:$0xff] }
  0x2d   : > { %4388 = vmatmul.mubr.f32.gmra.mrb[2].mxu1 %v390_v33  ;;  %5541 = vmatprep.subr.bf16.mxu0 %v5540_v26  ;;  %v5560_v24 = vpack.c.bf16 %v3735_v19, %v3734_v18  ;;  %v6425_v27 = vld [vmem:[#allocation2 + $0x99] sm:$0xff]  ;;  %v6435_v34 = vld [vmem:[#allocation2 + $0xa9] sm:$0xff]  ;;  %v2082_v14 = vld [vmem:[#allocation2 + $0xc1] sm:$0xff] }
  0x2e   : > { %4836 = vmatmul.mubr.f32.gmra.mrb[2].mxu0 %v6208_v43  ;;  %5287 = vmatpush3.bf16.msra.mxu1 %v5284_v25  ;;  %v385_v25 = vld [vmem:[%s7126_s2 + $0x70] sm:$0xff]  ;;  %v3737_v33 = vld [vmem:[%s7126_s2 + $0x4f8] sm:$0xff]  ;;  %v3611_v42 = vld [vmem:[%s7126_s2 + $0x108] sm:$0xff] }
  0x2f   : > { %5543 = vmatpush3.bf16.msra.mxu0 %v5540_v26  ;;  %4390 = vmatprep.mubr.f32.mxu1 %v6334_v37  ;;  %v386_v26 = vld [vmem:[%s7126_s2 + $0x78] sm:$0xff]  ;;  %v3738_v45 = vld [vmem:[%s7126_s2 + $0x500] sm:$0xff]  ;;  %v3739_v47 = vld [vmem:[%s7126_s2 + $0x508] sm:$0xff] }
  0x30   : > { %4838 = vmatprep.mubr.f32.mxu0 %v6212_v44  ;;  %5289 = vmatprep.subr.bf16.mxu1 %v5288_v40  ;;  %v5308_v35 = vpack.c.bf16 %v386_v26, %v385_v25  ;;  %v3741_v53 = vld [vmem:[%s7126_s2 + $0x518] sm:$0xff]  ;;  %v3614_v58 = vld [vmem:[%s7126_s2 + $0x120] sm:$0xff]  ;;  %v3615_v59 = vld [vmem:[%s7126_s2 + $0x128] sm:$0xff] }
  0x31   : > { %4391 = vmatmul.mubr.f32.gmra.mrb[4].mxu1 %v6343_v46  ;;  %5545 = vmatprep.subr.bf16.mxu0 %v5544_v41  ;;  %v3616_v60 = vld [vmem:[%s7126_s2 + $0x130] sm:$0xff]  ;;  %v3619_v2 = vld [vmem:[%s7126_s2 + $0x148] sm:$0xff]  ;;  %v3625_v18 = vld [vmem:[%s7126_s2 + $0x178] sm:$0xff] }
  0x32   : > { %4839 = vmatmul.mubr.f32.gmra.mrb[4].mxu0 %v6226_v51  ;;  %5291 = vmatpush3.bf16.msra.mxu1 %v5288_v40  ;;  %v5564_v40 = vpack.c.bf16 %v3737_v33, %v3736_v31  ;;  %v3620_v4 = vld [vmem:[%s7126_s2 + $0x150] sm:$0xff]  ;;  %v3626_v25 = vld [vmem:[%s7126_s2 + $0x180] sm:$0xff]  ;;  %v3627_v26 = vld [vmem:[%s7126_s2 + $0x188] sm:$0xff] }
  0x33   : > { %5547 = vmatpush3.bf16.msra.mxu0 %v5544_v41  ;;  %4393 = vmatprep.mubr.f32.mxu1 %v6353_v49  ;;  %v3610_v41 = vld [vmem:[%s7126_s2 + $0x100] sm:$0xff]  ;;  %v2083_v19 = vld [vmem:[#allocation2 + $0xc9] sm:$0xff]  ;;  %v5344_v33 = vpack.c.bf16 %v3627_v26, %v3626_v25  ;;  %v3641_v25 = vld [vmem:[%s7126_s2 + $0x1f8] sm:$0xff] }
  0x34   : > { %4841 = vmatprep.mubr.f32.mxu0 %v6233_v54  ;;  %5293 = vmatprep.subr.bf16.mxu1 %v5292_v50  ;;  %v5312_v48 = vpack.c.bf16 %v3611_v42, %v3610_v41  ;;  %v710_v31 = vld [vmem:[#allocation2 + $0x2] sm:$0xff]  ;;  %v3629_v41 = vld [vmem:[%s7126_s2 + $0x198] sm:$0xff]  ;;  %v3756_v42 = vld [vmem:[%s7126_s2 + $0x590] sm:$0xff] }
  0x35   : > { %4394 = vmatmul.mubr.f32.gmra.mrb[6].mxu1 %v6363_v56  ;;  %5549 = vmatprep.subr.bf16.mxu0 %v5548_v52  ;;  %v3768_v26 = vld [vmem:[%s7126_s2 + $0x5f0] sm:$0xff] }
  0x36   : > { %4842 = vmatmul.mubr.f32.gmra.mrb[6].mxu0 %v6238_v57  ;;  %5295 = vmatpush3.bf16.msra.mxu1 %v5292_v50  ;;  %v3612_v50 = vld [vmem:[%s7126_s2 + $0x110] sm:$0xff] }
  0x37   : > { %5551 = vmatpush3.bf16.msra.mxu0 %v5548_v52  ;;  %4396 = vmatprep.mubr.f32.mxu1 %v6374_v61  ;;  %v3613_v52 = vld [vmem:[%s7126_s2 + $0x118] sm:$0xff] }
  0x38   : > { %4844 = vmatprep.mubr.f32.mxu0 %v6254_v63  ;;  %5297 = vmatprep.subr.bf16.mxu1 %v5296_v62  ;;  %v5316_v55 = vpack.c.bf16 %v3613_v52, %v3612_v50  ;;  %v3630_v52 = vld [vmem:[%s7126_s2 + $0x1a0] sm:$0xff] }
  0x39   : > { %4397 = vmatmul.mubr.f32.gmra.mrb[8].mxu1 %v6385_v5  ;;  %5553 = vmatprep.subr.bf16.mxu0 %v5552_v0 }
  0x3a   : > { %4845 = vmatmul.mubr.f32.gmra.mrb[8].mxu0 %v6261_v1  ;;  %5299 = vmatpush3.bf16.msra.mxu1 %v5296_v62  ;;  %v3617_v62 = vld [vmem:[%s7126_s2 + $0x138] sm:$0xff] }
  0x3b   : > { %5555 = vmatpush3.bf16.msra.mxu0 %v5552_v0  ;;  %4399 = vmatprep.mubr.f32.mxu1 %v6395_v9  ;;  %v3618_v0 = vld [vmem:[%s7126_s2 + $0x140] sm:$0xff] }
  0x3c   : > { %4847 = vmatprep.mubr.f32.mxu0 %v6271_v6  ;;  %5301 = vmatprep.subr.bf16.mxu1 %v5300_v11 }
  0x3d   : > { %4400 = vmatmul.mubr.f32.gmra.mrb[10].mxu1 %v6405_v17  ;;  %5557 = vmatprep.subr.bf16.mxu0 %v5556_v13 }
  0x3e   : > { %4848 = vmatmul.mubr.f32.gmra.mrb[10].mxu0 %v6287_v10  ;;  %5303 = vmatpush3.bf16.msra.mxu1 %v5300_v11  ;;  %v3623_v11 = vld [vmem:[%s7126_s2 + $0x168] sm:$0xff] }
  0x3f   : > { %5559 = vmatpush3.bf16.msra.mxu0 %v5556_v13  ;;  %4402 = vmatprep.mubr.f32.mxu1 %v6415_v20 }
  0x40   : > { %4850 = vmatprep.mubr.f32.mxu0 %v6291_v12  ;;  %5305 = vmatprep.subr.bf16.mxu1 %v5304_v22  ;;  %v6445_v12 = vld [vmem:[#allocation2 + $0xb1] sm:$0xff] }
  0x41   : > { %4403 = vmatmul.mubr.f32.gmra.mrb[12].mxu1 %v6425_v27  ;;  %5561 = vmatprep.subr.bf16.mxu0 %v5560_v24 }
  0x42   : > { %4851 = vmatmul.mubr.f32.gmra.mrb[12].mxu0 %v6299_v16  ;;  %5307 = vmatpush3.bf16.msra.mxu1 %v5304_v22  ;;  %v5568_v16 = vpack.c.bf16 %v3739_v47, %v3738_v45  ;;  %v2084_v22 = vld [vmem:[#allocation2 + $0xd9] sm:$0xff]  ;;  %v2266_v47 = vld [vmem:[#allocation2 + $0x4a] sm:$0xff] }
  0x43   : > { %5563 = vmatpush3.bf16.msra.mxu0 %v5560_v24  ;;  %4405 = vmatprep.mubr.f32.mxu1 %v6435_v34  ;;  %v712_v45 = vld [vmem:[#allocation2 + $0x1a] sm:$0xff] }
  0x44   : > { %4853 = vmatprep.mubr.f32.mxu0 %v6312_v21  ;;  %5309 = vmatprep.subr.bf16.mxu1 %v5308_v35  ;;  %v3740_v21 = vld [vmem:[%s7126_s2 + $0x510] sm:$0xff] }
  0x45   : > { %4406 = vmatmul.mubr.f32.gmra.mrb[14].mxu1 %v6445_v12  ;;  %5565 = vmatprep.subr.bf16.mxu0 %v5564_v40 }
  0x46   : > { %4854 = vmatmul.mubr.f32.gmra.mrb[14].mxu0 %v6317_v23  ;;  %5311 = vmatpush3.bf16.msra.mxu1 %v5308_v35  ;;  %v5572_v23 = vpack.c.bf16 %v3741_v53, %v3740_v21  ;;  %v3631_v21 = vld [vmem:[%s7126_s2 + $0x1a8] sm:$0xff]  ;;  %v6604_v53 = vld [vmem:[%s6277_s30 + $0x38] sm:$0xff] }
  0x47   : > { %5567 = vmatpush3.bf16.msra.mxu0 %v5564_v40  ;;  %4440 = vmatprep.mubr.f32.mxu1 %v6165_v28  ;;  %v3742_v28 = vld [vmem:[%s7126_s2 + $0x520] sm:$0xff]  ;;  %v3628_v40 = vld [vmem:[%s7126_s2 + $0x190] sm:$0xff]  ;;  %353 = vst [vmem:[#allocation2 + $0xf8] sm:$0xff] %v6604_v53 }
  0x48   : > { %4888 = vmatprep.mubr.f32.mxu0 %v6334_v37  ;;  %5313 = vmatprep.subr.bf16.mxu1 %v5312_v48  ;;  %v5320_v37 = vpack.c.bf16 %v3615_v59, %v3614_v58  ;;  %v3759_v58 = vld [vmem:[%s7126_s2 + $0x5a8] sm:$0xff]  ;;  %v2267_v59 = vld [vmem:[#allocation2 + $0x52] sm:$0xff] }
  0x49   : > { %4441 = vmatmul.mubr.f32.vlgmr.msra.gmra.mrb[0].mxu1 %v6168_v29  ;;  %5569 = vmatprep.subr.bf16.mxu0 %v5568_v16  ;;  %v3743_v29 = vld [vmem:[%s7126_s2 + $0x528] sm:$0xff] }
  0x4a   : > { %4889 = vmatmul.mubr.f32.vlgmr.msra.gmra.mrb[0].mxu0 %v6343_v46  ;;  %5315 = vmatpush3.bf16.msra.mxu1 %v5312_v48  ;;  %v5576_v46 = vpack.c.bf16 %v3743_v29, %v3742_v28  ;;  %v5348_v48 = vpack.c.bf16 %v3629_v41, %v3628_v40  ;;  %v5352_v28 = vpack.c.bf16 %v3631_v21, %v3630_v52  ;;  %v2268_v29 = vld [vmem:[#allocation2 + $0x62] sm:$0xff]  ;;  %v3772_v52 = vld [vmem:[%s7126_s2 + $0x610] sm:$0xff]  ;;  %v3773_v21 = vld [vmem:[%s7126_s2 + $0x618] sm:$0xff] }
  0x4b   : > { %5571 = vmatpush3.bf16.msra.mxu0 %v5568_v16  ;;  %4443 = vmatprep.mubr.f32.mxu1 %v6189_v36  ;;  %v3744_v36 = vld [vmem:[%s7126_s2 + $0x530] sm:$0xff]  ;;  %v3770_v40 = vld [vmem:[%s7126_s2 + $0x600] sm:$0xff]  ;;  %v3771_v41 = vld [vmem:[%s7126_s2 + $0x608] sm:$0xff] }
  0x4c   : > { %4891 = vmatprep.mubr.f32.mxu0 %v6353_v49  ;;  %5317 = vmatprep.subr.bf16.mxu1 %v5316_v55  ;;  %v5324_v49 = vpack.c.bf16 %v3617_v62, %v3616_v60  ;;  %v6594_v16 = vld [vmem:[%s6277_s30 + $0x30] sm:$0xff]  ;;  %v3633_v60 = vld [vmem:[%s7126_s2 + $0x1b8] sm:$0xff] }
  0x4d   : > { %4444 = vmatmul.mubr.f32.gmra.mrb[2].mxu1 %v6192_v38  ;;  %5573 = vmatprep.subr.bf16.mxu0 %v5572_v23  ;;  %v3745_v38 = vld [vmem:[%s7126_s2 + $0x538] sm:$0xff]  ;;  %352 = vst [vmem:[#allocation2 + $0xf0] sm:$0xff] %v6594_v16  ;;  %v3760_v62 = vld [vmem:[%s7126_s2 + $0x5b0] sm:$0xff] }
  0x4e   : > { %4892 = vmatmul.mubr.f32.gmra.mrb[2].mxu0 %v6363_v56  ;;  %5319 = vmatpush3.bf16.msra.mxu1 %v5316_v55  ;;  %v5580_v56 = vpack.c.bf16 %v3745_v38, %v3744_v36  ;;  %v713_v55 = vld [vmem:[#allocation2 + $0x22] sm:$0xff]  ;;  %v3761_v36 = vld [vmem:[%s7126_s2 + $0x5b8] sm:$0xff]  ;;  %v2269_v38 = vld [vmem:[#allocation2 + $0x6a] sm:$0xff] }
  0x4f   : > { %5575 = vmatpush3.bf16.msra.mxu0 %v5572_v23  ;;  %4446 = vmatprep.mubr.f32.mxu1 %v6172_v30  ;;  %v3746_v30 = vld [vmem:[%s7126_s2 + $0x540] sm:$0xff] }
  0x50   : > { %4894 = vmatprep.mubr.f32.mxu0 %v6374_v61  ;;  %5321 = vmatprep.subr.bf16.mxu1 %v5320_v37  ;;  %v5328_v61 = vpack.c.bf16 %v3619_v2, %v3618_v0  ;;  %v3758_v23 = vld [vmem:[%s7126_s2 + $0x5a0] sm:$0xff]  ;;  %v5612_v0 = vpack.c.bf16 %v3761_v36, %v3760_v62  ;;  %v3775_v62 = vld [vmem:[%s7126_s2 + $0x628] sm:$0xff]  ;;  %v2461_v36 = vld [vmem:[#allocation2 + $0x53] sm:$0xff] }
  0x51   : > { %4447 = vmatmul.mubr.f32.gmra.mrb[4].mxu1 %v6179_v32  ;;  %5577 = vmatprep.subr.bf16.mxu0 %v5576_v46  ;;  %v3747_v32 = vld [vmem:[%s7126_s2 + $0x548] sm:$0xff]  ;;  %v3634_v2 = vld [vmem:[%s7126_s2 + $0x1c0] sm:$0xff] }
  0x52   : > { %4895 = vmatmul.mubr.f32.gmra.mrb[4].mxu0 %v6385_v5  ;;  %5323 = vmatpush3.bf16.msra.mxu1 %v5320_v37  ;;  %v5584_v3 = vpack.c.bf16 %v3747_v32, %v3746_v30  ;;  %v3621_v5 = vld [vmem:[%s7126_s2 + $0x158] sm:$0xff]  ;;  %v5608_v37 = vpack.c.bf16 %v3759_v58, %v3758_v23  ;;  %v3635_v30 = vld [vmem:[%s7126_s2 + $0x1c8] sm:$0xff]  ;;  %v3762_v32 = vld [vmem:[%s7126_s2 + $0x5c0] sm:$0xff] }
  0x53   : > { %5579 = vmatpush3.bf16.msra.mxu0 %v5576_v46  ;;  %4449 = vmatprep.mubr.f32.mxu1 %v6196_v39  ;;  %v3748_v39 = vld [vmem:[%s7126_s2 + $0x550] sm:$0xff]  ;;  %v5332_v7 = vpack.c.bf16 %v3621_v5, %v3620_v4  ;;  %v5360_v4 = vpack.c.bf16 %v3635_v30, %v3634_v2  ;;  %v906_v23 = vld [vmem:[#allocation2 + $0x1b] sm:$0xff] }
  0x54   : > { %4897 = vmatprep.mubr.f32.mxu0 %v6395_v9  ;;  %5325 = vmatprep.subr.bf16.mxu1 %v5324_v49  ;;  %v3622_v9 = vld [vmem:[%s7126_s2 + $0x160] sm:$0xff]  ;;  %v3632_v46 = vld [vmem:[%s7126_s2 + $0x1b0] sm:$0xff]  ;;  %v3649_v2 = vld [vmem:[%s7126_s2 + $0x238] sm:$0xff] }
  0x55   : > { %4450 = vmatmul.mubr.f32.gmra.mrb[6].mxu1 %v6208_v43  ;;  %5581 = vmatprep.subr.bf16.mxu0 %v5580_v56  ;;  %v3749_v43 = vld [vmem:[%s7126_s2 + $0x558] sm:$0xff]  ;;  %v5336_v13 = vpack.c.bf16 %v3623_v11, %v3622_v9  ;;  %v3776_v30 = vld [vmem:[%s7126_s2 + $0x630] sm:$0xff] }
  0x56   : > { %4898 = vmatmul.mubr.f32.gmra.mrb[6].mxu0 %v6405_v17  ;;  %5327 = vmatpush3.bf16.msra.mxu1 %v5324_v49  ;;  %v5588_v8 = vpack.c.bf16 %v3749_v43, %v3748_v39  ;;  %v3624_v17 = vld [vmem:[%s7126_s2 + $0x170] sm:$0xff]  ;;  %v5356_v49 = vpack.c.bf16 %v3633_v60, %v3632_v46  ;;  %v3765_v9 = vld [vmem:[%s7126_s2 + $0x5d8] sm:$0xff]  ;;  %v907_v46 = vld [vmem:[#allocation2 + $0x23] sm:$0xff] }
  0x57   : > { %5583 = vmatpush3.bf16.msra.mxu0 %v5580_v56  ;;  %4452 = vmatprep.mubr.f32.mxu1 %v6212_v44  ;;  %v3750_v44 = vld [vmem:[%s7126_s2 + $0x560] sm:$0xff]  ;;  %v2272_v5 = vld [vmem:[#allocation2 + $0x92] sm:$0xff] }
  0x58   : > { %4900 = vmatprep.mubr.f32.mxu0 %v6415_v20  ;;  %5329 = vmatprep.subr.bf16.mxu1 %v5328_v61  ;;  %v5340_v20 = vpack.c.bf16 %v3625_v18, %v3624_v17  ;;  %v2270_v56 = vld [vmem:[#allocation2 + $0x7a] sm:$0xff]  ;;  %v3636_v43 = vld [vmem:[%s7126_s2 + $0x1d0] sm:$0xff]  ;;  %v3767_v18 = vld [vmem:[%s7126_s2 + $0x5e8] sm:$0xff] }
  0x59   : > { %4453 = vmatmul.mubr.f32.gmra.mrb[8].mxu1 %v6226_v51  ;;  %5585 = vmatprep.subr.bf16.mxu0 %v5584_v3  ;;  %v3751_v51 = vld [vmem:[%s7126_s2 + $0x568] sm:$0xff]  ;;  %v2273_v11 = vld [vmem:[#allocation2 + $0x9a] sm:$0xff] }
  0x5a   : > { %4901 = vmatmul.mubr.f32.gmra.mrb[8].mxu0 %v6425_v27  ;;  %5331 = vmatpush3.bf16.msra.mxu1 %v5328_v61  ;;  %v5592_v15 = vpack.c.bf16 %v3751_v51, %v3750_v44  ;;  %v2085_v27 = vld [vmem:[#allocation2 + $0xe1] sm:$0xff]  ;;  %v2274_v51 = vld [vmem:[#allocation2 + $0xaa] sm:$0xff] }
  0x5b   : > { %5587 = vmatpush3.bf16.msra.mxu0 %v5584_v3  ;;  %4455 = vmatprep.mubr.f32.mxu1 %v6233_v54  ;;  %v3752_v54 = vld [vmem:[%s7126_s2 + $0x570] sm:$0xff]  ;;  %v3763_v61 = vld [vmem:[%s7126_s2 + $0x5c8] sm:$0xff]  ;;  %v3766_v17 = vld [vmem:[%s7126_s2 + $0x5e0] sm:$0xff] }
  0x5c   : > { %4903 = vmatprep.mubr.f32.mxu0 %v6435_v34  ;;  %5333 = vmatprep.subr.bf16.mxu1 %v5332_v7  ;;  %v2264_v34 = vld [vmem:[#allocation2 + $0x32] sm:$0xff]  ;;  %v2271_v3 = vld [vmem:[#allocation2 + $0x82] sm:$0xff]  ;;  %v5616_v39 = vpack.c.bf16 %v3763_v61, %v3762_v32 }
  0x5d   : > { %4456 = vmatmul.mubr.f32.gmra.mrb[10].mxu1 %v6238_v57  ;;  %5589 = vmatprep.subr.bf16.mxu0 %v5588_v8  ;;  %v3753_v57 = vld [vmem:[%s7126_s2 + $0x578] sm:$0xff]  ;;  %v3774_v60 = vld [vmem:[%s7126_s2 + $0x620] sm:$0xff]  ;;  %v2463_v61 = vld [vmem:[#allocation2 + $0x6b] sm:$0xff] }
  0x5e   : > { %4904 = vmatmul.mubr.f32.gmra.mrb[10].mxu0 %v6445_v12  ;;  %5335 = vmatpush3.bf16.msra.mxu1 %v5332_v7  ;;  %v5596_v24 = vpack.c.bf16 %v3753_v57, %v3752_v54  ;;  %v2265_v12 = vld [vmem:[#allocation2 + $0x3a] sm:$0xff]  ;;  %v2275_v54 = vld [vmem:[#allocation2 + $0xb2] sm:$0xff] }
  0x5f   : > { %5591 = vmatpush3.bf16.msra.mxu0 %v5588_v8  ;;  %4458 = vmatprep.mubr.f32.mxu1 %v6254_v63  ;;  %v3754_v63 = vld [vmem:[%s7126_s2 + $0x580] sm:$0xff]  ;;  %v3637_v7 = vld [vmem:[%s7126_s2 + $0x1d8] sm:$0xff]  ;;  %v3764_v8 = vld [vmem:[%s7126_s2 + $0x5d0] sm:$0xff] }
  0x60   : > { %4906 = vmatprep.mubr.f32.mxu0 %v2082_v14  ;;  %5337 = vmatprep.subr.bf16.mxu1 %v5336_v13  ;;  %v5364_v44 = vpack.c.bf16 %v3637_v7, %v3636_v43  ;;  %v3638_v14 = vld [vmem:[%s7126_s2 + $0x1e0] sm:$0xff]  ;;  %v3777_v32 = vld [vmem:[%s7126_s2 + $0x638] sm:$0xff]  ;;  %v3651_v43 = vld [vmem:[%s7126_s2 + $0x248] sm:$0xff] }
  0x61   : > { %4459 = vmatmul.mubr.f32.gmra.mrb[12].mxu1 %v6261_v1  ;;  %5593 = vmatprep.subr.bf16.mxu0 %v5592_v15  ;;  %v3755_v1 = vld [vmem:[%s7126_s2 + $0x588] sm:$0xff]  ;;  %v344_v57 = vld [vmem:[%s6277_s30 + $0x40] sm:$0x7]  ;;  %s7081_s30 = scalar_lea.vmem %s7128_s4, %s3839_s23 }
  0x62   : > { %4907 = vmatmul.mubr.f32.gmra.mrb[12].mxu0 %v2083_v19  ;;  %5339 = vmatpush3.bf16.msra.mxu1 %v5336_v13  ;;  %v5600_v35 = vpack.c.bf16 %v3755_v1, %v3754_v63  ;;  %v5620_v13 = vpack.c.bf16 %v3765_v9, %v3764_v8  ;;  %354 = vst [vmem:[#allocation2 + $0x100] sm:$0x7] %v344_v57  ;;  %v3769_v63 = vld [vmem:[%s7126_s2 + $0x5f8] sm:$0xff]  ;;  %v2277_v1 = vld [vmem:[#allocation2 + $0xca] sm:$0xff]  ;;  %v3778_v7 = vld [vmem:[%s7126_s2 + $0x640] sm:$0xff] }
  0x63   : > { %5595 = vmatpush3.bf16.msra.mxu0 %v5592_v15  ;;  %4461 = vmatprep.mubr.f32.mxu1 %v6271_v6  ;;  %v711_v6 = vld [vmem:[#allocation2 + $0xa] sm:$0xff] }
  0x64   : > { %4909 = vmatprep.mubr.f32.mxu0 %v2084_v22  ;;  %5341 = vmatprep.subr.bf16.mxu1 %v5340_v20  ;;  %v3639_v15 = vld [vmem:[%s7126_s2 + $0x1e8] sm:$0xff]  ;;  %v5624_v22 = vpack.c.bf16 %v3767_v18, %v3766_v17  ;;  %v3781_v17 = vld [vmem:[%s7126_s2 + $0x658] sm:$0xff] }
  0x65   : > { %4462 = vmatmul.mubr.f32.gmra.mrb[14].mxu1 %v6287_v10  ;;  %5597 = vmatprep.subr.bf16.mxu0 %v5596_v24  ;;  %v3757_v10 = vld [vmem:[%s7126_s2 + $0x598] sm:$0xff]  ;;  %v5368_v19 = vpack.c.bf16 %v3639_v15, %v3638_v14  ;;  %v3779_v8 = vld [vmem:[%s7126_s2 + $0x648] sm:$0xff]  ;;  %v3780_v15 = vld [vmem:[%s7126_s2 + $0x650] sm:$0xff] }
  0x66   : > { %4910 = vmatmul.mubr.f32.gmra.mrb[14].mxu0 %v2085_v27  ;;  %5343 = vmatpush3.bf16.msra.mxu1 %v5340_v20  ;;  %v5604_v50 = vpack.c.bf16 %v3757_v10, %v3756_v42  ;;  %v2276_v20 = vld [vmem:[#allocation2 + $0xc2] sm:$0xff]  ;;  %v3653_v14 = vld [vmem:[%s7126_s2 + $0x258] sm:$0xff]  ;;  %v2468_v57 = vld [vmem:[#allocation2 + $0xab] sm:$0xff] }
  0x67   : > { %5599 = vmatpush3.bf16.msra.mxu0 %v5596_v24  ;;  %4496 = vmatprep.mubr.f32.mxu1 %v710_v31  ;;  %v3640_v24 = vld [vmem:[%s7126_s2 + $0x1f0] sm:$0xff]  ;;  %v2278_v31 = vld [vmem:[#allocation2 + $0xda] sm:$0xff]  ;;  %v904_v42 = vld [vmem:[#allocation2 + $0x3] sm:$0xff] }
  0x68   : > { %4944 = vmatprep.mubr.f32.mxu0 %v2264_v34  ;;  %5345 = vmatprep.subr.bf16.mxu1 %v5344_v33  ;;  %v5372_v27 = vpack.c.bf16 %v3641_v25, %v3640_v24  ;;  %v2465_v9 = vld [vmem:[#allocation2 + $0x83] sm:$0xff]  ;;  %v2467_v18 = vld [vmem:[#allocation2 + $0x9b] sm:$0xff] }
  0x69   : > { %4497 = vmatmul.mubr.f32.vlgmr.msra.gmra.mrb[0].mxu1 %v711_v6  ;;  %5601 = vmatprep.subr.bf16.mxu0 %v5600_v35  ;;  %v2279_v6 = vld [vmem:[#allocation2 + $0xe2] sm:$0xff] }
  0x6a   : > { %4945 = vmatmul.mubr.f32.vlgmr.msra.gmra.mrb[0].mxu0 %v2265_v12  ;;  %5347 = vmatpush3.bf16.msra.mxu1 %v5344_v33  ;;  %v5628_v33 = vpack.c.bf16 %v3769_v63, %v3768_v26  ;;  %v3782_v24 = vld [vmem:[%s7126_s2 + $0x660] sm:$0xff]  ;;  %v3783_v25 = vld [vmem:[%s7126_s2 + $0x668] sm:$0xff]  ;;  %v2469_v26 = vld [vmem:[#allocation2 + $0xb3] sm:$0xff] }
  0x6b   : > { %5603 = vmatpush3.bf16.msra.mxu0 %v5600_v35  ;;  %4499 = vmatprep.mubr.f32.mxu1 %v712_v45  ;;  %v3643_v35 = vld [vmem:[%s7126_s2 + $0x208] sm:$0xff]  ;;  %v5632_v45 = vpack.c.bf16 %v3771_v41, %v3770_v40 }
  0x6c   : > { %4947 = vmatprep.mubr.f32.mxu0 %v2266_v47  ;;  %5349 = vmatprep.subr.bf16.mxu1 %v5348_v48  ;;  %v6770_v40 = vld [vmem:[#allocation2 + $0xcb] sm:$0xff] }
  0x6d   : > { %4500 = vmatmul.mubr.f32.gmra.mrb[2].mxu1 %v713_v55  ;;  %5605 = vmatprep.subr.bf16.mxu0 %v5604_v50  ;;  %v2459_v55 = vld [vmem:[#allocation2 + $0x3b] sm:$0xff] }
  0x6e   : > { %4948 = vmatmul.mubr.f32.gmra.mrb[2].mxu0 %v2267_v59  ;;  %5351 = vmatpush3.bf16.msra.mxu1 %v5348_v48  ;;  %v3645_v48 = vld [vmem:[%s7126_s2 + $0x218] sm:$0xff] }
  0x6f   : > { %5607 = vmatpush3.bf16.msra.mxu0 %v5604_v50  ;;  %4502 = vmatprep.mubr.f32.mxu1 %v2264_v34  ;;  %v3642_v34 = vld [vmem:[%s7126_s2 + $0x200] sm:$0xff]  ;;  %v905_v50 = vld [vmem:[#allocation2 + $0xb] sm:$0xff] }
  0x70   : > { %4950 = vmatprep.mubr.f32.mxu0 %v2268_v29  ;;  %5353 = vmatprep.subr.bf16.mxu1 %v5352_v28  ;;  %v5376_v10 = vpack.c.bf16 %v3643_v35, %v3642_v34  ;;  %v3784_v34 = vld [vmem:[%s7126_s2 + $0x670] sm:$0xff]  ;;  %v3785_v35 = vld [vmem:[%s7126_s2 + $0x678] sm:$0xff] }
  0x71   : > { %4503 = vmatmul.mubr.f32.gmra.mrb[4].mxu1 %v2265_v12  ;;  %5609 = vmatprep.subr.bf16.mxu0 %v5608_v37  ;;  %v2458_v12 = vld [vmem:[#allocation2 + $0x33] sm:$0xff] }
  0x72   : > { %4951 = vmatmul.mubr.f32.gmra.mrb[4].mxu0 %v2269_v38  ;;  %5355 = vmatpush3.bf16.msra.mxu1 %v5352_v28  ;;  %v5636_v28 = vpack.c.bf16 %v3773_v21, %v3772_v52  ;;  %v2653_v21 = vld [vmem:[#allocation2 + $0x48] sm:$0xff] }
  0x73   : > { %5611 = vmatpush3.bf16.msra.mxu0 %v5608_v37  ;;  %4505 = vmatprep.mubr.f32.mxu1 %v2266_v47  ;;  %v3644_v47 = vld [vmem:[%s7126_s2 + $0x210] sm:$0xff]  ;;  %v3647_v37 = vld [vmem:[%s7126_s2 + $0x228] sm:$0xff] }
  0x74   : > { %4953 = vmatprep.mubr.f32.mxu0 %v2270_v56  ;;  %5357 = vmatprep.subr.bf16.mxu1 %v5356_v49  ;;  %v5380_v58 = vpack.c.bf16 %v3645_v48, %v3644_v47  ;;  %v3787_v47 = vld [vmem:[%s7126_s2 + $0x688] sm:$0xff] }
  0x75   : > { %4506 = vmatmul.mubr.f32.gmra.mrb[6].mxu1 %v2267_v59  ;;  %5613 = vmatprep.subr.bf16.mxu0 %v5612_v0  ;;  %v2460_v59 = vld [vmem:[#allocation2 + $0x4b] sm:$0xff]  ;;  %v6787_v48 = vld [vmem:[#allocation2 + $0xe3] sm:$0xff] }
  0x76   : > { %4954 = vmatmul.mubr.f32.gmra.mrb[6].mxu0 %v2271_v3  ;;  %5359 = vmatpush3.bf16.msra.mxu1 %v5356_v49  ;;  %v2462_v49 = vld [vmem:[#allocation2 + $0x63] sm:$0xff] }
  0x77   : > { %5615 = vmatpush3.bf16.msra.mxu0 %v5612_v0  ;;  %4508 = vmatprep.mubr.f32.mxu1 %v2268_v29  ;;  %v3646_v29 = vld [vmem:[%s7126_s2 + $0x220] sm:$0xff]  ;;  %v3648_v0 = vld [vmem:[%s7126_s2 + $0x230] sm:$0xff] }
  0x78   : > { %4956 = vmatprep.mubr.f32.mxu0 %v2272_v5  ;;  %5361 = vmatprep.subr.bf16.mxu1 %v5360_v4 }
  0x79   : > { %4509 = vmatmul.mubr.f32.gmra.mrb[8].mxu1 %v2269_v38  ;;  %5617 = vmatprep.subr.bf16.mxu0 %v5616_v39  ;;  %v5384_v38 = vpack.c.bf16 %v3647_v37, %v3646_v29  ;;  %v3789_v29 = vld [vmem:[%s7126_s2 + $0x698] sm:$0xff]  ;;  %v2654_v37 = vld [vmem:[#allocation2 + $0x50] sm:$0xff] }
  0x7a   : > { %4957 = vmatmul.mubr.f32.gmra.mrb[8].mxu0 %v2273_v11  ;;  %5363 = vmatpush3.bf16.msra.mxu1 %v5360_v4  ;;  %v2464_v4 = vld [vmem:[#allocation2 + $0x7b] sm:$0xff] }
  0x7b   : > { %5619 = vmatpush3.bf16.msra.mxu0 %v5616_v39  ;;  %4511 = vmatprep.mubr.f32.mxu1 %v2270_v56  ;;  %v5640_v56 = vpack.c.bf16 %v3775_v62, %v3774_v60  ;;  %v3650_v39 = vld [vmem:[%s7126_s2 + $0x240] sm:$0xff] }
  0x7c   : > { %4959 = vmatprep.mubr.f32.mxu0 %v2274_v51  ;;  %5365 = vmatprep.subr.bf16.mxu1 %v5364_v44  ;;  %v2655_v62 = vld [vmem:[#allocation2 + $0x60] sm:$0xff] }
  0x7d   : > { %4512 = vmatmul.mubr.f32.gmra.mrb[10].mxu1 %v2271_v3  ;;  %5621 = vmatprep.subr.bf16.mxu0 %v5620_v13  ;;  %v5388_v3 = vpack.c.bf16 %v3649_v2, %v3648_v0  ;;  %v3790_v0 = vld [vmem:[%s7126_s2 + $0x6a0] sm:$0xff]  ;;  %v3791_v2 = vld [vmem:[%s7126_s2 + $0x6a8] sm:$0xff] }
  0x7e   : > { %4960 = vmatmul.mubr.f32.gmra.mrb[10].mxu0 %v2275_v54  ;;  %5367 = vmatpush3.bf16.msra.mxu1 %v5364_v44  ;;  %v2466_v44 = vld [vmem:[#allocation2 + $0x93] sm:$0xff] }
  0x7f   : > { %5623 = vmatpush3.bf16.msra.mxu0 %v5620_v13  ;;  %4514 = vmatprep.mubr.f32.mxu1 %v2272_v5  ;;  %v5644_v5 = vpack.c.bf16 %v3777_v32, %v3776_v30  ;;  %v3652_v13 = vld [vmem:[%s7126_s2 + $0x250] sm:$0xff]  ;;  %v2656_v30 = vld [vmem:[#allocation2 + $0x68] sm:$0xff] }
  0x80   : > { %4962 = vmatprep.mubr.f32.mxu0 %v2276_v20  ;;  %5369 = vmatprep.subr.bf16.mxu1 %v5368_v19  ;;  %v3654_v20 = vld [vmem:[%s7126_s2 + $0x260] sm:$0xff] }
  0x81   : > { %4515 = vmatmul.mubr.f32.gmra.mrb[12].mxu1 %v2273_v11  ;;  %5625 = vmatprep.subr.bf16.mxu0 %v5624_v22  ;;  %v5392_v11 = vpack.c.bf16 %v3651_v43, %v3650_v39  ;;  %v3792_v39 = vld [vmem:[%s7126_s2 + $0x6b0] sm:$0xff]  ;;  %v3793_v43 = vld [vmem:[%s7126_s2 + $0x6b8] sm:$0xff] }
  0x82   : > { %4963 = vmatmul.mubr.f32.gmra.mrb[12].mxu0 %v2277_v1  ;;  %5371 = vmatpush3.bf16.msra.mxu1 %v5368_v19  ;;  %v5652_v19 = vpack.c.bf16 %v3781_v17, %v3780_v15  ;;  %v2470_v1 = vld [vmem:[#allocation2 + $0xc3] sm:$0xff]  ;;  %v2660_v15 = vld [vmem:[#allocation2 + $0x98] sm:$0xff] }
  0x83   : > { %5627 = vmatpush3.bf16.msra.mxu0 %v5624_v22  ;;  %4517 = vmatprep.mubr.f32.mxu1 %v2274_v51  ;;  %v5648_v51 = vpack.c.bf16 %v3779_v8, %v3778_v7  ;;  %v3655_v22 = vld [vmem:[%s7126_s2 + $0x268] sm:$0xff]  ;;  %v2658_v7 = vld [vmem:[#allocation2 + $0x80] sm:$0xff] }
  0x84   : > { %4965 = vmatprep.mubr.f32.mxu0 %v2278_v31  ;;  %5373 = vmatprep.subr.bf16.mxu1 %v5372_v27  ;;  %v5400_v63 = vpack.c.bf16 %v3655_v22, %v3654_v20  ;;  %v3656_v31 = vld [vmem:[%s7126_s2 + $0x270] sm:$0xff]  ;;  %v3797_v22 = vld [vmem:[%s7126_s2 + $0x6d8] sm:$0xff] }
  0x85   : > { %4518 = vmatmul.mubr.f32.gmra.mrb[14].mxu1 %v2275_v54  ;;  %5629 = vmatprep.subr.bf16.mxu0 %v5628_v33  ;;  %v5396_v54 = vpack.c.bf16 %v3653_v14, %v3652_v13  ;;  %v3794_v13 = vld [vmem:[%s7126_s2 + $0x6c0] sm:$0xff]  ;;  %v3795_v14 = vld [vmem:[%s7126_s2 + $0x6c8] sm:$0xff]  ;;  %v3796_v20 = vld [vmem:[%s7126_s2 + $0x6d0] sm:$0xff] }
  0x86   : > { %4966 = vmatmul.mubr.f32.gmra.mrb[14].mxu0 %v2279_v6  ;;  %5375 = vmatpush3.bf16.msra.mxu1 %v5372_v27  ;;  %v5656_v27 = vpack.c.bf16 %v3783_v25, %v3782_v24  ;;  %v6772_v6 = vld [vmem:[#allocation2 + $0xdb] sm:$0xff]  ;;  %v2662_v24 = vld [vmem:[#allocation2 + $0xb0] sm:$0xff] }
  0x87   : > { %5631 = vmatpush3.bf16.msra.mxu0 %v5628_v33  ;;  %4552 = vmatprep.mubr.f32.mxu1 %v904_v42  ;;  %v3657_v33 = vld [vmem:[%s7126_s2 + $0x278] sm:$0xff]  ;;  %v5660_v42 = vpack.c.bf16 %v3785_v35, %v3784_v34  ;;  %v2664_v34 = vld [vmem:[#allocation2 + $0xc8] sm:$0xff] }
  0x88   : > { %5000 = vmatprep.mubr.f32.mxu0 %v2458_v12  ;;  %5377 = vmatprep.subr.bf16.mxu1 %v5376_v10  ;;  %v5404_v41 = vpack.c.bf16 %v3657_v33, %v3656_v31  ;;  %v3798_v31 = vld [vmem:[%s7126_s2 + $0x6e0] sm:$0xff]  ;;  %v3799_v33 = vld [vmem:[%s7126_s2 + $0x6e8] sm:$0xff] }
  0x89   : > { %4553 = vmatmul.mubr.f32.vlgmr.msra.gmra.mrb[0].mxu1 %v905_v50  ;;  %5633 = vmatprep.subr.bf16.mxu0 %v5632_v45  ;;  %v1099_v50 = vld [vmem:[#allocation2 + $0x18] sm:$0xff] }
  0x8a   : > { %5001 = vmatmul.mubr.f32.vlgmr.msra.gmra.mrb[0].mxu0 %v2459_v55  ;;  %5379 = vmatpush3.bf16.msra.mxu1 %v5376_v10  ;;  %v3658_v10 = vld [vmem:[%s7126_s2 + $0x280] sm:$0xff] }
  0x8b   : > { %5635 = vmatpush3.bf16.msra.mxu0 %v5632_v45  ;;  %4555 = vmatprep.mubr.f32.mxu1 %v906_v23  ;;  %v3786_v45 = vld [vmem:[%s7126_s2 + $0x680] sm:$0xff]  ;;  %v3660_v23 = vld [vmem:[%s7126_s2 + $0x290] sm:$0xff] }
  0x8c   : > { %5003 = vmatprep.mubr.f32.mxu0 %v2460_v59  ;;  %5381 = vmatprep.subr.bf16.mxu1 %v5380_v58 }
  0x8d   : > { %4556 = vmatmul.mubr.f32.gmra.mrb[2].mxu1 %v907_v46  ;;  %5637 = vmatprep.subr.bf16.mxu0 %v5636_v28  ;;  %v1101_v46 = vld [vmem:[#allocation2 + $0x30] sm:$0xff] }
  0x8e   : > { %5004 = vmatmul.mubr.f32.gmra.mrb[2].mxu0 %v2461_v36  ;;  %5383 = vmatpush3.bf16.msra.mxu1 %v5380_v58  ;;  %v3661_v58 = vld [vmem:[%s7126_s2 + $0x298] sm:$0xff] }
  0x8f   : > { %5639 = vmatpush3.bf16.msra.mxu0 %v5636_v28  ;;  %4558 = vmatprep.mubr.f32.mxu1 %v2458_v12  ;;  %v3659_v12 = vld [vmem:[%s7126_s2 + $0x288] sm:$0xff]  ;;  %v3788_v28 = vld [vmem:[%s7126_s2 + $0x690] sm:$0xff]  ;;  %v5412_v60 = vpack.c.bf16 %v3661_v58, %v3660_v23  ;;  %v3802_v58 = vld [vmem:[%s7126_s2 + $0x700] sm:$0xff] }
  0x90   : > { %5006 = vmatprep.mubr.f32.mxu0 %v2462_v49  ;;  %5385 = vmatprep.subr.bf16.mxu1 %v5384_v38  ;;  %v5408_v52 = vpack.c.bf16 %v3659_v12, %v3658_v10  ;;  %v3672_v10 = vld [vmem:[%s7126_s2 + $0x2f0] sm:$0xff]  ;;  %v3673_v12 = vld [vmem:[%s7126_s2 + $0x2f8] sm:$0xff]  ;;  %v3675_v23 = vld [vmem:[%s7126_s2 + $0x308] sm:$0xff] }
  0x91   : > { %4559 = vmatmul.mubr.f32.gmra.mrb[4].mxu1 %v2459_v55  ;;  %5641 = vmatprep.subr.bf16.mxu0 %v5640_v56  ;;  %v5664_v55 = vpack.c.bf16 %v3787_v47, %v3786_v45  ;;  %v3800_v45 = vld [vmem:[%s7126_s2 + $0x6f0] sm:$0xff]  ;;  %v3801_v47 = vld [vmem:[%s7126_s2 + $0x6f8] sm:$0xff] }
  0x92   : > { %5007 = vmatmul.mubr.f32.gmra.mrb[4].mxu0 %v2463_v61  ;;  %5387 = vmatpush3.bf16.msra.mxu1 %v5384_v38  ;;  %v3662_v38 = vld [vmem:[%s7126_s2 + $0x2a0] sm:$0xff] }
  0x93   : > { %5643 = vmatpush3.bf16.msra.mxu0 %v5640_v56  ;;  %4561 = vmatprep.mubr.f32.mxu1 %v2460_v59  ;;  %v1100_v59 = vld [vmem:[#allocation2 + $0x20] sm:$0xff]  ;;  %v1102_v56 = vld [vmem:[#allocation2 + $0x38] sm:$0xff] }
  0x94   : > { %5009 = vmatprep.mubr.f32.mxu0 %v2464_v4  ;;  %5389 = vmatprep.subr.bf16.mxu1 %v5388_v3 }
  0x95   : > { %4562 = vmatmul.mubr.f32.gmra.mrb[6].mxu1 %v2461_v36  ;;  %5645 = vmatprep.subr.bf16.mxu0 %v5644_v5  ;;  %v5668_v36 = vpack.c.bf16 %v3789_v29, %v3788_v28  ;;  %v1293_v28 = vld [vmem:[#allocation2 + $0x19] sm:$0xff] }
  0x96   : > { %5010 = vmatmul.mubr.f32.gmra.mrb[6].mxu0 %v2465_v9  ;;  %5391 = vmatpush3.bf16.msra.mxu1 %v5388_v3  ;;  %v5672_v3 = vpack.c.bf16 %v3791_v2, %v3790_v0 }
  0x97   : > { %5647 = vmatpush3.bf16.msra.mxu0 %v5644_v5  ;;  %4564 = vmatprep.mubr.f32.mxu1 %v2462_v49  ;;  %v3663_v49 = vld [vmem:[%s7126_s2 + $0x2a8] sm:$0xff]  ;;  %v3665_v5 = vld [vmem:[%s7126_s2 + $0x2b8] sm:$0xff] }
  0x98   : > { %5012 = vmatprep.mubr.f32.mxu0 %v2466_v44  ;;  %5393 = vmatprep.subr.bf16.mxu1 %v5392_v11  ;;  %v5416_v32 = vpack.c.bf16 %v3663_v49, %v3662_v38  ;;  %v3805_v38 = vld [vmem:[%s7126_s2 + $0x718] sm:$0xff] }
  0x99   : > { %4565 = vmatmul.mubr.f32.gmra.mrb[8].mxu1 %v2463_v61  ;;  %5649 = vmatprep.subr.bf16.mxu0 %v5648_v51  ;;  %v2657_v61 = vld [vmem:[#allocation2 + $0x78] sm:$0xff] }
  0x9a   : > { %5013 = vmatmul.mubr.f32.gmra.mrb[8].mxu0 %v2467_v18  ;;  %5395 = vmatpush3.bf16.msra.mxu1 %v5392_v11  ;;  %v5676_v11 = vpack.c.bf16 %v3793_v43, %v3792_v39  ;;  %v2848_v49 = vld [vmem:[#allocation2 + $0x51] sm:$0xff]  ;;  %v2851_v43 = vld [vmem:[#allocation2 + $0x79] sm:$0xff] }
  0x9b   : > { %5651 = vmatpush3.bf16.msra.mxu0 %v5648_v51  ;;  %4567 = vmatprep.mubr.f32.mxu1 %v2464_v4  ;;  %v3664_v4 = vld [vmem:[%s7126_s2 + $0x2b0] sm:$0xff]  ;;  %v3667_v51 = vld [vmem:[%s7126_s2 + $0x2c8] sm:$0xff] }
  0x9c   : > { %5015 = vmatprep.mubr.f32.mxu0 %v2468_v57  ;;  %5397 = vmatprep.subr.bf16.mxu1 %v5396_v54  ;;  %v5420_v8 = vpack.c.bf16 %v3665_v5, %v3664_v4  ;;  %v3807_v4 = vld [vmem:[%s7126_s2 + $0x728] sm:$0xff] }
  0x9d   : > { %4568 = vmatmul.mubr.f32.gmra.mrb[10].mxu1 %v2465_v9  ;;  %5653 = vmatprep.subr.bf16.mxu0 %v5652_v19  ;;  %v2659_v9 = vld [vmem:[#allocation2 + $0x90] sm:$0xff] }
  0x9e   : > { %5016 = vmatmul.mubr.f32.gmra.mrb[10].mxu0 %v2469_v26  ;;  %5399 = vmatpush3.bf16.msra.mxu1 %v5396_v54  ;;  %v5680_v54 = vpack.c.bf16 %v3795_v14, %v3794_v13  ;;  %v2850_v5 = vld [vmem:[#allocation2 + $0x69] sm:$0xff]  ;;  %v2853_v14 = vld [vmem:[#allocation2 + $0x91] sm:$0xff] }
  0x9f   : > { %5655 = vmatpush3.bf16.msra.mxu0 %v5652_v19  ;;  %4570 = vmatprep.mubr.f32.mxu1 %v2466_v44  ;;  %v3666_v44 = vld [vmem:[%s7126_s2 + $0x2c0] sm:$0xff]  ;;  %v3669_v19 = vld [vmem:[%s7126_s2 + $0x2d8] sm:$0xff] }
  0xa0   : > { %5018 = vmatprep.mubr.f32.mxu0 %v2470_v1  ;;  %5401 = vmatprep.subr.bf16.mxu1 %v5400_v63  ;;  %v5424_v17 = vpack.c.bf16 %v3667_v51, %v3666_v44  ;;  %v3670_v1 = vld [vmem:[%s7126_s2 + $0x2e0] sm:$0xff]  ;;  %v3809_v44 = vld [vmem:[%s7126_s2 + $0x738] sm:$0xff] }
  0xa1   : > { %4571 = vmatmul.mubr.f32.gmra.mrb[12].mxu1 %v2467_v18  ;;  %5657 = vmatprep.subr.bf16.mxu0 %v5656_v27  ;;  %v2661_v18 = vld [vmem:[#allocation2 + $0xa8] sm:$0xff] }
  0xa2   : > { %5019 = vmatmul.mubr.f32.gmra.mrb[12].mxu0 %v6770_v40  ;;  %5403 = vmatpush3.bf16.msra.mxu1 %v5400_v63  ;;  %v5684_v63 = vpack.c.bf16 %v3797_v22, %v3796_v20  ;;  %v2852_v51 = vld [vmem:[#allocation2 + $0x81] sm:$0xff]  ;;  %v2855_v22 = vld [vmem:[#allocation2 + $0xa9] sm:$0xff] }
  0xa3   : > { %5659 = vmatpush3.bf16.msra.mxu0 %v5656_v27  ;;  %4573 = vmatprep.mubr.f32.mxu1 %v2468_v57  ;;  %v3668_v57 = vld [vmem:[%s7126_s2 + $0x2d0] sm:$0xff]  ;;  %v3671_v27 = vld [vmem:[%s7126_s2 + $0x2e8] sm:$0xff] }
  0xa4   : > { %5021 = vmatprep.mubr.f32.mxu0 %v6772_v6  ;;  %5405 = vmatprep.subr.bf16.mxu1 %v5404_v41  ;;  %v5428_v25 = vpack.c.bf16 %v3669_v19, %v3668_v57  ;;  %v5432_v35 = vpack.c.bf16 %v3671_v27, %v3670_v1  ;;  %v3811_v57 = vld [vmem:[%s7126_s2 + $0x748] sm:$0xff]  ;;  %v2854_v19 = vld [vmem:[#allocation2 + $0x99] sm:$0xff]  ;;  %v2856_v27 = vld [vmem:[#allocation2 + $0xb1] sm:$0xff] }
  0xa5   : > { %4574 = vmatmul.mubr.f32.gmra.mrb[14].mxu1 %v2469_v26  ;;  %5661 = vmatprep.subr.bf16.mxu0 %v5660_v42  ;;  %v2663_v26 = vld [vmem:[#allocation2 + $0xc0] sm:$0xff]  ;;  %v3813_v1 = vld [vmem:[%s7126_s2 + $0x758] sm:$0xff] }
  0xa6   : > { %5022 = vmatmul.mubr.f32.gmra.mrb[14].mxu0 %v6787_v48  ;;  %5407 = vmatpush3.bf16.msra.mxu1 %v5404_v41  ;;  %v2665_v41 = vld [vmem:[#allocation2 + $0xd8] sm:$0xff] }
  0xa7   : > { %5663 = vmatpush3.bf16.msra.mxu0 %v5660_v42  ;;  %4608 = vmatprep.mubr.f32.mxu1 %v1099_v50  ;;  %v5688_v42 = vpack.c.bf16 %v3799_v33, %v3798_v31  ;;  %v2666_v50 = vld [vmem:[#allocation2 + $0xe0] sm:$0xff] }
  0xa8   : > { %5056 = vmatprep.mubr.f32.mxu0 %v2653_v21  ;;  %5409 = vmatprep.subr.bf16.mxu1 %v5408_v52  ;;  %v2857_v33 = vld [vmem:[#allocation2 + $0xc1] sm:$0xff] }
  0xa9   : > { %4609 = vmatmul.mubr.f32.vlgmr.msra.gmra.mrb[0].mxu1 %v1100_v59  ;;  %5665 = vmatprep.subr.bf16.mxu0 %v5664_v55  ;;  %v3803_v59 = vld [vmem:[%s7126_s2 + $0x708] sm:$0xff] }
  0xaa   : > { %5057 = vmatmul.mubr.f32.vlgmr.msra.gmra.mrb[0].mxu0 %v2654_v37  ;;  %5411 = vmatpush3.bf16.msra.mxu1 %v5408_v52  ;;  %v5436_v52 = vpack.c.bf16 %v3673_v12, %v3672_v10  ;;  %v3815_v10 = vld [vmem:[%s7126_s2 + $0x768] sm:$0xff] }
  0xab   : > { %5667 = vmatpush3.bf16.msra.mxu0 %v5664_v55  ;;  %4611 = vmatprep.mubr.f32.mxu1 %v1101_v46  ;;  %v3674_v55 = vld [vmem:[%s7126_s2 + $0x300] sm:$0xff]  ;;  %v5696_v46 = vpack.c.bf16 %v3803_v59, %v3802_v58  ;;  %v2858_v12 = vld [vmem:[#allocation2 + $0xc9] sm:$0xff] }
  0xac   : > { %5059 = vmatprep.mubr.f32.mxu0 %v2655_v62  ;;  %5413 = vmatprep.subr.bf16.mxu1 %v5412_v60  ;;  %v5440_v29 = vpack.c.bf16 %v3675_v23, %v3674_v55  ;;  %v3816_v55 = vld [vmem:[%s7126_s2 + $0x770] sm:$0xff]  ;;  %v3817_v23 = vld [vmem:[%s7126_s2 + $0x778] sm:$0xff]  ;;  %v2860_v58 = vld [vmem:[#allocation2 + $0xe1] sm:$0xff] }
  0xad   : > { %4612 = vmatmul.mubr.f32.gmra.mrb[2].mxu1 %v1102_v56  ;;  %5669 = vmatprep.subr.bf16.mxu0 %v5668_v36  ;;  %v1295_v56 = vld [vmem:[#allocation2 + $0x31] sm:$0xff] }
  0xae   : > { %5060 = vmatmul.mubr.f32.gmra.mrb[2].mxu0 %v2656_v30  ;;  %5415 = vmatpush3.bf16.msra.mxu1 %v5412_v60  ;;  %v3676_v60 = vld [vmem:[%s7126_s2 + $0x310] sm:$0xff] }
  0xaf   : > { %5671 = vmatpush3.bf16.msra.mxu0 %v5668_v36  ;;  %4614 = vmatprep.mubr.f32.mxu1 %v2653_v21  ;;  %v5692_v21 = vpack.c.bf16 %v3801_v47, %v3800_v45  ;;  %v1294_v36 = vld [vmem:[#allocation2 + $0x21] sm:$0xff]  ;;  %v2859_v47 = vld [vmem:[#allocation2 + $0xd9] sm:$0xff] }
  0xb0   : > { %5062 = vmatprep.mubr.f32.mxu0 %v2657_v61  ;;  %5417 = vmatprep.subr.bf16.mxu1 %v5416_v32 }
  0xb1   : > { %4615 = vmatmul.mubr.f32.gmra.mrb[4].mxu1 %v2654_v37  ;;  %5673 = vmatprep.subr.bf16.mxu0 %v5672_v3  ;;  %v2847_v37 = vld [vmem:[#allocation2 + $0x49] sm:$0xff] }
  0xb2   : > { %5063 = vmatmul.mubr.f32.gmra.mrb[4].mxu0 %v2658_v7  ;;  %5419 = vmatpush3.bf16.msra.mxu1 %v5416_v32  ;;  %v3679_v32 = vld [vmem:[%s7126_s2 + $0x328] sm:$0xff] }
  0xb3   : > { %5675 = vmatpush3.bf16.msra.mxu0 %v5672_v3  ;;  %4617 = vmatprep.mubr.f32.mxu1 %v2655_v62  ;;  %v3677_v62 = vld [vmem:[%s7126_s2 + $0x318] sm:$0xff]  ;;  %v3806_v3 = vld [vmem:[%s7126_s2 + $0x720] sm:$0xff] }
  0xb4   : > { %5065 = vmatprep.mubr.f32.mxu0 %v2659_v9  ;;  %5421 = vmatprep.subr.bf16.mxu1 %v5420_v8  ;;  %v5444_v0 = vpack.c.bf16 %v3677_v62, %v3676_v60  ;;  %v3818_v60 = vld [vmem:[%s7126_s2 + $0x780] sm:$0xff]  ;;  %v3819_v62 = vld [vmem:[%s7126_s2 + $0x788] sm:$0xff] }
  0xb5   : > { %4618 = vmatmul.mubr.f32.gmra.mrb[6].mxu1 %v2656_v30  ;;  %5677 = vmatprep.subr.bf16.mxu0 %v5676_v11  ;;  %v3678_v30 = vld [vmem:[%s7126_s2 + $0x320] sm:$0xff] }
  0xb6   : > { %5066 = vmatmul.mubr.f32.gmra.mrb[6].mxu0 %v2660_v15  ;;  %5423 = vmatpush3.bf16.msra.mxu1 %v5420_v8  ;;  %v5448_v39 = vpack.c.bf16 %v3679_v32, %v3678_v30  ;;  %v3680_v8 = vld [vmem:[%s7126_s2 + $0x330] sm:$0xff]  ;;  %v3821_v32 = vld [vmem:[%s7126_s2 + $0x798] sm:$0xff] }
  0xb7   : > { %5679 = vmatpush3.bf16.msra.mxu0 %v5676_v11  ;;  %4620 = vmatprep.mubr.f32.mxu1 %v2657_v61  ;;  %v1296_v61 = vld [vmem:[#allocation2 + $0x39] sm:$0xff]  ;;  %v3808_v11 = vld [vmem:[%s7126_s2 + $0x730] sm:$0xff] }
  0xb8   : > { %5068 = vmatprep.mubr.f32.mxu0 %v2661_v18  ;;  %5425 = vmatprep.subr.bf16.mxu1 %v5424_v17  ;;  %v3820_v30 = vld [vmem:[%s7126_s2 + $0x790] sm:$0xff] }
  0xb9   : > { %4621 = vmatmul.mubr.f32.gmra.mrb[8].mxu1 %v2658_v7  ;;  %5681 = vmatprep.subr.bf16.mxu0 %v5680_v54  ;;  %v5704_v7 = vpack.c.bf16 %v3807_v4, %v3806_v3  ;;  %v1489_v3 = vld [vmem:[#allocation2 + $0x32] sm:$0xff] }
  0xba   : > { %5069 = vmatmul.mubr.f32.gmra.mrb[8].mxu0 %v2662_v24  ;;  %5427 = vmatpush3.bf16.msra.mxu1 %v5424_v17  ;;  %v3682_v17 = vld [vmem:[%s7126_s2 + $0x340] sm:$0xff] }
  0xbb   : > { %5683 = vmatpush3.bf16.msra.mxu0 %v5680_v54  ;;  %4623 = vmatprep.mubr.f32.mxu1 %v2659_v9  ;;  %v3681_v9 = vld [vmem:[%s7126_s2 + $0x338] sm:$0xff]  ;;  %v3810_v54 = vld [vmem:[%s7126_s2 + $0x740] sm:$0xff] }
  0xbc   : > { %5071 = vmatprep.mubr.f32.mxu0 %v2663_v26  ;;  %5429 = vmatprep.subr.bf16.mxu1 %v5428_v25  ;;  %v5452_v13 = vpack.c.bf16 %v3681_v9, %v3680_v8  ;;  %v1490_v8 = vld [vmem:[#allocation2 + $0x3a] sm:$0xff] }
  0xbd   : > { %4624 = vmatmul.mubr.f32.gmra.mrb[10].mxu1 %v2660_v15  ;;  %5685 = vmatprep.subr.bf16.mxu0 %v5684_v63  ;;  %v5708_v15 = vpack.c.bf16 %v3809_v44, %v3808_v11  ;;  %v3822_v9 = vld [vmem:[%s7126_s2 + $0x7a0] sm:$0xff]  ;;  %v3823_v11 = vld [vmem:[%s7126_s2 + $0x7a8] sm:$0xff] }
  0xbe   : > { %5072 = vmatmul.mubr.f32.gmra.mrb[10].mxu0 %v2664_v34  ;;  %5431 = vmatpush3.bf16.msra.mxu1 %v5428_v25  ;;  %v3684_v25 = vld [vmem:[%s7126_s2 + $0x350] sm:$0xff] }
  0xbf   : > { %5687 = vmatpush3.bf16.msra.mxu0 %v5684_v63  ;;  %4626 = vmatprep.mubr.f32.mxu1 %v2661_v18  ;;  %v3683_v18 = vld [vmem:[%s7126_s2 + $0x348] sm:$0xff]  ;;  %v3812_v63 = vld [vmem:[%s7126_s2 + $0x750] sm:$0xff] }
  0xc0   : > { %5074 = vmatprep.mubr.f32.mxu0 %v2665_v41  ;;  %5433 = vmatprep.subr.bf16.mxu1 %v5432_v35  ;;  %v5456_v20 = vpack.c.bf16 %v3683_v18, %v3682_v17  ;;  %v3687_v41 = vld [vmem:[%s7126_s2 + $0x368] sm:$0xff]  ;;  %v3697_v17 = vld [vmem:[%s7126_s2 + $0x3b8] sm:$0xff]  ;;  %v3824_v18 = vld [vmem:[%s7126_s2 + $0x7b0] sm:$0xff] }
  0xc1   : > { %4627 = vmatmul.mubr.f32.gmra.mrb[12].mxu1 %v2662_v24  ;;  %5689 = vmatprep.subr.bf16.mxu0 %v5688_v42  ;;  %v5712_v24 = vpack.c.bf16 %v3811_v57, %v3810_v54  ;;  %v3044_v44 = vld [vmem:[#allocation2 + $0x6a] sm:$0xff]  ;;  %v3825_v54 = vld [vmem:[%s7126_s2 + $0x7b8] sm:$0xff]  ;;  %v3046_v57 = vld [vmem:[#allocation2 + $0x82] sm:$0xff] }
  0xc2   : > { %5075 = vmatmul.mubr.f32.gmra.mrb[12].mxu0 %v2666_v50  ;;  %5435 = vmatpush3.bf16.msra.mxu1 %v5432_v35  ;;  %v3686_v35 = vld [vmem:[%s7126_s2 + $0x360] sm:$0xff] }
  0xc3   : > { %5691 = vmatpush3.bf16.msra.mxu0 %v5688_v42  ;;  %4629 = vmatprep.mubr.f32.mxu1 %v2663_v26  ;;  %v3685_v26 = vld [vmem:[%s7126_s2 + $0x358] sm:$0xff]  ;;  %v3814_v42 = vld [vmem:[%s7126_s2 + $0x760] sm:$0xff]  ;;  %v5464_v45 = vpack.c.bf16 %v3687_v41, %v3686_v35  ;;  %v3828_v41 = vld [vmem:[%s7126_s2 + $0x7d0] sm:$0xff] }
  0xc4   : > { %5077 = vmatprep.mubr.f32.mxu0 %v6594_v16  ;;  %5437 = vmatprep.subr.bf16.mxu1 %v5436_v52  ;;  %v3804_v16 = vld [vmem:[%s7126_s2 + $0x710] sm:$0xff]  ;;  %v5460_v31 = vpack.c.bf16 %v3685_v26, %v3684_v25  ;;  %v5720_v50 = vpack.c.bf16 %v3815_v10, %v3814_v42  ;;  %v3699_v25 = vld [vmem:[%s7126_s2 + $0x3c8] sm:$0xff]  ;;  %v3826_v26 = vld [vmem:[%s7126_s2 + $0x7c0] sm:$0xff] }
  0xc5   : > { %4630 = vmatmul.mubr.f32.gmra.mrb[14].mxu1 %v2664_v34  ;;  %5693 = vmatprep.subr.bf16.mxu0 %v5692_v21  ;;  %v5700_v2 = vpack.c.bf16 %v3805_v38, %v3804_v16  ;;  %v5716_v34 = vpack.c.bf16 %v3813_v1, %v3812_v63  ;;  %v1487_v16 = vld [vmem:[#allocation2 + $0x1a] sm:$0xff]  ;;  %v3827_v63 = vld [vmem:[%s7126_s2 + $0x7c8] sm:$0xff]  ;;  %v3050_v10 = vld [vmem:[#allocation2 + $0xb2] sm:$0xff] }
  0xc6   : > { %5078 = vmatmul.mubr.f32.gmra.mrb[14].mxu0 %v6604_v53  ;;  %5439 = vmatpush3.bf16.msra.mxu1 %v5436_v52  ;;  %v2849_v53 = vld [vmem:[#allocation2 + $0x61] sm:$0xff]  ;;  %v3688_v52 = vld [vmem:[%s7126_s2 + $0x370] sm:$0xff]  ;;  %v3701_v35 = vld [vmem:[%s7126_s2 + $0x3d8] sm:$0xff] }
  0xc7   : > { %5695 = vmatpush3.bf16.msra.mxu0 %v5692_v21  ;;  %4664 = vmatprep.mubr.f32.mxu1 %v1293_v28  ;;  %v3689_v21 = vld [vmem:[%s7126_s2 + $0x378] sm:$0xff] }
  0xc8   : > { %5112 = vmatprep.mubr.f32.mxu0 %v2847_v37  ;;  %5441 = vmatprep.subr.bf16.mxu1 %v5440_v29  ;;  %v5468_v59 = vpack.c.bf16 %v3689_v21, %v3688_v52  ;;  %v2861_v28 = vld [vmem:[#allocation2 + $0xf1] sm:$0xff]  ;;  %v3048_v1 = vld [vmem:[#allocation2 + $0x9a] sm:$0xff]  ;;  %v3703_v52 = vld [vmem:[%s7126_s2 + $0x3e8] sm:$0xff] }
  0xc9   : > { %4665 = vmatmul.mubr.f32.vlgmr.msra.gmra.mrb[0].mxu1 %v1294_v36  ;;  %5697 = vmatprep.subr.bf16.mxu0 %v5696_v46  ;;  %v2862_v36 = vld [vmem:[#allocation2 + $0xf9] sm:$0xff] }
  0xca   : > { %5113 = vmatmul.mubr.f32.vlgmr.msra.gmra.mrb[0].mxu0 %v2848_v49  ;;  %5443 = vmatpush3.bf16.msra.mxu1 %v5440_v29  ;;  %v5724_v29 = vpack.c.bf16 %v3817_v23, %v3816_v55  ;;  %v3829_v42 = vld [vmem:[%s7126_s2 + $0x7d8] sm:$0xff]  ;;  %v3830_v21 = vld [vmem:[%s7126_s2 + $0x7e0] sm:$0xff]  ;;  %v3831_v55 = vld [vmem:[%s7126_s2 + $0x7e8] sm:$0xff] }
  0xcb   : > { %5699 = vmatpush3.bf16.msra.mxu0 %v5696_v46  ;;  %4667 = vmatprep.mubr.f32.mxu1 %v1295_v56  ;;  %v3691_v46 = vld [vmem:[%s7126_s2 + $0x388] sm:$0xff]  ;;  %v5728_v56 = vpack.c.bf16 %v3819_v62, %v3818_v60  ;;  %v3833_v60 = vld [vmem:[%s7126_s2 + $0x7f8] sm:$0xff] }
  0xcc   : > { %5115 = vmatprep.mubr.f32.mxu0 %v2849_v53  ;;  %5445 = vmatprep.subr.bf16.mxu1 %v5444_v0  ;;  %v3052_v23 = vld [vmem:[#allocation2 + $0xca] sm:$0xff]  ;;  %v3054_v62 = vld [vmem:[#allocation2 + $0xe2] sm:$0xff] }
  0xcd   : > { %4668 = vmatmul.mubr.f32.gmra.mrb[2].mxu1 %v1296_v61  ;;  %5701 = vmatprep.subr.bf16.mxu0 %v5700_v2  ;;  %v3042_v61 = vld [vmem:[#allocation2 + $0x52] sm:$0xff] }
  0xce   : > { %5116 = vmatmul.mubr.f32.gmra.mrb[2].mxu0 %v2850_v5  ;;  %5447 = vmatpush3.bf16.msra.mxu1 %v5444_v0  ;;  %v3692_v0 = vld [vmem:[%s7126_s2 + $0x390] sm:$0xff] }
  0xcf   : > { %5703 = vmatpush3.bf16.msra.mxu0 %v5700_v2  ;;  %4670 = vmatprep.mubr.f32.mxu1 %v2847_v37  ;;  %v3690_v37 = vld [vmem:[%s7126_s2 + $0x380] sm:$0xff] }
  0xd0   : > { %5118 = vmatprep.mubr.f32.mxu0 %v2851_v43  ;;  %5449 = vmatprep.subr.bf16.mxu1 %v5448_v39  ;;  %v5472_v38 = vpack.c.bf16 %v3691_v46, %v3690_v37  ;;  %v1488_v2 = vld [vmem:[#allocation2 + $0x22] sm:$0xff]  ;;  %v3705_v37 = vld [vmem:[%s7126_s2 + $0x3f8] sm:$0xff]  ;;  %v3832_v46 = vld [vmem:[%s7126_s2 + $0x7f0] sm:$0xff] }
  0xd1   : > { %4671 = vmatmul.mubr.f32.gmra.mrb[4].mxu1 %v2848_v49  ;;  %5705 = vmatprep.subr.bf16.mxu0 %v5704_v7  ;;  %v3041_v49 = vld [vmem:[#allocation2 + $0x4a] sm:$0xff] }
  0xd2   : > { %5119 = vmatmul.mubr.f32.gmra.mrb[4].mxu0 %v2852_v51  ;;  %5451 = vmatpush3.bf16.msra.mxu1 %v5448_v39  ;;  %v5732_v39 = vpack.c.bf16 %v3821_v32, %v3820_v30  ;;  %v1683_v30 = vld [vmem:[#allocation2 + $0x33] sm:$0xff]  ;;  %v3237_v32 = vld [vmem:[#allocation2 + $0x63] sm:$0xff] }
  0xd3   : > { %5707 = vmatpush3.bf16.msra.mxu0 %v5704_v7  ;;  %4673 = vmatprep.mubr.f32.mxu1 %v2849_v53  ;;  %v3693_v53 = vld [vmem:[%s7126_s2 + $0x398] sm:$0xff]  ;;  %v3695_v7 = vld [vmem:[%s7126_s2 + $0x3a8] sm:$0xff] }
  0xd4   : > { %5121 = vmatprep.mubr.f32.mxu0 %v2853_v14  ;;  %5453 = vmatprep.subr.bf16.mxu1 %v5452_v13  ;;  %v5476_v4 = vpack.c.bf16 %v3693_v53, %v3692_v0  ;;  %v3235_v0 = vld [vmem:[#allocation2 + $0x4b] sm:$0xff]  ;;  %v1682_v53 = vld [vmem:[#allocation2 + $0x23] sm:$0xff] }
  0xd5   : > { %4674 = vmatmul.mubr.f32.gmra.mrb[6].mxu1 %v2850_v5  ;;  %5709 = vmatprep.subr.bf16.mxu0 %v5708_v15  ;;  %v3043_v5 = vld [vmem:[#allocation2 + $0x62] sm:$0xff] }
  0xd6   : > { %5122 = vmatmul.mubr.f32.gmra.mrb[6].mxu0 %v2854_v19  ;;  %5455 = vmatpush3.bf16.msra.mxu1 %v5452_v13  ;;  %v3045_v13 = vld [vmem:[#allocation2 + $0x7a] sm:$0xff] }
  0xd7   : > { %5711 = vmatpush3.bf16.msra.mxu0 %v5708_v15  ;;  %4676 = vmatprep.mubr.f32.mxu1 %v2851_v43  ;;  %v3694_v43 = vld [vmem:[%s7126_s2 + $0x3a0] sm:$0xff]  ;;  %v3696_v15 = vld [vmem:[%s7126_s2 + $0x3b0] sm:$0xff] }
  0xd8   : > { %5124 = vmatprep.mubr.f32.mxu0 %v2855_v22  ;;  %5457 = vmatprep.subr.bf16.mxu1 %v5456_v20 }
  0xd9   : > { %4677 = vmatmul.mubr.f32.gmra.mrb[8].mxu1 %v2852_v51  ;;  %5713 = vmatprep.subr.bf16.mxu0 %v5712_v24  ;;  %v5480_v51 = vpack.c.bf16 %v3695_v7, %v3694_v43  ;;  %v3242_v43 = vld [vmem:[#allocation2 + $0x9b] sm:$0xff]  ;;  %v3243_v7 = vld [vmem:[#allocation2 + $0xab] sm:$0xff] }
  0xda   : > { %5125 = vmatmul.mubr.f32.gmra.mrb[8].mxu0 %v2856_v27  ;;  %5459 = vmatpush3.bf16.msra.mxu1 %v5456_v20  ;;  %v3047_v20 = vld [vmem:[#allocation2 + $0x92] sm:$0xff] }
  0xdb   : > { %5715 = vmatpush3.bf16.msra.mxu0 %v5712_v24  ;;  %4679 = vmatprep.mubr.f32.mxu1 %v2853_v14  ;;  %v5736_v14 = vpack.c.bf16 %v3823_v11, %v3822_v9  ;;  %v3698_v24 = vld [vmem:[%s7126_s2 + $0x3c0] sm:$0xff]  ;;  %v3249_v11 = vld [vmem:[#allocation2 + $0xf3] sm:$0xff] }
  0xdc   : > { %5127 = vmatprep.mubr.f32.mxu0 %v2857_v33  ;;  %5461 = vmatprep.subr.bf16.mxu1 %v5460_v31  ;;  %v3245_v9 = vld [vmem:[#allocation2 + $0xc3] sm:$0xff] }
  0xdd   : > { %4680 = vmatmul.mubr.f32.gmra.mrb[10].mxu1 %v2854_v19  ;;  %5717 = vmatprep.subr.bf16.mxu0 %v5716_v34  ;;  %v5484_v19 = vpack.c.bf16 %v3697_v17, %v3696_v15 }
  0xde   : > { %5128 = vmatmul.mubr.f32.gmra.mrb[10].mxu0 %v2858_v12  ;;  %5463 = vmatpush3.bf16.msra.mxu1 %v5460_v31  ;;  %v3049_v31 = vld [vmem:[#allocation2 + $0xaa] sm:$0xff] }
  0xdf   : > { %5719 = vmatpush3.bf16.msra.mxu0 %v5716_v34  ;;  %4682 = vmatprep.mubr.f32.mxu1 %v2855_v22  ;;  %v5740_v22 = vpack.c.bf16 %v3825_v54, %v3824_v18  ;;  %v3700_v34 = vld [vmem:[%s7126_s2 + $0x3d0] sm:$0xff] }
  0xe0   : > { %5130 = vmatprep.mubr.f32.mxu0 %v2859_v47  ;;  %5465 = vmatprep.subr.bf16.mxu1 %v5464_v45  ;;  %v5748_v47 = vpack.c.bf16 %v3829_v42, %v3828_v41 }
  0xe1   : > { %4683 = vmatmul.mubr.f32.gmra.mrb[12].mxu1 %v2856_v27  ;;  %5721 = vmatprep.subr.bf16.mxu0 %v5720_v50  ;;  %v5488_v27 = vpack.c.bf16 %v3699_v25, %v3698_v24 }
  0xe2   : > { %5131 = vmatmul.mubr.f32.gmra.mrb[12].mxu0 %v2860_v58  ;;  %5467 = vmatpush3.bf16.msra.mxu1 %v5464_v45  ;;  %v3051_v45 = vld [vmem:[#allocation2 + $0xc2] sm:$0xff] }
  0xe3   : > { %5723 = vmatpush3.bf16.msra.mxu0 %v5720_v50  ;;  %4685 = vmatprep.mubr.f32.mxu1 %v2857_v33  ;;  %v5744_v33 = vpack.c.bf16 %v3827_v63, %v3826_v26  ;;  %v3702_v50 = vld [vmem:[%s7126_s2 + $0x3e0] sm:$0xff] }
  0xe4   : > { %5133 = vmatprep.mubr.f32.mxu0 %v2861_v28  ;;  %5469 = vmatprep.subr.bf16.mxu1 %v5468_v59  ;;  %v5496_v58 = vpack.c.bf16 %v3703_v52, %v3702_v50  ;;  %v5752_v28 = vpack.c.bf16 %v3831_v55, %v3830_v21 }
  0xe5   : > { %4686 = vmatmul.mubr.f32.gmra.mrb[14].mxu1 %v2858_v12  ;;  %5725 = vmatprep.subr.bf16.mxu0 %v5724_v29  ;;  %v5492_v12 = vpack.c.bf16 %v3701_v35, %v3700_v34 }
  0xe6   : > { %5134 = vmatmul.mubr.f32.gmra.mrb[14].mxu0 %v2862_v36  ;;  %5471 = vmatpush3.bf16.msra.mxu1 %v5468_v59  ;;  %v3053_v59 = vld [vmem:[#allocation2 + $0xda] sm:$0xff] }
  0xe7   : > { %5727 = vmatpush3.bf16.msra.mxu0 %v5724_v29  ;;  %4720 = vmatprep.mubr.f32.mxu1 %v1487_v16  ;;  %v3704_v29 = vld [vmem:[%s7126_s2 + $0x3f0] sm:$0xff] }
  0xe8   : > { %5168 = vmatprep.mubr.f32.mxu0 %v3041_v49  ;;  %5473 = vmatprep.subr.bf16.mxu1 %v5472_v38  ;;  %v5500_v36 = vpack.c.bf16 %v3705_v37, %v3704_v29  ;;  %v3055_v16 = vld [vmem:[#allocation2 + $0xf2] sm:$0xff] }
  0xe9   : > { %4721 = vmatmul.mubr.f32.vlgmr.msra.gmra.mrb[0].mxu1 %v1488_v2  ;;  %5729 = vmatprep.subr.bf16.mxu0 %v5728_v56  ;;  %v3236_v2 = vld [vmem:[#allocation2 + $0x53] sm:$0xff] }
  0xea   : > { %5169 = vmatmul.mubr.f32.vlgmr.msra.gmra.mrb[0].mxu0 %v3042_v61  ;;  %5475 = vmatpush3.bf16.msra.mxu1 %v5472_v38  ;;  %v5756_v38 = vpack.c.bf16 %v3833_v60, %v3832_v46 }
  0xeb   : > { %5731 = vmatpush3.bf16.msra.mxu0 %v5728_v56  ;;  %4723 = vmatprep.mubr.f32.mxu1 %v1489_v3  ;;  %v1681_v56 = vld [vmem:[#allocation2 + $0x1b] sm:$0xff]  ;;  %v3238_v3 = vld [vmem:[#allocation2 + $0x6b] sm:$0xff] }
  0xec   : > { %5171 = vmatprep.mubr.f32.mxu0 %v3043_v5  ;;  %5477 = vmatprep.subr.bf16.mxu1 %v5476_v4 }
  0xed   : > { %4724 = vmatmul.mubr.f32.gmra.mrb[2].mxu1 %v1490_v8  ;;  %5733 = vmatprep.subr.bf16.mxu0 %v5732_v39  ;;  %v3244_v8 = vld [vmem:[#allocation2 + $0xb3] sm:$0xff] }
  0xee   : > { %5172 = vmatmul.mubr.f32.gmra.mrb[2].mxu0 %v3044_v44  ;;  %5479 = vmatpush3.bf16.msra.mxu1 %v5476_v4  ;;  %v3239_v4 = vld [vmem:[#allocation2 + $0x7b] sm:$0xff] }
  0xef   : > { %5735 = vmatpush3.bf16.msra.mxu0 %v5732_v39  ;;  %4726 = vmatprep.mubr.f32.mxu1 %v3041_v49  ;;  %v3056_v49 = vld [vmem:[#allocation2 + $0xfa] sm:$0xff] }
  0xf0   : > { %5174 = vmatprep.mubr.f32.mxu0 %v3045_v13  ;;  %5481 = vmatprep.subr.bf16.mxu1 %v5480_v51  ;;  %v3241_v39 = vld [vmem:[#allocation2 + $0x93] sm:$0xff] }
  0xf1   : > { %4727 = vmatmul.mubr.f32.gmra.mrb[4].mxu1 %v3042_v61  ;;  %5737 = vmatprep.subr.bf16.mxu0 %v5736_v14  ;;  %v1684_v61 = vld [vmem:[#allocation2 + $0x3b] sm:$0xff] }
  0xf2   : > { %5175 = vmatmul.mubr.f32.gmra.mrb[4].mxu0 %v3046_v57  ;;  %5483 = vmatpush3.bf16.msra.mxu1 %v5480_v51  ;;  %v3250_v51 = vld [vmem:[#allocation2 + $0xfb] sm:$0xff] }
  0xf3   : > { %5739 = vmatpush3.bf16.msra.mxu0 %v5736_v14  ;;  %4729 = vmatprep.mubr.f32.mxu1 %v3043_v5  ;;  %v3240_v5 = vld [vmem:[#allocation2 + $0x83] sm:$0xff] }
  0xf4   : > { %5177 = vmatprep.mubr.f32.mxu0 %v3047_v20  ;;  %5485 = vmatprep.subr.bf16.mxu1 %v5484_v19 }
  0xf5   : > { %4730 = vmatmul.mubr.f32.gmra.mrb[6].mxu1 %v3044_v44  ;;  %5741 = vmatprep.subr.bf16.mxu0 %v5740_v22  ;;  %v1696_v44 = vld [vmem:[#allocation2 + $0xcb] sm:$0xff] }
  0xf6   : > { %5178 = vmatmul.mubr.f32.gmra.mrb[6].mxu0 %v3048_v1  ;;  %5487 = vmatpush3.bf16.msra.mxu1 %v5484_v19 }
  0xf7   : > { %5743 = vmatpush3.bf16.msra.mxu0 %v5740_v22  ;;  %4732 = vmatprep.mubr.f32.mxu1 %v3045_v13 }
  0xf8   : > { %5180 = vmatprep.mubr.f32.mxu0 %v3049_v31  ;;  %5489 = vmatprep.subr.bf16.mxu1 %v5488_v27 }
  0xf9   : > { %4733 = vmatmul.mubr.f32.gmra.mrb[8].mxu1 %v3046_v57  ;;  %5745 = vmatprep.subr.bf16.mxu0 %v5744_v33 }
  0xfa   : > { %5181 = vmatmul.mubr.f32.gmra.mrb[8].mxu0 %v3050_v10  ;;  %5491 = vmatpush3.bf16.msra.mxu1 %v5488_v27 }
  0xfb   : > { %5747 = vmatpush3.bf16.msra.mxu0 %v5744_v33  ;;  %4735 = vmatprep.mubr.f32.mxu1 %v3047_v20 }
  0xfc   : > { %5183 = vmatprep.mubr.f32.mxu0 %v3051_v45  ;;  %5493 = vmatprep.subr.bf16.mxu1 %v5492_v12 }
  0xfd   : > { %4736 = vmatmul.mubr.f32.gmra.mrb[10].mxu1 %v3048_v1  ;;  %5749 = vmatprep.subr.bf16.mxu0 %v5748_v47 }
  0xfe   : > { %5184 = vmatmul.mubr.f32.gmra.mrb[10].mxu0 %v3052_v23  ;;  %5495 = vmatpush3.bf16.msra.mxu1 %v5492_v12 }
  0xff   : > { %5751 = vmatpush3.bf16.msra.mxu0 %v5748_v47  ;;  %4738 = vmatprep.mubr.f32.mxu1 %v3049_v31 }
 0x100   : > { %5186 = vmatprep.mubr.f32.mxu0 %v3053_v59  ;;  %5497 = vmatprep.subr.bf16.mxu1 %v5496_v58 }
 0x101   : > { %4739 = vmatmul.mubr.f32.gmra.mrb[12].mxu1 %v3050_v10  ;;  %5753 = vmatprep.subr.bf16.mxu0 %v5752_v28 }
 0x102   : > { %5187 = vmatmul.mubr.f32.gmra.mrb[12].mxu0 %v3054_v62  ;;  %5499 = vmatpush3.bf16.msra.mxu1 %v5496_v58 }
 0x103   : > { %5755 = vmatpush3.bf16.msra.mxu0 %v5752_v28  ;;  %4741 = vmatprep.mubr.f32.mxu1 %v3051_v45 }
 0x104   : > { %5189 = vmatprep.mubr.f32.mxu0 %v3055_v16  ;;  %5501 = vmatprep.subr.bf16.mxu1 %v5500_v36 }
 0x105   : > { %4742 = vmatmul.mubr.f32.gmra.mrb[14].mxu1 %v3052_v23  ;;  %5757 = vmatprep.subr.bf16.mxu0 %v5756_v38 }
 0x106   : > { %5190 = vmatmul.mubr.f32.gmra.mrb[14].mxu0 %v3056_v49  ;;  %5503 = vmatpush3.bf16.msra.mxu1 %v5500_v36 }
 0x107   : > { %5759 = vmatpush3.bf16.msra.mxu0 %v5756_v38  ;;  %4776 = vmatprep.mubr.f32.mxu1 %v1681_v56 }
 0x108   : > { %5224 = vmatprep.mubr.f32.mxu0 %v3235_v0 }
 0x109   : > { %4777 = vmatmul.mubr.f32.vlgmr.msra.gmra.mrb[0].mxu1 %v1682_v53 }
 0x10a   : > { %5225 = vmatmul.mubr.f32.vlgmr.msra.gmra.mrb[0].mxu0 %v3236_v2  ;;  %4779 = vmatprep.mubr.f32.mxu1 %v1683_v30 }
 0x10b   : > { %5227 = vmatprep.mubr.f32.mxu0 %v3237_v32 }
 0x10d   : > { %4780 = vmatmul.mubr.f32.gmra.mrb[2].mxu1 %v1684_v61 }
 0x10e   : > { %5228 = vmatmul.mubr.f32.gmra.mrb[2].mxu0 %v3238_v3  ;;  %4782 = vmatprep.mubr.f32.mxu1 %v3235_v0 }
 0x10f   : > { %5230 = vmatprep.mubr.f32.mxu0 %v3239_v4 }
 0x111   : > { %4783 = vmatmul.mubr.f32.gmra.mrb[4].mxu1 %v3236_v2 }
 0x112   : > { %5231 = vmatmul.mubr.f32.gmra.mrb[4].mxu0 %v3240_v5  ;;  %4785 = vmatprep.mubr.f32.mxu1 %v3237_v32 }
 0x113   : > { %5233 = vmatprep.mubr.f32.mxu0 %v3241_v39 }
 0x115   : > { %4786 = vmatmul.mubr.f32.gmra.mrb[6].mxu1 %v3238_v3 }
 0x116   : > { %5234 = vmatmul.mubr.f32.gmra.mrb[6].mxu0 %v3242_v43  ;;  %4788 = vmatprep.mubr.f32.mxu1 %v3239_v4 }
 0x117   : > { %5236 = vmatprep.mubr.f32.mxu0 %v3243_v7 }
 0x119   : > { %4789 = vmatmul.mubr.f32.gmra.mrb[8].mxu1 %v3240_v5 }
 0x11a   : > { %5237 = vmatmul.mubr.f32.gmra.mrb[8].mxu0 %v3244_v8  ;;  %4791 = vmatprep.mubr.f32.mxu1 %v3241_v39 }
 0x11b   : > { %5239 = vmatprep.mubr.f32.mxu0 %v3245_v9 }
 0x11d   : > { %4792 = vmatmul.mubr.f32.gmra.mrb[10].mxu1 %v3242_v43 }
 0x11e   : > { %5240 = vmatmul.mubr.f32.gmra.mrb[10].mxu0 %v6770_v40  ;;  %4794 = vmatprep.mubr.f32.mxu1 %v3243_v7  ;;  %v7076_v40 = vld [vmem:[%s7127_s3] ss:$0 sm:$0xff] }
 0x11f   : > { %5242 = vmatprep.mubr.f32.mxu0 %v6772_v6 }
 0x121   : > { %4795 = vmatmul.mubr.f32.gmra.mrb[12].mxu1 %v3244_v8 }
 0x122   : > { %5243 = vmatmul.mubr.f32.gmra.mrb[12].mxu0 %v6787_v48  ;;  %4797 = vmatprep.mubr.f32.mxu1 %v3245_v9 }
 0x123   : > { %5245 = vmatprep.mubr.f32.mxu0 %v3249_v11 }
 0x125   : > { %4798 = vmatmul.mubr.f32.gmra.mrb[14].mxu1 %v1696_v44 }
 0x126   : > { %5246 = vmatmul.mubr.f32.gmra.mrb[14].mxu0 %v3250_v51 }
 0x1dc   : > { %v4778_v13 = vpop.f32.mrb[0].mxu1 }
 0x1dd   : > { %v5226_v14 = vpop.f32.mrb[0].mxu0  ;;  %v1780_v15 = vpop.f32.mrb[1].mxu1 }
 0x1de   : > { %v5760_v6 = vadd.f32 %v5226_v14, %v4778_v13  ;;  %v3334_v17 = vpop.f32.mrb[1].mxu0 }
 0x1df   : > { %v5761_v48 = vadd.f32 %v3334_v17, %v1780_v15 }
 0x1e0   : > { %v3437_v18 = vadd.f32 %v5760_v6, %v7076_v40  ;;  %v4781_v54 = vpop.f32.mrb[2].mxu1 }
 0x1e1   : > { %v3436_v57 = vadd.f32 %v5761_v48, %v7076_v40  ;;  %v5229_v19 = vpop.f32.mrb[2].mxu0  ;;  %v1790_v20 = vpop.f32.mrb[3].mxu1 }
 0x1e2   : > { %3453 = vst [vmem:[%s7081_s30 + $0x8] sm:$0xff] %v3437_v18  ;;  %v5762_v22 = vadd.f32 %v5229_v19, %v4781_v54  ;;  %v3344_v24 = vpop.f32.mrb[3].mxu0 }
 0x1e3   : > { %3452 = vst [vmem:[%s7081_s30] sm:$0xff] %v3436_v57  ;;  %v5763_v25 = vadd.f32 %v3344_v24, %v1790_v20 }
 0x1e4   : > { %v3439_v26 = vadd.f32 %v5762_v22, %v7076_v40  ;;  %v4784_v63 = vpop.f32.mrb[4].mxu1 }
 0x1e5   : > { %v3438_v1 = vadd.f32 %v5763_v25, %v7076_v40  ;;  %v5232_v27 = vpop.f32.mrb[4].mxu0  ;;  %v1800_v31 = vpop.f32.mrb[5].mxu1 }
 0x1e6   : > { %3455 = vst [vmem:[%s7081_s30 + $0x18] sm:$0xff] %v3439_v26  ;;  %v5764_v33 = vadd.f32 %v5232_v27, %v4784_v63  ;;  %v3354_v34 = vpop.f32.mrb[5].mxu0 }
 0x1e7   : > { %3454 = vst [vmem:[%s7081_s30 + $0x10] sm:$0xff] %v3438_v1  ;;  %v5765_v35 = vadd.f32 %v3354_v34, %v1800_v31 }
 0x1e8   : > { %v3441_v41 = vadd.f32 %v5764_v33, %v7076_v40  ;;  %v4787_v42 = vpop.f32.mrb[6].mxu1 }
 0x1e9   : > { %v3440_v10 = vadd.f32 %v5765_v35, %v7076_v40  ;;  %v5235_v12 = vpop.f32.mrb[6].mxu0  ;;  %v1810_v45 = vpop.f32.mrb[7].mxu1 }
 0x1ea   : > { %3457 = vst [vmem:[%s7081_s30 + $0x28] sm:$0xff] %v3441_v41  ;;  %v5766_v47 = vadd.f32 %v5235_v12, %v4787_v42  ;;  %v3364_v50 = vpop.f32.mrb[7].mxu0 }
 0x1eb   : > { %3456 = vst [vmem:[%s7081_s30 + $0x20] sm:$0xff] %v3440_v10  ;;  %v5767_v52 = vadd.f32 %v3364_v50, %v1810_v45 }
 0x1ec   : > { %v3443_v21 = vadd.f32 %v5766_v47, %v7076_v40  ;;  %v4790_v55 = vpop.f32.mrb[8].mxu1 }
 0x1ed   : > { %v3442_v23 = vadd.f32 %v5767_v52, %v7076_v40  ;;  %v5238_v58 = vpop.f32.mrb[8].mxu0  ;;  %v1820_v59 = vpop.f32.mrb[9].mxu1 }
 0x1ee   : > { %3459 = vst [vmem:[%s7081_s30 + $0x38] sm:$0xff] %v3443_v21  ;;  %v5768_v28 = vadd.f32 %v5238_v58, %v4790_v55  ;;  %v3374_v29 = vpop.f32.mrb[9].mxu0 }
 0x1ef   : > { %3458 = vst [vmem:[%s7081_s30 + $0x30] sm:$0xff] %v3442_v23  ;;  %v5769_v37 = vadd.f32 %v3374_v29, %v1820_v59 }
 0x1f0   : > { %v3445_v46 = vadd.f32 %v5768_v28, %v7076_v40  ;;  %v4793_v60 = vpop.f32.mrb[10].mxu1 }
 0x1f1   : > { %v3444_v62 = vadd.f32 %v5769_v37, %v7076_v40  ;;  %v5241_v36 = vpop.f32.mrb[10].mxu0  ;;  %v1830_v16 = vpop.f32.mrb[11].mxu1 }
 0x1f2   : > { %3461 = vst [vmem:[%s7081_s30 + $0x48] sm:$0xff] %v3445_v46  ;;  %v5770_v38 = vadd.f32 %v5241_v36, %v4793_v60  ;;  %v3384_v49 = vpop.f32.mrb[11].mxu0 }
 0x1f3   : > { %3460 = vst [vmem:[%s7081_s30 + $0x40] sm:$0xff] %v3444_v62  ;;  %v5771_v56 = vadd.f32 %v3384_v49, %v1830_v16 }
 0x1f4   : > { %v3447_v0 = vadd.f32 %v5770_v38, %v7076_v40  ;;  %v4796_v53 = vpop.f32.mrb[12].mxu1 }
 0x1f5   : > { %v3446_v2 = vadd.f32 %v5771_v56, %v7076_v40  ;;  %v5244_v30 = vpop.f32.mrb[12].mxu0  ;;  %v1840_v32 = vpop.f32.mrb[13].mxu1 }
 0x1f6   : > { %3463 = vst [vmem:[%s7081_s30 + $0x58] sm:$0xff] %v3447_v0  ;;  %v5772_v61 = vadd.f32 %v5244_v30, %v4796_v53  ;;  %v3394_v3 = vpop.f32.mrb[13].mxu0 }
 0x1f7   : > { %3462 = vst [vmem:[%s7081_s30 + $0x50] sm:$0xff] %v3446_v2  ;;  %v5773_v4 = vadd.f32 %v3394_v3, %v1840_v32 }
 0x1f8   : > { %v3449_v5 = vadd.f32 %v5772_v61, %v7076_v40  ;;  %v4799_v39 = vpop.f32.mrb[14].mxu1 }
 0x1f9   : > { %v3448_v43 = vadd.f32 %v5773_v4, %v7076_v40  ;;  %v5247_v7 = vpop.f32.mrb[14].mxu0  ;;  %v1850_v8 = vpop.f32.mrb[15].mxu1 }
 0x1fa   : > { %3465 = vst [vmem:[%s7081_s30 + $0x68] sm:$0xff] %v3449_v5  ;;  %v5774_v9 = vadd.f32 %v5247_v7, %v4799_v39  ;;  %v3404_v11 = vpop.f32.mrb[15].mxu0 }
 0x1fb   : > { %3464 = vst [vmem:[%s7081_s30 + $0x60] sm:$0xff] %v3448_v43  ;;  %v5775_v44 = vadd.f32 %v3404_v11, %v1850_v8 }
 0x1fc   : > { %v3451_v51 = vadd.f32 %v5774_v9, %v7076_v40 }
 0x1fd   : > { %v3450_v13 = vadd.f32 %v5775_v44, %v7076_v40 }
 0x1fe   : > { %3467 = vst [vmem:[%s7081_s30 + $0x78] sm:$0xff] %v3451_v51 }
 0x1ff   : > { %3466 = vst [vmem:[%s7081_s30 + $0x70] sm:$0xff] %v3450_v13 }
 0x200 PF: > { %s14_s17 = sadd.s32 1, %s6049_s17   ;;  %s7129_s15 = smov %s6045_s16 }
 0x201   : > { %p11_p5 = scmp.ge.s32.totalorder %s14_s17, 4   ;;  %s7130_s16 = smov %s7132_s18 }
 0x203   :  { %13 = sbr.rel (!%p11_p5) target bundleno = 2 (0x2), region = 88 }

</bundles_post_ra>
